<compile_context>
chip_gen: v6e
topology: v6e:2x2x1
jax: 0.10.0
libtpu: 0.0.40
codegen_flags: <defaults>
</compile_context>

<pallas_src>
import functools

import jax
import jax.numpy as jnp
from jax import lax
from jax.experimental import pallas as pl
from jax.experimental.pallas import tpu as pltpu


# -----------------------------------------------------------------------------
# Fused forward kernel for one batch tile of TB samples (H-major layout).
#   x_ref     : (28, TB, 28)       input tile, rows = H, sublanes = batch
#   band1_ref : (3, 28, 1024)      conv1 band weights, cols = p*512 + wq*32 + c
#   band2_ref : (3, 512, 1024)     conv2 band weights, rows = wq_in*32 + ci
#   fc1_ref   : (7, 512, 128)      fc1, one (512,128) slab per pooled row hq
#   o_ref     : (TB, 128)          lane-dense logits (cols 10..127 are garbage)
# -----------------------------------------------------------------------------
def _mnist_fused_kernel(x_ref, band1_ref, b1_ref, band2_ref, b2_ref,
                        fc1_ref, fb1_ref, fc2_ref, fb2_ref, o_ref,
                        xp_ref, hp_ref, *, TB):
    f32 = jnp.float32

    # SAME-padding border rows only (interiors are fully rewritten below).
    # Re-zeroed every grid step (~TB KiB) for megacore safety: with a
    # "parallel" grid axis each core has its own scratch and only one core
    # would ever execute a pl.when(program_id == 0) init.
    xp_ref[0:1] = jnp.zeros((1, TB, 28), f32)
    xp_ref[29:30] = jnp.zeros((1, TB, 28), f32)
    hp_ref[0:1] = jnp.zeros((1, TB, 512), f32)
    hp_ref[15:16] = jnp.zeros((1, TB, 512), f32)

    # ---- conv1: 3x3 SAME, 1 -> 32, three accumulated banded matmuls --------
    # Output columns: p*512 + wq*32 + c  with spatial w = 2*wq + p
    # (wq in 0..13 valid; wq = 14,15 are zero pad columns: zero weights+bias).
    xp_ref[1:29] = x_ref[...]                                   # (28, TB, 28)
    acc1 = jnp.dot(xp_ref[0:28].reshape(28 * TB, 28), band1_ref[0],
                   preferred_element_type=f32)
    acc1 = acc1 + jnp.dot(xp_ref[1:29].reshape(28 * TB, 28), band1_ref[1],
                          preferred_element_type=f32)
    acc1 = acc1 + jnp.dot(xp_ref[2:30].reshape(28 * TB, 28), band1_ref[2],
                          preferred_element_type=f32)
    y1 = jnp.maximum(acc1 + b1_ref[...], 0.0)                   # (28*TB, 1024)

    # ---- pool1 (2x2/2): H via even/odd row pairs, W via parity halves ------
    y1p = y1.reshape(14, 2, TB, 1024)                           # leading split only
    h1 = jnp.maximum(y1p[:, 0], y1p[:, 1])                      # (14, TB, 1024)
    hp_ref[1:15] = jnp.maximum(h1[:, :, :512], h1[:, :, 512:])  # (14, TB, 512)

    # ---- conv2: 3x3 SAME, 32 -> 64, three accumulated banded matmuls -------
    # Input = hp_ref (H-padded pooled slab, lanes = wq_in*32 + ci); W padding,
    # the pool1 even/odd selection and SAME W-pad live in band2's zero rows.
    acc2 = jnp.dot(hp_ref[0:14].reshape(14 * TB, 512), band2_ref[0],
                   preferred_element_type=f32)
    acc2 = acc2 + jnp.dot(hp_ref[1:15].reshape(14 * TB, 512), band2_ref[1],
                          preferred_element_type=f32)
    acc2 = acc2 + jnp.dot(hp_ref[2:16].reshape(14 * TB, 512), band2_ref[2],
                          preferred_element_type=f32)
    y2 = jnp.maximum(acc2 + b2_ref[...], 0.0)                   # (14*TB, 1024)

    # ---- pool2 (2x2/2) ------------------------------------------------------
    y2p = y2.reshape(7, 2, TB, 1024)
    h2 = jnp.maximum(y2p[:, 0], y2p[:, 1])                      # (7, TB, 1024)
    p2 = jnp.maximum(h2[:, :, :512], h2[:, :, 512:])            # (7, TB, 512)

    # ---- fc1 + ReLU: 7 accumulated dots (flatten folded into fc1 weights) --
    h = jnp.dot(p2[0], fc1_ref[0], preferred_element_type=f32)
    for hq in range(1, 7):
        h = h + jnp.dot(p2[hq], fc1_ref[hq], preferred_element_type=f32)
    h = jnp.maximum(h + fb1_ref[...], 0.0)                      # (TB, 128)

    # ---- fc2 (padded to 128 lane-dense output columns) ---------------------
    o_ref[...] = (jnp.dot(h, fc2_ref[...], preferred_element_type=f32)
                  + fb2_ref[...]).astype(o_ref.dtype)


# -----------------------------------------------------------------------------
# One-time weight re-layouts (traceable; tiny XLA ops).  Parameters use the
# PyTorch convention: conv* OIHW, conv bias (Cout,), fc* (out, in), fc bias.
# -----------------------------------------------------------------------------
def _prepare_params(p):
    f32 = jnp.float32
    w1 = p["conv1_w"].astype(f32)             # (32, 1, 3, 3)
    b1 = p["conv1_b"].astype(f32)              # (32,)
    w2 = p["conv2_w"].astype(f32)              # (64, 32, 3, 3)
    b2 = p["conv2_b"].astype(f32)              # (64,)
    fw1 = p["fc1_w"].astype(f32)               # (128, 3136)
    fb1 = p["fc1_b"].astype(f32)               # (128,)
    fw2 = p["fc2_w"].astype(f32)               # (10, 128)
    fb2 = p["fc2_b"].astype(f32)               # (10,)

    par = jnp.arange(2)

    # conv1 band: band1[dy, wi, p*512 + wq*32 + co] = w1[co, 0, dy, dx]
    #   with w_out = 2*wq + p, dx = wi - w_out + 1 in {0,1,2}; wq>13 -> 0.
    w1t = jnp.transpose(w1[:, 0], (1, 2, 0))                     # (dy, dx, co)
    wi = jnp.arange(28)
    wq = jnp.arange(16)
    w_out = 2 * wq[None, :] + par[:, None]                       # (2, 16)
    dx = wi[:, None, None] - w_out[None, :, :] + 1               # (28, 2, 16)
    valid = ((dx >= 0) & (dx <= 2) & (wq[None, None, :] <= 13)).astype(f32)
    band1 = w1t[:, jnp.clip(dx, 0, 2), :]                        # (3,28,2,16,32)
    band1 = (band1 * valid[None, :, :, :, None]).reshape(3, 28, 1024)
    b1k = jnp.where((wq <= 13)[None, :, None],
                    jnp.broadcast_to(b1[None, None, :], (2, 16, 32)),
                    0.0).reshape(1, 1024)

    # conv2 band: rows = wq_in*32 + ci (wq_in>13 -> 0), cols = p*512+wq2*64+co
    #   with w2_out = 2*wq2 + p, dx = wq_in - w2_out + 1 in {0,1,2}; wq2>6 -> 0.
    w2t = jnp.transpose(w2, (2, 3, 1, 0))                        # (dy, dx, ci, co)
    wq_in = jnp.arange(16)
    wq2 = jnp.arange(8)
    w2o = 2 * wq2[None, :] + par[:, None]                        # (2, 8)
    dx2 = wq_in[:, None, None] - w2o[None, :, :] + 1             # (16, 2, 8)
    valid2 = ((dx2 >= 0) & (dx2 <= 2)
              & (wq_in[:, None, None] <= 13)
              & (wq2[None, None, :] <= 6)).astype(f32)
    band2 = w2t[:, jnp.clip(dx2, 0, 2), :, :]                    # (3,16,2,8,32,64)
    band2 = band2 * valid2[None, :, :, :, None, None]
    band2 = jnp.transpose(band2, (0, 1, 4, 2, 3, 5)).reshape(3, 512, 1024)
    b2k = jnp.where((wq2 <= 6)[None, :, None],
                    jnp.broadcast_to(b2[None, None, :], (2, 8, 64)),
                    0.0).reshape(1, 1024)

    # fc1: fold torch's NCHW view(-1, 64*7*7) flatten + the pool2 lane layout.
    #   fc1k[hq, wq2*64 + co, o] = fw1[o, co*49 + hq*7 + wq2]; wq2 = 7 -> 0.
    f1 = fw1.reshape(128, 64, 7, 7)                              # (o, c, h, w)
    f1t = jnp.transpose(f1, (2, 3, 1, 0))                        # (h, w, c, o)
    f1t = jnp.pad(f1t, ((0, 0), (0, 1), (0, 0), (0, 0)))         # (7, 8, 64, 128)
    fc1k = f1t.reshape(7, 512, 128)
    fb1k = fb1.reshape(1, 128)

    # fc2: zero-pad the 10 outputs to 128 lane-dense columns.
    fc2k = jnp.pad(fw2.T, ((0, 0), (0, 118)))                    # (128, 128)
    fb2k = jnp.pad(fb2, (0, 118)).reshape(1, 128)

    return dict(band1=band1, b1=b1k, band2=band2, b2=b2k,
                fc1=fc1k, fb1=fb1k, fc2=fc2k, fb2=fb2k)


# -----------------------------------------------------------------------------
# Public forward pass: x is NCHW float32 [B, 1, 28, 28] (PyTorch convention).
# -----------------------------------------------------------------------------
def mnist_net(x_nchw, p):
    B = x_nchw.shape[0]
    assert x_nchw.shape[1:] == (1, 28, 28), x_nchw.shape
    kp = _prepare_params(p)

    # H-major layout for the kernel: (28, B, 28).
    xh = jnp.transpose(x_nchw.reshape(B, 28, 28).astype(jnp.float32), (1, 0, 2))

    # Batch tile: as large as possible (<=32), but >=2 grid steps for B > 8 so
    # v7x's two TensorCores both get work; multiple of 8 to satisfy tiling.
    if B <= 8:
        TB = B
    else:
        half = -(-B // 2)
        TB = min(32, -(-half // 8) * 8)
    Bp = -(-B // TB) * TB
    if Bp != B:
        xh = jnp.concatenate([xh, jnp.zeros((28, Bp - B, 28), xh.dtype)], axis=1)

    kernel = functools.partial(_mnist_fused_kernel, TB=TB)
    out = pl.pallas_call(
        kernel,
        out_shape=jax.ShapeDtypeStruct((Bp, 128), jnp.float32),
        grid=(Bp // TB,),
        in_specs=[
            pl.BlockSpec((28, TB, 28), lambda i: (0, i, 0)),      # input tile
            pl.BlockSpec((3, 28, 1024), lambda i: (0, 0, 0)),     # conv1 band
            pl.BlockSpec((1, 1024), lambda i: (0, 0)),            # conv1 bias
            pl.BlockSpec((3, 512, 1024), lambda i: (0, 0, 0)),    # conv2 band
            pl.BlockSpec((1, 1024), lambda i: (0, 0)),            # conv2 bias
            pl.BlockSpec((7, 512, 128), lambda i: (0, 0, 0)),     # fc1 (permuted)
            pl.BlockSpec((1, 128), lambda i: (0, 0)),             # fc1 bias
            pl.BlockSpec((128, 128), lambda i: (0, 0)),           # fc2 (padded)
            pl.BlockSpec((1, 128), lambda i: (0, 0)),             # fc2 bias
        ],
        out_specs=pl.BlockSpec((TB, 128), lambda i: (i, 0)),
        scratch_shapes=[
            pltpu.VMEM((30, TB, 28), jnp.float32),                # H-padded input
            pltpu.VMEM((16, TB, 512), jnp.float32),               # padded pool1 slab
        ],
        compiler_params=pltpu.CompilerParams(
            dimension_semantics=("parallel",),
            vmem_limit_bytes=48 * 1024 * 1024),
    )(xh, kp["band1"], kp["b1"], kp["band2"], kp["b2"],
      kp["fc1"], kp["fb1"], kp["fc2"], kp["fb2"])
    return out[:B, :10]


# -----------------------------------------------------------------------------
# Pure-JAX reference (mirrors the PyTorch module exactly).
# -----------------------------------------------------------------------------
def mnist_net_ref(x_nchw, p):
    def conv(x, w, b):
        y = lax.conv_general_dilated(
            x, w, (1, 1), "SAME", dimension_numbers=("NCHW", "OIHW", "NCHW"))
        return jnp.maximum(y + b[None, :, None, None], 0.0)

    def pool(x):
        return lax.reduce_window(x, -jnp.inf, lax.max,
                                 (1, 1, 2, 2), (1, 1, 2, 2), "VALID")

    x = pool(conv(x_nchw, p["conv1_w"], p["conv1_b"]))
    x = pool(conv(x, p["conv2_w"], p["conv2_b"]))
    x = x.reshape(x.shape[0], -1)                       # torch view(-1, 64*7*7)
    x = jnp.maximum(x @ p["fc1_w"].T + p["fc1_b"], 0.0)
    return x @ p["fc2_w"].T + p["fc2_b"]


def init_params(key):
    ks = jax.random.split(key, 8)

    def u(k, shape, fan_in):
        bound = 1.0 / float(fan_in) ** 0.5
        return jax.random.uniform(k, shape, jnp.float32, -bound, bound)

    return {
        "conv1_w": u(ks[0], (32, 1, 3, 3), 1 * 9),
        "conv1_b": u(ks[1], (32,), 1 * 9),
        "conv2_w": u(ks[2], (64, 32, 3, 3), 32 * 9),
        "conv2_b": u(ks[3], (64,), 32 * 9),
        "fc1_w":   u(ks[4], (128, 64 * 7 * 7), 64 * 7 * 7),
        "fc1_b":   u(ks[5], (128,), 64 * 7 * 7),
        "fc2_w":   u(ks[6], (10, 128), 128),
        "fc2_b":   u(ks[7], (10,), 128),
    }


if __name__ == "__main__":
    key = jax.random.PRNGKey(0)
    k_param, k_x = jax.random.split(key)
    params = init_params(k_param)

    B = 2                                   # MNIST-shaped input (28x28 required)
    x = jax.random.normal(k_x, (B, 1, 28, 28), jnp.float32)

    out = jax.block_until_ready(jax.jit(mnist_net)(x, params))
    ref = jax.block_until_ready(jax.jit(mnist_net_ref)(x, params))

    assert out.shape == (B, 10), out.shape
    max_err = float(jnp.max(jnp.abs(out - ref)))
    assert jnp.allclose(out, ref, rtol=1e-3, atol=1e-3), max_err

    print("KERNEL_OK")
</pallas_src>

<mosaic_0001>
module attributes {stable_mosaic.version = 11 : i64} {
  func.func @_mnist_fused_kernel(%arg0: i32, %arg1: memref<28x2x28xf32, #tpu.memory_space<vmem>>, %arg2: memref<3x28x1024xf32, #tpu.memory_space<vmem>>, %arg3: memref<1x1024xf32, #tpu.memory_space<vmem>>, %arg4: memref<3x512x1024xf32, #tpu.memory_space<vmem>>, %arg5: memref<1x1024xf32, #tpu.memory_space<vmem>>, %arg6: memref<7x512x128xf32, #tpu.memory_space<vmem>>, %arg7: memref<1x128xf32, #tpu.memory_space<vmem>>, %arg8: memref<128x128xf32, #tpu.memory_space<vmem>>, %arg9: memref<1x128xf32, #tpu.memory_space<vmem>>, %arg10: memref<2x128xf32, #tpu.memory_space<vmem>>, %arg11: memref<30x2x28xf32, #tpu.memory_space<vmem>>, %arg12: memref<16x2x512xf32, #tpu.memory_space<vmem>>) attributes {dimension_semantics = [#tpu.dimension_semantics<parallel>], iteration_bounds = array<i64: 1>, scalar_prefetch = 0 : i64, scratch_operands = 2 : i64, tpu.core_type = #tpu.core_type<tc>, window_params = [{transform_indices = @transform_0, window_bounds = array<i64: 28, 2, 28>}, {pipeline_mode = #tpu.pipeline_mode<synchronous>, transform_indices = @transform_1, window_bounds = array<i64: 3, 28, 1024>}, {pipeline_mode = #tpu.pipeline_mode<synchronous>, transform_indices = @transform_2, window_bounds = array<i64: 1, 1024>}, {pipeline_mode = #tpu.pipeline_mode<synchronous>, transform_indices = @transform_3, window_bounds = array<i64: 3, 512, 1024>}, {pipeline_mode = #tpu.pipeline_mode<synchronous>, transform_indices = @transform_4, window_bounds = array<i64: 1, 1024>}, {pipeline_mode = #tpu.pipeline_mode<synchronous>, transform_indices = @transform_5, window_bounds = array<i64: 7, 512, 128>}, {pipeline_mode = #tpu.pipeline_mode<synchronous>, transform_indices = @transform_6, window_bounds = array<i64: 1, 128>}, {pipeline_mode = #tpu.pipeline_mode<synchronous>, transform_indices = @transform_7, window_bounds = array<i64: 128, 128>}, {pipeline_mode = #tpu.pipeline_mode<synchronous>, transform_indices = @transform_8, window_bounds = array<i64: 1, 128>}, {transform_indices = @transform_9, window_bounds = array<i64: 2, 128>}]} {
    %cst = arith.constant 0.000000e+00 : f32
    %0 = vector.broadcast %cst : f32 to vector<1x2x28xf32>
    %c0 = arith.constant 0 : index
    %c0_0 = arith.constant 0 : index
    %c0_1 = arith.constant 0 : index
    %1 = vector.load %arg11[%c0, %c0_0, %c0_1] : memref<30x2x28xf32, #tpu.memory_space<vmem>>, vector<1x2x28xf32>
    tpu.vector_store %arg11[%c0, %c0_0, %c0_1], %0 {strides = array<i32>} : memref<30x2x28xf32, #tpu.memory_space<vmem>>, vector<1x2x28xf32>,
    %cst_2 = arith.constant 0.000000e+00 : f32
    %2 = vector.broadcast %cst_2 : f32 to vector<1x2x28xf32>
    %c29 = arith.constant 29 : index
    %c0_3 = arith.constant 0 : index
    %c0_4 = arith.constant 0 : index
    %3 = vector.load %arg11[%c29, %c0_3, %c0_4] : memref<30x2x28xf32, #tpu.memory_space<vmem>>, vector<1x2x28xf32>
    tpu.vector_store %arg11[%c29, %c0_3, %c0_4], %2 {strides = array<i32>} : memref<30x2x28xf32, #tpu.memory_space<vmem>>, vector<1x2x28xf32>,
    %cst_5 = arith.constant 0.000000e+00 : f32
    %4 = vector.broadcast %cst_5 : f32 to vector<1x2x512xf32>
    %c0_6 = arith.constant 0 : index
    %c0_7 = arith.constant 0 : index
    %c0_8 = arith.constant 0 : index
    %5 = vector.load %arg12[%c0_6, %c0_7, %c0_8] : memref<16x2x512xf32, #tpu.memory_space<vmem>>, vector<1x2x512xf32>
    tpu.vector_store %arg12[%c0_6, %c0_7, %c0_8], %4 {strides = array<i32>} : memref<16x2x512xf32, #tpu.memory_space<vmem>>, vector<1x2x512xf32>,
    %cst_9 = arith.constant 0.000000e+00 : f32
    %6 = vector.broadcast %cst_9 : f32 to vector<1x2x512xf32>
    %c15 = arith.constant 15 : index
    %c0_10 = arith.constant 0 : index
    %c0_11 = arith.constant 0 : index
    %7 = vector.load %arg12[%c15, %c0_10, %c0_11] : memref<16x2x512xf32, #tpu.memory_space<vmem>>, vector<1x2x512xf32>
    tpu.vector_store %arg12[%c15, %c0_10, %c0_11], %6 {strides = array<i32>} : memref<16x2x512xf32, #tpu.memory_space<vmem>>, vector<1x2x512xf32>,
    %c0_12 = arith.constant 0 : index
    %c0_13 = arith.constant 0 : index
    %c0_14 = arith.constant 0 : index
    %8 = vector.load %arg1[%c0_12, %c0_13, %c0_14] : memref<28x2x28xf32, #tpu.memory_space<vmem>>, vector<28x2x28xf32>
    %c1 = arith.constant 1 : index
    %c0_15 = arith.constant 0 : index
    %c0_16 = arith.constant 0 : index
    %9 = vector.load %arg11[%c1, %c0_15, %c0_16] : memref<30x2x28xf32, #tpu.memory_space<vmem>>, vector<28x2x28xf32>
    tpu.vector_store %arg11[%c1, %c0_15, %c0_16], %8 {strides = array<i32>} : memref<30x2x28xf32, #tpu.memory_space<vmem>>, vector<28x2x28xf32>,
    %c0_17 = arith.constant 0 : index
    %c0_18 = arith.constant 0 : index
    %c0_19 = arith.constant 0 : index
    %10 = vector.load %arg11[%c0_17, %c0_18, %c0_19] : memref<30x2x28xf32, #tpu.memory_space<vmem>>, vector<28x2x28xf32>
    %11 = vector.shape_cast %10 : vector<28x2x28xf32> to vector<56x28xf32>
    %c0_20 = arith.constant 0 : index
    %c0_21 = arith.constant 0 : index
    %c0_22 = arith.constant 0 : index
    %12 = vector.load %arg2[%c0_20, %c0_21, %c0_22] : memref<3x28x1024xf32, #tpu.memory_space<vmem>>, vector<1x28x1024xf32>
    %13 = vector.shape_cast %12 : vector<1x28x1024xf32> to vector<28x1024xf32>
    %cst_23 = arith.constant dense<0.000000e+00> : vector<56x1024xf32>
    %14 = tpu.matmul %11, %13, %cst_23 {dimension_numbers = #tpu.dot_dimension_numbers<[1], [0], [0], [1], [0, 0, 1, 1], [], []>} : vector<56x28xf32>, vector<28x1024xf32>, vector<56x1024xf32> -> vector<56x1024xf32>
    %c1_24 = arith.constant 1 : index
    %c0_25 = arith.constant 0 : index
    %c0_26 = arith.constant 0 : index
    %15 = vector.load %arg11[%c1_24, %c0_25, %c0_26] : memref<30x2x28xf32, #tpu.memory_space<vmem>>, vector<28x2x28xf32>
    %16 = vector.shape_cast %15 : vector<28x2x28xf32> to vector<56x28xf32>
    %c1_27 = arith.constant 1 : index
    %c0_28 = arith.constant 0 : index
    %c0_29 = arith.constant 0 : index
    %17 = vector.load %arg2[%c1_27, %c0_28, %c0_29] : memref<3x28x1024xf32, #tpu.memory_space<vmem>>, vector<1x28x1024xf32>
    %18 = vector.shape_cast %17 : vector<1x28x1024xf32> to vector<28x1024xf32>
    %cst_30 = arith.constant dense<0.000000e+00> : vector<56x1024xf32>
    %19 = tpu.matmul %16, %18, %cst_30 {dimension_numbers = #tpu.dot_dimension_numbers<[1], [0], [0], [1], [0, 0, 1, 1], [], []>} : vector<56x28xf32>, vector<28x1024xf32>, vector<56x1024xf32> -> vector<56x1024xf32>
    %20 = arith.addf %14, %19 : vector<56x1024xf32>
    %c2 = arith.constant 2 : index
    %c0_31 = arith.constant 0 : index
    %c0_32 = arith.constant 0 : index
    %21 = vector.load %arg11[%c2, %c0_31, %c0_32] : memref<30x2x28xf32, #tpu.memory_space<vmem>>, vector<28x2x28xf32>
    %22 = vector.shape_cast %21 : vector<28x2x28xf32> to vector<56x28xf32>
    %c2_33 = arith.constant 2 : index
    %c0_34 = arith.constant 0 : index
    %c0_35 = arith.constant 0 : index
    %23 = vector.load %arg2[%c2_33, %c0_34, %c0_35] : memref<3x28x1024xf32, #tpu.memory_space<vmem>>, vector<1x28x1024xf32>
    %24 = vector.shape_cast %23 : vector<1x28x1024xf32> to vector<28x1024xf32>
    %cst_36 = arith.constant dense<0.000000e+00> : vector<56x1024xf32>
    %25 = tpu.matmul %22, %24, %cst_36 {dimension_numbers = #tpu.dot_dimension_numbers<[1], [0], [0], [1], [0, 0, 1, 1], [], []>} : vector<56x28xf32>, vector<28x1024xf32>, vector<56x1024xf32> -> vector<56x1024xf32>
    %26 = arith.addf %20, %25 : vector<56x1024xf32>
    %c0_37 = arith.constant 0 : index
    %c0_38 = arith.constant 0 : index
    %27 = vector.load %arg3[%c0_37, %c0_38] : memref<1x1024xf32, #tpu.memory_space<vmem>>, vector<1x1024xf32>
    %28 = vector.broadcast %27 : vector<1x1024xf32> to vector<56x1024xf32>
    %29 = arith.addf %26, %28 : vector<56x1024xf32>
    %cst_39 = arith.constant 0.000000e+00 : f32
    %30 = vector.broadcast %cst_39 : f32 to vector<56x1024xf32>
    %31 = arith.maximumf %29, %30 : vector<56x1024xf32>
    %32 = vector.shape_cast %31 : vector<56x1024xf32> to vector<14x2x2x1024xf32>
    %33 = vector.extract_strided_slice %32 {offsets = [0, 0, 0, 0], sizes = [14, 1, 2, 1024], strides = [1, 1, 1, 1]} : vector<14x2x2x1024xf32> to vector<14x1x2x1024xf32>
    %34 = vector.shape_cast %33 : vector<14x1x2x1024xf32> to vector<14x2x1024xf32>
    %35 = vector.extract_strided_slice %32 {offsets = [0, 1, 0, 0], sizes = [14, 1, 2, 1024], strides = [1, 1, 1, 1]} : vector<14x2x2x1024xf32> to vector<14x1x2x1024xf32>
    %36 = vector.shape_cast %35 : vector<14x1x2x1024xf32> to vector<14x2x1024xf32>
    %37 = arith.maximumf %34, %36 : vector<14x2x1024xf32>
    %38 = vector.extract_strided_slice %37 {offsets = [0, 0, 0], sizes = [14, 2, 512], strides = [1, 1, 1]} : vector<14x2x1024xf32> to vector<14x2x512xf32>
    %39 = vector.extract_strided_slice %37 {offsets = [0, 0, 512], sizes = [14, 2, 512], strides = [1, 1, 1]} : vector<14x2x1024xf32> to vector<14x2x512xf32>
    %40 = arith.maximumf %38, %39 : vector<14x2x512xf32>
    %c1_40 = arith.constant 1 : index
    %c0_41 = arith.constant 0 : index
    %c0_42 = arith.constant 0 : index
    %41 = vector.load %arg12[%c1_40, %c0_41, %c0_42] : memref<16x2x512xf32, #tpu.memory_space<vmem>>, vector<14x2x512xf32>
    tpu.vector_store %arg12[%c1_40, %c0_41, %c0_42], %40 {strides = array<i32>} : memref<16x2x512xf32, #tpu.memory_space<vmem>>, vector<14x2x512xf32>,
    %c0_43 = arith.constant 0 : index
    %c0_44 = arith.constant 0 : index
    %c0_45 = arith.constant 0 : index
    %42 = vector.load %arg12[%c0_43, %c0_44, %c0_45] : memref<16x2x512xf32, #tpu.memory_space<vmem>>, vector<14x2x512xf32>
    %43 = vector.shape_cast %42 : vector<14x2x512xf32> to vector<28x512xf32>
    %c0_46 = arith.constant 0 : index
    %c0_47 = arith.constant 0 : index
    %c0_48 = arith.constant 0 : index
    %44 = vector.load %arg4[%c0_46, %c0_47, %c0_48] : memref<3x512x1024xf32, #tpu.memory_space<vmem>>, vector<1x512x1024xf32>
    %45 = vector.shape_cast %44 : vector<1x512x1024xf32> to vector<512x1024xf32>
    %cst_49 = arith.constant dense<0.000000e+00> : vector<28x1024xf32>
    %46 = tpu.matmul %43, %45, %cst_49 {dimension_numbers = #tpu.dot_dimension_numbers<[1], [0], [0], [1], [0, 0, 1, 1], [], []>} : vector<28x512xf32>, vector<512x1024xf32>, vector<28x1024xf32> -> vector<28x1024xf32>
    %c1_50 = arith.constant 1 : index
    %c0_51 = arith.constant 0 : index
    %c0_52 = arith.constant 0 : index
    %47 = vector.load %arg12[%c1_50, %c0_51, %c0_52] : memref<16x2x512xf32, #tpu.memory_space<vmem>>, vector<14x2x512xf32>
    %48 = vector.shape_cast %47 : vector<14x2x512xf32> to vector<28x512xf32>
    %c1_53 = arith.constant 1 : index
    %c0_54 = arith.constant 0 : index
    %c0_55 = arith.constant 0 : index
    %49 = vector.load %arg4[%c1_53, %c0_54, %c0_55] : memref<3x512x1024xf32, #tpu.memory_space<vmem>>, vector<1x512x1024xf32>
    %50 = vector.shape_cast %49 : vector<1x512x1024xf32> to vector<512x1024xf32>
    %cst_56 = arith.constant dense<0.000000e+00> : vector<28x1024xf32>
    %51 = tpu.matmul %48, %50, %cst_56 {dimension_numbers = #tpu.dot_dimension_numbers<[1], [0], [0], [1], [0, 0, 1, 1], [], []>} : vector<28x512xf32>, vector<512x1024xf32>, vector<28x1024xf32> -> vector<28x1024xf32>
    %52 = arith.addf %46, %51 : vector<28x1024xf32>
    %c2_57 = arith.constant 2 : index
    %c0_58 = arith.constant 0 : index
    %c0_59 = arith.constant 0 : index
    %53 = vector.load %arg12[%c2_57, %c0_58, %c0_59] : memref<16x2x512xf32, #tpu.memory_space<vmem>>, vector<14x2x512xf32>
    %54 = vector.shape_cast %53 : vector<14x2x512xf32> to vector<28x512xf32>
    %c2_60 = arith.constant 2 : index
    %c0_61 = arith.constant 0 : index
    %c0_62 = arith.constant 0 : index
    %55 = vector.load %arg4[%c2_60, %c0_61, %c0_62] : memref<3x512x1024xf32, #tpu.memory_space<vmem>>, vector<1x512x1024xf32>
    %56 = vector.shape_cast %55 : vector<1x512x1024xf32> to vector<512x1024xf32>
    %cst_63 = arith.constant dense<0.000000e+00> : vector<28x1024xf32>
    %57 = tpu.matmul %54, %56, %cst_63 {dimension_numbers = #tpu.dot_dimension_numbers<[1], [0], [0], [1], [0, 0, 1, 1], [], []>} : vector<28x512xf32>, vector<512x1024xf32>, vector<28x1024xf32> -> vector<28x1024xf32>
    %58 = arith.addf %52, %57 : vector<28x1024xf32>
    %c0_64 = arith.constant 0 : index
    %c0_65 = arith.constant 0 : index
    %59 = vector.load %arg5[%c0_64, %c0_65] : memref<1x1024xf32, #tpu.memory_space<vmem>>, vector<1x1024xf32>
    %60 = vector.broadcast %59 : vector<1x1024xf32> to vector<28x1024xf32>
    %61 = arith.addf %58, %60 : vector<28x1024xf32>
    %cst_66 = arith.constant 0.000000e+00 : f32
    %62 = vector.broadcast %cst_66 : f32 to vector<28x1024xf32>
    %63 = arith.maximumf %61, %62 : vector<28x1024xf32>
    %64 = vector.shape_cast %63 : vector<28x1024xf32> to vector<7x2x2x1024xf32>
    %65 = vector.extract_strided_slice %64 {offsets = [0, 0, 0, 0], sizes = [7, 1, 2, 1024], strides = [1, 1, 1, 1]} : vector<7x2x2x1024xf32> to vector<7x1x2x1024xf32>
    %66 = vector.shape_cast %65 : vector<7x1x2x1024xf32> to vector<7x2x1024xf32>
    %67 = vector.extract_strided_slice %64 {offsets = [0, 1, 0, 0], sizes = [7, 1, 2, 1024], strides = [1, 1, 1, 1]} : vector<7x2x2x1024xf32> to vector<7x1x2x1024xf32>
    %68 = vector.shape_cast %67 : vector<7x1x2x1024xf32> to vector<7x2x1024xf32>
    %69 = arith.maximumf %66, %68 : vector<7x2x1024xf32>
    %70 = vector.extract_strided_slice %69 {offsets = [0, 0, 0], sizes = [7, 2, 512], strides = [1, 1, 1]} : vector<7x2x1024xf32> to vector<7x2x512xf32>
    %71 = vector.extract_strided_slice %69 {offsets = [0, 0, 512], sizes = [7, 2, 512], strides = [1, 1, 1]} : vector<7x2x1024xf32> to vector<7x2x512xf32>
    %72 = arith.maximumf %70, %71 : vector<7x2x512xf32>
    %73 = vector.extract_strided_slice %72 {offsets = [0, 0, 0], sizes = [1, 2, 512], strides = [1, 1, 1]} : vector<7x2x512xf32> to vector<1x2x512xf32>
    %74 = vector.shape_cast %73 : vector<1x2x512xf32> to vector<2x512xf32>
    %c0_67 = arith.constant 0 : index
    %c0_68 = arith.constant 0 : index
    %c0_69 = arith.constant 0 : index
    %75 = vector.load %arg6[%c0_67, %c0_68, %c0_69] : memref<7x512x128xf32, #tpu.memory_space<vmem>>, vector<1x512x128xf32>
    %76 = vector.shape_cast %75 : vector<1x512x128xf32> to vector<512x128xf32>
    %cst_70 = arith.constant dense<0.000000e+00> : vector<2x128xf32>
    %77 = tpu.matmul %74, %76, %cst_70 {dimension_numbers = #tpu.dot_dimension_numbers<[1], [0], [0], [1], [0, 0, 1, 1], [], []>} : vector<2x512xf32>, vector<512x128xf32>, vector<2x128xf32> -> vector<2x128xf32>
    %78 = vector.extract_strided_slice %72 {offsets = [1, 0, 0], sizes = [1, 2, 512], strides = [1, 1, 1]} : vector<7x2x512xf32> to vector<1x2x512xf32>
    %79 = vector.shape_cast %78 : vector<1x2x512xf32> to vector<2x512xf32>
    %c1_71 = arith.constant 1 : index
    %c0_72 = arith.constant 0 : index
    %c0_73 = arith.constant 0 : index
    %80 = vector.load %arg6[%c1_71, %c0_72, %c0_73] : memref<7x512x128xf32, #tpu.memory_space<vmem>>, vector<1x512x128xf32>
    %81 = vector.shape_cast %80 : vector<1x512x128xf32> to vector<512x128xf32>
    %cst_74 = arith.constant dense<0.000000e+00> : vector<2x128xf32>
    %82 = tpu.matmul %79, %81, %cst_74 {dimension_numbers = #tpu.dot_dimension_numbers<[1], [0], [0], [1], [0, 0, 1, 1], [], []>} : vector<2x512xf32>, vector<512x128xf32>, vector<2x128xf32> -> vector<2x128xf32>
    %83 = arith.addf %77, %82 : vector<2x128xf32>
    %84 = vector.extract_strided_slice %72 {offsets = [2, 0, 0], sizes = [1, 2, 512], strides = [1, 1, 1]} : vector<7x2x512xf32> to vector<1x2x512xf32>
    %85 = vector.shape_cast %84 : vector<1x2x512xf32> to vector<2x512xf32>
    %c2_75 = arith.constant 2 : index
    %c0_76 = arith.constant 0 : index
    %c0_77 = arith.constant 0 : index
    %86 = vector.load %arg6[%c2_75, %c0_76, %c0_77] : memref<7x512x128xf32, #tpu.memory_space<vmem>>, vector<1x512x128xf32>
    %87 = vector.shape_cast %86 : vector<1x512x128xf32> to vector<512x128xf32>
    %cst_78 = arith.constant dense<0.000000e+00> : vector<2x128xf32>
    %88 = tpu.matmul %85, %87, %cst_78 {dimension_numbers = #tpu.dot_dimension_numbers<[1], [0], [0], [1], [0, 0, 1, 1], [], []>} : vector<2x512xf32>, vector<512x128xf32>, vector<2x128xf32> -> vector<2x128xf32>
    %89 = arith.addf %83, %88 : vector<2x128xf32>
    %90 = vector.extract_strided_slice %72 {offsets = [3, 0, 0], sizes = [1, 2, 512], strides = [1, 1, 1]} : vector<7x2x512xf32> to vector<1x2x512xf32>
    %91 = vector.shape_cast %90 : vector<1x2x512xf32> to vector<2x512xf32>
    %c3 = arith.constant 3 : index
    %c0_79 = arith.constant 0 : index
    %c0_80 = arith.constant 0 : index
    %92 = vector.load %arg6[%c3, %c0_79, %c0_80] : memref<7x512x128xf32, #tpu.memory_space<vmem>>, vector<1x512x128xf32>
    %93 = vector.shape_cast %92 : vector<1x512x128xf32> to vector<512x128xf32>
    %cst_81 = arith.constant dense<0.000000e+00> : vector<2x128xf32>
    %94 = tpu.matmul %91, %93, %cst_81 {dimension_numbers = #tpu.dot_dimension_numbers<[1], [0], [0], [1], [0, 0, 1, 1], [], []>} : vector<2x512xf32>, vector<512x128xf32>, vector<2x128xf32> -> vector<2x128xf32>
    %95 = arith.addf %89, %94 : vector<2x128xf32>
    %96 = vector.extract_strided_slice %72 {offsets = [4, 0, 0], sizes = [1, 2, 512], strides = [1, 1, 1]} : vector<7x2x512xf32> to vector<1x2x512xf32>
    %97 = vector.shape_cast %96 : vector<1x2x512xf32> to vector<2x512xf32>
    %c4 = arith.constant 4 : index
    %c0_82 = arith.constant 0 : index
    %c0_83 = arith.constant 0 : index
    %98 = vector.load %arg6[%c4, %c0_82, %c0_83] : memref<7x512x128xf32, #tpu.memory_space<vmem>>, vector<1x512x128xf32>
    %99 = vector.shape_cast %98 : vector<1x512x128xf32> to vector<512x128xf32>
    %cst_84 = arith.constant dense<0.000000e+00> : vector<2x128xf32>
    %100 = tpu.matmul %97, %99, %cst_84 {dimension_numbers = #tpu.dot_dimension_numbers<[1], [0], [0], [1], [0, 0, 1, 1], [], []>} : vector<2x512xf32>, vector<512x128xf32>, vector<2x128xf32> -> vector<2x128xf32>
    %101 = arith.addf %95, %100 : vector<2x128xf32>
    %102 = vector.extract_strided_slice %72 {offsets = [5, 0, 0], sizes = [1, 2, 512], strides = [1, 1, 1]} : vector<7x2x512xf32> to vector<1x2x512xf32>
    %103 = vector.shape_cast %102 : vector<1x2x512xf32> to vector<2x512xf32>
    %c5 = arith.constant 5 : index
    %c0_85 = arith.constant 0 : index
    %c0_86 = arith.constant 0 : index
    %104 = vector.load %arg6[%c5, %c0_85, %c0_86] : memref<7x512x128xf32, #tpu.memory_space<vmem>>, vector<1x512x128xf32>
    %105 = vector.shape_cast %104 : vector<1x512x128xf32> to vector<512x128xf32>
    %cst_87 = arith.constant dense<0.000000e+00> : vector<2x128xf32>
    %106 = tpu.matmul %103, %105, %cst_87 {dimension_numbers = #tpu.dot_dimension_numbers<[1], [0], [0], [1], [0, 0, 1, 1], [], []>} : vector<2x512xf32>, vector<512x128xf32>, vector<2x128xf32> -> vector<2x128xf32>
    %107 = arith.addf %101, %106 : vector<2x128xf32>
    %108 = vector.extract_strided_slice %72 {offsets = [6, 0, 0], sizes = [1, 2, 512], strides = [1, 1, 1]} : vector<7x2x512xf32> to vector<1x2x512xf32>
    %109 = vector.shape_cast %108 : vector<1x2x512xf32> to vector<2x512xf32>
    %c6 = arith.constant 6 : index
    %c0_88 = arith.constant 0 : index
    %c0_89 = arith.constant 0 : index
    %110 = vector.load %arg6[%c6, %c0_88, %c0_89] : memref<7x512x128xf32, #tpu.memory_space<vmem>>, vector<1x512x128xf32>
    %111 = vector.shape_cast %110 : vector<1x512x128xf32> to vector<512x128xf32>
    %cst_90 = arith.constant dense<0.000000e+00> : vector<2x128xf32>
    %112 = tpu.matmul %109, %111, %cst_90 {dimension_numbers = #tpu.dot_dimension_numbers<[1], [0], [0], [1], [0, 0, 1, 1], [], []>} : vector<2x512xf32>, vector<512x128xf32>, vector<2x128xf32> -> vector<2x128xf32>
    %113 = arith.addf %107, %112 : vector<2x128xf32>
    %c0_91 = arith.constant 0 : index
    %c0_92 = arith.constant 0 : index
    %114 = vector.load %arg7[%c0_91, %c0_92] : memref<1x128xf32, #tpu.memory_space<vmem>>, vector<1x128xf32>
    %115 = vector.broadcast %114 : vector<1x128xf32> to vector<2x128xf32>
    %116 = arith.addf %113, %115 : vector<2x128xf32>
    %cst_93 = arith.constant 0.000000e+00 : f32
    %117 = vector.broadcast %cst_93 : f32 to vector<2x128xf32>
    %118 = arith.maximumf %116, %117 : vector<2x128xf32>
    %c0_94 = arith.constant 0 : index
    %c0_95 = arith.constant 0 : index
    %119 = vector.load %arg8[%c0_94, %c0_95] : memref<128x128xf32, #tpu.memory_space<vmem>>, vector<128x128xf32>
    %cst_96 = arith.constant dense<0.000000e+00> : vector<2x128xf32>
    %120 = tpu.matmul %118, %119, %cst_96 {dimension_numbers = #tpu.dot_dimension_numbers<[1], [0], [0], [1], [0, 0, 1, 1], [], []>} : vector<2x128xf32>, vector<128x128xf32>, vector<2x128xf32> -> vector<2x128xf32>
    %c0_97 = arith.constant 0 : index
    %c0_98 = arith.constant 0 : index
    %121 = vector.load %arg9[%c0_97, %c0_98] : memref<1x128xf32, #tpu.memory_space<vmem>>, vector<1x128xf32>
    %122 = vector.broadcast %121 : vector<1x128xf32> to vector<2x128xf32>
    %123 = arith.addf %120, %122 : vector<2x128xf32>
    %c0_99 = arith.constant 0 : index
    %c0_100 = arith.constant 0 : index
    %124 = vector.load %arg10[%c0_99, %c0_100] : memref<2x128xf32, #tpu.memory_space<vmem>>, vector<2x128xf32>
    tpu.vector_store %arg10[%c0_99, %c0_100], %123 {strides = array<i32>} : memref<2x128xf32, #tpu.memory_space<vmem>>, vector<2x128xf32>,
    return
  }
  func.func @transform_0(%arg0: i32) -> (i32, i32, i32) {
    %c0_i32 = arith.constant 0 : i32
    %c0_i32_0 = arith.constant 0 : i32
    %c0_i32_1 = arith.constant 0 : i32
    return %c0_i32, %arg0, %c0_i32_0 : i32, i32, i32
  }
  func.func @transform_1(%arg0: i32) -> (i32, i32, i32) {
    %c0_i32 = arith.constant 0 : i32
    %c0_i32_0 = arith.constant 0 : i32
    %c0_i32_1 = arith.constant 0 : i32
    %c0_i32_2 = arith.constant 0 : i32
    return %c0_i32, %c0_i32_0, %c0_i32_1 : i32, i32, i32
  }
  func.func @transform_2(%arg0: i32) -> (i32, i32) {
    %c0_i32 = arith.constant 0 : i32
    %c0_i32_0 = arith.constant 0 : i32
    %c0_i32_1 = arith.constant 0 : i32
    return %c0_i32, %c0_i32_0 : i32, i32
  }
  func.func @transform_3(%arg0: i32) -> (i32, i32, i32) {
    %c0_i32 = arith.constant 0 : i32
    %c0_i32_0 = arith.constant 0 : i32
    %c0_i32_1 = arith.constant 0 : i32
    %c0_i32_2 = arith.constant 0 : i32
    return %c0_i32, %c0_i32_0, %c0_i32_1 : i32, i32, i32
  }
  func.func @transform_4(%arg0: i32) -> (i32, i32) {
    %c0_i32 = arith.constant 0 : i32
    %c0_i32_0 = arith.constant 0 : i32
    %c0_i32_1 = arith.constant 0 : i32
    return %c0_i32, %c0_i32_0 : i32, i32
  }
  func.func @transform_5(%arg0: i32) -> (i32, i32, i32) {
    %c0_i32 = arith.constant 0 : i32
    %c0_i32_0 = arith.constant 0 : i32
    %c0_i32_1 = arith.constant 0 : i32
    %c0_i32_2 = arith.constant 0 : i32
    return %c0_i32, %c0_i32_0, %c0_i32_1 : i32, i32, i32
  }
  func.func @transform_6(%arg0: i32) -> (i32, i32) {
    %c0_i32 = arith.constant 0 : i32
    %c0_i32_0 = arith.constant 0 : i32
    %c0_i32_1 = arith.constant 0 : i32
    return %c0_i32, %c0_i32_0 : i32, i32
  }
  func.func @transform_7(%arg0: i32) -> (i32, i32) {
    %c0_i32 = arith.constant 0 : i32
    %c0_i32_0 = arith.constant 0 : i32
    %c0_i32_1 = arith.constant 0 : i32
    return %c0_i32, %c0_i32_0 : i32, i32
  }
  func.func @transform_8(%arg0: i32) -> (i32, i32) {
    %c0_i32 = arith.constant 0 : i32
    %c0_i32_0 = arith.constant 0 : i32
    %c0_i32_1 = arith.constant 0 : i32
    return %c0_i32, %c0_i32_0 : i32, i32
  }
  func.func @transform_9(%arg0: i32) -> (i32, i32) {
    %c0_i32 = arith.constant 0 : i32
    %c0_i32_0 = arith.constant 0 : i32
    return %arg0, %c0_i32 : i32, i32
  }
}

</mosaic_0001>

<bundles_post_ra>
// kernel: mnist_net.1
= control target key start
LH: loop header
LB: loop body
LE: loop exit
PB: predicated region body
PF: predicated region fallthrough
CT: control target
= control target key end

     0   :  { %vm380_vm0 = vcmask 1043456   ;;  %vm33_vm1 = vcmask 222208   ;;  %v251_v7 = vlaneseq  ;;  %v20002_v8 = vmov 0.0   ;;  %s19992_s0 = inlined_call_operand.vmem [shape: f32[28,2,28], index: 0, kind: input, shape index: {}]   ;;  %s19993_s1 = inlined_call_operand.vmem [shape: f32[3,28,1024], index: 1, kind: input, shape index: {}]   ;;  %s19994_s2 = inlined_call_operand.vmem [shape: f32[1,1024], index: 2, kind: input, shape index: {}]   ;;  %s19995_s3 = inlined_call_operand.vmem [shape: f32[3,512,1024], index: 3, kind: input, shape index: {}]   ;;  %s19996_s4 = inlined_call_operand.vmem [shape: f32[1,1024], index: 4, kind: input, shape index: {}]   ;;  %s19997_s5 = inlined_call_operand.vmem [shape: f32[7,512,128], index: 5, kind: input, shape index: {}]   ;;  %s19998_s6 = inlined_call_operand.vmem [shape: f32[1,128], index: 6, kind: input, shape index: {}]   ;;  %s19999_s7 = inlined_call_operand.vmem [shape: f32[128,128], index: 7, kind: input, shape index: {}]   ;;  %s20000_s8 = inlined_call_operand.vmem [shape: f32[1,128], index: 8, kind: input, shape index: {}]   ;;  %s20001_s9 = inlined_call_operand.hbm [shape: f32[2,128], index: 9, kind: output, shape index: {}]  }
   0x1   :  { %v9395_v0 = vld [vmem:[%s19993_s1 + $0x1c8] sm:$0xf]  ;;  %v9394_v1 = vld [vmem:[%s19993_s1 + $0x1c0] sm:$0xf]  ;;  %34 = vst.msk [vmem:[#allocation2] sm:$0x3] %vm33_vm1, %v20002_v8  ;;  %469 = vmatprep.mubr.f32.mxu0 %v20002_v8  ;;  %487 = vmatprep.mubr.f32.mxu1 %v20002_v8 }
   0x2   :  { %v9387_v2 = vld [vmem:[%s19993_s1 + $0x188] sm:$0xff]  ;;  %11494 = vmatprep.subr.msk.mxu1 %vm380_vm0, %v9395_v0  ;;  %9402 = vmatprep.subr.msk.mxu0 %vm380_vm0, %v9395_v0  ;;  %v9386_v3 = vld [vmem:[%s19993_s1 + $0x180] sm:$0xff]  ;;  %36 = vst.msk [vmem:[#allocation2 + $0x3a] sm:$0x3] %vm33_vm1, %v20002_v8  ;;  %v11529_v12 = vmov 1983009808  }
   0x3   :  { %11498 = vmatpush1.msk.msra.mxu1 %vm380_vm0, %v9394_v1  ;;  %9403 = vmatpush1.msk.msra.mxu0 %vm380_vm0, %v9394_v1  ;;  %v9379_v4 = vld [vmem:[%s19993_s1 + $0x148] sm:$0xff]  ;;  %v9378_v5 = vld [vmem:[%s19993_s1 + $0x140] sm:$0xff]  ;;  %v249_v13 = vunpack.c.l.s4 %v11529_v12  ;;  %v52_v16 = vld [vmem:[%s19992_s0 + $0x18] sm:$0x3]  ;;  %v11646_v22 = vshrl.u32 %v251_v7, 7  ;;  %vm365_vm2 = vcmask 228352  }
   0x4   :  { %v9371_v6 = vld [vmem:[%s19993_s1 + $0x108] sm:$0xff]  ;;  %11495 = vmatprep.subr.mxu1 %v9387_v2  ;;  %431 = vmatprep.subr.mxu0 %v9387_v2  ;;  %v40_v9 = vld [vmem:[%s19992_s0] sm:$0x3]  ;;  %v41_v10 = vld [vmem:[%s19992_s0 + $0x2] sm:$0x3] }
   0x5   :  { %v42_v11 = vld [vmem:[%s19992_s0 + $0x4] sm:$0x3]  ;;  %11499 = vmatpush1.msra.mxu1 %v9386_v3  ;;  %432 = vmatpush1.msra.mxu0 %v9386_v3  ;;  %v43_v15 = vld [vmem:[%s19992_s0 + $0x6] sm:$0x3]  ;;  %69 = vst.msk [vmem:[#allocation2 + $0x2] sm:$0x3] %vm33_vm1, %v40_v9  ;;  %v250_v21 = vunpack.c.0.s8 %v249_v13 }
   0x6   :  { %v9370_v14 = vld [vmem:[%s19993_s1 + $0x100] sm:$0xff]  ;;  %70 = vst.msk [vmem:[#allocation2 + $0x4] sm:$0x3] %vm33_vm1, %v41_v10  ;;  %71 = vst.msk [vmem:[#allocation2 + $0x6] sm:$0x3] %vm33_vm1, %v42_v11  ;;  %11496 = vmatprep.subr.mxu1 %v9379_v4  ;;  %433 = vmatprep.subr.mxu0 %v9379_v4  ;;  %v9389_v11 = vld [vmem:[%s19993_s1 + $0x198] sm:$0xff] }
   0x7   :  { %v9397_v17 = vld [vmem:[%s19993_s1 + $0x1d8] sm:$0xf]  ;;  %72 = vst.msk [vmem:[#allocation2 + $0x8] sm:$0x3] %vm33_vm1, %v43_v15  ;;  %v54_v19 = vld [vmem:[%s19992_s0 + $0x1c] sm:$0x3]  ;;  %11500 = vmatpush1.msra.mxu1 %v9378_v5  ;;  %434 = vmatpush1.msra.mxu0 %v9378_v5  ;;  %v11690_v32 = vsub.s32 %v250_v21, %v11646_v22 }
   0x8   :  { %v53_v18 = vld [vmem:[%s19992_s0 + $0x1a] sm:$0x3]  ;;  %v55_v20 = vld [vmem:[%s19992_s0 + $0x1e] sm:$0x3]  ;;  %81 = vst.msk [vmem:[#allocation2 + $0x1a] sm:$0x3] %vm33_vm1, %v52_v16  ;;  %11497 = vmatprep.subr.mxu1 %v9371_v6  ;;  %435 = vmatprep.subr.mxu0 %v9371_v6 }
   0x9   :  { %20016 = vst [vmem:[#allocation7_spill] sm:$0xff] %v11646_v22  ;;  %82 = vst.msk [vmem:[#allocation2 + $0x1c] sm:$0x3] %vm33_vm1, %v53_v18  ;;  %v44_v23 = vld [vmem:[%s19992_s0 + $0x8] sm:$0x3]  ;;  %11501 = vmatpush1.msra.mxu1 %v9370_v14  ;;  %436 = vmatpush1.msra.mxu0 %v9370_v14  ;;  %v9388_v16 = vld [vmem:[%s19993_s1 + $0x190] sm:$0xff] }
   0xa   :  { %83 = vst.msk [vmem:[#allocation2 + $0x1e] sm:$0x3] %vm33_vm1, %v54_v19  ;;  %84 = vst.msk [vmem:[#allocation2 + $0x20] sm:$0x3] %vm33_vm1, %v55_v20  ;;  %v45_v24 = vld [vmem:[%s19992_s0 + $0xa] sm:$0x3]  ;;  %9411 = vmatprep.subr.msk.mxu1 %vm380_vm0, %v9397_v17 }
   0xb   :  { %v46_v25 = vld [vmem:[%s19992_s0 + $0xc] sm:$0x3]  ;;  %v47_v26 = vld [vmem:[%s19992_s0 + $0xe] sm:$0x3]  ;;  %73 = vst.msk [vmem:[#allocation2 + $0xa] sm:$0x3] %vm33_vm1, %v44_v23 }
   0xc   :  { %74 = vst.msk [vmem:[#allocation2 + $0xc] sm:$0x3] %vm33_vm1, %v45_v24  ;;  %v56_v27 = vld [vmem:[%s19992_s0 + $0x20] sm:$0x3]  ;;  %75 = vst.msk [vmem:[#allocation2 + $0xe] sm:$0x3] %vm33_vm1, %v46_v25 }
   0xd   :  { %76 = vst.msk [vmem:[#allocation2 + $0x10] sm:$0x3] %vm33_vm1, %v47_v26  ;;  %v57_v28 = vld [vmem:[%s19992_s0 + $0x22] sm:$0x3]  ;;  %v58_v29 = vld [vmem:[%s19992_s0 + $0x24] sm:$0x3] }
   0xe   :  { %v59_v30 = vld [vmem:[%s19992_s0 + $0x26] sm:$0x3]  ;;  %85 = vst.msk [vmem:[#allocation2 + $0x22] sm:$0x3] %vm33_vm1, %v56_v27  ;;  %86 = vst.msk [vmem:[#allocation2 + $0x24] sm:$0x3] %vm33_vm1, %v57_v28 }
   0xf   :  { %87 = vst.msk [vmem:[#allocation2 + $0x26] sm:$0x3] %vm33_vm1, %v58_v29  ;;  %88 = vst.msk [vmem:[#allocation2 + $0x28] sm:$0x3] %vm33_vm1, %v59_v30  ;;  %v9399_v31 = vld [vmem:[%s19993_s1 + $0x1e8] sm:$0xf] }
  0x10   :  { %20017 = vst [vmem:[#allocation8_spill] sm:$0xff] %v11690_v32  ;;  %9420 = vmatprep.subr.msk.mxu0 %vm380_vm0, %v9399_v31  ;;  %v157_v33 = vld [vmem:[#allocation2 + $0x2] sm:$0x3]  ;;  %v158_v34 = vld [vmem:[#allocation2 + $0x4] sm:$0x3]  ;;  %v9391_v17 = vld [vmem:[%s19993_s1 + $0x1a8] sm:$0xff] }
  0x11   :  { %v159_v35 = vld [vmem:[#allocation2 + $0x6] sm:$0x3]  ;;  %v160_v36 = vld [vmem:[#allocation2 + $0x8] sm:$0x3]  ;;  %v246_v37 = vcombine.low %v157_v33, %v158_v34  ;;  %v169_v38 = vld [vmem:[#allocation2 + $0x1a] sm:$0x3] }
  0x12   :  { %v48_v39 = vld [vmem:[%s19992_s0 + $0x10] sm:$0x3]  ;;  %v247_v40 = vcombine.low %v159_v35, %v160_v36  ;;  %v170_v41 = vld [vmem:[#allocation2 + $0x1c] sm:$0x3]  ;;  %v171_v42 = vld [vmem:[#allocation2 + $0x1e] sm:$0x3] }
  0x13   :  { %v172_v43 = vld [vmem:[#allocation2 + $0x20] sm:$0x3]  ;;  %77 = vst.msk [vmem:[#allocation2 + $0x12] sm:$0x3] %vm33_vm1, %v48_v39  ;;  %v254_v44 = vrot.slane %v246_v37, %v11690_v32  ;;  %v297_v45 = vcombine.low %v169_v38, %v170_v41  ;;  %v161_v47 = vld [vmem:[#allocation2 + $0xa] sm:$0x3] }
  0x14   :  { %v298_v46 = vcombine.low %v171_v42, %v172_v43  ;;  %v162_v48 = vld [vmem:[#allocation2 + $0xc] sm:$0x3]  ;;  %v49_v49 = vld [vmem:[%s19992_s0 + $0x12] sm:$0x3]  ;;  %v261_v50 = vrot.slane %v247_v40, %v11690_v32  ;;  %v163_v51 = vld [vmem:[#allocation2 + $0xe] sm:$0x3] }
  0x15   :  { %v164_v52 = vld [vmem:[#allocation2 + $0x10] sm:$0x3]  ;;  %v263_v53 = vcombine.low %v161_v47, %v162_v48  ;;  %v173_v54 = vld [vmem:[#allocation2 + $0x22] sm:$0x3]  ;;  %78 = vst.msk [vmem:[#allocation2 + $0x14] sm:$0x3] %vm33_vm1, %v49_v49  ;;  %v305_v55 = vrot.slane %v297_v45, %v11690_v32 }
  0x16   :  { %v312_v56 = vrot.slane %v298_v46, %v11690_v32  ;;  %v9396_v57 = vld [vmem:[%s19993_s1 + $0x1d0] sm:$0xf]  ;;  %v264_v58 = vcombine.low %v163_v51, %v164_v52  ;;  %v174_v59 = vld [vmem:[#allocation2 + $0x24] sm:$0x3]  ;;  %v175_v60 = vld [vmem:[#allocation2 + $0x26] sm:$0x3]  ;;  %v11708_v62 = vcombine.low %v254_v44, %v261_v50 }
  0x17   :  { %v176_v61 = vld [vmem:[#allocation2 + $0x28] sm:$0x3]  ;;  %v271_v63 = vrot.slane %v263_v53, %v11690_v32  ;;  %v314_v0 = vcombine.low %v173_v54, %v174_v59  ;;  %v50_v2 = vld [vmem:[%s19992_s0 + $0x14] sm:$0x3]  ;;  %v51_v3 = vld [vmem:[%s19992_s0 + $0x16] sm:$0x3] }
  0x18   :  { %v315_v1 = vcombine.low %v175_v60, %v176_v61  ;;  %v60_v4 = vld [vmem:[%s19992_s0 + $0x28] sm:$0x3]  ;;  %v11720_v5 = vcombine.low %v305_v55, %v312_v56  ;;  %v278_v6 = vrot.slane %v264_v58, %v11690_v32  ;;  %79 = vst.msk [vmem:[#allocation2 + $0x16] sm:$0x3] %vm33_vm1, %v50_v2  ;;  %80 = vst.msk [vmem:[#allocation2 + $0x18] sm:$0x3] %vm33_vm1, %v51_v3  ;;  %9404 = vmatmul.mubr.msk.f32.vlgmr.msra.gmra.mxu0 %vm365_vm2, %v11708_v62 }
  0x19   :  { %v61_v7 = vld [vmem:[%s19992_s0 + $0x2a] sm:$0x3]  ;;  %v62_v9 = vld [vmem:[%s19992_s0 + $0x2c] sm:$0x3]  ;;  %v63_v10 = vld [vmem:[%s19992_s0 + $0x2e] sm:$0x3]  ;;  %v322_v12 = vrot.slane %v314_v0, %v11690_v32  ;;  %475 = vmatprep.mubr.f32.mxu0 %v20002_v8 }
  0x1a   :  { %89 = vst.msk [vmem:[#allocation2 + $0x2a] sm:$0x3] %vm33_vm1, %v60_v4  ;;  %v329_v13 = vrot.slane %v315_v1, %v11690_v32  ;;  %v9398_v14 = vld [vmem:[%s19993_s1 + $0x1e0] sm:$0xf]  ;;  %90 = vst.msk [vmem:[#allocation2 + $0x2c] sm:$0x3] %vm33_vm1, %v61_v7  ;;  %9407 = vmatmul.mubr.msk.f32.vlgmr.msra.gmra.mxu1 %vm365_vm2, %v11720_v5  ;;  %v11751_v15 = vcombine.low %v271_v63, %v278_v6 }
  0x1b   :  { %91 = vst.msk [vmem:[#allocation2 + $0x2e] sm:$0x3] %vm33_vm1, %v62_v9  ;;  %92 = vst.msk [vmem:[#allocation2 + $0x30] sm:$0x3] %vm33_vm1, %v63_v10  ;;  %v165_v18 = vld [vmem:[#allocation2 + $0x12] sm:$0x3]  ;;  %9412 = vmatpush1.msk.msra.mxu1 %vm380_vm0, %v9396_v57  ;;  %493 = vmatprep.mubr.f32.mxu1 %v20002_v8 }
  0x1c   :  { %v11761_v19 = vcombine.low %v322_v12, %v329_v13  ;;  %v9381_v20 = vld [vmem:[%s19993_s1 + $0x158] sm:$0xff]  ;;  %v9390_v21 = vld [vmem:[%s19993_s1 + $0x1a0] sm:$0xff]  ;;  %v64_v23 = vld [vmem:[%s19992_s0 + $0x30] sm:$0x3]  ;;  %538 = vmatprep.subr.mxu1 %v9389_v11  ;;  %9421 = vmatpush1.msk.msra.mxu0 %vm380_vm0, %v9398_v14 }
  0x1d   :  { %v65_v24 = vld [vmem:[%s19992_s0 + $0x32] sm:$0x3]  ;;  %v166_v25 = vld [vmem:[#allocation2 + $0x14] sm:$0x3]  ;;  %v67_v27 = vld [vmem:[%s19992_s0 + $0x36] sm:$0x3]  ;;  %9405 = vmatmul.mubr.msk.f32.gmra.mxu0 %vm365_vm2, %v11751_v15  ;;  %539 = vmatpush1.msra.mxu1 %v9388_v16 }
  0x1e   :  { %v66_v26 = vld [vmem:[%s19992_s0 + $0x34] sm:$0x3]  ;;  %93 = vst.msk [vmem:[#allocation2 + $0x32] sm:$0x3] %vm33_vm1, %v64_v23  ;;  %94 = vst.msk [vmem:[#allocation2 + $0x34] sm:$0x3] %vm33_vm1, %v65_v24  ;;  %v280_v28 = vcombine.low %v165_v18, %v166_v25  ;;  %9408 = vmatmul.mubr.msk.f32.gmra.mxu1 %vm365_vm2, %v11761_v19  ;;  %645 = vmatprep.subr.mxu0 %v9391_v17 }
  0x1f   :  { %v9380_v29 = vld [vmem:[%s19993_s1 + $0x150] sm:$0xff]  ;;  %v9383_v30 = vld [vmem:[%s19993_s1 + $0x168] sm:$0xff]  ;;  %v9382_v31 = vld [vmem:[%s19993_s1 + $0x160] sm:$0xff]  ;;  %95 = vst.msk [vmem:[#allocation2 + $0x36] sm:$0x3] %vm33_vm1, %v66_v26  ;;  %481 = vmatprep.mubr.f32.mxu0 %v20002_v8  ;;  %499 = vmatprep.mubr.f32.mxu1 %v20002_v8 }
  0x20   :  { %96 = vst.msk [vmem:[#allocation2 + $0x38] sm:$0x3] %vm33_vm1, %v67_v27  ;;  %v9375_v33 = vld [vmem:[%s19993_s1 + $0x128] sm:$0xff]  ;;  %v9373_v34 = vld [vmem:[%s19993_s1 + $0x118] sm:$0xff]  ;;  %v9372_v35 = vld [vmem:[%s19993_s1 + $0x110] sm:$0xff]  ;;  %540 = vmatprep.subr.mxu1 %v9381_v20  ;;  %646 = vmatpush1.msra.mxu0 %v9390_v21  ;;  %v288_v40 = vrot.slane %v280_v28, %v11690_v32 }
  0x21   :  { %v167_v36 = vld [vmem:[#allocation2 + $0x16] sm:$0x3]  ;;  %v168_v37 = vld [vmem:[#allocation2 + $0x18] sm:$0x3]  ;;  %v177_v38 = vld [vmem:[#allocation2 + $0x2a] sm:$0x3]  ;;  %541 = vmatpush1.msra.mxu1 %v9380_v29  ;;  %647 = vmatprep.subr.mxu0 %v9383_v30 }
  0x22   :  { %v281_v39 = vcombine.low %v167_v36, %v168_v37  ;;  %v178_v41 = vld [vmem:[#allocation2 + $0x2c] sm:$0x3]  ;;  %v179_v42 = vld [vmem:[#allocation2 + $0x2e] sm:$0x3]  ;;  %v180_v43 = vld [vmem:[#allocation2 + $0x30] sm:$0x3]  ;;  %648 = vmatpush1.msra.mxu0 %v9382_v31  ;;  %542 = vmatprep.subr.mxu1 %v9373_v34 }
  0x23   :  { %v331_v44 = vcombine.low %v177_v38, %v178_v41  ;;  %v332_v45 = vcombine.low %v179_v42, %v180_v43  ;;  %v9374_v46 = vld [vmem:[%s19993_s1 + $0x120] sm:$0xff]  ;;  %v9401_v47 = vld [vmem:[%s19993_s1 + $0x1f8] sm:$0xf]  ;;  %v150_v49 = vld [vmem:[%s19993_s1 + $0xc8] sm:$0xf]  ;;  %649 = vmatprep.subr.mxu0 %v9375_v33  ;;  %543 = vmatpush1.msra.mxu1 %v9372_v35 }
  0x24   :  { %v295_v48 = vrot.slane %v281_v39, %v11690_v32  ;;  %650 = vmatpush1.msra.mxu0 %v9374_v46  ;;  %9429 = vmatprep.subr.msk.mxu1 %vm380_vm0, %v9401_v47  ;;  %v149_v0 = vld [vmem:[%s19993_s1 + $0xc0] sm:$0xf]  ;;  %v142_v1 = vld [vmem:[%s19993_s1 + $0x88] sm:$0xff]  ;;  %v9400_v2 = vld [vmem:[%s19993_s1 + $0x1f0] sm:$0xf] }
  0x25   :  { %v339_v50 = vrot.slane %v331_v44, %v11690_v32  ;;  %v346_v51 = vrot.slane %v332_v45, %v11690_v32  ;;  %v181_v52 = vld [vmem:[#allocation2 + $0x32] sm:$0x3]  ;;  %v182_v53 = vld [vmem:[#allocation2 + $0x34] sm:$0x3]  ;;  %9438 = vmatprep.subr.msk.mxu0 %vm380_vm0, %v150_v49  ;;  %v9393_v3 = vld [vmem:[%s19993_s1 + $0x1b8] sm:$0xff] }
  0x26   :  { %v11823_v54 = vcombine.low %v288_v40, %v295_v48  ;;  %v183_v55 = vld [vmem:[#allocation2 + $0x36] sm:$0x3]  ;;  %v348_v57 = vcombine.low %v181_v52, %v182_v53  ;;  %v141_v4 = vld [vmem:[%s19993_s1 + $0x80] sm:$0xff]  ;;  %v9385_v7 = vld [vmem:[%s19993_s1 + $0x178] sm:$0xff] }
  0x27   :  { %v184_v56 = vld [vmem:[#allocation2 + $0x38] sm:$0x3]  ;;  %v11826_v58 = vcombine.low %v339_v50, %v346_v51  ;;  %v9392_v6 = vld [vmem:[%s19993_s1 + $0x1b0] sm:$0xff]  ;;  %v134_v10 = vld [vmem:[%s19993_s1 + $0x48] sm:$0xff] }
  0x28   :  { %v349_v59 = vcombine.low %v183_v55, %v184_v56  ;;  %9406 = vmatmul.mubr.msk.f32.gmra.mxu0 %vm365_vm2, %v11823_v54  ;;  %v356_v60 = vrot.slane %v348_v57, %v11690_v32  ;;  %v9384_v9 = vld [vmem:[%s19993_s1 + $0x170] sm:$0xff]  ;;  %v9377_v11 = vld [vmem:[%s19993_s1 + $0x138] sm:$0xff]  ;;  %v133_v13 = vld [vmem:[%s19993_s1 + $0x40] sm:$0xff] }
  0x29   :  { %9409 = vmatmul.mubr.msk.f32.gmra.mxu1 %vm365_vm2, %v11826_v58  ;;  %683 = vmatprep.mubr.f32.mxu0 %v20002_v8  ;;  %v9376_v12 = vld [vmem:[%s19993_s1 + $0x130] sm:$0xff]  ;;  %v126_v14 = vld [vmem:[%s19993_s1 + $0x8] sm:$0xff]  ;;  %v97_v16 = vld [vmem:[#allocation2] sm:$0x3] }
  0x2a   :  { %v363_v61 = vrot.slane %v349_v59, %v11690_v32  ;;  %505 = vmatprep.mubr.f32.mxu1 %v20002_v8  ;;  %v152_v17 = vld [vmem:[%s19993_s1 + $0xd8] sm:$0xf]  ;;  %v98_v18 = vld [vmem:[#allocation2 + $0x2] sm:$0x3]  ;;  %v99_v20 = vld [vmem:[#allocation2 + $0x4] sm:$0x3] }
  0x2b   :  { %v100_v21 = vld [vmem:[#allocation2 + $0x6] sm:$0x3]  ;;  %v861_v24 = vcombine.low %v97_v16, %v98_v18  ;;  %v101_v26 = vld [vmem:[#allocation2 + $0x8] sm:$0x3]  ;;  %v102_v28 = vld [vmem:[#allocation2 + $0xa] sm:$0x3] }
  0x2c   :  { %v11837_v63 = vcombine.low %v356_v60, %v363_v61  ;;  %9422 = vmatmul.mubr.msk.f32.vlgmr.msra.gmra.mxu0 %vm365_vm2, %v11708_v62  ;;  %v125_v23 = vld [vmem:[%s19993_s1] sm:$0xff]  ;;  %v862_v25 = vcombine.low %v99_v20, %v100_v21  ;;  %v154_v27 = vld [vmem:[%s19993_s1 + $0xe8] sm:$0xf]  ;;  %v103_v29 = vld [vmem:[#allocation2 + $0xc] sm:$0x3]  ;;  %v878_v34 = vcombine.low %v101_v26, %v102_v28 }
  0x2d   :  { %689 = vmatprep.mubr.f32.mxu0 %v20002_v8  ;;  %9439 = vmatpush1.msk.msra.mxu0 %vm380_vm0, %v149_v0  ;;  %v104_v30 = vld [vmem:[#allocation2 + $0xe] sm:$0x3]  ;;  %v869_v31 = vrot.slane %v861_v24, %v11690_v32  ;;  %v105_v36 = vld [vmem:[#allocation2 + $0x10] sm:$0x3]  ;;  %v106_v37 = vld [vmem:[#allocation2 + $0x12] sm:$0x3] }
  0x2e   :  { %9410 = vmatmul.mubr.msk.f32.gmra.mxu1 %vm365_vm2, %v11837_v63  ;;  %1044 = vmatprep.subr.mxu0 %v142_v1  ;;  %v876_v33 = vrot.slane %v862_v25, %v11690_v32  ;;  %v879_v35 = vcombine.low %v103_v29, %v104_v30  ;;  %v107_v38 = vld [vmem:[#allocation2 + $0x14] sm:$0x3]  ;;  %v108_v39 = vld [vmem:[#allocation2 + $0x16] sm:$0x3]  ;;  %v895_v40 = vcombine.low %v105_v36, %v106_v37  ;;  %v109_v45 = vld [vmem:[#allocation2 + $0x18] sm:$0x3] }
  0x2f   :  { %576 = vmatprep.mubr.f32.mxu1 %v20002_v8  ;;  %1045 = vmatpush1.msra.mxu0 %v141_v4  ;;  %v886_v42 = vrot.slane %v878_v34, %v11690_v32  ;;  %v896_v44 = vcombine.low %v107_v38, %v108_v39  ;;  %v110_v46 = vld [vmem:[#allocation2 + $0x1a] sm:$0x3]  ;;  %v111_v47 = vld [vmem:[#allocation2 + $0x1c] sm:$0x3]  ;;  %v112_v48 = vld [vmem:[#allocation2 + $0x1e] sm:$0x3] }
  0x30   :  { %9423 = vmatmul.mubr.msk.f32.gmra.mxu0 %vm365_vm2, %v11751_v15  ;;  %1046 = vmatprep.subr.mxu0 %v134_v10  ;;  %v11931_v41 = vcombine.low %v869_v31, %v876_v33  ;;  %v893_v43 = vrot.slane %v879_v35, %v11690_v32  ;;  %v903_v49 = vrot.slane %v895_v40, %v11690_v32  ;;  %v113_v50 = vld [vmem:[#allocation2 + $0x20] sm:$0x3]  ;;  %v114_v51 = vld [vmem:[#allocation2 + $0x22] sm:$0x3]  ;;  %v115_v59 = vld [vmem:[#allocation2 + $0x24] sm:$0x3] }
  0x31   :  { %695 = vmatprep.mubr.f32.mxu0 %v20002_v8  ;;  %1047 = vmatpush1.msra.mxu0 %v133_v13  ;;  %v153_v52 = vld [vmem:[%s19993_s1 + $0xe0] sm:$0xf]  ;;  %v910_v55 = vrot.slane %v896_v44, %v11690_v32  ;;  %v912_v56 = vcombine.low %v109_v45, %v110_v46  ;;  %v913_v57 = vcombine.low %v111_v47, %v112_v48  ;;  %v116_v60 = vld [vmem:[#allocation2 + $0x26] sm:$0x3]  ;;  %v146_v61 = vld [vmem:[%s19993_s1 + $0xa8] sm:$0xff] }
  0x32   :  { %9413 = vmatmul.mubr.msk.f32.vlgmr.msra.gmra.mxu1 %vm365_vm2, %v11708_v62  ;;  %1048 = vmatprep.subr.mxu0 %v126_v14  ;;  %v11945_v53 = vcombine.low %v886_v42, %v893_v43  ;;  %v151_v0 = vld [vmem:[%s19993_s1 + $0xd0] sm:$0xf]  ;;  %v144_v1 = vld [vmem:[%s19993_s1 + $0x98] sm:$0xff]  ;;  %v930_v4 = vcombine.low %v115_v59, %v116_v60  ;;  %v117_v10 = vld [vmem:[#allocation2 + $0x28] sm:$0x3] }
  0x33   :  { %9430 = vmatpush1.msk.msra.mxu1 %vm380_vm0, %v9400_v2  ;;  %582 = vmatprep.mubr.f32.mxu1 %v20002_v8  ;;  %v143_v2 = vld [vmem:[%s19993_s1 + $0x90] sm:$0xff]  ;;  %v119_v13 = vld [vmem:[#allocation2 + $0x2c] sm:$0x3]  ;;  %v120_v14 = vld [vmem:[#allocation2 + $0x2e] sm:$0x3] }
  0x34   :  { %752 = vmatprep.subr.mxu1 %v9393_v3  ;;  %9424 = vmatmul.mubr.msk.f32.gmra.mxu0 %vm365_vm2, %v11823_v54  ;;  %v929_v3 = vcombine.low %v113_v50, %v114_v51 }
  0x35   :  { %753 = vmatpush1.msra.mxu1 %v9392_v6  ;;  %701 = vmatprep.mubr.f32.mxu0 %v20002_v8  ;;  %v11967_v6 = vcombine.low %v903_v49, %v910_v55 }
  0x36   :  { %9414 = vmatmul.mubr.msk.f32.gmra.mxu1 %vm365_vm2, %v11751_v15  ;;  %754 = vmatprep.subr.mxu1 %v9385_v7  ;;  %v920_v7 = vrot.slane %v912_v56, %v11690_v32 }
  0x37   :  { %588 = vmatprep.mubr.f32.mxu1 %v20002_v8  ;;  %755 = vmatpush1.msra.mxu1 %v9384_v9  ;;  %v927_v9 = vrot.slane %v913_v57, %v11690_v32 }
  0x38   :  { %9425 = vmatmul.mubr.msk.f32.gmra.mxu0 %vm365_vm2, %v11720_v5  ;;  %756 = vmatprep.subr.mxu1 %v9377_v11  ;;  %v118_v11 = vld [vmem:[#allocation2 + $0x2a] sm:$0x3] }
  0x39   :  { %707 = vmatprep.mubr.f32.mxu0 %v20002_v8  ;;  %757 = vmatpush1.msra.mxu1 %v9376_v12  ;;  %v145_v12 = vld [vmem:[%s19993_s1 + $0xa0] sm:$0xff] }
  0x3a   :  { %9415 = vmatmul.mubr.msk.f32.gmra.mxu1 %vm365_vm2, %v11823_v54  ;;  %9447 = vmatprep.subr.msk.mxu1 %vm380_vm0, %v152_v17 }
  0x3b   :  { %594 = vmatprep.mubr.f32.mxu1 %v20002_v8  ;;  %1049 = vmatpush1.msra.mxu0 %v125_v23 }
  0x3c   :  { %9426 = vmatmul.mubr.msk.f32.gmra.mxu0 %vm365_vm2, %v11761_v19  ;;  %9456 = vmatprep.subr.msk.mxu0 %vm380_vm0, %v154_v27 }
  0x3d   :  { %713 = vmatprep.mubr.f32.mxu0 %v20002_v8 }
  0x3e   :  { %9416 = vmatmul.mubr.msk.f32.gmra.mxu1 %vm365_vm2, %v11720_v5 }
  0x3f   :  { %600 = vmatprep.mubr.f32.mxu1 %v20002_v8 }
  0x40   :  { %9427 = vmatmul.mubr.msk.f32.gmra.mxu0 %vm365_vm2, %v11826_v58 }
  0x41   :  { %719 = vmatprep.mubr.f32.mxu0 %v20002_v8 }
  0x42   :  { %9417 = vmatmul.mubr.msk.f32.gmra.mxu1 %vm365_vm2, %v11761_v19 }
  0x43   :  { %606 = vmatprep.mubr.f32.mxu1 %v20002_v8 }
  0x44   :  { %9428 = vmatmul.mubr.msk.f32.gmra.mxu0 %vm365_vm2, %v11837_v63 }
  0x45   :  { %1082 = vmatprep.mubr.f32.mxu0 %v20002_v8 }
  0x46   :  { %9418 = vmatmul.mubr.msk.f32.gmra.mxu1 %vm365_vm2, %v11826_v58 }
  0x47   :  { %612 = vmatprep.mubr.f32.mxu1 %v20002_v8 }
  0x48   :  { %9440 = vmatmul.mubr.msk.f32.vlgmr.msra.gmra.mxu0 %vm365_vm2, %v11931_v41 }
  0x49   :  { %1088 = vmatprep.mubr.f32.mxu0 %v20002_v8  ;;  %9457 = vmatpush1.msk.msra.mxu0 %vm380_vm0, %v153_v52 }
  0x4a   :  { %9419 = vmatmul.mubr.msk.f32.gmra.mxu1 %vm365_vm2, %v11837_v63  ;;  %1258 = vmatprep.subr.mxu0 %v146_v61 }
  0x4b   :  { %790 = vmatprep.mubr.f32.mxu1 %v20002_v8 }
  0x4c   :  { %9441 = vmatmul.mubr.msk.f32.gmra.mxu0 %vm365_vm2, %v11945_v53 }
  0x4d   :  { %1094 = vmatprep.mubr.f32.mxu0 %v20002_v8 }
  0x4e   :  { %9431 = vmatmul.mubr.msk.f32.vlgmr.msra.gmra.mxu1 %vm365_vm2, %v11708_v62 }
  0x4f   :  { %14 = vsyncpa [#allocation5], 0  ;;  %9448 = vmatpush1.msk.msra.mxu1 %vm380_vm0, %v151_v0  ;;  %796 = vmatprep.mubr.f32.mxu1 %v20002_v8  ;;  %v937_v16 = vrot.slane %v929_v3, %v11690_v32  ;;  %v944_v17 = vrot.slane %v930_v4, %v11690_v32  ;;  %v136_v18 = vld [vmem:[%s19993_s1 + $0x58] sm:$0xff]  ;;  %v135_v62 = vld [vmem:[%s19993_s1 + $0x50] sm:$0xff]  ;;  %v946_v20 = vcombine.low %v117_v10, %v118_v11  ;;  %vm11530_vm3 = vmmov 0   ;;  %s11531_s22 = smov [#allocation4]  }
  0x50   :  { %1151 = vmatprep.subr.mxu1 %v144_v1  ;;  %1259 = vmatpush1.msra.mxu0 %v145_v12  ;;  %v11989_v21 = vcombine.low %v920_v7, %v927_v9  ;;  %v947_v23 = vcombine.low %v119_v13, %v120_v14  ;;  %v121_v24 = vld [vmem:[#allocation2 + $0x30] sm:$0x3]  ;;  %v122_v25 = vld [vmem:[#allocation2 + $0x32] sm:$0x3]  ;;  %v138_v26 = vld [vmem:[%s19993_s1 + $0x68] sm:$0xff]  ;;  %s9362_s23 = sshll.u32 %s11531_s22, 4  ;;  %s9363_s23 = int_to_ptr.vmem [resolvable:$true] %s9362_s23 }
  0x51   :  { %9442 = vmatmul.mubr.msk.f32.gmra.mxu0 %vm365_vm2, %v11967_v6  ;;  %1152 = vmatpush1.msra.mxu1 %v143_v2  ;;  %v123_v27 = vld [vmem:[#allocation2 + $0x34] sm:$0x3]  ;;  %v124_v28 = vld [vmem:[#allocation2 + $0x36] sm:$0x3]  ;;  %v128_v29 = vld [vmem:[%s19993_s1 + $0x18] sm:$0xff]  ;;  %v12001_v30 = vcombine.low %v937_v16, %v944_v17  ;;  %v954_v31 = vrot.slane %v946_v20, %v11690_v32  ;;  %v963_v34 = vcombine.low %v121_v24, %v122_v25  ;;  %p11511_p1 = scmp.lt.s32.totalorder %s9363_s23, %s9363_s23 }
  0x52   :  { %9432 = vmatmul.mubr.msk.f32.gmra.mxu1 %vm365_vm2, %v11751_v15  ;;  %1100 = vmatprep.mubr.f32.mxu0 %v20002_v8  ;;  %v127_v15 = vld [vmem:[%s19993_s1 + $0x10] sm:$0xff]  ;;  %v961_v33 = vrot.slane %v947_v23, %v11690_v32  ;;  %v964_v35 = vcombine.low %v123_v27, %v124_v28  ;;  %v137_v36 = vld [vmem:[%s19993_s1 + $0x60] sm:$0xff]  ;;  %v156_v37 = vld [vmem:[%s19993_s1 + $0xf8] sm:$0xf] }
  0x53   :  { %802 = vmatprep.mubr.f32.mxu1 %v20002_v8  ;;  %1153 = vmatprep.subr.mxu1 %v136_v18  ;;  %v130_v38 = vld [vmem:[%s19993_s1 + $0x28] sm:$0xff]  ;;  %v129_v39 = vld [vmem:[%s19993_s1 + $0x20] sm:$0xff]  ;;  %v971_v40 = vrot.slane %v963_v34, %v11690_v32  ;;  %v148_v45 = vld [vmem:[%s19993_s1 + $0xb8] sm:$0xff] }
  0x54   :  { %1154 = vmatpush1.msra.mxu1 %v135_v62  ;;  %1260 = vmatprep.subr.mxu0 %v138_v26  ;;  %v978_v42 = vrot.slane %v964_v35, %v11690_v32  ;;  %v9499_v43 = vld [vmem:[%s19993_s1 + $0x2c8] sm:$0xf]  ;;  %v147_v46 = vld [vmem:[%s19993_s1 + $0xb0] sm:$0xff]  ;;  %v140_v47 = vld [vmem:[%s19993_s1 + $0x78] sm:$0xff] }
  0x55   :  { %9443 = vmatmul.mubr.msk.f32.gmra.mxu0 %vm365_vm2, %v11989_v21  ;;  %1155 = vmatprep.subr.mxu1 %v128_v29  ;;  %v139_v48 = vld [vmem:[%s19993_s1 + $0x70] sm:$0xff]  ;;  %v9483_v49 = vld [vmem:[%s19993_s1 + $0x248] sm:$0xff]  ;;  %v132_v50 = vld [vmem:[%s19993_s1 + $0x38] sm:$0xff] }
  0x56   :  { %9433 = vmatmul.mubr.msk.f32.gmra.mxu1 %vm365_vm2, %v11823_v54  ;;  %1106 = vmatprep.mubr.f32.mxu0 %v20002_v8  ;;  %v12029_v54 = vcombine.low %v954_v31, %v961_v33  ;;  %v12043_v44 = vcombine.low %v971_v40, %v978_v42  ;;  %v131_v51 = vld [vmem:[%s19993_s1 + $0x30] sm:$0xff]  ;;  %v9482_v52 = vld [vmem:[%s19993_s1 + $0x240] sm:$0xff]  ;;  %v9475_v55 = vld [vmem:[%s19993_s1 + $0x208] sm:$0xff] }
  0x57   :  { %808 = vmatprep.mubr.f32.mxu1 %v20002_v8  ;;  %1156 = vmatpush1.msra.mxu1 %v127_v15  ;;  %v1447_v56 = vld [vmem:[#allocation2 + $0x4] sm:$0x3]  ;;  %v9501_v57 = vld [vmem:[%s19993_s1 + $0x2d8] sm:$0xf]  ;;  %v1448_v59 = vld [vmem:[#allocation2 + $0x6] sm:$0x3] }
  0x58   :  { %1261 = vmatpush1.msra.mxu0 %v137_v36  ;;  %9465 = vmatprep.subr.msk.mxu1 %vm380_vm0, %v156_v37  ;;  %v1449_v60 = vld [vmem:[#allocation2 + $0x8] sm:$0x3]  ;;  %v1450_v61 = vld [vmem:[#allocation2 + $0xa] sm:$0x3]  ;;  %v9474_v0 = vld [vmem:[%s19993_s1 + $0x200] sm:$0xff]  ;;  %v1536_v1 = vcombine.low %v1447_v56, %v1448_v59 }
  0x59   :  { %9444 = vmatmul.mubr.msk.f32.gmra.mxu0 %vm365_vm2, %v12001_v30  ;;  %1262 = vmatprep.subr.mxu0 %v130_v38  ;;  %v1537_v2 = vcombine.low %v1449_v60, %v1450_v61  ;;  %v1451_v3 = vld [vmem:[#allocation2 + $0xc] sm:$0x3]  ;;  %v9503_v4 = vld [vmem:[%s19993_s1 + $0x2e8] sm:$0xf]  ;;  %v1452_v7 = vld [vmem:[#allocation2 + $0xe] sm:$0x3] }
  0x5a   :  { %9434 = vmatmul.mubr.msk.f32.gmra.mxu1 %vm365_vm2, %v11720_v5  ;;  %1112 = vmatprep.mubr.f32.mxu0 %v20002_v8  ;;  %v9498_v5 = vld [vmem:[%s19993_s1 + $0x2c0] sm:$0xf]  ;;  %v1453_v9 = vld [vmem:[#allocation2 + $0x10] sm:$0x3]  ;;  %v1454_v10 = vld [vmem:[#allocation2 + $0x12] sm:$0x3]  ;;  %v1544_v11 = vrot.slane %v1536_v1, %v11690_v32  ;;  %v1553_v13 = vcombine.low %v1451_v3, %v1452_v7 }
  0x5b   :  { %814 = vmatprep.mubr.f32.mxu1 %v20002_v8  ;;  %1263 = vmatpush1.msra.mxu0 %v129_v39  ;;  %v1551_v12 = vrot.slane %v1537_v2, %v11690_v32  ;;  %v1554_v14 = vcombine.low %v1453_v9, %v1454_v10  ;;  %v1455_v16 = vld [vmem:[#allocation2 + $0x14] sm:$0x3]  ;;  %v1456_v17 = vld [vmem:[#allocation2 + $0x16] sm:$0x3]  ;;  %v1457_v18 = vld [vmem:[#allocation2 + $0x18] sm:$0x3] }
  0x5c   :  { %9506 = vmatprep.subr.msk.mxu0 %vm380_vm0, %v9499_v43  ;;  %v1458_v62 = vld [vmem:[#allocation2 + $0x1a] sm:$0x3]  ;;  %v1570_v20 = vcombine.low %v1455_v16, %v1456_v17  ;;  %v1561_v24 = vrot.slane %v1553_v13, %v11690_v32  ;;  %v1459_v27 = vld [vmem:[#allocation2 + $0x1c] sm:$0x3]  ;;  %v1460_v28 = vld [vmem:[#allocation2 + $0x1e] sm:$0x3] }
  0x5d   :  { %9445 = vmatmul.mubr.msk.f32.gmra.mxu0 %vm365_vm2, %v12029_v54  ;;  %v12147_v23 = vcombine.low %v1544_v11, %v1551_v12  ;;  %v1568_v25 = vrot.slane %v1554_v14, %v11690_v32  ;;  %v1571_v26 = vcombine.low %v1457_v18, %v1458_v62  ;;  %v1461_v29 = vld [vmem:[#allocation2 + $0x20] sm:$0x3]  ;;  %v1462_v31 = vld [vmem:[#allocation2 + $0x22] sm:$0x3]  ;;  %v1463_v33 = vld [vmem:[#allocation2 + $0x24] sm:$0x3]  ;;  %v1587_v38 = vcombine.low %v1459_v27, %v1460_v28 }
  0x5e   :  { %9435 = vmatmul.mubr.msk.f32.gmra.mxu1 %vm365_vm2, %v11761_v19  ;;  %1118 = vmatprep.mubr.f32.mxu0 %v20002_v8  ;;  %v9491_v19 = vld [vmem:[%s19993_s1 + $0x288] sm:$0xff]  ;;  %v1578_v15 = vrot.slane %v1570_v20, %v11690_v32  ;;  %v1464_v34 = vld [vmem:[#allocation2 + $0x26] sm:$0x3]  ;;  %v9502_v35 = vld [vmem:[%s19993_s1 + $0x2e0] sm:$0xf]  ;;  %v1588_v39 = vcombine.low %v1461_v29, %v1462_v31 }
  0x5f   :  { %820 = vmatprep.mubr.f32.mxu1 %v20002_v8  ;;  %v12161_v36 = vcombine.low %v1561_v24, %v1568_v25  ;;  %v1585_v37 = vrot.slane %v1571_v26, %v11690_v32  ;;  %v1465_v40 = vld [vmem:[#allocation2 + $0x28] sm:$0x3]  ;;  %v1466_v42 = vld [vmem:[#allocation2 + $0x2a] sm:$0x3]  ;;  %v9484_v59 = vld [vmem:[%s19993_s1 + $0x250] sm:$0xff] }
  0x60   :  { %v9495_v43 = vld [vmem:[%s19993_s1 + $0x2a8] sm:$0xff]  ;;  %v1471_v1 = vld [vmem:[#allocation2 + $0x34] sm:$0x3]  ;;  %v1472_v2 = vld [vmem:[#allocation2 + $0x36] sm:$0x3] }
  0x61   :  { %9446 = vmatmul.mubr.msk.f32.gmra.mxu0 %vm365_vm2, %v12043_v44  ;;  %v9487_v3 = vld [vmem:[%s19993_s1 + $0x268] sm:$0xff]  ;;  %v1474_v7 = vld [vmem:[#allocation2 + $0x3a] sm:$0x3]  ;;  %v1638_v13 = vcombine.low %v1471_v1, %v1472_v2  ;;  %v9486_v16 = vld [vmem:[%s19993_s1 + $0x260] sm:$0xff] }
  0x62   :  { %9436 = vmatmul.mubr.msk.f32.gmra.mxu1 %vm365_vm2, %v11826_v58  ;;  %1296 = vmatprep.mubr.f32.mxu0 %v20002_v8  ;;  %v155_v58 = vld [vmem:[%s19993_s1 + $0xf0] sm:$0xf]  ;;  %v9477_v9 = vld [vmem:[%s19993_s1 + $0x218] sm:$0xff]  ;;  %v9479_v18 = vld [vmem:[%s19993_s1 + $0x228] sm:$0xff] }
  0x63   :  { %826 = vmatprep.mubr.f32.mxu1 %v20002_v8  ;;  %v9505_v17 = vld [vmem:[%s19993_s1 + $0x2f8] sm:$0xf]  ;;  %v9478_v62 = vld [vmem:[%s19993_s1 + $0x220] sm:$0xff]  ;;  %v1646_v20 = vrot.slane %v1638_v13, %v11690_v32  ;;  %v9488_v26 = vld [vmem:[%s19993_s1 + $0x270] sm:$0xff] }
  0x64   :  { %v9481_v27 = vld [vmem:[%s19993_s1 + $0x238] sm:$0xff]  ;;  %v9480_v28 = vld [vmem:[%s19993_s1 + $0x230] sm:$0xff]  ;;  %v9919_v29 = vld [vmem:[%s19995_s3 + $0x1bc8] sm:$0xff] }
  0x65   :  { %9458 = vmatmul.mubr.msk.f32.vlgmr.msra.gmra.mxu0 %vm365_vm2, %v11931_v41  ;;  %v9662_v31 = vld [vmem:[%s19995_s3 + $0x13c0] sm:$0xff] }
  0x66   :  { %9437 = vmatmul.mubr.msk.f32.gmra.mxu1 %vm365_vm2, %v11837_v63  ;;  %1302 = vmatprep.mubr.f32.mxu0 %v20002_v8  ;;  %v9490_v63 = vld [vmem:[%s19993_s1 + $0x280] sm:$0xff] }
  0x67   :  { %1189 = vmatprep.mubr.f32.mxu1 %v20002_v8  ;;  %9507 = vmatpush1.msk.msra.mxu0 %vm380_vm0, %v9498_v5  ;;  %v9500_v5 = vld [vmem:[%s19993_s1 + $0x2d0] sm:$0xf]  ;;  %v9614_v1 = vld [vmem:[%s19995_s3 + $0x1240] sm:$0xff] }
  0x68   :  { %1719 = vmatprep.subr.mxu0 %v9491_v19  ;;  %v9493_v19 = vld [vmem:[%s19993_s1 + $0x298] sm:$0xff]  ;;  %v9870_v2 = vld [vmem:[%s19995_s3 + $0x1a40] sm:$0xff] }
  0x69   :  { %9459 = vmatmul.mubr.msk.f32.gmra.mxu0 %vm365_vm2, %v11945_v53  ;;  %v9862_v13 = vld [vmem:[%s19995_s3 + $0x1a00] sm:$0xff] }
  0x6a   :  { %9449 = vmatmul.mubr.msk.f32.vlgmr.msra.gmra.mxu1 %vm365_vm2, %v11931_v41  ;;  %1308 = vmatprep.mubr.f32.mxu0 %v20002_v8 }
  0x6b   :  { %9466 = vmatpush1.msk.msra.mxu1 %vm380_vm0, %v155_v58  ;;  %1195 = vmatprep.mubr.f32.mxu1 %v20002_v8  ;;  %v1604_v58 = vcombine.low %v1463_v33, %v1464_v34  ;;  %v9655_v34 = vld [vmem:[%s19995_s3 + $0x1388] sm:$0xff] }
  0x6c   :  { %1365 = vmatprep.subr.mxu1 %v148_v45  ;;  %1720 = vmatpush1.msra.mxu0 %v9490_v63  ;;  %v1605_v45 = vcombine.low %v1465_v40, %v1466_v42  ;;  %v12180_v63 = vcombine.low %v1578_v15, %v1585_v37  ;;  %v9918_v15 = vld [vmem:[%s19995_s3 + $0x1bc0] sm:$0xff]  ;;  %v9647_v40 = vld [vmem:[%s19995_s3 + $0x1348] sm:$0xff] }
  0x6d   :  { %9460 = vmatmul.mubr.msk.f32.gmra.mxu0 %vm365_vm2, %v11967_v6  ;;  %1366 = vmatpush1.msra.mxu1 %v147_v46  ;;  %v1595_v46 = vrot.slane %v1587_v38, %v11690_v32  ;;  %v1612_v56 = vrot.slane %v1604_v58, %v11690_v32  ;;  %v9654_v37 = vld [vmem:[%s19995_s3 + $0x1380] sm:$0xff]  ;;  %v9903_v42 = vld [vmem:[%s19995_s3 + $0x1b48] sm:$0xff] }
  0x6e   :  { %9450 = vmatmul.mubr.msk.f32.gmra.mxu1 %vm365_vm2, %v11945_v53  ;;  %1314 = vmatprep.mubr.f32.mxu0 %v20002_v8  ;;  %v9910_v38 = vld [vmem:[%s19995_s3 + $0x1b80] sm:$0xff]  ;;  %v9639_v58 = vld [vmem:[%s19995_s3 + $0x1308] sm:$0xff] }
  0x6f   :  { %1201 = vmatprep.mubr.f32.mxu1 %v20002_v8  ;;  %1367 = vmatprep.subr.mxu1 %v140_v47  ;;  %v1602_v47 = vrot.slane %v1588_v39, %v11690_v32 }
  0x70   :  { %1368 = vmatpush1.msra.mxu1 %v139_v48  ;;  %1721 = vmatprep.subr.mxu0 %v9483_v49  ;;  %v1467_v48 = vld [vmem:[#allocation2 + $0x2c] sm:$0x3]  ;;  %v1468_v49 = vld [vmem:[#allocation2 + $0x2e] sm:$0x3] }
  0x71   :  { %9461 = vmatmul.mubr.msk.f32.gmra.mxu0 %vm365_vm2, %v11989_v21  ;;  %1369 = vmatprep.subr.mxu1 %v132_v50  ;;  %v9494_v50 = vld [vmem:[%s19993_s1 + $0x2a0] sm:$0xff]  ;;  %v1621_v60 = vcombine.low %v1467_v48, %v1468_v49  ;;  %v12205_v61 = vcombine.low %v1595_v46, %v1602_v47  ;;  %v9631_v49 = vld [vmem:[%s19995_s3 + $0x12c8] sm:$0xff] }
  0x72   :  { %9451 = vmatmul.mubr.msk.f32.gmra.mxu1 %vm365_vm2, %v11967_v6  ;;  %1320 = vmatprep.mubr.f32.mxu0 %v20002_v8  ;;  %v9638_v46 = vld [vmem:[%s19995_s3 + $0x1300] sm:$0xff] }
  0x73   :  { %1207 = vmatprep.mubr.f32.mxu1 %v20002_v8  ;;  %1370 = vmatpush1.msra.mxu1 %v131_v51  ;;  %v9492_v51 = vld [vmem:[%s19993_s1 + $0x290] sm:$0xff]  ;;  %v1629_v11 = vrot.slane %v1621_v60, %v11690_v32  ;;  %v9894_v47 = vld [vmem:[%s19995_s3 + $0x1b00] sm:$0xff] }
  0x74   :  { %1722 = vmatpush1.msra.mxu0 %v9482_v52  ;;  %9515 = vmatprep.subr.msk.mxu1 %vm380_vm0, %v9501_v57  ;;  %v1469_v52 = vld [vmem:[#allocation2 + $0x30] sm:$0x3]  ;;  %v1619_v57 = vrot.slane %v1605_v45, %v11690_v32  ;;  %v9895_v45 = vld [vmem:[%s19995_s3 + $0x1b08] sm:$0xff]  ;;  %v9878_v60 = vld [vmem:[%s19995_s3 + $0x1a80] sm:$0xff] }
  0x75   :  { %9462 = vmatmul.mubr.msk.f32.gmra.mxu0 %vm365_vm2, %v12001_v30  ;;  %1723 = vmatprep.subr.mxu0 %v9475_v55  ;;  %v1470_v55 = vld [vmem:[#allocation2 + $0x32] sm:$0x3] }
  0x76   :  { %9452 = vmatmul.mubr.msk.f32.gmra.mxu1 %vm365_vm2, %v11989_v21  ;;  %1326 = vmatprep.mubr.f32.mxu0 %v20002_v8  ;;  %v12217_v10 = vcombine.low %v1612_v56, %v1619_v57  ;;  %v9879_v56 = vld [vmem:[%s19995_s3 + $0x1a88] sm:$0xff] }
  0x77   :  { %1213 = vmatprep.mubr.f32.mxu1 %v20002_v8  ;;  %1724 = vmatpush1.msra.mxu0 %v9474_v0  ;;  %v1622_v0 = vcombine.low %v1469_v52, %v1470_v55  ;;  %v9886_v52 = vld [vmem:[%s19995_s3 + $0x1ac0] sm:$0xff]  ;;  %v9623_v55 = vld [vmem:[%s19995_s3 + $0x1288] sm:$0xff] }
  0x78   :  { %9524 = vmatprep.subr.msk.mxu0 %vm380_vm0, %v9503_v4  ;;  %v1473_v4 = vld [vmem:[#allocation2 + $0x38] sm:$0x3] }
  0x79   :  { %9463 = vmatmul.mubr.msk.f32.gmra.mxu0 %vm365_vm2, %v12029_v54  ;;  %v1636_v12 = vrot.slane %v1622_v0, %v11690_v32  ;;  %v1639_v14 = vcombine.low %v1473_v4, %v1474_v7  ;;  %v9871_v0 = vld [vmem:[%s19995_s3 + $0x1a48] sm:$0xff] }
  0x7a   :  { %9453 = vmatmul.mubr.msk.f32.gmra.mxu1 %vm365_vm2, %v12001_v30  ;;  %1332 = vmatprep.mubr.f32.mxu0 %v20002_v8  ;;  %v9607_v4 = vld [vmem:[%s19995_s3 + $0x1208] sm:$0xff] }
  0x7b   :  { %1219 = vmatprep.mubr.f32.mxu1 %v20002_v8  ;;  %v1653_v24 = vrot.slane %v1639_v14, %v11690_v32  ;;  %v9863_v7 = vld [vmem:[%s19995_s3 + $0x1a08] sm:$0xff] }
  0x7d   :  { %9464 = vmatmul.mubr.msk.f32.gmra.mxu0 %vm365_vm2, %v12043_v44  ;;  %v12255_v25 = vcombine.low %v1646_v20, %v1653_v24  ;;  %v9591_v24 = vld [vmem:[%s19995_s3 + $0x1188] sm:$0xff] }
  0x7e   :  { %9454 = vmatmul.mubr.msk.f32.gmra.mxu1 %vm365_vm2, %v12029_v54  ;;  %1757 = vmatprep.mubr.f32.mxu0 %v20002_v8 }
  0x7f   :  { %1225 = vmatprep.mubr.f32.mxu1 %v20002_v8 }
  0x81   :  { %9508 = vmatmul.mubr.msk.f32.vlgmr.msra.gmra.mxu0 %vm365_vm2, %v12147_v23 }
  0x82   :  { %9455 = vmatmul.mubr.msk.f32.gmra.mxu1 %vm365_vm2, %v12043_v44  ;;  %1763 = vmatprep.mubr.f32.mxu0 %v20002_v8 }
  0x83   :  { %1403 = vmatprep.mubr.f32.mxu1 %v20002_v8  ;;  %9525 = vmatpush1.msk.msra.mxu0 %vm380_vm0, %v9502_v35  ;;  %v9911_v35 = vld [vmem:[%s19995_s3 + $0x1b88] sm:$0xff] }
  0x84   :  { %1933 = vmatprep.subr.mxu0 %v9495_v43 }
  0x85   :  { %9509 = vmatmul.mubr.msk.f32.gmra.mxu0 %vm365_vm2, %v12161_v36 }
  0x86   :  { %9467 = vmatmul.mubr.msk.f32.vlgmr.msra.gmra.mxu1 %vm365_vm2, %v11931_v41  ;;  %1769 = vmatprep.mubr.f32.mxu0 %v20002_v8  ;;  %v9485_v41 = vld [vmem:[%s19993_s1 + $0x258] sm:$0xff] }
  0x87   :  { %9516 = vmatpush1.msk.msra.mxu1 %vm380_vm0, %v9500_v5  ;;  %1409 = vmatprep.mubr.f32.mxu1 %v20002_v8  ;;  %v9646_v5 = vld [vmem:[%s19995_s3 + $0x1340] sm:$0xff] }
  0x88   :  { %1826 = vmatprep.subr.mxu1 %v9493_v19  ;;  %1934 = vmatpush1.msra.mxu0 %v9494_v50  ;;  %v9902_v19 = vld [vmem:[%s19995_s3 + $0x1b40] sm:$0xff]  ;;  %v9887_v50 = vld [vmem:[%s19995_s3 + $0x1ac8] sm:$0xff] }
  0x89   :  { %9510 = vmatmul.mubr.msk.f32.gmra.mxu0 %vm365_vm2, %v12180_v63  ;;  %1827 = vmatpush1.msra.mxu1 %v9492_v51  ;;  %v9630_v51 = vld [vmem:[%s19995_s3 + $0x12c0] sm:$0xff] }
  0x8a   :  { %9468 = vmatmul.mubr.msk.f32.gmra.mxu1 %vm365_vm2, %v11945_v53  ;;  %1775 = vmatprep.mubr.f32.mxu0 %v20002_v8  ;;  %v9476_v53 = vld [vmem:[%s19993_s1 + $0x210] sm:$0xff] }
  0x8b   :  { %1415 = vmatprep.mubr.f32.mxu1 %v20002_v8  ;;  %1828 = vmatprep.subr.mxu1 %v9485_v41 }
  0x8c   :  { %1829 = vmatpush1.msra.mxu1 %v9484_v59  ;;  %1935 = vmatprep.subr.mxu0 %v9487_v3  ;;  %v9622_v59 = vld [vmem:[%s19995_s3 + $0x1280] sm:$0xff] }
  0x8d   :  { %9511 = vmatmul.mubr.msk.f32.gmra.mxu0 %vm365_vm2, %v12205_v61  ;;  %1830 = vmatprep.subr.mxu1 %v9477_v9 }
  0x8e   :  { %9469 = vmatmul.mubr.msk.f32.gmra.mxu1 %vm365_vm2, %v11967_v6  ;;  %1781 = vmatprep.mubr.f32.mxu0 %v20002_v8  ;;  %v12245_v6 = vcombine.low %v1629_v11, %v1636_v12  ;;  %v9606_v12 = vld [vmem:[%s19995_s3 + $0x1200] sm:$0xff] }
  0x8f   :  { %1421 = vmatprep.mubr.f32.mxu1 %v20002_v8  ;;  %1831 = vmatpush1.msra.mxu1 %v9476_v53 }
  0x90   :  { %1936 = vmatpush1.msra.mxu0 %v9486_v16  ;;  %9533 = vmatprep.subr.msk.mxu1 %vm380_vm0, %v9505_v17  ;;  %v9599_v16 = vld [vmem:[%s19995_s3 + $0x11c8] sm:$0xff] }
  0x91   :  { %9512 = vmatmul.mubr.msk.f32.gmra.mxu0 %vm365_vm2, %v12217_v10  ;;  %1937 = vmatprep.subr.mxu0 %v9479_v18  ;;  %v9855_v17 = vld [vmem:[%s19995_s3 + $0x19c8] sm:$0xff] }
  0x92   :  { %9470 = vmatmul.mubr.msk.f32.gmra.mxu1 %vm365_vm2, %v11989_v21  ;;  %1787 = vmatprep.mubr.f32.mxu0 %v20002_v8  ;;  %v9504_v21 = vld [vmem:[%s19993_s1 + $0x2f0] sm:$0xf] }
  0x93   :  { %1427 = vmatprep.mubr.f32.mxu1 %v20002_v8  ;;  %1938 = vmatpush1.msra.mxu0 %v9478_v62  ;;  %v9598_v62 = vld [vmem:[%s19995_s3 + $0x11c0] sm:$0xff] }
  0x95   :  { %9513 = vmatmul.mubr.msk.f32.gmra.mxu0 %vm365_vm2, %v12245_v6 }
  0x96   :  { %9471 = vmatmul.mubr.msk.f32.gmra.mxu1 %vm365_vm2, %v12001_v30  ;;  %1793 = vmatprep.mubr.f32.mxu0 %v20002_v8  ;;  %v9497_v30 = vld [vmem:[%s19993_s1 + $0x2b8] sm:$0xff] }
  0x97   :  { %1433 = vmatprep.mubr.f32.mxu1 %v20002_v8 }
  0x99   :  { %9514 = vmatmul.mubr.msk.f32.gmra.mxu0 %vm365_vm2, %v12255_v25 }
  0x9a   :  { %9472 = vmatmul.mubr.msk.f32.gmra.mxu1 %vm365_vm2, %v12029_v54  ;;  %1971 = vmatprep.mubr.f32.mxu0 %v20002_v8  ;;  %v9496_v54 = vld [vmem:[%s19993_s1 + $0x2b0] sm:$0xff] }
  0x9b   :  { %1439 = vmatprep.mubr.f32.mxu1 %v20002_v8 }
  0x9d   :  { %9526 = vmatmul.mubr.msk.f32.vlgmr.msra.gmra.mxu0 %vm365_vm2, %v12147_v23 }
  0x9e   :  { %9473 = vmatmul.mubr.msk.f32.gmra.mxu1 %vm365_vm2, %v12043_v44  ;;  %1977 = vmatprep.mubr.f32.mxu0 %v20002_v8  ;;  %v9489_v44 = vld [vmem:[%s19993_s1 + $0x278] sm:$0xff] }
  0x9f   :  { %1864 = vmatprep.mubr.f32.mxu1 %v20002_v8 }
  0xa1   :  { %9527 = vmatmul.mubr.msk.f32.gmra.mxu0 %vm365_vm2, %v12161_v36 }
  0xa2   :  { %9517 = vmatmul.mubr.msk.f32.vlgmr.msra.gmra.mxu1 %vm365_vm2, %v12147_v23  ;;  %1983 = vmatprep.mubr.f32.mxu0 %v20002_v8 }
  0xa3   :  { %9534 = vmatpush1.msk.msra.mxu1 %vm380_vm0, %v9504_v21  ;;  %1870 = vmatprep.mubr.f32.mxu1 %v20002_v8 }
  0xa4   :  { %2040 = vmatprep.subr.mxu1 %v9497_v30 }
  0xa5   :  { %9528 = vmatmul.mubr.msk.f32.gmra.mxu0 %vm365_vm2, %v12180_v63  ;;  %2041 = vmatpush1.msra.mxu1 %v9496_v54 }
  0xa6   :  { %9518 = vmatmul.mubr.msk.f32.gmra.mxu1 %vm365_vm2, %v12161_v36  ;;  %1989 = vmatprep.mubr.f32.mxu0 %v20002_v8 }
  0xa7   :  { %1876 = vmatprep.mubr.f32.mxu1 %v20002_v8  ;;  %2042 = vmatprep.subr.mxu1 %v9489_v44 }
  0xa8   :  { %2043 = vmatpush1.msra.mxu1 %v9488_v26  ;;  %v9590_v26 = vld [vmem:[%s19995_s3 + $0x1180] sm:$0xff] }
  0xa9   :  { %9529 = vmatmul.mubr.msk.f32.gmra.mxu0 %vm365_vm2, %v12205_v61  ;;  %2044 = vmatprep.subr.mxu1 %v9481_v27  ;;  %v9846_v27 = vld [vmem:[%s19995_s3 + $0x1980] sm:$0xff] }
  0xaa   :  { %9519 = vmatmul.mubr.msk.f32.gmra.mxu1 %vm365_vm2, %v12180_v63  ;;  %1995 = vmatprep.mubr.f32.mxu0 %v20002_v8 }
  0xab   :  { %1882 = vmatprep.mubr.f32.mxu1 %v20002_v8  ;;  %2045 = vmatpush1.msra.mxu1 %v9480_v28 }
  0xac   :  { %4302 = vmatprep.subr.mxu1 %v9919_v29  ;;  %v9839_v29 = vld [vmem:[%s19995_s3 + $0x1948] sm:$0xff] }
  0xad   :  { %9530 = vmatmul.mubr.msk.f32.gmra.mxu0 %vm365_vm2, %v12217_v10 }
  0xae   :  { %9520 = vmatmul.mubr.msk.f32.gmra.mxu1 %vm365_vm2, %v12205_v61  ;;  %2001 = vmatprep.mubr.f32.mxu0 %v20002_v8 }
  0xaf   :  { %1888 = vmatprep.mubr.f32.mxu1 %v20002_v8 }
  0xb1   :  { %9531 = vmatmul.mubr.msk.f32.gmra.mxu0 %vm365_vm2, %v12245_v6 }
  0xb2   :  { %9521 = vmatmul.mubr.msk.f32.gmra.mxu1 %vm365_vm2, %v12217_v10  ;;  %2007 = vmatprep.mubr.f32.mxu0 %v20002_v8 }
  0xb3   :  { %1894 = vmatprep.mubr.f32.mxu1 %v20002_v8 }
  0xb5   :  { %9532 = vmatmul.mubr.msk.f32.gmra.mxu0 %vm365_vm2, %v12255_v25 }
  0xb6   :  { %9522 = vmatmul.mubr.msk.f32.gmra.mxu1 %vm365_vm2, %v12245_v6 }
  0xb7   :  { %1900 = vmatprep.mubr.f32.mxu1 %v20002_v8 }
  0xba   :  { %9523 = vmatmul.mubr.msk.f32.gmra.mxu1 %vm365_vm2, %v12255_v25 }
  0xbb   :  { %2078 = vmatprep.mubr.f32.mxu1 %v20002_v8 }
  0xbe   :  { %9535 = vmatmul.mubr.msk.f32.vlgmr.msra.gmra.mxu1 %vm365_vm2, %v12147_v23  ;;  %v9663_v23 = vld [vmem:[%s19995_s3 + $0x13c8] sm:$0xff] }
  0xbf   :  { %2084 = vmatprep.mubr.f32.mxu1 %v20002_v8  ;;  %4213 = vmatprep.subr.mxu0 %v9663_v23  ;;  %v9583_v23 = vld [vmem:[%s19995_s3 + $0x1148] sm:$0xff] }
  0xc0   :  { %4214 = vmatpush1.msra.mxu0 %v9662_v31  ;;  %4303 = vmatpush1.msra.mxu1 %v9918_v15  ;;  %v9582_v15 = vld [vmem:[%s19995_s3 + $0x1140] sm:$0xff] }
  0xc1   :  { %4215 = vmatprep.subr.mxu0 %v9655_v34  ;;  %4304 = vmatprep.subr.mxu1 %v9911_v35  ;;  %v9838_v34 = vld [vmem:[%s19995_s3 + $0x1940] sm:$0xff] }
  0xc2   :  { %9536 = vmatmul.mubr.msk.f32.gmra.mxu1 %vm365_vm2, %v12161_v36  ;;  %4216 = vmatpush1.msra.mxu0 %v9654_v37  ;;  %v9575_v37 = vld [vmem:[%s19995_s3 + $0x1108] sm:$0xff] }
  0xc3   :  { %2090 = vmatprep.mubr.f32.mxu1 %v20002_v8  ;;  %4305 = vmatpush1.msra.mxu1 %v9910_v38  ;;  %v9831_v38 = vld [vmem:[%s19995_s3 + $0x1908] sm:$0xff] }
  0xc4   :  { %4217 = vmatprep.subr.mxu0 %v9647_v40  ;;  %4306 = vmatprep.subr.mxu1 %v9903_v42 }
  0xc5   :  { %4218 = vmatpush1.msra.mxu0 %v9646_v5  ;;  %4307 = vmatpush1.msra.mxu1 %v9902_v19 }
  0xc6   :  { %9537 = vmatmul.mubr.msk.f32.gmra.mxu1 %vm365_vm2, %v12180_v63  ;;  %4219 = vmatprep.subr.mxu0 %v9639_v58  ;;  %v9574_v58 = vld [vmem:[%s19995_s3 + $0x1100] sm:$0xff] }
  0xc7   :  { %2096 = vmatprep.mubr.f32.mxu1 %v20002_v8  ;;  %4308 = vmatprep.subr.mxu1 %v9895_v45  ;;  %v9830_v45 = vld [vmem:[%s19995_s3 + $0x1900] sm:$0xff] }
  0xc8   :  { %4220 = vmatpush1.msra.mxu0 %v9638_v46  ;;  %4309 = vmatpush1.msra.mxu1 %v9894_v47  ;;  %v9567_v47 = vld [vmem:[%s19995_s3 + $0x10c8] sm:$0xff] }
  0xc9   :  { %4221 = vmatprep.subr.mxu0 %v9631_v49  ;;  %4310 = vmatprep.subr.mxu1 %v9887_v50  ;;  %v9823_v49 = vld [vmem:[%s19995_s3 + $0x18c8] sm:$0xff] }
  0xca   :  { %9538 = vmatmul.mubr.msk.f32.gmra.mxu1 %vm365_vm2, %v12205_v61  ;;  %4222 = vmatpush1.msra.mxu0 %v9630_v51  ;;  %v9615_v61 = vld [vmem:[%s19995_s3 + $0x1248] sm:$0xff]  ;;  %v9566_v51 = vld [vmem:[%s19995_s3 + $0x10c0] sm:$0xff] }
  0xcb   :  { %2102 = vmatprep.mubr.f32.mxu1 %v20002_v8  ;;  %4311 = vmatpush1.msra.mxu1 %v9886_v52  ;;  %v9822_v52 = vld [vmem:[%s19995_s3 + $0x18c0] sm:$0xff] }
  0xcc   :  { %4223 = vmatprep.subr.mxu0 %v9623_v55  ;;  %4312 = vmatprep.subr.mxu1 %v9879_v56  ;;  %v9559_v56 = vld [vmem:[%s19995_s3 + $0x1088] sm:$0xff] }
  0xcd   :  { %4224 = vmatpush1.msra.mxu0 %v9622_v59  ;;  %4313 = vmatpush1.msra.mxu1 %v9878_v60  ;;  %v9815_v59 = vld [vmem:[%s19995_s3 + $0x1888] sm:$0xff] }
  0xce   :  { %9539 = vmatmul.mubr.msk.f32.gmra.mxu1 %vm365_vm2, %v12217_v10  ;;  %4225 = vmatprep.subr.mxu0 %v9615_v61 }
  0xcf   :  { %2108 = vmatprep.mubr.f32.mxu1 %v20002_v8  ;;  %4314 = vmatprep.subr.mxu1 %v9871_v0  ;;  %v9558_v0 = vld [vmem:[%s19995_s3 + $0x1080] sm:$0xff] }
  0xd0   :  { %4226 = vmatpush1.msra.mxu0 %v9614_v1  ;;  %4315 = vmatpush1.msra.mxu1 %v9870_v2  ;;  %v9814_v1 = vld [vmem:[%s19995_s3 + $0x1880] sm:$0xff] }
  0xd1   :  { %4227 = vmatprep.subr.mxu0 %v9607_v4  ;;  %4316 = vmatprep.subr.mxu1 %v9863_v7  ;;  %v9551_v4 = vld [vmem:[%s19995_s3 + $0x1048] sm:$0xff] }
  0xd2   :  { %9540 = vmatmul.mubr.msk.f32.gmra.mxu1 %vm365_vm2, %v12245_v6  ;;  %4228 = vmatpush1.msra.mxu0 %v9606_v12  ;;  %v9854_v6 = vld [vmem:[%s19995_s3 + $0x19c0] sm:$0xff]  ;;  %v9807_v7 = vld [vmem:[%s19995_s3 + $0x1848] sm:$0xff] }
  0xd3   :  { %2114 = vmatprep.mubr.f32.mxu1 %v20002_v8  ;;  %4317 = vmatpush1.msra.mxu1 %v9862_v13 }
  0xd4   :  { %4229 = vmatprep.subr.mxu0 %v9599_v16  ;;  %4318 = vmatprep.subr.mxu1 %v9855_v17  ;;  %v9550_v16 = vld [vmem:[%s19995_s3 + $0x1040] sm:$0xff] }
  0xd5   :  { %4230 = vmatpush1.msra.mxu0 %v9598_v62  ;;  %4319 = vmatpush1.msra.mxu1 %v9854_v6  ;;  %v9806_v17 = vld [vmem:[%s19995_s3 + $0x1840] sm:$0xff]  ;;  %v9543_v6 = vld [vmem:[%s19995_s3 + $0x1008] sm:$0xff] }
  0xd6   :  { %9541 = vmatmul.mubr.msk.f32.gmra.mxu1 %vm365_vm2, %v12255_v25  ;;  %v9847_v25 = vld [vmem:[%s19995_s3 + $0x1988] sm:$0xff]  ;;  %4231 = vmatprep.subr.mxu0 %v9591_v24 }
  0xd7   :  { %4320 = vmatprep.subr.mxu1 %v9847_v25  ;;  %4232 = vmatpush1.msra.mxu0 %v9590_v26  ;;  %v9799_v24 = vld [vmem:[%s19995_s3 + $0x1808] sm:$0xff]  ;;  %v9542_v26 = vld [vmem:[%s19995_s3 + $0x1000] sm:$0xff] }
  0xd8   :  { %v12365_v33 = vpop.f32.mrf.mxu0  ;;  %4321 = vmatpush1.msra.mxu1 %v9846_v27  ;;  %4233 = vmatprep.subr.mxu0 %v9583_v23  ;;  %v9798_v27 = vld [vmem:[%s19995_s3 + $0x1800] sm:$0xff] }
  0xd9   :  { %4322 = vmatprep.subr.mxu1 %v9839_v29  ;;  %4234 = vmatpush1.msra.mxu0 %v9582_v15  ;;  %v9791_v29 = vld [vmem:[%s19995_s3 + $0x17c8] sm:$0xff] }
  0xda   :  { %v12373_v36 = vpop.f32.mrf.mxu1  ;;  %v12381_v39 = vpop.f32.mrf.mxu0  ;;  %4323 = vmatpush1.msra.mxu1 %v9838_v34  ;;  %4235 = vmatprep.subr.mxu0 %v9575_v37  ;;  %v10047_v15 = vld [vmem:[%s19995_s3 + $0x1fc8] sm:$0xff]  ;;  %v9790_v37 = vld [vmem:[%s19995_s3 + $0x17c0] sm:$0xff] }
  0xdb   :  { %4324 = vmatprep.subr.mxu1 %v9831_v38  ;;  %4236 = vmatpush1.msra.mxu0 %v9574_v58  ;;  %v10046_v38 = vld [vmem:[%s19995_s3 + $0x1fc0] sm:$0xff] }
  0xdc   :  { %v12389_v43 = vpop.f32.mrf.mxu1  ;;  %4325 = vmatpush1.msra.mxu1 %v9830_v45  ;;  %4237 = vmatprep.subr.mxu0 %v9567_v47  ;;  %v9783_v45 = vld [vmem:[%s19995_s3 + $0x1788] sm:$0xff] }
  0xdd   :  { %v12403_v63 = vpop.f32.mrf.mxu0  ;;  %4326 = vmatprep.subr.mxu1 %v9823_v49  ;;  %4238 = vmatpush1.msra.mxu0 %v9566_v51  ;;  %v10039_v47 = vld [vmem:[%s19995_s3 + $0x1f88] sm:$0xff] }
  0xde   :  { %v12411_v48 = vpop.f32.mrf.mxu1  ;;  %4327 = vmatpush1.msra.mxu1 %v9822_v52  ;;  %4239 = vmatprep.subr.mxu0 %v9559_v56 }
  0xdf   :  { %v12431_v57 = vpop.f32.mrf.mxu0  ;;  %4328 = vmatprep.subr.mxu1 %v9815_v59  ;;  %4240 = vmatpush1.msra.mxu0 %v9558_v0  ;;  %v9782_v59 = vld [vmem:[%s19995_s3 + $0x1780] sm:$0xff] }
  0xe0   :  { %v12433_v41 = vpop.f32.mrf.mxu1  ;;  %4329 = vmatpush1.msra.mxu1 %v9814_v1  ;;  %4241 = vmatprep.subr.mxu0 %v9551_v4  ;;  %v10038_v0 = vld [vmem:[%s19995_s3 + $0x1f80] sm:$0xff]  ;;  %v9775_v4 = vld [vmem:[%s19995_s3 + $0x1748] sm:$0xff] }
  0xe1   :  { %4330 = vmatprep.subr.mxu1 %v9807_v7  ;;  %4242 = vmatpush1.msra.mxu0 %v9550_v16  ;;  %v9774_v16 = vld [vmem:[%s19995_s3 + $0x1740] sm:$0xff] }
  0xe2   :  { %4331 = vmatpush1.msra.mxu1 %v9806_v17  ;;  %4243 = vmatprep.subr.mxu0 %v9543_v6  ;;  %v10030_v17 = vld [vmem:[%s19995_s3 + $0x1f40] sm:$0xff] }
  0xe3   :  { %4332 = vmatprep.subr.mxu1 %v9799_v24  ;;  %4244 = vmatpush1.msra.mxu0 %v9542_v26  ;;  %v9767_v26 = vld [vmem:[%s19995_s3 + $0x1708] sm:$0xff] }
  0xe4   :  { %4333 = vmatpush1.msra.mxu1 %v9798_v27  ;;  %4245 = vmatprep.subr.mxu0 %v9791_v29  ;;  %v10023_v27 = vld [vmem:[%s19995_s3 + $0x1f08] sm:$0xff] }
  0xe5   :  { %4334 = vmatprep.subr.mxu1 %v10047_v15  ;;  %4246 = vmatpush2.msra.mxu0 %v9790_v37  ;;  %v9766_v15 = vld [vmem:[%s19995_s3 + $0x1700] sm:$0xff] }
  0xe6   :  { %4335 = vmatpush2.msra.mxu1 %v10046_v38  ;;  %4247 = vmatprep.subr.mxu0 %v9783_v45  ;;  %v9759_v38 = vld [vmem:[%s19995_s3 + $0x16c8] sm:$0xff] }
  0xe7   :  { %4336 = vmatprep.subr.mxu1 %v10039_v47  ;;  %4248 = vmatpush2.msra.mxu0 %v9782_v59  ;;  %v10015_v45 = vld [vmem:[%s19995_s3 + $0x1ec8] sm:$0xff]  ;;  %v10014_v59 = vld [vmem:[%s19995_s3 + $0x1ec0] sm:$0xff] }
  0xe8   :  { %v12453_v3 = vpop.f32.mrf.mxu0  ;;  %4337 = vmatpush2.msra.mxu1 %v10038_v0  ;;  %4249 = vmatprep.subr.mxu0 %v9775_v4 }
  0xe9   :  { %v12461_v9 = vpop.f32.mrf.mxu1  ;;  %4250 = vmatpush2.msra.mxu0 %v9774_v16 }
  0xea   :  { %v12463_v10 = vpop.f32.mrf.mxu0  ;;  %4251 = vmatprep.subr.mxu0 %v9767_v26 }
  0xeb   :  { %v12465_v11 = vpop.f32.mrf.mxu1  ;;  %4252 = vmatpush2.msra.mxu0 %v9766_v15  ;;  %v9999_v15 = vld [vmem:[%s19995_s3 + $0x1e48] sm:$0xff] }
  0xec   :  { %v12467_v53 = vpop.f32.mrf.mxu0  ;;  %4253 = vmatprep.subr.mxu0 %v9759_v38  ;;  %v9742_v38 = vld [vmem:[%s19995_s3 + $0x1640] sm:$0xff] }
  0xee   :  { %v12475_v14 = vpop.f32.mrf.mxu1  ;;  %v12483_v18 = vpop.f32.mrf.mxu0 }
  0xf0   :  { %v12491_v20 = vpop.f32.mrf.mxu1  ;;  %v12499_v21 = vpop.f32.mrf.mxu0 }
  0xf2   :  { %v12501_v30 = vpop.f32.mrf.mxu1  ;;  %v12503_v54 = vpop.f32.mrf.mxu0 }
  0xf4   :  { %v12505_v44 = vpop.f32.mrf.mxu1  ;;  %v12513_v28 = vpop.f32.mrf.mxu0 }
  0xf6   :  { %v12521_v31 = vpop.f32.mrf.mxu1  ;;  %v12529_v35 = vpop.f32.mrf.mxu0 }
  0xf8   :  { %v12537_v40 = vpop.f32.mrf.mxu1  ;;  %v12539_v42 = vpop.f32.mrf.mxu0 }
  0xfa   :  { %v12541_v5 = vpop.f32.mrf.mxu1  ;;  %v12543_v19 = vpop.f32.mrf.mxu0 }
  0xfc   :  { %v12551_v46 = vpop.f32.mrf.mxu1  ;;  %v12559_v50 = vpop.f32.mrf.mxu0 }
  0xfe   :  { %v12567_v55 = vpop.f32.mrf.mxu1  ;;  %v12575_v60 = vpop.f32.mrf.mxu0 }
 0x100   :  { %v12577_v61 = vpop.f32.mrf.mxu1  ;;  %v12585_v2 = vpop.f32.mrf.mxu0 }
 0x102   :  { %v12593_v12 = vpop.f32.mrf.mxu1  ;;  %v12595_v13 = vpop.f32.mrf.mxu0 }
 0x103   :  { %20018 = vst [vmem:[#allocation9_spill] sm:$0xff] %v12595_v13 }
 0x104   :  { %v12603_v62 = vpop.f32.mrf.mxu1  ;;  %v12611_v25 = vpop.f32.mrf.mxu0 }
 0x106   :  { %v12619_v23 = vpop.f32.mrf.mxu1  ;;  %v12627_v34 = vpop.f32.mrf.mxu0 }
 0x107   :  { %20019 = vst [vmem:[#allocation10_spill] sm:$0xff] %v12627_v34 }
 0x108   :  { %v12635_v58 = vpop.f32.mrf.mxu1  ;;  %v1084_v49 = vpop.f32.mrf.mxu0 }
 0x109   :  { %20020 = vst [vmem:[#allocation11_spill] sm:$0xff] %v12635_v58  ;;  %v12646_v52 = vadd.f32 %v1084_v49, %v12365_v33  ;;  %v10031_v33 = vld [vmem:[%s19995_s3 + $0x1f48] sm:$0xff]  ;;  %v9758_v49 = vld [vmem:[%s19995_s3 + $0x16c0] sm:$0xff] }
 0x10a   :  { %v12643_v51 = vpop.f32.mrf.mxu1  ;;  %v12648_v56 = vpop.f32.mrf.mxu0  ;;  %4338 = vmatprep.subr.mxu1 %v10031_v33  ;;  %4254 = vmatpush2.msra.mxu0 %v9758_v49  ;;  %v9751_v33 = vld [vmem:[%s19995_s3 + $0x1688] sm:$0xff] }
 0x10b   :  { %4339 = vmatpush2.msra.mxu1 %v10030_v17  ;;  %4255 = vmatprep.subr.mxu0 %v9751_v33  ;;  %v9750_v17 = vld [vmem:[%s19995_s3 + $0x1680] sm:$0xff]  ;;  %v9991_v33 = vld [vmem:[%s19995_s3 + $0x1e08] sm:$0xff] }
 0x10c   :  { %v12656_v1 = vpop.f32.mrf.mxu1  ;;  %v1090_v7 = vpop.f32.mrf.mxu0  ;;  %4340 = vmatprep.subr.mxu1 %v10023_v27  ;;  %4256 = vmatpush2.msra.mxu0 %v9750_v17  ;;  %v9743_v27 = vld [vmem:[%s19995_s3 + $0x1648] sm:$0xff]  ;;  %v9734_v17 = vld [vmem:[%s19995_s3 + $0x1600] sm:$0xff] }
 0x10d   :  { %20021 = vst [vmem:[#allocation12_spill] sm:$0xff] %v12656_v1  ;;  %v12673_v24 = vadd.f32 %v1090_v7, %v12403_v63  ;;  %v10022_v63 = vld [vmem:[%s19995_s3 + $0x1f00] sm:$0xff]  ;;  %v10007_v7 = vld [vmem:[%s19995_s3 + $0x1e88] sm:$0xff]  ;;  %4257 = vmatprep.subr.mxu0 %v9743_v27 }
 0x10e   :  { %v12670_v6 = vpop.f32.mrf.mxu1  ;;  %v12681_v29 = vpop.f32.mrf.mxu0  ;;  %4341 = vmatpush2.msra.mxu1 %v10022_v63  ;;  %4258 = vmatpush2.msra.mxu0 %v9742_v38  ;;  %v9727_v27 = vld [vmem:[%s19995_s3 + $0x15c8] sm:$0xff]  ;;  %v9726_v38 = vld [vmem:[%s19995_s3 + $0x15c0] sm:$0xff] }
 0x10f   :  { %20022 = vst [vmem:[#allocation13_spill] sm:$0xff] %v12670_v6  ;;  %4342 = vmatprep.subr.mxu1 %v10015_v45  ;;  %v9998_v45 = vld [vmem:[%s19995_s3 + $0x1e40] sm:$0xff] }
 0x110   :  { %v12689_v37 = vpop.f32.mrf.mxu1  ;;  %4343 = vmatpush2.msra.mxu1 %v10014_v59  ;;  %v9735_v59 = vld [vmem:[%s19995_s3 + $0x1608] sm:$0xff] }
 0x111   :  { %20023 = vst [vmem:[#allocation14_spill] sm:$0xff] %v12689_v37  ;;  %v1096_v47 = vpop.f32.mrf.mxu0  ;;  %4344 = vmatprep.subr.mxu1 %v10007_v7  ;;  %4259 = vmatprep.subr.mxu0 %v9735_v59 }
 0x112   :  { %v12703_v0 = vpop.f32.mrf.mxu1  ;;  %v12706_v4 = vadd.f32 %v1096_v47, %v12453_v3  ;;  %v10006_v3 = vld [vmem:[%s19995_s3 + $0x1e80] sm:$0xff]  ;;  %4260 = vmatpush2.msra.mxu0 %v9734_v17  ;;  %v9719_v17 = vld [vmem:[%s19995_s3 + $0x1588] sm:$0xff] }
 0x113   :  { %20024 = vst [vmem:[#allocation15_spill] sm:$0xff] %v12703_v0  ;;  %v12714_v16 = vpop.f32.mrf.mxu0  ;;  %4345 = vmatpush2.msra.mxu1 %v10006_v3  ;;  %4261 = vmatprep.subr.mxu0 %v9727_v27 }
 0x114   :  { %v12722_v26 = vpop.f32.mrf.mxu1  ;;  %4346 = vmatprep.subr.mxu1 %v9999_v15  ;;  %v9983_v15 = vld [vmem:[%s19995_s3 + $0x1dc8] sm:$0xff]  ;;  %4262 = vmatpush2.msra.mxu0 %v9726_v38 }
 0x115   :  { %20025 = vst [vmem:[#allocation16_spill] sm:$0xff] %v12722_v26  ;;  %v1102_v63 = vpop.f32.mrf.mxu0  ;;  %4347 = vmatpush2.msra.mxu1 %v9998_v45  ;;  %v9982_v45 = vld [vmem:[%s19995_s3 + $0x1dc0] sm:$0xff]  ;;  %4263 = vmatprep.subr.mxu0 %v9719_v17  ;;  %v9967_v17 = vld [vmem:[%s19995_s3 + $0x1d48] sm:$0xff] }
 0x116   :  { %v12736_v47 = vpop.f32.mrf.mxu1  ;;  %v12739_v49 = vadd.f32 %v1102_v63, %v12373_v36  ;;  %4348 = vmatprep.subr.mxu1 %v9991_v33  ;;  %v9990_v36 = vld [vmem:[%s19995_s3 + $0x1e00] sm:$0xff] }
 0x117   :  { %20026 = vst [vmem:[#allocation17_spill] sm:$0xff] %v12736_v47  ;;  %v12747_v7 = vpop.f32.mrf.mxu0  ;;  %4349 = vmatpush2.msra.mxu1 %v9990_v36  ;;  %v9975_v36 = vld [vmem:[%s19995_s3 + $0x1d88] sm:$0xff] }
 0x118   :  { %20027 = vst [vmem:[#allocation18_spill] sm:$0xff] %v12739_v49  ;;  %v12755_v3 = vpop.f32.mrf.mxu1  ;;  %4350 = vmatprep.subr.mxu1 %v9983_v15  ;;  %v1093_v49 = vadd.f32 %v12681_v29, %v12431_v57  ;;  %v20061_v57 = vsub.s32 6, %v11646_v22  ;;  %v20062_v29 = vsub.s32 7, %v11646_v22 }
 0x119   :  { %20028 = vst [vmem:[#allocation19_spill] sm:$0xff] %v12755_v3  ;;  %v1108_v63 = vpop.f32.mrf.mxu0  ;;  %4351 = vmatpush2.msra.mxu1 %v9982_v45  ;;  %v9711_v45 = vld [vmem:[%s19995_s3 + $0x1548] sm:$0xff] }
 0x11a   :  { %v12769_v59 = vpop.f32.mrf.mxu1  ;;  %v12772_v33 = vadd.f32 %v1108_v63, %v12411_v48  ;;  %4352 = vmatprep.subr.mxu1 %v9975_v36  ;;  %v9718_v48 = vld [vmem:[%s19995_s3 + $0x1580] sm:$0xff] }
 0x11b   :  { %20029 = vst [vmem:[#allocation20_spill] sm:$0xff] %v12769_v59  ;;  %v12780_v27 = vpop.f32.mrf.mxu0  ;;  %v9974_v63 = vld [vmem:[%s19995_s3 + $0x1d80] sm:$0xff]  ;;  %4264 = vmatpush2.msra.mxu0 %v9718_v48  ;;  %v9703_v59 = vld [vmem:[%s19995_s3 + $0x1508] sm:$0xff] }
 0x11c   :  { %20030 = vst [vmem:[#allocation21_spill] sm:$0xff] %v12772_v33  ;;  %v12782_v15 = vpop.f32.mrf.mxu1  ;;  %4353 = vmatpush2.msra.mxu1 %v9974_v63  ;;  %4265 = vmatprep.subr.mxu0 %v9711_v45  ;;  %v9710_v48 = vld [vmem:[%s19995_s3 + $0x1540] sm:$0xff] }
 0x11d   :  { %20031 = vst [vmem:[#allocation22_spill] sm:$0xff] %v12782_v15  ;;  %v1114_v38 = vpop.f32.mrf.mxu0  ;;  %4354 = vmatprep.subr.mxu1 %v9967_v17  ;;  %v9966_v63 = vld [vmem:[%s19995_s3 + $0x1d40] sm:$0xff]  ;;  %4266 = vmatpush2.msra.mxu0 %v9710_v48 }
 0x11e   :  { %v12796_v36 = vpop.f32.mrf.mxu1  ;;  %v12799_v8 = vadd.f32 %v1114_v38, %v12461_v9  ;;  %4355 = vmatpush2.msra.mxu1 %v9966_v63  ;;  %v9959_v9 = vld [vmem:[%s19995_s3 + $0x1d08] sm:$0xff]  ;;  %4267 = vmatprep.subr.mxu0 %v9703_v59  ;;  %v9702_v45 = vld [vmem:[%s19995_s3 + $0x1500] sm:$0xff] }
 0x11f   :  { %20032 = vst [vmem:[#allocation23_spill] sm:$0xff] %v12796_v36  ;;  %v12807_v15 = vpop.f32.mrf.mxu0  ;;  %4356 = vmatprep.subr.mxu1 %v9959_v9  ;;  %v9958_v17 = vld [vmem:[%s19995_s3 + $0x1d00] sm:$0xff]  ;;  %4268 = vmatpush2.msra.mxu0 %v9702_v45  ;;  %v9695_v63 = vld [vmem:[%s19995_s3 + $0x14c8] sm:$0xff] }
 0x120   :  { %20033 = vst [vmem:[#allocation24_spill] sm:$0xff] %v12799_v8  ;;  %v12815_v38 = vpop.f32.mrf.mxu1  ;;  %4357 = vmatpush2.msra.mxu1 %v9958_v17  ;;  %v9951_v59 = vld [vmem:[%s19995_s3 + $0x1cc8] sm:$0xff]  ;;  %4269 = vmatprep.subr.mxu0 %v9695_v63  ;;  %v9694_v45 = vld [vmem:[%s19995_s3 + $0x14c0] sm:$0xff] }
 0x121   :  { %20034 = vst [vmem:[#allocation25_spill] sm:$0xff] %v12815_v38  ;;  %v1120_v48 = vpop.f32.mrf.mxu0  ;;  %4358 = vmatprep.subr.mxu1 %v9951_v59  ;;  %v9950_v17 = vld [vmem:[%s19995_s3 + $0x1cc0] sm:$0xff]  ;;  %4270 = vmatpush2.msra.mxu0 %v9694_v45 }
 0x122   :  { %v12829_v9 = vpop.f32.mrf.mxu1  ;;  %v12832_v38 = vadd.f32 %v1120_v48, %v12475_v14  ;;  %4359 = vmatpush2.msra.mxu1 %v9950_v17  ;;  %v9943_v14 = vld [vmem:[%s19995_s3 + $0x1c88] sm:$0xff]  ;;  %v9686_v63 = vld [vmem:[%s19995_s3 + $0x1480] sm:$0xff] }
 0x123   :  { %20035 = vst [vmem:[#allocation26_spill] sm:$0xff] %v12829_v9  ;;  %v12840_v3 = vpop.f32.mrf.mxu0  ;;  %v9687_v9 = vld [vmem:[%s19995_s3 + $0x1488] sm:$0xff]  ;;  %4360 = vmatprep.subr.mxu1 %v9943_v14  ;;  %v9942_v59 = vld [vmem:[%s19995_s3 + $0x1c80] sm:$0xff] }
 0x124   :  { %20036 = vst [vmem:[#allocation27_spill] sm:$0xff] %v12832_v38  ;;  %v12848_v48 = vpop.f32.mrf.mxu1  ;;  %4271 = vmatprep.subr.mxu0 %v9687_v9  ;;  %4361 = vmatpush2.msra.mxu1 %v9942_v59  ;;  %v9679_v17 = vld [vmem:[%s19995_s3 + $0x1448] sm:$0xff] }
 0x125   :  { %20037 = vst [vmem:[#allocation28_spill] sm:$0xff] %v12848_v48  ;;  %v12856_v45 = vpop.f32.mrf.mxu0  ;;  %4272 = vmatpush2.msra.mxu0 %v9686_v63  ;;  %v9935_v9 = vld [vmem:[%s19995_s3 + $0x1c48] sm:$0xff]  ;;  %v9678_v48 = vld [vmem:[%s19995_s3 + $0x1440] sm:$0xff] }
 0x126   :  { %v12864_v14 = vpop.f32.mrf.mxu1  ;;  %4273 = vmatprep.subr.mxu0 %v9679_v17  ;;  %4362 = vmatprep.subr.mxu1 %v9935_v9  ;;  %v9934_v63 = vld [vmem:[%s19995_s3 + $0x1c40] sm:$0xff]  ;;  %v9671_v38 = vld [vmem:[%s19995_s3 + $0x1408] sm:$0xff] }
 0x127   :  { %20038 = vst [vmem:[#allocation29_spill] sm:$0xff] %v12864_v14  ;;  %v12872_v59 = vpop.f32.mrf.mxu0  ;;  %4274 = vmatpush2.msra.mxu0 %v9678_v48  ;;  %4363 = vmatpush2.msra.mxu1 %v9934_v63  ;;  %v9927_v17 = vld [vmem:[%s19995_s3 + $0x1c08] sm:$0xff]  ;;  %v9670_v14 = vld [vmem:[%s19995_s3 + $0x1400] sm:$0xff] }
 0x128   :  { %v12880_v9 = vpop.f32.mrf.mxu1  ;;  %4275 = vmatprep.subr.mxu0 %v9671_v38  ;;  %4364 = vmatprep.subr.mxu1 %v9927_v17  ;;  %v9926_v48 = vld [vmem:[%s19995_s3 + $0x1c00] sm:$0xff] }
 0x129   :  { %20039 = vst [vmem:[#allocation30_spill] sm:$0xff] %v12880_v9  ;;  %v12888_v63 = vpop.f32.mrf.mxu0  ;;  %4276 = vmatpush2.msra.mxu0 %v9670_v14  ;;  %4365 = vmatpush2.msra.mxu1 %v9926_v48 }
 0x12a   :  { %v1191_v47 = vpop.f32.mrf.mxu1 }
 0x12b   :  { %v12891_v36 = vadd.f32 %v1191_v47, %v12501_v30  ;;  %v12893_v26 = vpop.f32.mrf.mxu0 }
 0x12c   :  { %v12895_v38 = vpop.f32.mrf.mxu1 }
 0x12d   :  { %20040 = vst [vmem:[#allocation31_spill] sm:$0xff] %v12891_v36  ;;  %v12897_v17 = vpop.f32.mrf.mxu0 }
 0x12e   :  { %v1197_v9 = vpop.f32.mrf.mxu1 }
 0x12f   :  { %v12900_v8 = vadd.f32 %v1197_v9, %v12521_v31  ;;  %v12902_v0 = vpop.f32.mrf.mxu0 }
 0x130   :  { %v12904_v32 = vpop.f32.mrf.mxu1 }
 0x131   :  { %20041 = vst [vmem:[#allocation32_spill] sm:$0xff] %v12900_v8  ;;  %v12906_v14 = vpop.f32.mrf.mxu0 }
 0x132   :  { %v1203_v48 = vpop.f32.mrf.mxu1 }
 0x133   :  { %v12909_v30 = vadd.f32 %v1203_v48, %v12541_v5  ;;  %v12911_v47 = vpop.f32.mrf.mxu0  ;;  %v9665_v5 = vld [vmem:[%s19995_s3 + $0x13d8] sm:$0xff] }
 0x134   :  { %v12913_v36 = vpop.f32.mrf.mxu1  ;;  %v9921_v48 = vld [vmem:[%s19995_s3 + $0x1bd8] sm:$0xff]  ;;  %4391 = vmatprep.subr.mxu0 %v9665_v5 }
 0x135   :  { %20042 = vst [vmem:[#allocation33_spill] sm:$0xff] %v12909_v30  ;;  %v1322_v37 = vpop.f32.mrf.mxu0  ;;  %4480 = vmatprep.subr.mxu1 %v9921_v48 }
 0x136   :  { %v1209_v33 = vpop.f32.mrf.mxu1  ;;  %v12916_v6 = vadd.f32 %v1322_v37, %v12559_v50 }
 0x137   :  { %v12919_v31 = vadd.f32 %v1209_v33, %v12567_v55  ;;  %v12921_v9 = vpop.f32.mrf.mxu0 }
 0x138   :  { %20043 = vst [vmem:[#allocation34_spill] sm:$0xff] %v12916_v6  ;;  %v12923_v8 = vpop.f32.mrf.mxu1 }
 0x139   :  { %20044 = vst [vmem:[#allocation35_spill] sm:$0xff] %v12919_v31  ;;  %v12931_v30 = vpop.f32.mrf.mxu0 }
 0x13a   :  { %v1215_v50 = vpop.f32.mrf.mxu1 }
 0x13b   :  { %v12934_v55 = vadd.f32 %v1215_v50, %v12593_v12  ;;  %v12936_v37 = vpop.f32.mrf.mxu0  ;;  %v20055_v12 = vsub.s32 4, %v11646_v22 }
 0x13c   :  { %20046 = vst [vmem:[#allocation37_spill] sm:$0xff] %v12936_v37  ;;  %v12938_v33 = vpop.f32.mrf.mxu1  ;;  %v1087_v37 = vadd.f32 %v12648_v56, %v12381_v39 }
 0x13d   :  { %20045 = vst [vmem:[#allocation36_spill] sm:$0xff] %v12934_v55  ;;  %v1334_v6 = vpop.f32.mrf.mxu0  ;;  %v20058_v55 = vsub.s32 2, %v11646_v22 }
 0x13e   :  { %v1221_v31 = vpop.f32.mrf.mxu1  ;;  %v12941_v1 = vadd.f32 %v1334_v6, %v12611_v25 }
 0x13f   :  { %v12944_v58 = vadd.f32 %v1221_v31, %v12619_v23  ;;  %v12946_v34 = vpop.f32.mrf.mxu0  ;;  %v2177_v23 = vld [vmem:[%s19994_s2] sm:$0xff] }
 0x140   :  { %20047 = vst [vmem:[#allocation38_spill] sm:$0xff] %v12941_v1  ;;  %20049 = vst [vmem:[#allocation40_spill] sm:$0xff] %v12946_v34  ;;  %v12948_v5 = vpop.f32.mrf.mxu1  ;;  %v12989_v34 = vrot.slane %v2177_v23, %v20058_v55  ;;  %v1105_v55 = vadd.f32 %v12747_v7, %v12389_v43  ;;  %v13024_v43 = vadd.f32 %v12872_v59, %v12483_v18 }
 0x141   :  { %20048 = vst [vmem:[#allocation39_spill] sm:$0xff] %v12944_v58  ;;  %20050 = vst [vmem:[#allocation41_spill] sm:$0xff] %v12948_v5  ;;  %v1759_v48 = vpop.f32.mrf.mxu0  ;;  %v20054_v58 = vsub.s32 0, %v11646_v22  ;;  %v13042_v18 = vadd.f32 %v12897_v17, %v12513_v28  ;;  %v13059_v28 = vadd.f32 %v12913_v36, %v12551_v46  ;;  %v13076_v59 = vadd.f32 %v12931_v30, %v12585_v2 }
 0x142   :  { %v1227_v50 = vpop.f32.mrf.mxu1  ;;  %v2121_v39 = vadd.f32 %v1759_v48, %v12646_v52  ;;  %20059 = vst [vmem:[#allocation45_spill] sm:$0xff] %v12989_v34  ;;  %v12999_v52 = vrot.slane %v2177_v23, %v20061_v57  ;;  %v13003_v48 = vrot.slane %v2177_v23, %v20062_v29  ;;  %v13016_v57 = vadd.f32 %v12840_v3, %v12491_v20 }
 0x143   :  { %v12956_v25 = vadd.f32 %v1227_v50, %v12643_v51  ;;  %v1761_v6 = vpop.f32.mrf.mxu0  ;;  %v20053_v51 = vsub.s32 1, %v11646_v22  ;;  %v12974_v5 = vrot.slane %v2177_v23, %v20054_v58  ;;  %v1099_v58 = vadd.f32 %v12714_v16, %v12463_v10 }
 0x144   :  { %v12963_v1 = vpop.f32.mrf.mxu1  ;;  %v2122_v56 = vadd.f32 %v1761_v6, %v1087_v37  ;;  %v20057_v6 = vsub.s32 5, %v11646_v22 }
 0x145   :  { %20051 = vst [vmem:[#allocation42_spill] sm:$0xff] %v12956_v25  ;;  %20052 = vst [vmem:[#allocation43_spill] sm:$0xff] %v12963_v1  ;;  %v12970_v50 = vrot.slane %v2177_v23, %v20053_v51  ;;  %v1765_v25 = vpop.f32.mrf.mxu0  ;;  %v12978_v1 = vrot.slane %v2177_v23, %v20055_v12  ;;  %v20060_v12 = vsub.s32 3, %v11646_v22  ;;  %v2219_v20 = vadd.f32 %v12974_v5, %v2121_v39 }
 0x146   :  { %v1405_v31 = vpop.f32.mrf.mxu1  ;;  %v12985_v51 = vrot.slane %v2177_v23, %v20057_v6  ;;  %v1111_v6 = vadd.f32 %v12780_v27, %v12433_v41  ;;  %v2129_v7 = vadd.f32 %v1765_v25, %v12673_v24  ;;  %v13054_v24 = vadd.f32 %v12906_v14, %v12539_v42  ;;  %v20066_v14 = vld [vmem:[#allocation10_spill] sm:$0xff] }
 0x147   :  { %20056 = vst [vmem:[#allocation44_spill] sm:$0xff] %v12978_v1  ;;  %v1767_v37 = vpop.f32.mrf.mxu0  ;;  %v12995_v1 = vrot.slane %v2177_v23, %v20060_v12  ;;  %v2220_v10 = vadd.f32 %v12970_v50, %v2122_v56  ;;  %v13012_v12 = vadd.f32 %v12807_v15, %v12465_v11  ;;  %v13020_v23 = vadd.f32 %v12856_v45, %v12467_v53  ;;  %v20067_v2 = vld [vmem:[#allocation40_spill] sm:$0xff]  ;;  %v20068_v56 = vld [vmem:[#allocation11_spill] sm:$0xff] }
 0x148   :  { %v1407_v13 = vpop.f32.mrf.mxu1  ;;  %v2130_v16 = vadd.f32 %v1767_v37, %v1093_v49  ;;  %v13028_v49 = vadd.f32 %v12888_v63, %v12499_v21  ;;  %v13032_v11 = vadd.f32 %v12893_v26, %v12503_v54  ;;  %v13038_v53 = vadd.f32 %v12895_v38, %v12505_v44  ;;  %v20064_v38 = vld [vmem:[#allocation37_spill] sm:$0xff]  ;;  %v20070_v37 = vld [vmem:[#allocation12_spill] sm:$0xff] }
 0x149   :  { %v1771_v34 = vpop.f32.mrf.mxu0  ;;  %v13046_v21 = vadd.f32 %v12902_v0, %v12529_v35  ;;  %v13050_v26 = vadd.f32 %v12904_v32, %v12537_v40  ;;  %v2276_v44 = vmax.f32 %v2220_v10, 0.0  ;;  %v13063_v35 = vadd.f32 %v12911_v47, %v12543_v19  ;;  %v20072_v10 = vld [vmem:[#allocation13_spill] sm:$0xff] }
 0x14a   :  { %v1411_v41 = vpop.f32.mrf.mxu1  ;;  %v2228_v15 = vadd.f32 %v12970_v50, %v2130_v16  ;;  %v13067_v32 = vadd.f32 %v12921_v9, %v12575_v60  ;;  %v2137_v40 = vadd.f32 %v1771_v34, %v12706_v4  ;;  %v13072_v0 = vadd.f32 %v12923_v8, %v12577_v61  ;;  %v20063_v60 = vld [vmem:[#allocation9_spill] sm:$0xff]  ;;  %v20065_v8 = vld [vmem:[#allocation18_spill] sm:$0xff] }
 0x14b   :  { %v1773_v3 = vpop.f32.mrf.mxu0  ;;  %v2275_v46 = vmax.f32 %v2219_v20, 0.0  ;;  %v2227_v36 = vadd.f32 %v12974_v5, %v2129_v7  ;;  %v13081_v63 = vadd.f32 %v12938_v33, %v12603_v62  ;;  %v13085_v34 = vadd.f32 %v20064_v38, %v20063_v60  ;;  %v20069_v62 = vld [vmem:[#allocation41_spill] sm:$0xff]  ;;  %v20074_v60 = vld [vmem:[#allocation14_spill] sm:$0xff] }
 0x14c   :  { %v1413_v27 = vpop.f32.mrf.mxu1  ;;  %v2138_v54 = vadd.f32 %v1773_v3, %v1099_v58  ;;  %v13091_v30 = vadd.f32 %v20067_v2, %v20066_v14  ;;  %v2284_v9 = vmax.f32 %v2228_v15, 0.0  ;;  %v13095_v33 = vadd.f32 %v20069_v62, %v20068_v56  ;;  %v20071_v58 = vld [vmem:[#allocation43_spill] sm:$0xff] }
 0x14d   :  { %v1777_v45 = vpop.f32.mrf.mxu0  ;;  %v2387_v47 = vcombine.low %v2275_v46, %v2276_v44  ;;  %v13099_v29 = vadd.f32 %v20071_v58, %v20070_v37  ;;  %v13102_v16 = vadd.f32 %v1405_v31, %v20072_v10  ;;  %v2235_v20 = vadd.f32 %v12974_v5, %v2137_v40  ;;  %v20075_v31 = vld [vmem:[#allocation8_spill] sm:$0xff] }
 0x14e   :  { %v1417_v42 = vpop.f32.mrf.mxu1  ;;  %v2236_v4 = vadd.f32 %v12970_v50, %v2138_v54  ;;  %v2145_v61 = vadd.f32 %v1777_v45, %v20065_v8  ;;  %v2388_v3 = vcombine.high %v2275_v46, %v2276_v44  ;;  %v2283_v54 = vmax.f32 %v2227_v36, 0.0  ;;  %v20076_v44 = vld [vmem:[#allocation15_spill] sm:$0xff]  ;;  %v20077_v10 = vld [vmem:[#allocation24_spill] sm:$0xff] }
 0x14f   :  { %v1779_v19 = vpop.f32.mrf.mxu0  ;;  %v13108_v38 = vadd.f32 %v1407_v13, %v20074_v60  ;;  %v13112_v62 = vrot.slane %v2387_v47, %v20075_v31  ;;  %v13115_v46 = vadd.f32 %v1411_v41, %v20076_v44 }
 0x150   :  { %v1419_v17 = vpop.f32.mrf.mxu1  ;;  %v2146_v25 = vadd.f32 %v1779_v19, %v1105_v55  ;;  %v20073_v55 = vld [vmem:[#allocation21_spill] sm:$0xff]  ;;  %v2292_v8 = vmax.f32 %v2236_v4, 0.0  ;;  %v2243_v14 = vadd.f32 %v12974_v5, %v2145_v61  ;;  %v2459_v40 = vcombine.low %v2283_v54, %v2284_v9 }
 0x151   :  { %v1783_v39 = vpop.f32.mrf.mxu0  ;;  %v2460_v37 = vcombine.high %v2283_v54, %v2284_v9  ;;  %v13120_v61 = vrot.slane %v2388_v3, %v20075_v31  ;;  %v20079_v9 = vld [vmem:[#allocation23_spill] sm:$0xff]  ;;  %v20081_v3 = vld [vmem:[#allocation17_spill] sm:$0xff] }
 0x152   :  { %v1423_v7 = vpop.f32.mrf.mxu1  ;;  %v2244_v15 = vadd.f32 %v12970_v50, %v2146_v25  ;;  %v2153_v45 = vadd.f32 %v1783_v39, %v20073_v55  ;;  %v2291_v25 = vmax.f32 %v2235_v20, 0.0  ;;  %v13131_v44 = vrot.slane %v2459_v40, %v20075_v31  ;;  %v20084_v40 = vld [vmem:[#allocation20_spill] sm:$0xff] }
 0x153   :  { %v1785_v19 = vpop.f32.mrf.mxu0 }
 0x154   :  { %v1425_v2 = vpop.f32.mrf.mxu1  ;;  %v2154_v56 = vadd.f32 %v1785_v19, %v1111_v6  ;;  %v2300_v39 = vmax.f32 %v2244_v15, 0.0  ;;  %v20078_v6 = vld [vmem:[#allocation16_spill] sm:$0xff]  ;;  %v2251_v47 = vadd.f32 %v12974_v5, %v2153_v45  ;;  %v2531_v19 = vcombine.low %v2291_v25, %v2292_v8 }
 0x155   :  { %v1789_v36 = vpop.f32.mrf.mxu0  ;;  %v13123_v55 = vadd.f32 %v1413_v27, %v20078_v6  ;;  %v2532_v20 = vcombine.high %v2291_v25, %v2292_v8  ;;  %v2299_v15 = vmax.f32 %v2243_v14, 0.0  ;;  %v20082_v6 = vld [vmem:[#allocation19_spill] sm:$0xff] }
 0x156   :  { %v2252_v58 = vadd.f32 %v12970_v50, %v2154_v56  ;;  %v1429_v13 = vpop.f32.mrf.mxu1  ;;  %v2161_v4 = vadd.f32 %v1789_v36, %v20077_v10  ;;  %v13134_v36 = vadd.f32 %v1417_v42, %v20081_v3  ;;  %v2307_v42 = vmax.f32 %v2251_v47, 0.0  ;;  %v20085_v3 = vld [vmem:[#allocation27_spill] sm:$0xff] }
 0x157   :  { %v13127_v54 = vadd.f32 %v1429_v13, %v20079_v9  ;;  %v1791_v41 = vpop.f32.mrf.mxu0  ;;  %v13138_v13 = vrot.slane %v2460_v37, %v20075_v31  ;;  %v13141_v9 = vadd.f32 %v1419_v17, %v20082_v6  ;;  %v2603_v8 = vcombine.low %v2299_v15, %v2300_v39 }
 0x158   :  { %v1431_v60 = vpop.f32.mrf.mxu1  ;;  %v2162_v56 = vadd.f32 %v1791_v41, %v13012_v12  ;;  %v2308_v27 = vmax.f32 %v2252_v58, 0.0  ;;  %v2259_v10 = vadd.f32 %v12974_v5, %v2161_v4  ;;  %v2604_v25 = vcombine.high %v2299_v15, %v2300_v39 }
 0x159   :  { %20080 = vst [vmem:[#allocation9_spill] sm:$0xff] %v13127_v54  ;;  %v1795_v45 = vpop.f32.mrf.mxu0  ;;  %20083 = vst [vmem:[#allocation37_spill] sm:$0xff] %v13141_v9  ;;  %v13145_v41 = vadd.f32 %v1423_v7, %v20084_v40  ;;  %v13149_v4 = vrot.slane %v2531_v19, %v20075_v31  ;;  %v13152_v37 = vrot.slane %v2532_v20, %v20075_v31 }
 0x15a   :  { %v2260_v14 = vadd.f32 %v12970_v50, %v2162_v56  ;;  %v1435_v12 = vpop.f32.mrf.mxu1  ;;  %v2169_v58 = vadd.f32 %v1795_v45, %v20085_v3  ;;  %v2675_v56 = vcombine.low %v2307_v42, %v2308_v27  ;;  %v2676_v9 = vcombine.high %v2307_v42, %v2308_v27  ;;  %v20086_v45 = vld [vmem:[#allocation22_spill] sm:$0xff]  ;;  %v20088_v27 = vld [vmem:[#allocation29_spill] sm:$0xff] }
 0x15b   :  { %v1797_v22 = vpop.f32.mrf.mxu0  ;;  %v2315_v39 = vmax.f32 %v2259_v10, 0.0  ;;  %v13157_v47 = vrot.slane %v2603_v8, %v20075_v31  ;;  %v13160_v40 = vadd.f32 %v1425_v2, %v20086_v45  ;;  %v13165_v3 = vrot.slane %v2604_v25, %v20075_v31  ;;  %v20090_v42 = vld [vmem:[#allocation25_spill] sm:$0xff]  ;;  %v20092_v45 = vld [vmem:[#allocation44_spill] sm:$0xff]  ;;  %v20093_v25 = vld [vmem:[#allocation26_spill] sm:$0xff] }
 0x15c   :  { %v2316_v17 = vmax.f32 %v2260_v14, 0.0  ;;  %v1437_v6 = vpop.f32.mrf.mxu1  ;;  %v2170_v54 = vadd.f32 %v1797_v22, %v13016_v57  ;;  %v2267_v7 = vadd.f32 %v12974_v5, %v2169_v58  ;;  %v13171_v8 = vadd.f32 %v1431_v60, %v20090_v42  ;;  %v20097_v42 = vld [vmem:[#allocation31_spill] sm:$0xff] }
 0x15d   :  { %v1973_v15 = vpop.f32.mrf.mxu0  ;;  %20087 = vst [vmem:[#allocation18_spill] sm:$0xff] %v13160_v40 }
 0x15e   :  { %v2268_v19 = vadd.f32 %v12970_v50, %v2170_v54  ;;  %v1441_v20 = vpop.f32.mrf.mxu1  ;;  %v2125_v14 = vadd.f32 %v1973_v15, %v13020_v23  ;;  %v2747_v22 = vcombine.low %v2315_v39, %v2316_v17  ;;  %v2748_v57 = vcombine.high %v2315_v39, %v2316_v17  ;;  %20091 = vst [vmem:[#allocation40_spill] sm:$0xff] %v13171_v8 }
 0x15f   :  { %v13168_v10 = vadd.f32 %v1441_v20, %v20088_v27  ;;  %v1975_v5 = vpop.f32.mrf.mxu0  ;;  %v2323_v58 = vmax.f32 %v2267_v7, 0.0  ;;  %v13175_v54 = vrot.slane %v2675_v56, %v20075_v31  ;;  %v13178_v23 = vrot.slane %v2676_v9, %v20075_v31  ;;  %v20095_v20 = vld [vmem:[#allocation28_spill] sm:$0xff] }
 0x160   :  { %v2324_v2 = vmax.f32 %v2268_v19, 0.0  ;;  %v2223_v40 = vadd.f32 %v20092_v45, %v2125_v14  ;;  %v1443_v50 = vpop.f32.mrf.mxu1  ;;  %v13181_v17 = vadd.f32 %v1435_v12, %v20093_v25  ;;  %v2126_v39 = vadd.f32 %v1975_v5, %v13024_v43 }
 0x161   :  { %20089 = vst [vmem:[#allocation10_spill] sm:$0xff] %v13168_v10  ;;  %v1979_v15 = vpop.f32.mrf.mxu0  ;;  %v13185_v60 = vadd.f32 %v1437_v6, %v20095_v20  ;;  %v13189_v56 = vrot.slane %v2747_v22, %v20075_v31  ;;  %v13192_v9 = vrot.slane %v2748_v57, %v20075_v31  ;;  %v20098_v10 = vld [vmem:[#allocation30_spill] sm:$0xff]  ;;  %v20100_v57 = vld [vmem:[#allocation45_spill] sm:$0xff] }
 0x162   :  { %20094 = vst [vmem:[#allocation11_spill] sm:$0xff] %v13181_v17  ;;  %v2819_v7 = vcombine.low %v2323_v58, %v2324_v2  ;;  %v2820_v19 = vcombine.high %v2323_v58, %v2324_v2  ;;  %v1866_v27 = vpop.f32.mrf.mxu1  ;;  %v2133_v14 = vadd.f32 %v1979_v15, %v13028_v49  ;;  %v2224_v12 = vadd.f32 %v12985_v51, %v2126_v39 }
 0x163   :  { %20096 = vst [vmem:[#allocation41_spill] sm:$0xff] %v13185_v60  ;;  %v2123_v25 = vadd.f32 %v1866_v27, %v20097_v42  ;;  %v1981_v43 = vpop.f32.mrf.mxu0  ;;  %v2279_v5 = vmax.f32 %v2223_v40, 0.0  ;;  %v13197_v6 = vadd.f32 %v1443_v50, %v20098_v10 }
 0x164   :  { %v2231_v58 = vadd.f32 %v20092_v45, %v2133_v14  ;;  %v1868_v2 = vpop.f32.mrf.mxu1  ;;  %v2134_v49 = vadd.f32 %v1981_v43, %v13032_v11  ;;  %v13202_v22 = vrot.slane %v2819_v7, %v20075_v31  ;;  %v2280_v15 = vmax.f32 %v2224_v12, 0.0 }
 0x165   :  { %20099 = vst [vmem:[#allocation12_spill] sm:$0xff] %v13197_v6  ;;  %v2221_v20 = vadd.f32 %v20100_v57, %v2123_v25  ;;  %v2124_v39 = vadd.f32 %v1868_v2, %v13038_v53  ;;  %v1985_v60 = vpop.f32.mrf.mxu0  ;;  %v13207_v27 = vrot.slane %v2820_v19, %v20075_v31  ;;  %v20101_v25 = vld [vmem:[#allocation32_spill] sm:$0xff] }
 0x166   :  { %v2287_v40 = vmax.f32 %v2231_v58, 0.0  ;;  %v2232_v10 = vadd.f32 %v12985_v51, %v2134_v49  ;;  %v1872_v50 = vpop.f32.mrf.mxu1  ;;  %v2141_v14 = vadd.f32 %v1985_v60, %v13042_v18  ;;  %v2423_v42 = vcombine.low %v2279_v5, %v2280_v15 }
 0x167   :  { %v2424_v11 = vcombine.high %v2279_v5, %v2280_v15  ;;  %v2277_v43 = vmax.f32 %v2221_v20, 0.0  ;;  %v2222_v7 = vadd.f32 %v12995_v1, %v2124_v39  ;;  %v1987_v12 = vpop.f32.mrf.mxu0  ;;  %v2131_v17 = vadd.f32 %v1872_v50, %v20101_v25 }
 0x168   :  { %v2288_v6 = vmax.f32 %v2232_v10, 0.0  ;;  %v2239_v53 = vadd.f32 %v20092_v45, %v2141_v14  ;;  %v1874_v2 = vpop.f32.mrf.mxu1  ;;  %v2142_v19 = vadd.f32 %v1987_v12, %v13046_v21  ;;  %v13216_v58 = vrot.slane %v2423_v42, %v20075_v31 }
 0x169   :  { %v13219_v49 = vrot.slane %v2424_v11, %v20075_v31  ;;  %v2278_v18 = vmax.f32 %v2222_v7, 0.0  ;;  %v2132_v60 = vadd.f32 %v1874_v2, %v13050_v26  ;;  %v1991_v5 = vpop.f32.mrf.mxu0  ;;  %v2229_v39 = vadd.f32 %v20100_v57, %v2131_v17  ;;  %v20105_v2 = vld [vmem:[#allocation33_spill] sm:$0xff] }
 0x16a   :  { %v2495_v15 = vcombine.low %v2287_v40, %v2288_v6  ;;  %v2496_v20 = vcombine.high %v2287_v40, %v2288_v6  ;;  %v2295_v10 = vmax.f32 %v2239_v53, 0.0  ;;  %v1878_v50 = vpop.f32.mrf.mxu1  ;;  %v2240_v42 = vadd.f32 %v12985_v51, %v2142_v19 }
 0x16b   :  { %20102 = vst [vmem:[#allocation43_spill] sm:$0xff] %v13219_v49  ;;  %v2389_v14 = vcombine.low %v2277_v43, %v2278_v18  ;;  %v2390_v25 = vcombine.high %v2277_v43, %v2278_v18  ;;  %v2230_v21 = vadd.f32 %v12995_v1, %v2132_v60  ;;  %v1993_v12 = vpop.f32.mrf.mxu0  ;;  %v2285_v26 = vmax.f32 %v2229_v39, 0.0 }
 0x16c   :  { %v13226_v11 = vrot.slane %v2495_v15, %v20075_v31  ;;  %v13229_v7 = vrot.slane %v2496_v20, %v20075_v31  ;;  %v2139_v6 = vadd.f32 %v1878_v50, %v20105_v2  ;;  %v1880_v40 = vpop.f32.mrf.mxu1  ;;  %v2296_v18 = vmax.f32 %v2240_v42, 0.0 }
 0x16d   :  { %v2411_v17 = vrot.slane %v2389_v14, %v20075_v31  ;;  %v2418_v53 = vrot.slane %v2390_v25, %v20075_v31  ;;  %v2286_v43 = vmax.f32 %v2230_v21, 0.0  ;;  %v1997_v60 = vpop.f32.mrf.mxu0  ;;  %v2149_v8 = vadd.f32 %v1991_v5, %v13054_v24 }
 0x16e   :  { %20103 = vst [vmem:[#allocation13_spill] sm:$0xff] %v13226_v11  ;;  %20104 = vst [vmem:[#allocation21_spill] sm:$0xff] %v13229_v7  ;;  %v2237_v19 = vadd.f32 %v20100_v57, %v2139_v6  ;;  %v2140_v15 = vadd.f32 %v1880_v40, %v13059_v28  ;;  %v2150_v20 = vadd.f32 %v1993_v12, %v13063_v35  ;;  %v1884_v7 = vpop.f32.mrf.mxu1 }
 0x16f   :  { %v2419_v39 = vcombine.low %v13112_v62, %v2411_v17  ;;  %v2420_v50 = vcombine.high %v13112_v62, %v2411_v17  ;;  %v2421_v14 = vcombine.low %v13120_v61, %v2418_v53  ;;  %v2422_v25 = vcombine.high %v13120_v61, %v2418_v53  ;;  %v1999_v49 = vpop.f32.mrf.mxu0 }
 0x170   :  { %v2461_v21 = vcombine.low %v2285_v26, %v2286_v43  ;;  %v2462_v42 = vcombine.high %v2285_v26, %v2286_v43  ;;  %v2567_v2 = vcombine.low %v2295_v10, %v2296_v18  ;;  %v2568_v11 = vcombine.high %v2295_v10, %v2296_v18  ;;  %v1886_v6 = vpop.f32.mrf.mxu1  ;;  %v20108_v43 = vld [vmem:[#allocation35_spill] sm:$0xff] }
 0x171   :  { %v13242_v24 = vmax.f32 %v2419_v39, %v2420_v50  ;;  %v13244_v28 = vmax.f32 %v2421_v14, %v2422_v25  ;;  %v2293_v35 = vmax.f32 %v2237_v19, 0.0  ;;  %v2247_v5 = vadd.f32 %v20092_v45, %v2149_v8  ;;  %v2003_v14 = vpop.f32.mrf.mxu0 }
 0x172   :  { %v2483_v12 = vrot.slane %v2461_v21, %v20075_v31  ;;  %v2490_v62 = vrot.slane %v2462_v42, %v20075_v31  ;;  %v13250_v40 = vrot.slane %v2567_v2, %v20075_v31  ;;  %v13253_v61 = vrot.slane %v2568_v11, %v20075_v31  ;;  %v1890_v10 = vpop.f32.mrf.mxu1  ;;  %v20109_v2 = vld [vmem:[#allocation34_spill] sm:$0xff] }
 0x173   :  { %v2303_v26 = vmax.f32 %v2247_v5, 0.0  ;;  %v2238_v17 = vadd.f32 %v12995_v1, %v2140_v15  ;;  %v2248_v53 = vadd.f32 %v12985_v51, %v2150_v20  ;;  %v2147_v18 = vadd.f32 %v1884_v7, %v20108_v43 }
 0x174   :  { %20106 = vst [vmem:[#allocation14_spill] sm:$0xff] %v13250_v40  ;;  %20107 = vst [vmem:[#allocation8_spill] sm:$0xff] %v13253_v61  ;;  %v2491_v8 = vcombine.low %v13131_v44, %v2483_v12  ;;  %v2492_v19 = vcombine.high %v13131_v44, %v2483_v12  ;;  %v2493_v39 = vcombine.low %v13138_v13, %v2490_v62  ;;  %v1892_v25 = vpop.f32.mrf.mxu1 }
 0x175   :  { %v2494_v50 = vcombine.high %v13138_v13, %v2490_v62  ;;  %v2294_v11 = vmax.f32 %v2238_v17, 0.0  ;;  %v2304_v21 = vmax.f32 %v2248_v53, 0.0  ;;  %v2245_v42 = vadd.f32 %v20100_v57, %v2147_v18  ;;  %v2005_v18 = vpop.f32.mrf.mxu0 }
 0x176   :  { %v2157_v15 = vadd.f32 %v1997_v60, %v20109_v2  ;;  %v13264_v5 = vmax.f32 %v2491_v8, %v2492_v19  ;;  %v2148_v7 = vadd.f32 %v1886_v6, %v13072_v0  ;;  %v2158_v44 = vadd.f32 %v1999_v49, %v13067_v32  ;;  %v1896_v12 = vpop.f32.mrf.mxu1 }
 0x177   :  { %v13266_v20 = vmax.f32 %v2493_v39, %v2494_v50  ;;  %v2533_v43 = vcombine.low %v2293_v35, %v2294_v11  ;;  %v2534_v61 = vcombine.high %v2293_v35, %v2294_v11  ;;  %v2639_v13 = vcombine.low %v2303_v26, %v2304_v21  ;;  %v20110_v39 = vld [vmem:[#allocation36_spill] sm:$0xff] }
 0x178   :  { %v2640_v62 = vcombine.high %v2303_v26, %v2304_v21  ;;  %v2301_v40 = vmax.f32 %v2245_v42, 0.0  ;;  %v2255_v17 = vadd.f32 %v20092_v45, %v2157_v15  ;;  %v2246_v53 = vadd.f32 %v12995_v1, %v2148_v7  ;;  %v1898_v8 = vpop.f32.mrf.mxu1 }
 0x179   :  { %v2256_v60 = vadd.f32 %v12985_v51, %v2158_v44  ;;  %v2555_v19 = vrot.slane %v2533_v43, %v20075_v31  ;;  %v2562_v0 = vrot.slane %v2534_v61, %v20075_v31  ;;  %v13276_v32 = vrot.slane %v2639_v13, %v20075_v31  ;;  %v2009_v13 = vpop.f32.mrf.mxu0 }
 0x17a   :  { %v13279_v49 = vrot.slane %v2640_v62, %v20075_v31  ;;  %v2311_v6 = vmax.f32 %v2255_v17, 0.0  ;;  %v2302_v35 = vmax.f32 %v2246_v53, 0.0  ;;  %v2155_v50 = vadd.f32 %v1890_v10, %v20110_v39  ;;  %v1902_v11 = vpop.f32.mrf.mxu1 }
 0x17b   :  { %v2312_v26 = vmax.f32 %v2256_v60, 0.0  ;;  %v2563_v21 = vcombine.low %v13149_v4, %v2555_v19  ;;  %v2564_v42 = vcombine.high %v13149_v4, %v2555_v19  ;;  %v2565_v2 = vcombine.low %v13152_v37, %v2562_v0 }
 0x17c   :  { %v2566_v61 = vcombine.high %v13152_v37, %v2562_v0  ;;  %v2605_v15 = vcombine.low %v2301_v40, %v2302_v35  ;;  %v2606_v7 = vcombine.high %v2301_v40, %v2302_v35  ;;  %v1904_v62 = vpop.f32.mrf.mxu1  ;;  %v2253_v10 = vadd.f32 %v20100_v57, %v2155_v50 }
 0x17d   :  { %v2711_v44 = vcombine.low %v2311_v6, %v2312_v26  ;;  %v2712_v43 = vcombine.high %v2311_v6, %v2312_v26  ;;  %v13286_v17 = vmax.f32 %v2563_v21, %v2564_v42  ;;  %v2165_v60 = vadd.f32 %v2003_v14, %v13076_v59  ;;  %v2011_v42 = vpop.f32.mrf.mxu0 }
 0x17e   :  { %v13288_v53 = vmax.f32 %v2565_v2, %v2566_v61  ;;  %v2627_v4 = vrot.slane %v2605_v15, %v20075_v31  ;;  %v2634_v19 = vrot.slane %v2606_v7, %v20075_v31  ;;  %v13300_v0 = vpop.f32.mrf.mxu1  ;;  %v2309_v6 = vmax.f32 %v2253_v10, 0.0 }
 0x17f   :  { %v13295_v37 = vrot.slane %v2711_v44, %v20075_v31  ;;  %v13298_v40 = vrot.slane %v2712_v43, %v20075_v31  ;;  %v2263_v35 = vadd.f32 %v20092_v45, %v2165_v60  ;;  %v2156_v26 = vadd.f32 %v1892_v25, %v13081_v63  ;;  %v20111_v44 = vld [vmem:[#allocation39_spill] sm:$0xff]  ;;  %v20112_v25 = vld [vmem:[#allocation38_spill] sm:$0xff] }
 0x180   :  { %v2166_v39 = vadd.f32 %v2005_v18, %v13085_v34  ;;  %v2635_v59 = vcombine.low %v13157_v47, %v2627_v4  ;;  %v2636_v14 = vcombine.high %v13157_v47, %v2627_v4  ;;  %v2637_v50 = vcombine.low %v13165_v3, %v2634_v19  ;;  %v2082_v2 = vpop.f32.mrf.mxu1 }
 0x181   :  { %v2638_v21 = vcombine.high %v13165_v3, %v2634_v19  ;;  %v2319_v61 = vmax.f32 %v2263_v35, 0.0  ;;  %v2254_v15 = vadd.f32 %v12995_v1, %v2156_v26  ;;  %v2163_v43 = vadd.f32 %v1896_v12, %v20111_v44  ;;  %v20113_v12 = vld [vmem:[#allocation42_spill] sm:$0xff] }
 0x182   :  { %v2264_v7 = vadd.f32 %v12985_v51, %v2166_v39  ;;  %v13312_v63 = vmax.f32 %v2635_v59, %v2636_v14  ;;  %v2173_v18 = vadd.f32 %v2009_v13, %v20112_v25  ;;  %v2164_v47 = vadd.f32 %v1898_v8, %v13095_v33  ;;  %v2086_v10 = vpop.f32.mrf.mxu1 }
 0x183   :  { %v13314_v34 = vmax.f32 %v2637_v50, %v2638_v21  ;;  %v2310_v60 = vmax.f32 %v2254_v15, 0.0  ;;  %v2261_v4 = vadd.f32 %v20100_v57, %v2163_v43  ;;  %v2174_v19 = vadd.f32 %v2011_v42, %v13091_v30 }
 0x184   :  { %v2320_v3 = vmax.f32 %v2264_v7, 0.0  ;;  %v2271_v35 = vadd.f32 %v20092_v45, %v2173_v18  ;;  %v2262_v26 = vadd.f32 %v12995_v1, %v2164_v47  ;;  %v2171_v39 = vadd.f32 %v1902_v11, %v20113_v12  ;;  %v2088_v14 = vpop.f32.mrf.mxu1 }
 0x185   :  { %v2172_v59 = vadd.f32 %v1904_v62, %v13099_v29  ;;  %v2677_v50 = vcombine.low %v2309_v6, %v2310_v60  ;;  %v2678_v13 = vcombine.high %v2309_v6, %v2310_v60  ;;  %v2317_v8 = vmax.f32 %v2261_v4, 0.0 }
 0x186   :  { %v2783_v21 = vcombine.low %v2319_v61, %v2320_v3  ;;  %v2784_v33 = vcombine.high %v2319_v61, %v2320_v3  ;;  %v2327_v15 = vmax.f32 %v2271_v35, 0.0  ;;  %v2318_v7 = vmax.f32 %v2262_v26, 0.0  ;;  %v2092_v43 = vpop.f32.mrf.mxu1 }
 0x187   :  { %v2272_v44 = vadd.f32 %v12985_v51, %v2174_v19  ;;  %v2699_v30 = vrot.slane %v2677_v50, %v20075_v31  ;;  %v2706_v45 = vrot.slane %v2678_v13, %v20075_v31  ;;  %v2269_v61 = vadd.f32 %v20100_v57, %v2171_v39 }
 0x188   :  { %v13328_v42 = vrot.slane %v2783_v21, %v20075_v31  ;;  %v13331_v29 = vrot.slane %v2784_v33, %v20075_v31  ;;  %v2749_v11 = vcombine.low %v2317_v8, %v2318_v7  ;;  %v2750_v62 = vcombine.high %v2317_v8, %v2318_v7  ;;  %v2094_v25 = vpop.f32.mrf.mxu1 }
 0x189   :  { %v2328_v6 = vmax.f32 %v2272_v44, 0.0  ;;  %v2707_v18 = vcombine.low %v13175_v54, %v2699_v30  ;;  %v2708_v51 = vcombine.high %v13175_v54, %v2699_v30  ;;  %v2709_v47 = vcombine.low %v13178_v23, %v2706_v45 }
 0x18a   :  { %v2710_v60 = vcombine.high %v13178_v23, %v2706_v45  ;;  %v2771_v3 = vrot.slane %v2749_v11, %v20075_v31  ;;  %v2778_v4 = vrot.slane %v2750_v62, %v20075_v31  ;;  %v2098_v26 = vpop.f32.mrf.mxu1  ;;  %v2325_v57 = vmax.f32 %v2269_v61, 0.0 }
 0x18b   :  { %v2855_v19 = vcombine.low %v2327_v15, %v2328_v6  ;;  %v2856_v35 = vcombine.high %v2327_v15, %v2328_v6  ;;  %v13340_v12 = vmax.f32 %v2707_v18, %v2708_v51  ;;  %v2270_v39 = vadd.f32 %v12995_v1, %v2172_v59  ;;  %v20114_v18 = vld [vmem:[#allocation37_spill] sm:$0xff] }
 0x18c   :  { %v13342_v50 = vmax.f32 %v2709_v47, %v2710_v60  ;;  %v2779_v54 = vcombine.low %v13189_v56, %v2771_v3  ;;  %v2780_v13 = vcombine.high %v13189_v56, %v2771_v3  ;;  %v2781_v23 = vcombine.low %v13192_v9, %v2778_v4  ;;  %v2100_v33 = vpop.f32.mrf.mxu1 }
 0x18d   :  { %v2782_v21 = vcombine.high %v13192_v9, %v2778_v4  ;;  %v13350_v8 = vrot.slane %v2855_v19, %v20075_v31  ;;  %v13353_v15 = vrot.slane %v2856_v35, %v20075_v31  ;;  %v2326_v7 = vmax.f32 %v2270_v39, 0.0 }
 0x18e   :  { %v2127_v44 = vadd.f32 %v13300_v0, %v13102_v16  ;;  %v13357_v1 = vmax.f32 %v2779_v54, %v2780_v13  ;;  %v2128_v56 = vadd.f32 %v2082_v2, %v13108_v38  ;;  %v2135_v30 = vadd.f32 %v2086_v10, %v13115_v46  ;;  %v13363_v9 = vpop.f32.mrf.mxu1 }
 0x18f   :  { %v13359_v59 = vmax.f32 %v2781_v23, %v2782_v21  ;;  %v2821_v45 = vcombine.low %v2325_v57, %v2326_v7  ;;  %v2822_v11 = vcombine.high %v2325_v57, %v2326_v7  ;;  %v2136_v6 = vadd.f32 %v2088_v14, %v13123_v55 }
 0x190   :  { %v2225_v62 = vadd.f32 %v12999_v52, %v2127_v44  ;;  %v2226_v61 = vadd.f32 %v13003_v48, %v2128_v56  ;;  %v2233_v16 = vadd.f32 %v12999_v52, %v2135_v30  ;;  %v2143_v0 = vadd.f32 %v2092_v43, %v13134_v36  ;;  %v2106_v47 = vpop.f32.mrf.mxu1 }
 0x191   :  { %v2144_v51 = vadd.f32 %v2094_v25, %v20114_v18  ;;  %v2843_v38 = vrot.slane %v2821_v45, %v20075_v31  ;;  %v2850_v46 = vrot.slane %v2822_v11, %v20075_v31  ;;  %v2234_v10 = vadd.f32 %v13003_v48, %v2136_v6 }
 0x192   :  { %v2281_v2 = vmax.f32 %v2225_v62, 0.0  ;;  %v2282_v60 = vmax.f32 %v2226_v61, 0.0  ;;  %v2289_v3 = vmax.f32 %v2233_v16, 0.0  ;;  %v2241_v55 = vadd.f32 %v12999_v52, %v2143_v0  ;;  %v2110_v54 = vpop.f32.mrf.mxu1  ;;  %v20115_v62 = vld [vmem:[#allocation18_spill] sm:$0xff]  ;;  %v20116_v0 = vld [vmem:[#allocation43_spill] sm:$0xff] }
 0x193   :  { %v2242_v14 = vadd.f32 %v13003_v48, %v2144_v51  ;;  %v2851_v4 = vcombine.low %v13202_v22, %v2843_v38  ;;  %v2852_v36 = vcombine.high %v13202_v22, %v2843_v38  ;;  %v2853_v43 = vcombine.low %v13207_v27, %v2850_v46 }
 0x194   :  { %v2854_v25 = vcombine.high %v13207_v27, %v2850_v46  ;;  %v2425_v19 = vcombine.low %v2281_v2, %v2282_v60  ;;  %v2426_v35 = vcombine.high %v2281_v2, %v2282_v60  ;;  %v2290_v57 = vmax.f32 %v2234_v10, 0.0 }
 0x195   :  { %v2297_v39 = vmax.f32 %v2241_v55, 0.0  ;;  %v13380_v13 = vmax.f32 %v2851_v4, %v2852_v36  ;;  %v2298_v21 = vmax.f32 %v2242_v14, 0.0  ;;  %v2151_v7 = vadd.f32 %v2098_v26, %v13145_v41  ;;  %v2112_v26 = vpop.f32.mrf.mxu1  ;;  %v20117_v55 = vld [vmem:[#allocation13_spill] sm:$0xff] }
 0x196   :  { %v13382_v23 = vmax.f32 %v2853_v43, %v2854_v25  ;;  %v2447_v44 = vrot.slane %v2425_v19, %v20075_v31  ;;  %v2454_v22 = vrot.slane %v2426_v35, %v20075_v31  ;;  %v2497_v56 = vcombine.low %v2289_v3, %v2290_v57  ;;  %v20118_v4 = vld [vmem:[#allocation21_spill] sm:$0xff]  ;;  %v20119_v35 = vld [vmem:[#allocation14_spill] sm:$0xff] }
 0x197   :  { %v2498_v30 = vcombine.high %v2289_v3, %v2290_v57  ;;  %v2569_v45 = vcombine.low %v2297_v39, %v2298_v21  ;;  %v2570_v27 = vcombine.high %v2297_v39, %v2298_v21  ;;  %v2249_v11 = vadd.f32 %v12999_v52, %v2151_v7  ;;  %v2116_v21 = vpop.f32.mrf.mxu1 }
 0x198   :  { %v2152_v6 = vadd.f32 %v2100_v33, %v20115_v62  ;;  %v2455_v61 = vcombine.low %v13216_v58, %v2447_v44  ;;  %v2456_v16 = vcombine.high %v13216_v58, %v2447_v44  ;;  %v2457_v18 = vcombine.low %v20116_v0, %v2454_v22  ;;  %v20122_v62 = vld [vmem:[#allocation40_spill] sm:$0xff] }
 0x199   :  { %v2458_v41 = vcombine.high %v20116_v0, %v2454_v22  ;;  %v2519_v51 = vrot.slane %v2497_v56, %v20075_v31  ;;  %v2526_v38 = vrot.slane %v2498_v30, %v20075_v31  ;;  %v2591_v46 = vrot.slane %v2569_v45, %v20075_v31  ;;  %v20120_v22 = vld [vmem:[#allocation8_spill] sm:$0xff]  ;;  %v20123_v0 = vld [vmem:[#allocation11_spill] sm:$0xff] }
 0x19a   :  { %v2598_v2 = vrot.slane %v2570_v27, %v20075_v31  ;;  %v2948_v10 = vmax.f32 %v2455_v61, %v2456_v16  ;;  %v2305_v33 = vmax.f32 %v2249_v11, 0.0  ;;  %v2250_v3 = vadd.f32 %v13003_v48, %v2152_v6  ;;  %v20121_v11 = vld [vmem:[#allocation9_spill] sm:$0xff] }
 0x19b   :  { %v2950_v60 = vmax.f32 %v2457_v18, %v2458_v41  ;;  %v2527_v58 = vcombine.low %v20117_v55, %v2519_v51  ;;  %v2528_v14 = vcombine.high %v20117_v55, %v2519_v51  ;;  %v2529_v36 = vcombine.low %v20118_v4, %v2526_v38 }
 0x19c   :  { %v2530_v43 = vcombine.high %v20118_v4, %v2526_v38  ;;  %v13403_v25 = vmax.f32 %v13242_v24, %v2948_v10  ;;  %v2599_v57 = vcombine.low %v20119_v35, %v2591_v46  ;;  %v2600_v39 = vcombine.high %v20119_v35, %v2591_v46  ;;  %v20126_v4 = vld [vmem:[#allocation12_spill] sm:$0xff] }
 0x19d   :  { %v13406_v19 = vmax.f32 %v13244_v28, %v2950_v60  ;;  %v2952_v7 = vmax.f32 %v2527_v58, %v2528_v14  ;;  %v2601_v56 = vcombine.low %v20120_v22, %v2598_v2  ;;  %v2602_v30 = vcombine.high %v20120_v22, %v2598_v2  ;;  %v2118_v2 = vpop.f32.mrf.mxu1 }
 0x19e   :  { %v2954_v44 = vmax.f32 %v2529_v36, %v2530_v43  ;;  %v2956_v45 = vmax.f32 %v2599_v57, %v2600_v39  ;;  %v2306_v27 = vmax.f32 %v2250_v3, 0.0  ;;  %v2159_v24 = vadd.f32 %v13363_v9, %v20121_v11  ;;  %v20125_v3 = vld [vmem:[#allocation10_spill] sm:$0xff] }
 0x19f   :  { %v2160_v6 = vadd.f32 %v2106_v47, %v20122_v62  ;;  %v13416_v28 = vmax.f32 %v13264_v5, %v2952_v7  ;;  %v2958_v16 = vmax.f32 %v2601_v56, %v2602_v30  ;;  %v2167_v18 = vadd.f32 %v2110_v54, %v20123_v0 }
 0x1a0   :  { %v13419_v61 = vmax.f32 %v13266_v20, %v2954_v44  ;;  %v13423_v41 = vmax.f32 %v13286_v17, %v2956_v45  ;;  %v2641_v51 = vcombine.low %v2305_v33, %v2306_v27  ;;  %v2642_v38 = vcombine.high %v2305_v33, %v2306_v27  ;;  %v20124_v20 = vld [vmem:[#allocation41_spill] sm:$0xff] }
 0x1a1   :  { %v2257_v46 = vadd.f32 %v12999_v52, %v2159_v24  ;;  %v13427_v9 = vmax.f32 %v13288_v53, %v2958_v16  ;;  %v2258_v5 = vadd.f32 %v13003_v48, %v2160_v6  ;;  %v2265_v47 = vadd.f32 %v12999_v52, %v2167_v18 }
 0x1a2   :  { %v2168_v10 = vadd.f32 %v2112_v26, %v20124_v20  ;;  %v2663_v60 = vrot.slane %v2641_v51, %v20075_v31  ;;  %v2670_v54 = vrot.slane %v2642_v38, %v20075_v31  ;;  %v2175_v55 = vadd.f32 %v2116_v21, %v20125_v3 }
 0x1a3   :  { %v2313_v17 = vmax.f32 %v2257_v46, 0.0  ;;  %v2314_v33 = vmax.f32 %v2258_v5, 0.0  ;;  %v2321_v58 = vmax.f32 %v2265_v47, 0.0  ;;  %v2176_v53 = vadd.f32 %v2118_v2, %v20126_v4 }
 0x1a4   :  { %v2266_v14 = vadd.f32 %v13003_v48, %v2168_v10  ;;  %v2671_v36 = vcombine.low %v13276_v32, %v2663_v60  ;;  %v2672_v43 = vcombine.high %v13276_v32, %v2663_v60  ;;  %v2673_v35 = vcombine.low %v13279_v49, %v2670_v54 }
 0x1a5   :  { %v2674_v26 = vcombine.high %v13279_v49, %v2670_v54  ;;  %v2713_v57 = vcombine.low %v2313_v17, %v2314_v33  ;;  %v2714_v39 = vcombine.high %v2313_v17, %v2314_v33  ;;  %v2273_v44 = vadd.f32 %v12999_v52, %v2175_v55 }
 0x1a6   :  { %v2322_v7 = vmax.f32 %v2266_v14, 0.0  ;;  %v2960_v21 = vmax.f32 %v2671_v36, %v2672_v43  ;;  %v2274_v56 = vadd.f32 %v13003_v48, %v2176_v53  ;;  %v4071_v30 = vcombine.low %v13403_v25, %v13406_v19 }
 0x1a7   :  { %v2962_v22 = vmax.f32 %v2673_v35, %v2674_v26  ;;  %v2735_v45 = vrot.slane %v2713_v57, %v20075_v31  ;;  %v2742_v32 = vrot.slane %v2714_v39, %v20075_v31  ;;  %v2329_v52 = vmax.f32 %v2273_v44, 0.0 }
 0x1a8   :  { %v2785_v27 = vcombine.low %v2321_v58, %v2322_v7  ;;  %v2786_v11 = vcombine.high %v2321_v58, %v2322_v7  ;;  %v13448_v49 = vmax.f32 %v13312_v63, %v2960_v21  ;;  %v2330_v62 = vmax.f32 %v2274_v56, 0.0  ;;  %v9656_v56 = vld [vmem:[%s19995_s3 + $0x1390] sm:$0xff] }
 0x1a9   :  { %v13451_v24 = vmax.f32 %v13314_v34, %v2962_v22  ;;  %v2743_v6 = vcombine.low %v13295_v37, %v2735_v45  ;;  %v2744_v48 = vcombine.high %v13295_v37, %v2735_v45  ;;  %v2745_v16 = vcombine.low %v13298_v40, %v2742_v32 }
 0x1aa   :  { %v2746_v0 = vcombine.high %v13298_v40, %v2742_v32  ;;  %v2807_v18 = vrot.slane %v2785_v27, %v20075_v31  ;;  %v2814_v51 = vrot.slane %v2786_v11, %v20075_v31  ;;  %v2857_v38 = vcombine.low %v2329_v52, %v2330_v62 }
 0x1ab   :  { %v2858_v63 = vcombine.high %v2329_v52, %v2330_v62  ;;  %v2964_v46 = vmax.f32 %v2743_v6, %v2744_v48  ;;  %v4073_v34 = vcombine.low %v13416_v28, %v13419_v61  ;;  %v4081_v5 = vrot.slane %v4071_v30, %v20075_v31  ;;  %v9648_v48 = vld [vmem:[%s19995_s3 + $0x1350] sm:$0xff] }
 0x1ac   :  { %v2966_v2 = vmax.f32 %v2745_v16, %v2746_v0  ;;  %v2815_v47 = vcombine.low %v13328_v42, %v2807_v18  ;;  %v2816_v37 = vcombine.high %v13328_v42, %v2807_v18  ;;  %v2817_v20 = vcombine.low %v13331_v29, %v2814_v51  ;;  %v9641_v18 = vld [vmem:[%s19995_s3 + $0x1318] sm:$0xff] }
 0x1ad   :  { %v2818_v40 = vcombine.high %v13331_v29, %v2814_v51  ;;  %v13467_v10 = vmax.f32 %v13340_v12, %v2964_v46  ;;  %v2879_v54 = vrot.slane %v2857_v38, %v20075_v31  ;;  %v2886_v17 = vrot.slane %v2858_v63, %v20075_v31  ;;  %v9920_v51 = vld [vmem:[%s19995_s3 + $0x1bd0] sm:$0xff] }
 0x1ae   :  { %v13470_v60 = vmax.f32 %v13342_v50, %v2966_v2  ;;  %v2968_v3 = vmax.f32 %v2815_v47, %v2816_v37  ;;  %v4095_v33 = vrot.slane %v4073_v34, %v20075_v31  ;;  %v4072_v42 = vcombine.high %v13403_v25, %v13406_v19  ;;  %v9640_v38 = vld [vmem:[%s19995_s3 + $0x1310] sm:$0xff]  ;;  %v9913_v2 = vld [vmem:[%s19995_s3 + $0x1b98] sm:$0xff] }
 0x1af   :  { %v2970_v55 = vmax.f32 %v2817_v20, %v2818_v40  ;;  %v2887_v58 = vcombine.low %v13350_v8, %v2879_v54  ;;  %v2888_v29 = vcombine.high %v13350_v8, %v2879_v54  ;;  %v2889_v12 = vcombine.low %v13353_v15, %v2886_v17  ;;  %v9912_v37 = vld [vmem:[%s19995_s3 + $0x1b90] sm:$0xff]  ;;  %v9905_v54 = vld [vmem:[%s19995_s3 + $0x1b58] sm:$0xff] }
 0x1b0   :  { %v2890_v50 = vcombine.high %v13353_v15, %v2886_v17  ;;  %v13482_v14 = vmax.f32 %v13357_v1, %v2968_v3  ;;  %v13487_v53 = vcombine.low %v4081_v5, %v4095_v33  ;;  %v13489_v36 = vcombine.high %v4081_v5, %v4095_v33  ;;  %v9664_v15 = vld [vmem:[%s19995_s3 + $0x13d0] sm:$0xff]  ;;  %v9657_v1 = vld [vmem:[%s19995_s3 + $0x1398] sm:$0xff] }
 0x1b1   :  { %v13485_v4 = vmax.f32 %v13359_v59, %v2970_v55  ;;  %v2972_v43 = vmax.f32 %v2887_v58, %v2888_v29  ;;  %v4074_v26 = vcombine.high %v13416_v28, %v13419_v61  ;;  %v4088_v8 = vrot.slane %v4072_v42, %v20075_v31  ;;  %v9633_v17 = vld [vmem:[%s19995_s3 + $0x12d8] sm:$0xff]  ;;  %v9904_v33 = vld [vmem:[%s19995_s3 + $0x1b50] sm:$0xff] }
 0x1b2   :  { %v2974_v35 = vmax.f32 %v2889_v12, %v2890_v50  ;;  %4277 = vmatprep.mubr.f32.mxu0 %v13489_v36  ;;  %v4107_v59 = vcombine.low %v13423_v41, %v13427_v9  ;;  %v4109_v57 = vcombine.low %v13448_v49, %v13451_v24  ;;  %v4108_v39 = vcombine.high %v13423_v41, %v13427_v9  ;;  %v9897_v50 = vld [vmem:[%s19995_s3 + $0x1b18] sm:$0xff] }
 0x1b3   :  { %v4110_v7 = vcombine.high %v13448_v49, %v13451_v24  ;;  %v13510_v44 = vmax.f32 %v13380_v13, %v2972_v43  ;;  %v4102_v22 = vrot.slane %v4074_v26, %v20075_v31  ;;  %4278 = vmatmul.mubr.f32.vlgmr.msra.gmra.mxu0 %v13487_v53  ;;  %v4143_v30 = vcombine.low %v13467_v10, %v13470_v60  ;;  %v9649_v13 = vld [vmem:[%s19995_s3 + $0x1358] sm:$0xff] }
 0x1b4   :  { %v13513_v21 = vmax.f32 %v13382_v23, %v2974_v35  ;;  %4392 = vmatpush1.msra.mxu0 %v9664_v15  ;;  %v4117_v45 = vrot.slane %v4107_v59, %v20075_v31  ;;  %v4131_v23 = vrot.slane %v4109_v57, %v20075_v31  ;;  %v4124_v32 = vrot.slane %v4108_v39, %v20075_v31  ;;  %v9632_v15 = vld [vmem:[%s19995_s3 + $0x12d0] sm:$0xff]  ;;  %v9889_v39 = vld [vmem:[%s19995_s3 + $0x1ad8] sm:$0xff] }
 0x1b5   :  { %v4138_v27 = vrot.slane %v4110_v7, %v20075_v31  ;;  %v5047_v62 = vcombine.low %v13485_v4, %v13510_v44  ;;  %v5048_v6 = vcombine.high %v13485_v4, %v13510_v44  ;;  %4393 = vmatprep.subr.mxu0 %v9657_v1  ;;  %v13540_v16 = vcombine.low %v4088_v8, %v4102_v22  ;;  %v9625_v7 = vld [vmem:[%s19995_s3 + $0x1298] sm:$0xff] }
 0x1b6   :  { %v4179_v11 = vcombine.low %v13510_v44, %v13513_v21  ;;  %v4180_v52 = vcombine.high %v13510_v44, %v13513_v21  ;;  %v13542_v0 = vcombine.high %v4088_v8, %v4102_v22  ;;  %4394 = vmatpush1.msra.mxu0 %v9656_v56  ;;  %v13553_v63 = vcombine.high %v4117_v45, %v4131_v23  ;;  %v9896_v8 = vld [vmem:[%s19995_s3 + $0x1b10] sm:$0xff]  ;;  %v3365_v44 = vld [vmem:[%s19995_s3 + $0xad8] sm:$0xff] }
 0x1b7   :  { %4395 = vmatprep.subr.mxu0 %v9649_v13  ;;  %v13555_v46 = vcombine.high %v4124_v32, %v4138_v27  ;;  %v13561_v34 = vcombine.low %v4117_v45, %v4131_v23  ;;  %v13563_v5 = vcombine.low %v4124_v32, %v4138_v27  ;;  %v4145_v47 = vcombine.low %v13482_v14, %v13485_v4  ;;  %v9888_v13 = vld [vmem:[%s19995_s3 + $0x1ad0] sm:$0xff]  ;;  %v9881_v27 = vld [vmem:[%s19995_s3 + $0x1a98] sm:$0xff] }
 0x1b8   :  { %4366 = vmatprep.mubr.f32.mxu1 %v13542_v0  ;;  %4396 = vmatpush1.msra.mxu0 %v9648_v48  ;;  %v4144_v20 = vcombine.high %v13467_v10, %v13470_v60  ;;  %v4146_v40 = vcombine.high %v13482_v14, %v13485_v4  ;;  %v4153_v3 = vrot.slane %v4143_v30, %v20075_v31  ;;  %v20127_v29 = vmov 0.0   ;;  %v9624_v45 = vld [vmem:[%s19995_s3 + $0x1290] sm:$0xff]  ;;  %v3109_v4 = vld [vmem:[%s19995_s3 + $0x2d8] sm:$0xff] }
 0x1b9   :  { %4367 = vmatmul.mubr.f32.vlgmr.msra.gmra.mxu1 %v13540_v16  ;;  %4397 = vmatprep.subr.mxu0 %v9641_v18  ;;  %v4167_v55 = vrot.slane %v4145_v47, %v20075_v31  ;;  %v4939_v12 = vcombine.low %v20127_v29, %v13403_v25  ;;  %v13600_v26 = vrot.slane %v4179_v11, %v20075_v31  ;;  %v9617_v11 = vld [vmem:[%s19995_s3 + $0x1258] sm:$0xff]  ;;  %v9880_v48 = vld [vmem:[%s19995_s3 + $0x1a90] sm:$0xff] }
 0x1ba   :  { %4481 = vmatpush1.msra.mxu1 %v9920_v51  ;;  %4398 = vmatpush1.msra.mxu0 %v9640_v38  ;;  %v4160_v42 = vrot.slane %v4144_v20, %v20075_v31  ;;  %v4174_v58 = vrot.slane %v4146_v40, %v20075_v31  ;;  %v13613_v57 = vrot.slane %v4180_v52, %v20075_v31  ;;  %v9616_v18 = vld [vmem:[%s19995_s3 + $0x1250] sm:$0xff] }
 0x1bb   :  { %4482 = vmatprep.subr.mxu1 %v9913_v2  ;;  %4283 = vmatprep.mubr.f32.mxu0 %v13553_v63  ;;  %v13595_v43 = vcombine.high %v4153_v3, %v4167_v55  ;;  %v13597_v35 = vcombine.low %v4153_v3, %v4167_v55  ;;  %v4941_v22 = vcombine.low %v13406_v19, %v13416_v28  ;;  %v9872_v40 = vld [vmem:[%s19995_s3 + $0x1a50] sm:$0xff] }
 0x1bc   :  { %4483 = vmatpush1.msra.mxu1 %v9912_v37  ;;  %4372 = vmatprep.mubr.f32.mxu1 %v13555_v46  ;;  %v13608_v1 = vcombine.high %v4160_v42, %v4174_v58  ;;  %v13610_v59 = vcombine.low %v4160_v42, %v4174_v58  ;;  %v4949_v56 = vrot.slane %v4939_v12, %v20075_v31  ;;  %v9864_v58 = vld [vmem:[%s19995_s3 + $0x1a10] sm:$0xff] }
 0x1bd   :  { %4484 = vmatprep.subr.mxu1 %v9905_v54  ;;  %4399 = vmatprep.subr.mxu0 %v9633_v17  ;;  %v4940_v30 = vcombine.high %v20127_v29, %v13403_v25  ;;  %v4942_v23 = vcombine.high %v13406_v19, %v13416_v28  ;;  %v4975_v32 = vcombine.low %v13419_v61, %v13423_v41  ;;  %v9608_v54 = vld [vmem:[%s19995_s3 + $0x1210] sm:$0xff] }
 0x1be   :  { %4485 = vmatpush1.msra.mxu1 %v9904_v33  ;;  %4284 = vmatmul.mubr.f32.gmra.mxu0 %v13561_v34  ;;  %v4977_v25 = vcombine.low %v13427_v9, %v13448_v49  ;;  %v13647_v52 = vrot.slane %v4941_v22, %v20075_v31  ;;  %v4976_v28 = vcombine.high %v13419_v61, %v13423_v41  ;;  %v9873_v61 = vld [vmem:[%s19995_s3 + $0x1a58] sm:$0xff] }
 0x1bf   :  { %4486 = vmatprep.subr.mxu1 %v9897_v50  ;;  %4373 = vmatmul.mubr.f32.gmra.mxu1 %v13563_v5  ;;  %v4956_v19 = vrot.slane %v4940_v30, %v20075_v31  ;;  %v13659_v51 = vrot.slane %v4942_v23, %v20075_v31  ;;  %v13662_v38 = vrot.slane %v4975_v32, %v20075_v31  ;;  %v9609_v41 = vld [vmem:[%s19995_s3 + $0x1218] sm:$0xff] }
 0x1c0   :  { %4487 = vmatpush1.msra.mxu1 %v9896_v8  ;;  %4400 = vmatpush1.msra.mxu0 %v9632_v15  ;;  %v13665_v2 = vrot.slane %v4977_v25, %v20075_v31  ;;  %v13674_v47 = vcombine.low %v4949_v56, %v13647_v52  ;;  %v13677_v37 = vcombine.high %v4949_v56, %v13647_v52  ;;  %v9601_v15 = vld [vmem:[%s19995_s3 + $0x11d8] sm:$0xff] }
 0x1c1   :  { %4488 = vmatprep.subr.mxu1 %v9889_v39  ;;  %4401 = vmatprep.subr.mxu0 %v9625_v7  ;;  %v4978_v20 = vcombine.high %v13427_v9, %v13448_v49  ;;  %v13688_v17 = vcombine.low %v4956_v19, %v13659_v51  ;;  %v13691_v3 = vcombine.high %v4956_v19, %v13659_v51  ;;  %v9865_v9 = vld [vmem:[%s19995_s3 + $0x1a18] sm:$0xff] }
 0x1c2   :  { %4489 = vmatpush1.msra.mxu1 %v9888_v13  ;;  %4402 = vmatpush1.msra.mxu0 %v9624_v45  ;;  %v13695_v55 = vcombine.high %v13662_v38, %v13665_v2  ;;  %v4992_v49 = vrot.slane %v4976_v28, %v20075_v31  ;;  %v13704_v42 = vcombine.low %v13662_v38, %v13665_v2  ;;  %v9857_v39 = vld [vmem:[%s19995_s3 + $0x19d8] sm:$0xff]  ;;  %v9600_v13 = vld [vmem:[%s19995_s3 + $0x11d0] sm:$0xff] }
 0x1c3   :  { %4490 = vmatprep.subr.mxu1 %v9881_v27  ;;  %4403 = vmatprep.subr.mxu0 %v9617_v11  ;;  %v5006_v33 = vrot.slane %v4978_v20, %v20075_v31  ;;  %v5011_v12 = vcombine.low %v13451_v24, %v13467_v10  ;;  %v5013_v50 = vcombine.low %v13470_v60, %v13482_v14  ;;  %v9593_v32 = vld [vmem:[%s19995_s3 + $0x1198] sm:$0xff]  ;;  %v9592_v28 = vld [vmem:[%s19995_s3 + $0x1190] sm:$0xff] }
 0x1c4   :  { %4491 = vmatpush1.msra.mxu1 %v9880_v48  ;;  %4404 = vmatpush1.msra.mxu0 %v9616_v18  ;;  %v5012_v8 = vcombine.high %v13451_v24, %v13467_v10  ;;  %v5014_v56 = vcombine.high %v13470_v60, %v13482_v14  ;;  %v13730_v24 = vcombine.high %v13600_v26, %v13600_v26  ;;  %v9856_v60 = vld [vmem:[%s19995_s3 + $0x19d0] sm:$0xff]  ;;  %v9849_v25 = vld [vmem:[%s19995_s3 + $0x1998] sm:$0xff] }
 0x1c5   :  { %4492 = vmatprep.subr.mxu1 %v9873_v61  ;;  %4405 = vmatprep.subr.mxu0 %v9609_v41  ;;  %v13721_v7 = vcombine.high %v4992_v49, %v5006_v33  ;;  %v13723_v22 = vcombine.low %v4992_v49, %v5006_v33  ;;  %v5021_v10 = vrot.slane %v5011_v12, %v20075_v31  ;;  %v9848_v48 = vld [vmem:[%s19995_s3 + $0x1990] sm:$0xff] }
 0x1c6   :  { %4493 = vmatpush1.msra.mxu1 %v9872_v40  ;;  %4406 = vmatpush1.msra.mxu0 %v9608_v54  ;;  %v13734_v30 = vrot.slane %v5013_v50, %v20075_v31  ;;  %v13745_v14 = vcombine.high %v13613_v57, %v13613_v57  ;;  %v5028_v45 = vrot.slane %v5012_v8, %v20075_v31  ;;  %v9576_v50 = vld [vmem:[%s19995_s3 + $0x1110] sm:$0xff] }
 0x1c7   :  { %4494 = vmatprep.subr.mxu1 %v9865_v9  ;;  %4289 = vmatprep.mubr.f32.mxu0 %v13595_v43  ;;  %v13749_v23 = vrot.slane %v5014_v56, %v20075_v31  ;;  %v13765_v19 = vcombine.high %v13647_v52, %v13662_v38  ;;  %v13782_v41 = vcombine.high %v13659_v51, %v4992_v49  ;;  %v9585_v9 = vld [vmem:[%s19995_s3 + $0x1158] sm:$0xff]  ;;  %v9832_v8 = vld [vmem:[%s19995_s3 + $0x1910] sm:$0xff] }
 0x1c8   :  { %4495 = vmatpush1.msra.mxu1 %v9864_v58  ;;  %4378 = vmatprep.mubr.f32.mxu1 %v13608_v1  ;;  %v13758_v27 = vcombine.high %v5021_v10, %v13734_v30  ;;  %v13761_v11 = vcombine.low %v5021_v10, %v13734_v30  ;;  %v13786_v20 = vcombine.low %v13647_v52, %v13662_v38  ;;  %v9841_v58 = vld [vmem:[%s19995_s3 + $0x1958] sm:$0xff]  ;;  %v9584_v38 = vld [vmem:[%s19995_s3 + $0x1150] sm:$0xff] }
 0x1c9   :  { %4407 = vmatprep.subr.mxu0 %v9601_v15  ;;  %4496 = vmatprep.subr.mxu1 %v9857_v39  ;;  %v13776_v18 = vcombine.high %v5028_v45, %v13749_v23  ;;  %v13779_v61 = vcombine.low %v5028_v45, %v13749_v23  ;;  %v13789_v40 = vcombine.low %v13659_v51, %v4992_v49  ;;  %v9840_v49 = vld [vmem:[%s19995_s3 + $0x1950] sm:$0xff]  ;;  %v9569_v15 = vld [vmem:[%s19995_s3 + $0x10d8] sm:$0xff] }
 0x1ca   :  { %4290 = vmatmul.mubr.f32.gmra.mxu0 %v13597_v35  ;;  %4379 = vmatmul.mubr.f32.gmra.mxu1 %v13610_v59  ;;  %v13792_v54 = vcombine.high %v13665_v2, %v5021_v10  ;;  %v13800_v12 = vcombine.high %v5006_v33, %v5028_v45  ;;  %v13803_v52 = vcombine.low %v13665_v2, %v5021_v10  ;;  %v9577_v2 = vld [vmem:[%s19995_s3 + $0x1118] sm:$0xff]  ;;  %v9568_v56 = vld [vmem:[%s19995_s3 + $0x10d0] sm:$0xff] }
 0x1cb   :  { %4408 = vmatpush1.msra.mxu0 %v9600_v13  ;;  %4497 = vmatpush1.msra.mxu1 %v9856_v60  ;;  %v13805_v51 = vcombine.low %v5006_v33, %v5028_v45  ;;  %v9833_v33 = vld [vmem:[%s19995_s3 + $0x1918] sm:$0xff]  ;;  %v9824_v10 = vld [vmem:[%s19995_s3 + $0x18d0] sm:$0xff] }
 0x1cc   :  { %4409 = vmatprep.subr.mxu0 %v9593_v32  ;;  %4498 = vmatprep.subr.mxu1 %v9849_v25  ;;  %v9825_v39 = vld [vmem:[%s19995_s3 + $0x18d8] sm:$0xff]  ;;  %v9560_v45 = vld [vmem:[%s19995_s3 + $0x1090] sm:$0xff] }
 0x1cd   :  { %4410 = vmatpush1.msra.mxu0 %v9592_v28  ;;  %4499 = vmatpush1.msra.mxu1 %v9848_v48  ;;  %v9561_v13 = vld [vmem:[%s19995_s3 + $0x1098] sm:$0xff]  ;;  %v9816_v32 = vld [vmem:[%s19995_s3 + $0x1890] sm:$0xff] }
 0x1ce   :  { %4295 = vmatprep.mubr.f32.mxu0 %v13730_v24  ;;  %4384 = vmatprep.mubr.f32.mxu1 %v13745_v14  ;;  %v9817_v60 = vld [vmem:[%s19995_s3 + $0x1898] sm:$0xff]  ;;  %v9552_v48 = vld [vmem:[%s19995_s3 + $0x1050] sm:$0xff] }
 0x1cf   :  { %4411 = vmatprep.subr.mxu0 %v9585_v9  ;;  %4500 = vmatprep.subr.mxu1 %v9841_v58  ;;  %v9553_v25 = vld [vmem:[%s19995_s3 + $0x1058] sm:$0xff]  ;;  %v9808_v9 = vld [vmem:[%s19995_s3 + $0x1850] sm:$0xff] }
 0x1d0   :  { %4296 = vmatmul.mubr.f32.gmra.mxu0 %v13600_v26  ;;  %4385 = vmatmul.mubr.f32.gmra.mxu1 %v13613_v57  ;;  %v9809_v28 = vld [vmem:[%s19995_s3 + $0x1858] sm:$0xff] }
 0x1d1   :  { %4412 = vmatpush1.msra.mxu0 %v9584_v38  ;;  %4501 = vmatpush1.msra.mxu1 %v9840_v49  ;;  %v9545_v58 = vld [vmem:[%s19995_s3 + $0x1018] sm:$0xff]  ;;  %v9544_v49 = vld [vmem:[%s19995_s3 + $0x1010] sm:$0xff] }
 0x1d2   :  { %4413 = vmatprep.subr.mxu0 %v9577_v2  ;;  %4455 = vmatprep.mubr.f32.mxu0 %v13489_v36  ;;  %v9801_v38 = vld [vmem:[%s19995_s3 + $0x1818] sm:$0xff]  ;;  %v9800_v2 = vld [vmem:[%s19995_s3 + $0x1810] sm:$0xff] }
 0x1d3   :  { %4502 = vmatprep.subr.mxu1 %v9833_v33  ;;  %4544 = vmatprep.mubr.f32.mxu1 %v13542_v0  ;;  %v9793_v33 = vld [vmem:[%s19995_s3 + $0x17d8] sm:$0xff] }
 0x1d4   :  { %4414 = vmatpush1.msra.mxu0 %v9576_v50  ;;  %4503 = vmatpush1.msra.mxu1 %v9832_v8  ;;  %v10049_v50 = vld [vmem:[%s19995_s3 + $0x1fd8] sm:$0xff]  ;;  %v9792_v8 = vld [vmem:[%s19995_s3 + $0x17d0] sm:$0xff] }
 0x1d5   :  { %4415 = vmatprep.subr.mxu0 %v9569_v15  ;;  %4504 = vmatprep.subr.mxu1 %v9825_v39  ;;  %v10048_v15 = vld [vmem:[%s19995_s3 + $0x1fd0] sm:$0xff]  ;;  %v9785_v39 = vld [vmem:[%s19995_s3 + $0x1798] sm:$0xff] }
 0x1d6   :  { %4416 = vmatpush1.msra.mxu0 %v9568_v56  ;;  %4505 = vmatpush1.msra.mxu1 %v9824_v10  ;;  %v10041_v56 = vld [vmem:[%s19995_s3 + $0x1f98] sm:$0xff]  ;;  %v9784_v10 = vld [vmem:[%s19995_s3 + $0x1790] sm:$0xff] }
 0x1d7   :  { %4417 = vmatprep.subr.mxu0 %v9561_v13  ;;  %4506 = vmatprep.subr.mxu1 %v9817_v60  ;;  %v10040_v13 = vld [vmem:[%s19995_s3 + $0x1f90] sm:$0xff]  ;;  %v9777_v60 = vld [vmem:[%s19995_s3 + $0x1758] sm:$0xff] }
 0x1d8   :  { %4418 = vmatpush1.msra.mxu0 %v9560_v45  ;;  %4507 = vmatpush1.msra.mxu1 %v9816_v32  ;;  %v10033_v45 = vld [vmem:[%s19995_s3 + $0x1f58] sm:$0xff]  ;;  %v9776_v32 = vld [vmem:[%s19995_s3 + $0x1750] sm:$0xff] }
 0x1d9   :  { %4419 = vmatprep.subr.mxu0 %v9553_v25  ;;  %4508 = vmatprep.subr.mxu1 %v9809_v28  ;;  %v10032_v25 = vld [vmem:[%s19995_s3 + $0x1f50] sm:$0xff]  ;;  %v9769_v28 = vld [vmem:[%s19995_s3 + $0x1718] sm:$0xff] }
 0x1da   :  { %4420 = vmatpush1.msra.mxu0 %v9552_v48  ;;  %4509 = vmatpush1.msra.mxu1 %v9808_v9  ;;  %v10025_v48 = vld [vmem:[%s19995_s3 + $0x1f18] sm:$0xff]  ;;  %v9768_v9 = vld [vmem:[%s19995_s3 + $0x1710] sm:$0xff] }
 0x1db   :  { %4421 = vmatprep.subr.mxu0 %v9545_v58  ;;  %4510 = vmatprep.subr.mxu1 %v9801_v38  ;;  %v10024_v58 = vld [vmem:[%s19995_s3 + $0x1f10] sm:$0xff]  ;;  %v9761_v38 = vld [vmem:[%s19995_s3 + $0x16d8] sm:$0xff] }
 0x1dc   :  { %4422 = vmatpush1.msra.mxu0 %v9544_v49  ;;  %4511 = vmatpush1.msra.mxu1 %v9800_v2  ;;  %v10017_v49 = vld [vmem:[%s19995_s3 + $0x1ed8] sm:$0xff]  ;;  %v9760_v2 = vld [vmem:[%s19995_s3 + $0x16d0] sm:$0xff] }
 0x1dd   :  { %4423 = vmatprep.subr.mxu0 %v9793_v33  ;;  %4512 = vmatprep.subr.mxu1 %v10049_v50  ;;  %v10016_v33 = vld [vmem:[%s19995_s3 + $0x1ed0] sm:$0xff]  ;;  %v9753_v50 = vld [vmem:[%s19995_s3 + $0x1698] sm:$0xff] }
 0x1de   :  { %4424 = vmatpush2.msra.mxu0 %v9792_v8  ;;  %4513 = vmatpush2.msra.mxu1 %v10048_v15  ;;  %v10009_v8 = vld [vmem:[%s19995_s3 + $0x1e98] sm:$0xff]  ;;  %v9752_v15 = vld [vmem:[%s19995_s3 + $0x1690] sm:$0xff] }
 0x1df   :  { %4425 = vmatprep.subr.mxu0 %v9785_v39  ;;  %4514 = vmatprep.subr.mxu1 %v10041_v56  ;;  %v10008_v39 = vld [vmem:[%s19995_s3 + $0x1e90] sm:$0xff]  ;;  %v9745_v56 = vld [vmem:[%s19995_s3 + $0x1658] sm:$0xff] }
 0x1e0   :  { %4426 = vmatpush2.msra.mxu0 %v9784_v10  ;;  %4515 = vmatpush2.msra.mxu1 %v10040_v13  ;;  %v10001_v10 = vld [vmem:[%s19995_s3 + $0x1e58] sm:$0xff]  ;;  %v9744_v13 = vld [vmem:[%s19995_s3 + $0x1650] sm:$0xff] }
 0x1e1   :  { %4427 = vmatprep.subr.mxu0 %v9777_v60  ;;  %4516 = vmatprep.subr.mxu1 %v10033_v45  ;;  %v10000_v60 = vld [vmem:[%s19995_s3 + $0x1e50] sm:$0xff]  ;;  %v9737_v45 = vld [vmem:[%s19995_s3 + $0x1618] sm:$0xff] }
 0x1e2   :  { %4428 = vmatpush2.msra.mxu0 %v9776_v32  ;;  %4517 = vmatpush2.msra.mxu1 %v10032_v25  ;;  %v9993_v32 = vld [vmem:[%s19995_s3 + $0x1e18] sm:$0xff]  ;;  %v9736_v25 = vld [vmem:[%s19995_s3 + $0x1610] sm:$0xff] }
 0x1e3   :  { %4429 = vmatprep.subr.mxu0 %v9769_v28  ;;  %4518 = vmatprep.subr.mxu1 %v10025_v48  ;;  %v9992_v28 = vld [vmem:[%s19995_s3 + $0x1e10] sm:$0xff]  ;;  %v9729_v48 = vld [vmem:[%s19995_s3 + $0x15d8] sm:$0xff] }
 0x1e4   :  { %4430 = vmatpush2.msra.mxu0 %v9768_v9  ;;  %4519 = vmatpush2.msra.mxu1 %v10024_v58  ;;  %v9985_v9 = vld [vmem:[%s19995_s3 + $0x1dd8] sm:$0xff]  ;;  %v9728_v58 = vld [vmem:[%s19995_s3 + $0x15d0] sm:$0xff] }
 0x1e5   :  { %4431 = vmatprep.subr.mxu0 %v9761_v38  ;;  %4520 = vmatprep.subr.mxu1 %v10017_v49  ;;  %v9984_v38 = vld [vmem:[%s19995_s3 + $0x1dd0] sm:$0xff]  ;;  %v9721_v49 = vld [vmem:[%s19995_s3 + $0x1598] sm:$0xff] }
 0x1e6   :  { %4432 = vmatpush2.msra.mxu0 %v9760_v2  ;;  %4521 = vmatpush2.msra.mxu1 %v10016_v33  ;;  %v9977_v2 = vld [vmem:[%s19995_s3 + $0x1d98] sm:$0xff]  ;;  %v9720_v33 = vld [vmem:[%s19995_s3 + $0x1590] sm:$0xff] }
 0x1e7   :  { %4433 = vmatprep.subr.mxu0 %v9753_v50  ;;  %4522 = vmatprep.subr.mxu1 %v10009_v8  ;;  %v9976_v50 = vld [vmem:[%s19995_s3 + $0x1d90] sm:$0xff]  ;;  %v9713_v8 = vld [vmem:[%s19995_s3 + $0x1558] sm:$0xff] }
 0x1e8   :  { %4434 = vmatpush2.msra.mxu0 %v9752_v15  ;;  %4523 = vmatpush2.msra.mxu1 %v10008_v39  ;;  %v9969_v15 = vld [vmem:[%s19995_s3 + $0x1d58] sm:$0xff]  ;;  %v9712_v39 = vld [vmem:[%s19995_s3 + $0x1550] sm:$0xff] }
 0x1e9   :  { %4435 = vmatprep.subr.mxu0 %v9745_v56  ;;  %4524 = vmatprep.subr.mxu1 %v10001_v10  ;;  %v9968_v56 = vld [vmem:[%s19995_s3 + $0x1d50] sm:$0xff]  ;;  %v9705_v10 = vld [vmem:[%s19995_s3 + $0x1518] sm:$0xff] }
 0x1ea   :  { %4436 = vmatpush2.msra.mxu0 %v9744_v13  ;;  %4525 = vmatpush2.msra.mxu1 %v10000_v60  ;;  %v9961_v13 = vld [vmem:[%s19995_s3 + $0x1d18] sm:$0xff]  ;;  %v9704_v60 = vld [vmem:[%s19995_s3 + $0x1510] sm:$0xff] }
 0x1eb   :  { %4437 = vmatprep.subr.mxu0 %v9737_v45  ;;  %4526 = vmatprep.subr.mxu1 %v9993_v32  ;;  %v9960_v45 = vld [vmem:[%s19995_s3 + $0x1d10] sm:$0xff]  ;;  %v9697_v32 = vld [vmem:[%s19995_s3 + $0x14d8] sm:$0xff] }
 0x1ec   :  { %4438 = vmatpush2.msra.mxu0 %v9736_v25  ;;  %4527 = vmatpush2.msra.mxu1 %v9992_v28  ;;  %v9953_v25 = vld [vmem:[%s19995_s3 + $0x1cd8] sm:$0xff]  ;;  %v9696_v28 = vld [vmem:[%s19995_s3 + $0x14d0] sm:$0xff] }
 0x1ed   :  { %4439 = vmatprep.subr.mxu0 %v9729_v48  ;;  %4528 = vmatprep.subr.mxu1 %v9985_v9  ;;  %v9952_v48 = vld [vmem:[%s19995_s3 + $0x1cd0] sm:$0xff]  ;;  %v9689_v9 = vld [vmem:[%s19995_s3 + $0x1498] sm:$0xff] }
 0x1ee   :  { %4440 = vmatpush2.msra.mxu0 %v9728_v58  ;;  %4529 = vmatpush2.msra.mxu1 %v9984_v38  ;;  %v9945_v58 = vld [vmem:[%s19995_s3 + $0x1c98] sm:$0xff]  ;;  %v9688_v38 = vld [vmem:[%s19995_s3 + $0x1490] sm:$0xff] }
 0x1ef   :  { %4441 = vmatprep.subr.mxu0 %v9721_v49  ;;  %4530 = vmatprep.subr.mxu1 %v9977_v2  ;;  %v9944_v49 = vld [vmem:[%s19995_s3 + $0x1c90] sm:$0xff]  ;;  %v9681_v2 = vld [vmem:[%s19995_s3 + $0x1458] sm:$0xff] }
 0x1f0   :  { %4442 = vmatpush2.msra.mxu0 %v9720_v33  ;;  %4531 = vmatpush2.msra.mxu1 %v9976_v50  ;;  %v9937_v33 = vld [vmem:[%s19995_s3 + $0x1c58] sm:$0xff]  ;;  %v9680_v50 = vld [vmem:[%s19995_s3 + $0x1450] sm:$0xff] }
 0x1f1   :  { %4443 = vmatprep.subr.mxu0 %v9713_v8  ;;  %4532 = vmatprep.subr.mxu1 %v9969_v15  ;;  %v9936_v8 = vld [vmem:[%s19995_s3 + $0x1c50] sm:$0xff]  ;;  %v9673_v15 = vld [vmem:[%s19995_s3 + $0x1418] sm:$0xff] }
 0x1f2   :  { %4444 = vmatpush2.msra.mxu0 %v9712_v39  ;;  %4533 = vmatpush2.msra.mxu1 %v9968_v56  ;;  %v9929_v39 = vld [vmem:[%s19995_s3 + $0x1c18] sm:$0xff]  ;;  %v9672_v56 = vld [vmem:[%s19995_s3 + $0x1410] sm:$0xff] }
 0x1f3   :  { %4445 = vmatprep.subr.mxu0 %v9705_v10  ;;  %4534 = vmatprep.subr.mxu1 %v9961_v13  ;;  %v9928_v10 = vld [vmem:[%s19995_s3 + $0x1c10] sm:$0xff]  ;;  %v9667_v13 = vld [vmem:[%s19995_s3 + $0x13e8] sm:$0xff] }
 0x1f4   :  { %4446 = vmatpush2.msra.mxu0 %v9704_v60  ;;  %4535 = vmatpush2.msra.mxu1 %v9960_v45  ;;  %v9923_v60 = vld [vmem:[%s19995_s3 + $0x1be8] sm:$0xff]  ;;  %v9666_v45 = vld [vmem:[%s19995_s3 + $0x13e0] sm:$0xff] }
 0x1f5   :  { %4447 = vmatprep.subr.mxu0 %v9697_v32  ;;  %4536 = vmatprep.subr.mxu1 %v9953_v25  ;;  %v9922_v32 = vld [vmem:[%s19995_s3 + $0x1be0] sm:$0xff]  ;;  %v9659_v25 = vld [vmem:[%s19995_s3 + $0x13a8] sm:$0xff] }
 0x1f6   :  { %4448 = vmatpush2.msra.mxu0 %v9696_v28  ;;  %4537 = vmatpush2.msra.mxu1 %v9952_v48  ;;  %v9915_v28 = vld [vmem:[%s19995_s3 + $0x1ba8] sm:$0xff]  ;;  %v9658_v48 = vld [vmem:[%s19995_s3 + $0x13a0] sm:$0xff] }
 0x1f7   :  { %4449 = vmatprep.subr.mxu0 %v9689_v9  ;;  %4538 = vmatprep.subr.mxu1 %v9945_v58  ;;  %v9914_v9 = vld [vmem:[%s19995_s3 + $0x1ba0] sm:$0xff]  ;;  %v9651_v58 = vld [vmem:[%s19995_s3 + $0x1368] sm:$0xff] }
 0x1f8   :  { %4450 = vmatpush2.msra.mxu0 %v9688_v38  ;;  %4539 = vmatpush2.msra.mxu1 %v9944_v49  ;;  %v9907_v38 = vld [vmem:[%s19995_s3 + $0x1b68] sm:$0xff]  ;;  %v9650_v49 = vld [vmem:[%s19995_s3 + $0x1360] sm:$0xff] }
 0x1f9   :  { %4451 = vmatprep.subr.mxu0 %v9681_v2  ;;  %4540 = vmatprep.subr.mxu1 %v9937_v33  ;;  %v9906_v2 = vld [vmem:[%s19995_s3 + $0x1b60] sm:$0xff]  ;;  %v9643_v33 = vld [vmem:[%s19995_s3 + $0x1328] sm:$0xff] }
 0x1fa   :  { %4452 = vmatpush2.msra.mxu0 %v9680_v50  ;;  %4541 = vmatpush2.msra.mxu1 %v9936_v8  ;;  %v9899_v50 = vld [vmem:[%s19995_s3 + $0x1b28] sm:$0xff]  ;;  %v9642_v8 = vld [vmem:[%s19995_s3 + $0x1320] sm:$0xff] }
 0x1fb   :  { %4453 = vmatprep.subr.mxu0 %v9673_v15  ;;  %4542 = vmatprep.subr.mxu1 %v9929_v39  ;;  %v9898_v15 = vld [vmem:[%s19995_s3 + $0x1b20] sm:$0xff]  ;;  %v9635_v39 = vld [vmem:[%s19995_s3 + $0x12e8] sm:$0xff] }
 0x1fc   :  { %4454 = vmatpush2.msra.mxu0 %v9672_v56  ;;  %4543 = vmatpush2.msra.mxu1 %v9928_v10  ;;  %v9891_v56 = vld [vmem:[%s19995_s3 + $0x1ae8] sm:$0xff]  ;;  %v9634_v10 = vld [vmem:[%s19995_s3 + $0x12e0] sm:$0xff] }
 0x1fd   :  { %4456 = vmatmul.mubr.f32.vlgmr.msra.gmra.mxu0 %v13487_v53  ;;  %4545 = vmatmul.mubr.f32.vlgmr.msra.gmra.mxu1 %v13540_v16 }
 0x1fe   :  { %4569 = vmatprep.subr.mxu0 %v9667_v13  ;;  %4658 = vmatprep.subr.mxu1 %v9923_v60  ;;  %v9890_v13 = vld [vmem:[%s19995_s3 + $0x1ae0] sm:$0xff]  ;;  %v9627_v60 = vld [vmem:[%s19995_s3 + $0x12a8] sm:$0xff] }
 0x1ff   :  { %4461 = vmatprep.mubr.f32.mxu0 %v13553_v63  ;;  %4550 = vmatprep.mubr.f32.mxu1 %v13555_v46 }
 0x200   :  { %4570 = vmatpush1.msra.mxu0 %v9666_v45  ;;  %4659 = vmatpush1.msra.mxu1 %v9922_v32  ;;  %v9883_v45 = vld [vmem:[%s19995_s3 + $0x1aa8] sm:$0xff]  ;;  %v9626_v32 = vld [vmem:[%s19995_s3 + $0x12a0] sm:$0xff] }
 0x201   :  { %4571 = vmatprep.subr.mxu0 %v9659_v25  ;;  %4660 = vmatprep.subr.mxu1 %v9915_v28  ;;  %v9882_v25 = vld [vmem:[%s19995_s3 + $0x1aa0] sm:$0xff]  ;;  %v9619_v28 = vld [vmem:[%s19995_s3 + $0x1268] sm:$0xff] }
 0x202   :  { %4572 = vmatpush1.msra.mxu0 %v9658_v48  ;;  %4661 = vmatpush1.msra.mxu1 %v9914_v9  ;;  %v9875_v48 = vld [vmem:[%s19995_s3 + $0x1a68] sm:$0xff]  ;;  %v9618_v9 = vld [vmem:[%s19995_s3 + $0x1260] sm:$0xff] }
 0x203   :  { %4462 = vmatmul.mubr.f32.gmra.mxu0 %v13561_v34  ;;  %4551 = vmatmul.mubr.f32.gmra.mxu1 %v13563_v5 }
 0x204   :  { %4573 = vmatprep.subr.mxu0 %v9651_v58  ;;  %4662 = vmatprep.subr.mxu1 %v9907_v38  ;;  %v9874_v58 = vld [vmem:[%s19995_s3 + $0x1a60] sm:$0xff]  ;;  %v9611_v38 = vld [vmem:[%s19995_s3 + $0x1228] sm:$0xff] }
 0x205   :  { %4467 = vmatprep.mubr.f32.mxu0 %v13595_v43  ;;  %4556 = vmatprep.mubr.f32.mxu1 %v13608_v1 }
 0x206   :  { %4574 = vmatpush1.msra.mxu0 %v9650_v49  ;;  %4663 = vmatpush1.msra.mxu1 %v9906_v2  ;;  %v9867_v49 = vld [vmem:[%s19995_s3 + $0x1a28] sm:$0xff]  ;;  %v9610_v2 = vld [vmem:[%s19995_s3 + $0x1220] sm:$0xff] }
 0x207   :  { %4575 = vmatprep.subr.mxu0 %v9643_v33  ;;  %4664 = vmatprep.subr.mxu1 %v9899_v50  ;;  %v9866_v33 = vld [vmem:[%s19995_s3 + $0x1a20] sm:$0xff]  ;;  %v9603_v50 = vld [vmem:[%s19995_s3 + $0x11e8] sm:$0xff] }
 0x208   :  { %4576 = vmatpush1.msra.mxu0 %v9642_v8  ;;  %4665 = vmatpush1.msra.mxu1 %v9898_v15  ;;  %v9859_v8 = vld [vmem:[%s19995_s3 + $0x19e8] sm:$0xff]  ;;  %v9602_v15 = vld [vmem:[%s19995_s3 + $0x11e0] sm:$0xff] }
 0x209   :  { %4468 = vmatmul.mubr.f32.gmra.mxu0 %v13597_v35  ;;  %4557 = vmatmul.mubr.f32.gmra.mxu1 %v13610_v59 }
 0x20a   :  { %4577 = vmatprep.subr.mxu0 %v9635_v39  ;;  %4666 = vmatprep.subr.mxu1 %v9891_v56  ;;  %v9858_v39 = vld [vmem:[%s19995_s3 + $0x19e0] sm:$0xff]  ;;  %v9595_v56 = vld [vmem:[%s19995_s3 + $0x11a8] sm:$0xff] }
 0x20b   :  { %4473 = vmatprep.mubr.f32.mxu0 %v13730_v24  ;;  %4562 = vmatprep.mubr.f32.mxu1 %v13745_v14 }
 0x20c   :  { %4578 = vmatpush1.msra.mxu0 %v9634_v10  ;;  %4667 = vmatpush1.msra.mxu1 %v9890_v13  ;;  %v9851_v10 = vld [vmem:[%s19995_s3 + $0x19a8] sm:$0xff]  ;;  %v9594_v13 = vld [vmem:[%s19995_s3 + $0x11a0] sm:$0xff] }
 0x20d   :  { %4579 = vmatprep.subr.mxu0 %v9627_v60  ;;  %4668 = vmatprep.subr.mxu1 %v9883_v45  ;;  %v9850_v60 = vld [vmem:[%s19995_s3 + $0x19a0] sm:$0xff]  ;;  %v9587_v45 = vld [vmem:[%s19995_s3 + $0x1168] sm:$0xff] }
 0x20e   :  { %4580 = vmatpush1.msra.mxu0 %v9626_v32  ;;  %4669 = vmatpush1.msra.mxu1 %v9882_v25  ;;  %v9843_v32 = vld [vmem:[%s19995_s3 + $0x1968] sm:$0xff]  ;;  %v9586_v25 = vld [vmem:[%s19995_s3 + $0x1160] sm:$0xff] }
 0x20f   :  { %4474 = vmatmul.mubr.f32.gmra.mxu0 %v13600_v26  ;;  %4563 = vmatmul.mubr.f32.gmra.mxu1 %v13613_v57 }
 0x210   :  { %4581 = vmatprep.subr.mxu0 %v9619_v28  ;;  %4670 = vmatprep.subr.mxu1 %v9875_v48  ;;  %v9842_v28 = vld [vmem:[%s19995_s3 + $0x1960] sm:$0xff]  ;;  %v9579_v48 = vld [vmem:[%s19995_s3 + $0x1128] sm:$0xff] }
 0x211   :  { %4582 = vmatpush1.msra.mxu0 %v9618_v9  ;;  %4633 = vmatprep.mubr.f32.mxu0 %v13489_v36  ;;  %v9835_v9 = vld [vmem:[%s19995_s3 + $0x1928] sm:$0xff] }
 0x212   :  { %4671 = vmatpush1.msra.mxu1 %v9874_v58  ;;  %4722 = vmatprep.mubr.f32.mxu1 %v13542_v0  ;;  %v9578_v58 = vld [vmem:[%s19995_s3 + $0x1120] sm:$0xff] }
 0x213   :  { %4583 = vmatprep.subr.mxu0 %v9611_v38  ;;  %4672 = vmatprep.subr.mxu1 %v9867_v49  ;;  %v9834_v38 = vld [vmem:[%s19995_s3 + $0x1920] sm:$0xff]  ;;  %v9571_v49 = vld [vmem:[%s19995_s3 + $0x10e8] sm:$0xff] }
 0x214   :  { %4584 = vmatpush1.msra.mxu0 %v9610_v2  ;;  %4673 = vmatpush1.msra.mxu1 %v9866_v33  ;;  %v9827_v2 = vld [vmem:[%s19995_s3 + $0x18e8] sm:$0xff]  ;;  %v9570_v33 = vld [vmem:[%s19995_s3 + $0x10e0] sm:$0xff] }
 0x215   :  { %4585 = vmatprep.subr.mxu0 %v9603_v50  ;;  %4674 = vmatprep.subr.mxu1 %v9859_v8  ;;  %v9826_v50 = vld [vmem:[%s19995_s3 + $0x18e0] sm:$0xff]  ;;  %v9563_v8 = vld [vmem:[%s19995_s3 + $0x10a8] sm:$0xff] }
 0x216   :  { %4586 = vmatpush1.msra.mxu0 %v9602_v15  ;;  %4675 = vmatpush1.msra.mxu1 %v9858_v39  ;;  %v9819_v15 = vld [vmem:[%s19995_s3 + $0x18a8] sm:$0xff]  ;;  %v9562_v39 = vld [vmem:[%s19995_s3 + $0x10a0] sm:$0xff] }
 0x217   :  { %4587 = vmatprep.subr.mxu0 %v9595_v56  ;;  %4676 = vmatprep.subr.mxu1 %v9851_v10  ;;  %v9818_v56 = vld [vmem:[%s19995_s3 + $0x18a0] sm:$0xff]  ;;  %v9555_v10 = vld [vmem:[%s19995_s3 + $0x1068] sm:$0xff] }
 0x218   :  { %4588 = vmatpush1.msra.mxu0 %v9594_v13  ;;  %4677 = vmatpush1.msra.mxu1 %v9850_v60  ;;  %v9811_v13 = vld [vmem:[%s19995_s3 + $0x1868] sm:$0xff]  ;;  %v9554_v60 = vld [vmem:[%s19995_s3 + $0x1060] sm:$0xff] }
 0x219   :  { %4589 = vmatprep.subr.mxu0 %v9587_v45  ;;  %4678 = vmatprep.subr.mxu1 %v9843_v32  ;;  %v9810_v45 = vld [vmem:[%s19995_s3 + $0x1860] sm:$0xff]  ;;  %v9547_v32 = vld [vmem:[%s19995_s3 + $0x1028] sm:$0xff] }
 0x21a   :  { %4590 = vmatpush1.msra.mxu0 %v9586_v25  ;;  %4679 = vmatpush1.msra.mxu1 %v9842_v28  ;;  %v9803_v25 = vld [vmem:[%s19995_s3 + $0x1828] sm:$0xff]  ;;  %v9546_v28 = vld [vmem:[%s19995_s3 + $0x1020] sm:$0xff] }
 0x21b   :  { %4591 = vmatprep.subr.mxu0 %v9579_v48  ;;  %4680 = vmatprep.subr.mxu1 %v9835_v9  ;;  %v9802_v48 = vld [vmem:[%s19995_s3 + $0x1820] sm:$0xff]  ;;  %v9795_v9 = vld [vmem:[%s19995_s3 + $0x17e8] sm:$0xff] }
 0x21c   :  { %4592 = vmatpush1.msra.mxu0 %v9578_v58  ;;  %4681 = vmatpush1.msra.mxu1 %v9834_v38  ;;  %v10051_v58 = vld [vmem:[%s19995_s3 + $0x1fe8] sm:$0xff]  ;;  %v9794_v38 = vld [vmem:[%s19995_s3 + $0x17e0] sm:$0xff] }
 0x21d   :  { %4593 = vmatprep.subr.mxu0 %v9571_v49  ;;  %4682 = vmatprep.subr.mxu1 %v9827_v2  ;;  %v10050_v49 = vld [vmem:[%s19995_s3 + $0x1fe0] sm:$0xff]  ;;  %v9787_v2 = vld [vmem:[%s19995_s3 + $0x17a8] sm:$0xff] }
 0x21e   :  { %4594 = vmatpush1.msra.mxu0 %v9570_v33  ;;  %4683 = vmatpush1.msra.mxu1 %v9826_v50  ;;  %v10043_v33 = vld [vmem:[%s19995_s3 + $0x1fa8] sm:$0xff]  ;;  %v9786_v50 = vld [vmem:[%s19995_s3 + $0x17a0] sm:$0xff] }
 0x21f   :  { %4595 = vmatprep.subr.mxu0 %v9563_v8  ;;  %4684 = vmatprep.subr.mxu1 %v9819_v15  ;;  %v10042_v8 = vld [vmem:[%s19995_s3 + $0x1fa0] sm:$0xff]  ;;  %v9779_v15 = vld [vmem:[%s19995_s3 + $0x1768] sm:$0xff] }
 0x220   :  { %4596 = vmatpush1.msra.mxu0 %v9562_v39  ;;  %4685 = vmatpush1.msra.mxu1 %v9818_v56  ;;  %v10035_v39 = vld [vmem:[%s19995_s3 + $0x1f68] sm:$0xff]  ;;  %v9778_v56 = vld [vmem:[%s19995_s3 + $0x1760] sm:$0xff] }
 0x221   :  { %4597 = vmatprep.subr.mxu0 %v9555_v10  ;;  %4686 = vmatprep.subr.mxu1 %v9811_v13  ;;  %v10034_v10 = vld [vmem:[%s19995_s3 + $0x1f60] sm:$0xff]  ;;  %v9771_v13 = vld [vmem:[%s19995_s3 + $0x1728] sm:$0xff] }
 0x222   :  { %4598 = vmatpush1.msra.mxu0 %v9554_v60  ;;  %4687 = vmatpush1.msra.mxu1 %v9810_v45  ;;  %v10027_v60 = vld [vmem:[%s19995_s3 + $0x1f28] sm:$0xff]  ;;  %v9770_v45 = vld [vmem:[%s19995_s3 + $0x1720] sm:$0xff] }
 0x223   :  { %4599 = vmatprep.subr.mxu0 %v9547_v32  ;;  %4688 = vmatprep.subr.mxu1 %v9803_v25  ;;  %v10026_v32 = vld [vmem:[%s19995_s3 + $0x1f20] sm:$0xff]  ;;  %v9763_v25 = vld [vmem:[%s19995_s3 + $0x16e8] sm:$0xff] }
 0x224   :  { %4600 = vmatpush1.msra.mxu0 %v9546_v28  ;;  %4689 = vmatpush1.msra.mxu1 %v9802_v48  ;;  %v10019_v28 = vld [vmem:[%s19995_s3 + $0x1ee8] sm:$0xff]  ;;  %v9762_v48 = vld [vmem:[%s19995_s3 + $0x16e0] sm:$0xff] }
 0x225   :  { %4601 = vmatprep.subr.mxu0 %v9795_v9  ;;  %4690 = vmatprep.subr.mxu1 %v10051_v58  ;;  %v10018_v9 = vld [vmem:[%s19995_s3 + $0x1ee0] sm:$0xff]  ;;  %v9755_v58 = vld [vmem:[%s19995_s3 + $0x16a8] sm:$0xff] }
 0x226   :  { %4602 = vmatpush2.msra.mxu0 %v9794_v38  ;;  %4691 = vmatpush2.msra.mxu1 %v10050_v49  ;;  %v10011_v38 = vld [vmem:[%s19995_s3 + $0x1ea8] sm:$0xff]  ;;  %v9754_v49 = vld [vmem:[%s19995_s3 + $0x16a0] sm:$0xff] }
 0x227   :  { %4603 = vmatprep.subr.mxu0 %v9787_v2  ;;  %4692 = vmatprep.subr.mxu1 %v10043_v33  ;;  %v10010_v2 = vld [vmem:[%s19995_s3 + $0x1ea0] sm:$0xff]  ;;  %v9747_v33 = vld [vmem:[%s19995_s3 + $0x1668] sm:$0xff] }
 0x228   :  { %4604 = vmatpush2.msra.mxu0 %v9786_v50  ;;  %4693 = vmatpush2.msra.mxu1 %v10042_v8  ;;  %v10003_v50 = vld [vmem:[%s19995_s3 + $0x1e68] sm:$0xff]  ;;  %v9746_v8 = vld [vmem:[%s19995_s3 + $0x1660] sm:$0xff] }
 0x229   :  { %4605 = vmatprep.subr.mxu0 %v9779_v15  ;;  %4694 = vmatprep.subr.mxu1 %v10035_v39  ;;  %v10002_v15 = vld [vmem:[%s19995_s3 + $0x1e60] sm:$0xff]  ;;  %v9739_v39 = vld [vmem:[%s19995_s3 + $0x1628] sm:$0xff] }
 0x22a   :  { %4606 = vmatpush2.msra.mxu0 %v9778_v56  ;;  %4695 = vmatpush2.msra.mxu1 %v10034_v10  ;;  %v9995_v56 = vld [vmem:[%s19995_s3 + $0x1e28] sm:$0xff]  ;;  %v9738_v10 = vld [vmem:[%s19995_s3 + $0x1620] sm:$0xff] }
 0x22b   :  { %4607 = vmatprep.subr.mxu0 %v9771_v13  ;;  %4696 = vmatprep.subr.mxu1 %v10027_v60  ;;  %v9994_v13 = vld [vmem:[%s19995_s3 + $0x1e20] sm:$0xff]  ;;  %v9731_v60 = vld [vmem:[%s19995_s3 + $0x15e8] sm:$0xff] }
 0x22c   :  { %4608 = vmatpush2.msra.mxu0 %v9770_v45  ;;  %4697 = vmatpush2.msra.mxu1 %v10026_v32  ;;  %v9987_v45 = vld [vmem:[%s19995_s3 + $0x1de8] sm:$0xff]  ;;  %v9730_v32 = vld [vmem:[%s19995_s3 + $0x15e0] sm:$0xff] }
 0x22d   :  { %4609 = vmatprep.subr.mxu0 %v9763_v25  ;;  %4698 = vmatprep.subr.mxu1 %v10019_v28  ;;  %v9986_v25 = vld [vmem:[%s19995_s3 + $0x1de0] sm:$0xff]  ;;  %v9723_v28 = vld [vmem:[%s19995_s3 + $0x15a8] sm:$0xff] }
 0x22e   :  { %4610 = vmatpush2.msra.mxu0 %v9762_v48  ;;  %4699 = vmatpush2.msra.mxu1 %v10018_v9  ;;  %v9979_v48 = vld [vmem:[%s19995_s3 + $0x1da8] sm:$0xff]  ;;  %v9722_v9 = vld [vmem:[%s19995_s3 + $0x15a0] sm:$0xff] }
 0x22f   :  { %4611 = vmatprep.subr.mxu0 %v9755_v58  ;;  %4700 = vmatprep.subr.mxu1 %v10011_v38  ;;  %v9978_v58 = vld [vmem:[%s19995_s3 + $0x1da0] sm:$0xff]  ;;  %v9715_v38 = vld [vmem:[%s19995_s3 + $0x1568] sm:$0xff] }
 0x230   :  { %4612 = vmatpush2.msra.mxu0 %v9754_v49  ;;  %4701 = vmatpush2.msra.mxu1 %v10010_v2  ;;  %v9971_v49 = vld [vmem:[%s19995_s3 + $0x1d68] sm:$0xff]  ;;  %v9714_v2 = vld [vmem:[%s19995_s3 + $0x1560] sm:$0xff] }
 0x231   :  { %4613 = vmatprep.subr.mxu0 %v9747_v33  ;;  %4702 = vmatprep.subr.mxu1 %v10003_v50  ;;  %v9970_v33 = vld [vmem:[%s19995_s3 + $0x1d60] sm:$0xff]  ;;  %v9707_v50 = vld [vmem:[%s19995_s3 + $0x1528] sm:$0xff] }
 0x232   :  { %4614 = vmatpush2.msra.mxu0 %v9746_v8  ;;  %4703 = vmatpush2.msra.mxu1 %v10002_v15  ;;  %v9963_v8 = vld [vmem:[%s19995_s3 + $0x1d28] sm:$0xff]  ;;  %v9706_v15 = vld [vmem:[%s19995_s3 + $0x1520] sm:$0xff] }
 0x233   :  { %4615 = vmatprep.subr.mxu0 %v9739_v39  ;;  %4704 = vmatprep.subr.mxu1 %v9995_v56  ;;  %v9962_v39 = vld [vmem:[%s19995_s3 + $0x1d20] sm:$0xff]  ;;  %v9699_v56 = vld [vmem:[%s19995_s3 + $0x14e8] sm:$0xff] }
 0x234   :  { %4616 = vmatpush2.msra.mxu0 %v9738_v10  ;;  %4705 = vmatpush2.msra.mxu1 %v9994_v13  ;;  %v9955_v10 = vld [vmem:[%s19995_s3 + $0x1ce8] sm:$0xff]  ;;  %v9698_v13 = vld [vmem:[%s19995_s3 + $0x14e0] sm:$0xff] }
 0x235   :  { %4617 = vmatprep.subr.mxu0 %v9731_v60  ;;  %4706 = vmatprep.subr.mxu1 %v9987_v45  ;;  %v9954_v60 = vld [vmem:[%s19995_s3 + $0x1ce0] sm:$0xff]  ;;  %v9691_v45 = vld [vmem:[%s19995_s3 + $0x14a8] sm:$0xff] }
 0x236   :  { %4618 = vmatpush2.msra.mxu0 %v9730_v32  ;;  %4707 = vmatpush2.msra.mxu1 %v9986_v25  ;;  %v9947_v32 = vld [vmem:[%s19995_s3 + $0x1ca8] sm:$0xff]  ;;  %v9690_v25 = vld [vmem:[%s19995_s3 + $0x14a0] sm:$0xff] }
 0x237   :  { %4619 = vmatprep.subr.mxu0 %v9723_v28  ;;  %4708 = vmatprep.subr.mxu1 %v9979_v48  ;;  %v9946_v28 = vld [vmem:[%s19995_s3 + $0x1ca0] sm:$0xff]  ;;  %v9683_v48 = vld [vmem:[%s19995_s3 + $0x1468] sm:$0xff] }
 0x238   :  { %4620 = vmatpush2.msra.mxu0 %v9722_v9  ;;  %4709 = vmatpush2.msra.mxu1 %v9978_v58  ;;  %v9939_v9 = vld [vmem:[%s19995_s3 + $0x1c68] sm:$0xff]  ;;  %v9682_v58 = vld [vmem:[%s19995_s3 + $0x1460] sm:$0xff] }
 0x239   :  { %4621 = vmatprep.subr.mxu0 %v9715_v38  ;;  %4710 = vmatprep.subr.mxu1 %v9971_v49  ;;  %v9938_v38 = vld [vmem:[%s19995_s3 + $0x1c60] sm:$0xff]  ;;  %v9675_v49 = vld [vmem:[%s19995_s3 + $0x1428] sm:$0xff] }
 0x23a   :  { %4622 = vmatpush2.msra.mxu0 %v9714_v2  ;;  %4711 = vmatpush2.msra.mxu1 %v9970_v33  ;;  %v9931_v2 = vld [vmem:[%s19995_s3 + $0x1c28] sm:$0xff]  ;;  %v9674_v33 = vld [vmem:[%s19995_s3 + $0x1420] sm:$0xff] }
 0x23b   :  { %4623 = vmatprep.subr.mxu0 %v9707_v50  ;;  %4712 = vmatprep.subr.mxu1 %v9963_v8  ;;  %v9930_v50 = vld [vmem:[%s19995_s3 + $0x1c20] sm:$0xff]  ;;  %v9669_v8 = vld [vmem:[%s19995_s3 + $0x13f8] sm:$0xff] }
 0x23c   :  { %4624 = vmatpush2.msra.mxu0 %v9706_v15  ;;  %4713 = vmatpush2.msra.mxu1 %v9962_v39  ;;  %v9925_v15 = vld [vmem:[%s19995_s3 + $0x1bf8] sm:$0xff]  ;;  %v9668_v39 = vld [vmem:[%s19995_s3 + $0x13f0] sm:$0xff] }
 0x23d   :  { %4625 = vmatprep.subr.mxu0 %v9699_v56  ;;  %4714 = vmatprep.subr.mxu1 %v9955_v10  ;;  %v9924_v56 = vld [vmem:[%s19995_s3 + $0x1bf0] sm:$0xff]  ;;  %v9661_v10 = vld [vmem:[%s19995_s3 + $0x13b8] sm:$0xff] }
 0x23e   :  { %4626 = vmatpush2.msra.mxu0 %v9698_v13  ;;  %4715 = vmatpush2.msra.mxu1 %v9954_v60  ;;  %v9917_v13 = vld [vmem:[%s19995_s3 + $0x1bb8] sm:$0xff]  ;;  %v9660_v60 = vld [vmem:[%s19995_s3 + $0x13b0] sm:$0xff] }
 0x23f   :  { %4627 = vmatprep.subr.mxu0 %v9691_v45  ;;  %4716 = vmatprep.subr.mxu1 %v9947_v32  ;;  %v9916_v45 = vld [vmem:[%s19995_s3 + $0x1bb0] sm:$0xff]  ;;  %v9653_v32 = vld [vmem:[%s19995_s3 + $0x1378] sm:$0xff] }
 0x240   :  { %4628 = vmatpush2.msra.mxu0 %v9690_v25  ;;  %4717 = vmatpush2.msra.mxu1 %v9946_v28  ;;  %v9909_v25 = vld [vmem:[%s19995_s3 + $0x1b78] sm:$0xff]  ;;  %v9652_v28 = vld [vmem:[%s19995_s3 + $0x1370] sm:$0xff] }
 0x241   :  { %4629 = vmatprep.subr.mxu0 %v9683_v48  ;;  %4718 = vmatprep.subr.mxu1 %v9939_v9  ;;  %v9908_v48 = vld [vmem:[%s19995_s3 + $0x1b70] sm:$0xff]  ;;  %v9645_v9 = vld [vmem:[%s19995_s3 + $0x1338] sm:$0xff] }
 0x242   :  { %4630 = vmatpush2.msra.mxu0 %v9682_v58  ;;  %4719 = vmatpush2.msra.mxu1 %v9938_v38  ;;  %v9901_v58 = vld [vmem:[%s19995_s3 + $0x1b38] sm:$0xff]  ;;  %v9644_v38 = vld [vmem:[%s19995_s3 + $0x1330] sm:$0xff] }
 0x243   :  { %4631 = vmatprep.subr.mxu0 %v9675_v49  ;;  %4720 = vmatprep.subr.mxu1 %v9931_v2  ;;  %v9900_v49 = vld [vmem:[%s19995_s3 + $0x1b30] sm:$0xff]  ;;  %v9637_v2 = vld [vmem:[%s19995_s3 + $0x12f8] sm:$0xff] }
 0x244   :  { %4632 = vmatpush2.msra.mxu0 %v9674_v33  ;;  %4721 = vmatpush2.msra.mxu1 %v9930_v50  ;;  %v9893_v33 = vld [vmem:[%s19995_s3 + $0x1af8] sm:$0xff]  ;;  %v9636_v50 = vld [vmem:[%s19995_s3 + $0x12f0] sm:$0xff] }
 0x245   :  { %4634 = vmatmul.mubr.f32.vlgmr.msra.gmra.mxu0 %v13487_v53  ;;  %4723 = vmatmul.mubr.f32.vlgmr.msra.gmra.mxu1 %v13540_v16 }
 0x246   :  { %4747 = vmatprep.subr.mxu0 %v9669_v8  ;;  %4836 = vmatprep.subr.mxu1 %v9925_v15  ;;  %v9892_v8 = vld [vmem:[%s19995_s3 + $0x1af0] sm:$0xff]  ;;  %v9629_v15 = vld [vmem:[%s19995_s3 + $0x12b8] sm:$0xff] }
 0x247   :  { %4639 = vmatprep.mubr.f32.mxu0 %v13553_v63  ;;  %4728 = vmatprep.mubr.f32.mxu1 %v13555_v46 }
 0x248   :  { %4748 = vmatpush1.msra.mxu0 %v9668_v39  ;;  %4837 = vmatpush1.msra.mxu1 %v9924_v56  ;;  %v9885_v39 = vld [vmem:[%s19995_s3 + $0x1ab8] sm:$0xff]  ;;  %v9628_v56 = vld [vmem:[%s19995_s3 + $0x12b0] sm:$0xff] }
 0x249   :  { %4749 = vmatprep.subr.mxu0 %v9661_v10  ;;  %4838 = vmatprep.subr.mxu1 %v9917_v13  ;;  %v9884_v10 = vld [vmem:[%s19995_s3 + $0x1ab0] sm:$0xff]  ;;  %v9621_v13 = vld [vmem:[%s19995_s3 + $0x1278] sm:$0xff] }
 0x24a   :  { %4750 = vmatpush1.msra.mxu0 %v9660_v60  ;;  %4839 = vmatpush1.msra.mxu1 %v9916_v45  ;;  %v9877_v60 = vld [vmem:[%s19995_s3 + $0x1a78] sm:$0xff]  ;;  %v9620_v45 = vld [vmem:[%s19995_s3 + $0x1270] sm:$0xff] }
 0x24b   :  { %4640 = vmatmul.mubr.f32.gmra.mxu0 %v13561_v34  ;;  %4729 = vmatmul.mubr.f32.gmra.mxu1 %v13563_v5 }
 0x24c   :  { %4751 = vmatprep.subr.mxu0 %v9653_v32  ;;  %4840 = vmatprep.subr.mxu1 %v9909_v25  ;;  %v9876_v32 = vld [vmem:[%s19995_s3 + $0x1a70] sm:$0xff]  ;;  %v9613_v25 = vld [vmem:[%s19995_s3 + $0x1238] sm:$0xff] }
 0x24d   :  { %4645 = vmatprep.mubr.f32.mxu0 %v13595_v43  ;;  %4734 = vmatprep.mubr.f32.mxu1 %v13608_v1 }
 0x24e   :  { %4752 = vmatpush1.msra.mxu0 %v9652_v28  ;;  %4841 = vmatpush1.msra.mxu1 %v9908_v48  ;;  %v9869_v28 = vld [vmem:[%s19995_s3 + $0x1a38] sm:$0xff]  ;;  %v9612_v48 = vld [vmem:[%s19995_s3 + $0x1230] sm:$0xff] }
 0x24f   :  { %4753 = vmatprep.subr.mxu0 %v9645_v9  ;;  %4842 = vmatprep.subr.mxu1 %v9901_v58  ;;  %v9868_v9 = vld [vmem:[%s19995_s3 + $0x1a30] sm:$0xff]  ;;  %v9605_v58 = vld [vmem:[%s19995_s3 + $0x11f8] sm:$0xff] }
 0x250   :  { %4754 = vmatpush1.msra.mxu0 %v9644_v38  ;;  %4843 = vmatpush1.msra.mxu1 %v9900_v49  ;;  %v9861_v38 = vld [vmem:[%s19995_s3 + $0x19f8] sm:$0xff]  ;;  %v9860_v49 = vld [vmem:[%s19995_s3 + $0x19f0] sm:$0xff] }
 0x251   :  { %4646 = vmatmul.mubr.f32.gmra.mxu0 %v13597_v35  ;;  %4735 = vmatmul.mubr.f32.gmra.mxu1 %v13610_v59 }
 0x252   :  { %4755 = vmatprep.subr.mxu0 %v9637_v2  ;;  %4844 = vmatprep.subr.mxu1 %v9893_v33  ;;  %v9853_v2 = vld [vmem:[%s19995_s3 + $0x19b8] sm:$0xff]  ;;  %v9596_v33 = vld [vmem:[%s19995_s3 + $0x11b0] sm:$0xff] }
 0x253   :  { %4651 = vmatprep.mubr.f32.mxu0 %v13730_v24  ;;  %4740 = vmatprep.mubr.f32.mxu1 %v13745_v14 }
 0x254   :  { %4756 = vmatpush1.msra.mxu0 %v9636_v50  ;;  %4845 = vmatpush1.msra.mxu1 %v9892_v8  ;;  %v9852_v50 = vld [vmem:[%s19995_s3 + $0x19b0] sm:$0xff]  ;;  %v9589_v8 = vld [vmem:[%s19995_s3 + $0x1178] sm:$0xff] }
 0x255   :  { %4757 = vmatprep.subr.mxu0 %v9629_v15  ;;  %4846 = vmatprep.subr.mxu1 %v9885_v39  ;;  %v9845_v15 = vld [vmem:[%s19995_s3 + $0x1978] sm:$0xff]  ;;  %v9588_v39 = vld [vmem:[%s19995_s3 + $0x1170] sm:$0xff] }
 0x256   :  { %4758 = vmatpush1.msra.mxu0 %v9628_v56  ;;  %4847 = vmatpush1.msra.mxu1 %v9884_v10  ;;  %v9844_v56 = vld [vmem:[%s19995_s3 + $0x1970] sm:$0xff]  ;;  %v9581_v10 = vld [vmem:[%s19995_s3 + $0x1138] sm:$0xff] }
 0x257   :  { %4652 = vmatmul.mubr.f32.gmra.mxu0 %v13600_v26  ;;  %4741 = vmatmul.mubr.f32.gmra.mxu1 %v13613_v57 }
 0x258   :  { %4759 = vmatprep.subr.mxu0 %v9621_v13  ;;  %4848 = vmatprep.subr.mxu1 %v9877_v60  ;;  %v9837_v13 = vld [vmem:[%s19995_s3 + $0x1938] sm:$0xff]  ;;  %v9580_v60 = vld [vmem:[%s19995_s3 + $0x1130] sm:$0xff] }
 0x259   :  { %4760 = vmatpush1.msra.mxu0 %v9620_v45  ;;  %4811 = vmatprep.mubr.f32.mxu0 %v13489_v36  ;;  %v9604_v36 = vld [vmem:[%s19995_s3 + $0x11f0] sm:$0xff] }
 0x25a   :  { %4849 = vmatpush1.msra.mxu1 %v9876_v32  ;;  %4900 = vmatprep.mubr.f32.mxu1 %v13542_v0  ;;  %v9597_v0 = vld [vmem:[%s19995_s3 + $0x11b8] sm:$0xff]  ;;  %v9836_v45 = vld [vmem:[%s19995_s3 + $0x1930] sm:$0xff] }
 0x25b   :  { %4761 = vmatprep.subr.mxu0 %v9613_v25  ;;  %4850 = vmatprep.subr.mxu1 %v9869_v28  ;;  %v9573_v32 = vld [vmem:[%s19995_s3 + $0x10f8] sm:$0xff]  ;;  %v9572_v28 = vld [vmem:[%s19995_s3 + $0x10f0] sm:$0xff] }
 0x25c   :  { %4762 = vmatpush1.msra.mxu0 %v9612_v48  ;;  %4851 = vmatpush1.msra.mxu1 %v9868_v9  ;;  %v9829_v25 = vld [vmem:[%s19995_s3 + $0x18f8] sm:$0xff]  ;;  %v9828_v48 = vld [vmem:[%s19995_s3 + $0x18f0] sm:$0xff] }
 0x25d   :  { %4763 = vmatprep.subr.mxu0 %v9605_v58  ;;  %4852 = vmatprep.subr.mxu1 %v9861_v38  ;;  %v9565_v9 = vld [vmem:[%s19995_s3 + $0x10b8] sm:$0xff]  ;;  %v9564_v38 = vld [vmem:[%s19995_s3 + $0x10b0] sm:$0xff] }
 0x25e   :  { %4764 = vmatpush1.msra.mxu0 %v9604_v36  ;;  %4853 = vmatpush1.msra.mxu1 %v9860_v49  ;;  %v9821_v58 = vld [vmem:[%s19995_s3 + $0x18b8] sm:$0xff]  ;;  %v9820_v36 = vld [vmem:[%s19995_s3 + $0x18b0] sm:$0xff] }
 0x25f   :  { %4765 = vmatprep.subr.mxu0 %v9597_v0  ;;  %4854 = vmatprep.subr.mxu1 %v9853_v2  ;;  %v9557_v49 = vld [vmem:[%s19995_s3 + $0x1078] sm:$0xff]  ;;  %v9556_v2 = vld [vmem:[%s19995_s3 + $0x1070] sm:$0xff] }
 0x260   :  { %4766 = vmatpush1.msra.mxu0 %v9596_v33  ;;  %4855 = vmatpush1.msra.mxu1 %v9852_v50  ;;  %v9813_v0 = vld [vmem:[%s19995_s3 + $0x1878] sm:$0xff]  ;;  %v9812_v33 = vld [vmem:[%s19995_s3 + $0x1870] sm:$0xff] }
 0x261   :  { %4767 = vmatprep.subr.mxu0 %v9589_v8  ;;  %4856 = vmatprep.subr.mxu1 %v9845_v15  ;;  %v9549_v50 = vld [vmem:[%s19995_s3 + $0x1038] sm:$0xff]  ;;  %v9548_v15 = vld [vmem:[%s19995_s3 + $0x1030] sm:$0xff] }
 0x262   :  { %4768 = vmatpush1.msra.mxu0 %v9588_v39  ;;  %4857 = vmatpush1.msra.mxu1 %v9844_v56  ;;  %v9805_v8 = vld [vmem:[%s19995_s3 + $0x1838] sm:$0xff]  ;;  %v9804_v39 = vld [vmem:[%s19995_s3 + $0x1830] sm:$0xff] }
 0x263   :  { %4769 = vmatprep.subr.mxu0 %v9581_v10  ;;  %4858 = vmatprep.subr.mxu1 %v9837_v13  ;;  %v9797_v56 = vld [vmem:[%s19995_s3 + $0x17f8] sm:$0xff]  ;;  %v9796_v13 = vld [vmem:[%s19995_s3 + $0x17f0] sm:$0xff] }
 0x264   :  { %4770 = vmatpush1.msra.mxu0 %v9580_v60  ;;  %4859 = vmatpush1.msra.mxu1 %v9836_v45  ;;  %v10053_v10 = vld [vmem:[%s19995_s3 + $0x1ff8] sm:$0xff]  ;;  %v10052_v60 = vld [vmem:[%s19995_s3 + $0x1ff0] sm:$0xff] }
 0x265   :  { %4771 = vmatprep.subr.mxu0 %v9573_v32  ;;  %4860 = vmatprep.subr.mxu1 %v9829_v25  ;;  %v9789_v45 = vld [vmem:[%s19995_s3 + $0x17b8] sm:$0xff]  ;;  %v9788_v25 = vld [vmem:[%s19995_s3 + $0x17b0] sm:$0xff] }
 0x266   :  { %4772 = vmatpush1.msra.mxu0 %v9572_v28  ;;  %4861 = vmatpush1.msra.mxu1 %v9828_v48  ;;  %v10045_v32 = vld [vmem:[%s19995_s3 + $0x1fb8] sm:$0xff]  ;;  %v10044_v28 = vld [vmem:[%s19995_s3 + $0x1fb0] sm:$0xff] }
 0x267   :  { %4773 = vmatprep.subr.mxu0 %v9565_v9  ;;  %4862 = vmatprep.subr.mxu1 %v9821_v58  ;;  %v9781_v48 = vld [vmem:[%s19995_s3 + $0x1778] sm:$0xff]  ;;  %v9780_v58 = vld [vmem:[%s19995_s3 + $0x1770] sm:$0xff] }
 0x268   :  { %4774 = vmatpush1.msra.mxu0 %v9564_v38  ;;  %4863 = vmatpush1.msra.mxu1 %v9820_v36  ;;  %v10037_v9 = vld [vmem:[%s19995_s3 + $0x1f78] sm:$0xff]  ;;  %v10036_v38 = vld [vmem:[%s19995_s3 + $0x1f70] sm:$0xff] }
 0x269   :  { %4775 = vmatprep.subr.mxu0 %v9557_v49  ;;  %4864 = vmatprep.subr.mxu1 %v9813_v0  ;;  %v9773_v36 = vld [vmem:[%s19995_s3 + $0x1738] sm:$0xff]  ;;  %v9772_v0 = vld [vmem:[%s19995_s3 + $0x1730] sm:$0xff] }
 0x26a   :  { %4776 = vmatpush1.msra.mxu0 %v9556_v2  ;;  %4865 = vmatpush1.msra.mxu1 %v9812_v33  ;;  %v10029_v49 = vld [vmem:[%s19995_s3 + $0x1f38] sm:$0xff]  ;;  %v10028_v2 = vld [vmem:[%s19995_s3 + $0x1f30] sm:$0xff] }
 0x26b   :  { %4777 = vmatprep.subr.mxu0 %v9549_v50  ;;  %4866 = vmatprep.subr.mxu1 %v9805_v8  ;;  %v9765_v33 = vld [vmem:[%s19995_s3 + $0x16f8] sm:$0xff]  ;;  %v9764_v8 = vld [vmem:[%s19995_s3 + $0x16f0] sm:$0xff] }
 0x26c   :  { %4778 = vmatpush1.msra.mxu0 %v9548_v15  ;;  %4867 = vmatpush1.msra.mxu1 %v9804_v39  ;;  %v10021_v50 = vld [vmem:[%s19995_s3 + $0x1ef8] sm:$0xff]  ;;  %v10020_v15 = vld [vmem:[%s19995_s3 + $0x1ef0] sm:$0xff] }
 0x26d   :  { %4779 = vmatprep.subr.mxu0 %v9797_v56  ;;  %4868 = vmatprep.subr.mxu1 %v10053_v10  ;;  %v9757_v39 = vld [vmem:[%s19995_s3 + $0x16b8] sm:$0xff]  ;;  %v9756_v10 = vld [vmem:[%s19995_s3 + $0x16b0] sm:$0xff] }
 0x26e   :  { %4780 = vmatpush2.msra.mxu0 %v9796_v13  ;;  %4869 = vmatpush2.msra.mxu1 %v10052_v60  ;;  %v10013_v56 = vld [vmem:[%s19995_s3 + $0x1eb8] sm:$0xff]  ;;  %v10012_v13 = vld [vmem:[%s19995_s3 + $0x1eb0] sm:$0xff] }
 0x26f   :  { %4781 = vmatprep.subr.mxu0 %v9789_v45  ;;  %4870 = vmatprep.subr.mxu1 %v10045_v32  ;;  %v9749_v45 = vld [vmem:[%s19995_s3 + $0x1678] sm:$0xff] }
 0x270   :  { %4782 = vmatpush2.msra.mxu0 %v9788_v25  ;;  %4871 = vmatpush2.msra.mxu1 %v10044_v28  ;;  %v10005_v32 = vld [vmem:[%s19995_s3 + $0x1e78] sm:$0xff]  ;;  %v9748_v25 = vld [vmem:[%s19995_s3 + $0x1670] sm:$0xff] }
 0x271   :  { %4783 = vmatprep.subr.mxu0 %v9781_v48  ;;  %4872 = vmatprep.subr.mxu1 %v10037_v9  ;;  %v10004_v28 = vld [vmem:[%s19995_s3 + $0x1e70] sm:$0xff]  ;;  %v9741_v48 = vld [vmem:[%s19995_s3 + $0x1638] sm:$0xff] }
 0x272   :  { %4784 = vmatpush2.msra.mxu0 %v9780_v58  ;;  %4873 = vmatpush2.msra.mxu1 %v10036_v38  ;;  %v9997_v9 = vld [vmem:[%s19995_s3 + $0x1e38] sm:$0xff]  ;;  %v9740_v58 = vld [vmem:[%s19995_s3 + $0x1630] sm:$0xff] }
 0x273   :  { %4785 = vmatprep.subr.mxu0 %v9773_v36  ;;  %4874 = vmatprep.subr.mxu1 %v10029_v49  ;;  %v4279_v60 = vpop.f32.mrf.mxu0  ;;  %v9996_v38 = vld [vmem:[%s19995_s3 + $0x1e30] sm:$0xff] }
 0x274   :  { %4786 = vmatpush2.msra.mxu0 %v9772_v0  ;;  %4875 = vmatpush2.msra.mxu1 %v10028_v2  ;;  %v9733_v0 = vld [vmem:[%s19995_s3 + $0x15f8] sm:$0xff] }
 0x275   :  { %4787 = vmatprep.subr.mxu0 %v9765_v33  ;;  %4876 = vmatprep.subr.mxu1 %v10021_v50  ;;  %v4281_v49 = vpop.f32.mrf.mxu0  ;;  %v9989_v2 = vld [vmem:[%s19995_s3 + $0x1df8] sm:$0xff]  ;;  %v9732_v50 = vld [vmem:[%s19995_s3 + $0x15f0] sm:$0xff] }
 0x276   :  { %4788 = vmatpush2.msra.mxu0 %v9764_v8  ;;  %4877 = vmatpush2.msra.mxu1 %v10020_v15  ;;  %v9988_v8 = vld [vmem:[%s19995_s3 + $0x1df0] sm:$0xff] }
 0x277   :  { %4789 = vmatprep.subr.mxu0 %v9757_v39  ;;  %4878 = vmatprep.subr.mxu1 %v10013_v56  ;;  %v9725_v39 = vld [vmem:[%s19995_s3 + $0x15b8] sm:$0xff] }
 0x278   :  { %4790 = vmatpush2.msra.mxu0 %v9756_v10  ;;  %4879 = vmatpush2.msra.mxu1 %v10012_v13  ;;  %v9981_v56 = vld [vmem:[%s19995_s3 + $0x1db8] sm:$0xff]  ;;  %v9724_v13 = vld [vmem:[%s19995_s3 + $0x15b0] sm:$0xff] }
 0x279   :  { %4791 = vmatprep.subr.mxu0 %v9749_v45  ;;  %4880 = vmatprep.subr.mxu1 %v10005_v32  ;;  %v4368_v36 = vpop.f32.mrf.mxu1  ;;  %v9717_v45 = vld [vmem:[%s19995_s3 + $0x1578] sm:$0xff] }
 0x27a   :  { %4792 = vmatpush2.msra.mxu0 %v9748_v25  ;;  %4881 = vmatpush2.msra.mxu1 %v10004_v28  ;;  %v14781_v33 = vadd.f32 %v4368_v36, %v4279_v60  ;;  %v9980_v60 = vld [vmem:[%s19995_s3 + $0x1db0] sm:$0xff]  ;;  %v9973_v32 = vld [vmem:[%s19995_s3 + $0x1d78] sm:$0xff] }
 0x27b   :  { %4793 = vmatprep.subr.mxu0 %v9741_v48  ;;  %4882 = vmatprep.subr.mxu1 %v9997_v9  ;;  %v4370_v15 = vpop.f32.mrf.mxu1  ;;  %v9716_v28 = vld [vmem:[%s19995_s3 + $0x1570] sm:$0xff] }
 0x27c   :  { %4794 = vmatpush2.msra.mxu0 %v9740_v58  ;;  %4883 = vmatpush2.msra.mxu1 %v9996_v38  ;;  %v14795_v10 = vadd.f32 %v4370_v15, %v4281_v49  ;;  %v9972_v48 = vld [vmem:[%s19995_s3 + $0x1d70] sm:$0xff]  ;;  %v9709_v58 = vld [vmem:[%s19995_s3 + $0x1538] sm:$0xff] }
 0x27d   :  { %4795 = vmatprep.subr.mxu0 %v9733_v0  ;;  %4884 = vmatprep.subr.mxu1 %v9989_v2  ;;  %v9965_v38 = vld [vmem:[%s19995_s3 + $0x1d38] sm:$0xff]  ;;  %v9708_v0 = vld [vmem:[%s19995_s3 + $0x1530] sm:$0xff] }
 0x27e   :  { %4796 = vmatpush2.msra.mxu0 %v9732_v50  ;;  %4885 = vmatpush2.msra.mxu1 %v9988_v8  ;;  %v4285_v25 = vpop.f32.mrf.mxu0  ;;  %v9964_v2 = vld [vmem:[%s19995_s3 + $0x1d30] sm:$0xff]  ;;  %v9701_v8 = vld [vmem:[%s19995_s3 + $0x14f8] sm:$0xff] }
 0x27f   :  { %4797 = vmatprep.subr.mxu0 %v9725_v39  ;;  %4886 = vmatprep.subr.mxu1 %v9981_v56  ;;  %v4374_v9 = vpop.f32.mrf.mxu1  ;;  %v9957_v15 = vld [vmem:[%s19995_s3 + $0x1cf8] sm:$0xff]  ;;  %v9700_v56 = vld [vmem:[%s19995_s3 + $0x14f0] sm:$0xff] }
 0x280   :  { %4798 = vmatpush2.msra.mxu0 %v9724_v13  ;;  %4887 = vmatpush2.msra.mxu1 %v9980_v60  ;;  %v14821_v36 = vadd.f32 %v4374_v9, %v4285_v25  ;;  %v4287_v49 = vpop.f32.mrf.mxu0  ;;  %v9956_v13 = vld [vmem:[%s19995_s3 + $0x1cf0] sm:$0xff]  ;;  %v9693_v60 = vld [vmem:[%s19995_s3 + $0x14b8] sm:$0xff] }
 0x281   :  { %4799 = vmatprep.subr.mxu0 %v9717_v45  ;;  %4888 = vmatprep.subr.mxu1 %v9973_v32  ;;  %v4376_v50 = vpop.f32.mrf.mxu1  ;;  %v9949_v45 = vld [vmem:[%s19995_s3 + $0x1cb8] sm:$0xff]  ;;  %v9692_v32 = vld [vmem:[%s19995_s3 + $0x14b0] sm:$0xff] }
 0x282   :  { %4800 = vmatpush2.msra.mxu0 %v9716_v28  ;;  %4889 = vmatpush2.msra.mxu1 %v9972_v48  ;;  %v14835_v39 = vadd.f32 %v4376_v50, %v4287_v49  ;;  %v9948_v25 = vld [vmem:[%s19995_s3 + $0x1cb0] sm:$0xff]  ;;  %v9685_v28 = vld [vmem:[%s19995_s3 + $0x1478] sm:$0xff] }
 0x283   :  { %4801 = vmatprep.subr.mxu0 %v9709_v58  ;;  %4890 = vmatprep.subr.mxu1 %v9965_v38  ;;  %v9941_v48 = vld [vmem:[%s19995_s3 + $0x1c78] sm:$0xff]  ;;  %v9684_v9 = vld [vmem:[%s19995_s3 + $0x1470] sm:$0xff] }
 0x284   :  { %4802 = vmatpush2.msra.mxu0 %v9708_v0  ;;  %4891 = vmatpush2.msra.mxu1 %v9964_v2  ;;  %v9940_v58 = vld [vmem:[%s19995_s3 + $0x1c70] sm:$0xff]  ;;  %v9677_v38 = vld [vmem:[%s19995_s3 + $0x1438] sm:$0xff] }
 0x285   :  { %4803 = vmatprep.subr.mxu0 %v9701_v8  ;;  %4892 = vmatprep.subr.mxu1 %v9957_v15  ;;  %v9933_v49 = vld [vmem:[%s19995_s3 + $0x1c38] sm:$0xff]  ;;  %v9676_v0 = vld [vmem:[%s19995_s3 + $0x1430] sm:$0xff]  ;;  %v3139_v15 = vld [vmem:[%s19995_s3 + $0x3c8] sm:$0xff] }
 0x286   :  { %4804 = vmatpush2.msra.mxu0 %v9700_v56  ;;  %4893 = vmatpush2.msra.mxu1 %v9956_v13  ;;  %v9932_v2 = vld [vmem:[%s19995_s3 + $0x1c30] sm:$0xff]  ;;  %v3395_v56 = vld [vmem:[%s19995_s3 + $0xbc8] sm:$0xff] }
 0x287   :  { %4805 = vmatprep.subr.mxu0 %v9693_v60  ;;  %4894 = vmatprep.subr.mxu1 %v9949_v45 }
 0x288   :  { %4806 = vmatpush2.msra.mxu0 %v9692_v32  ;;  %4895 = vmatpush2.msra.mxu1 %v9948_v25  ;;  %v3138_v32 = vld [vmem:[%s19995_s3 + $0x3c0] sm:$0xff] }
 0x289   :  { %4807 = vmatprep.subr.mxu0 %v9685_v28  ;;  %4896 = vmatprep.subr.mxu1 %v9941_v48  ;;  %v3394_v25 = vld [vmem:[%s19995_s3 + $0xbc0] sm:$0xff]  ;;  %v3131_v48 = vld [vmem:[%s19995_s3 + $0x388] sm:$0xff] }
 0x28a   :  { %4808 = vmatpush2.msra.mxu0 %v9684_v9  ;;  %4897 = vmatpush2.msra.mxu1 %v9940_v58  ;;  %v4291_v50 = vpop.f32.mrf.mxu0  ;;  %v4380_v8 = vpop.f32.mrf.mxu1  ;;  %v3386_v9 = vld [vmem:[%s19995_s3 + $0xb80] sm:$0xff] }
 0x28b   :  { %4809 = vmatprep.subr.mxu0 %v9677_v38  ;;  %4898 = vmatprep.subr.mxu1 %v9933_v49  ;;  %v14885_v13 = vadd.f32 %v4380_v8, %v4291_v50  ;;  %v3122_v50 = vld [vmem:[%s19995_s3 + $0x340] sm:$0xff] }
 0x28c   :  { %4810 = vmatpush2.msra.mxu0 %v9676_v0  ;;  %4899 = vmatpush2.msra.mxu1 %v9932_v2  ;;  %v4293_v60 = vpop.f32.mrf.mxu0  ;;  %v4382_v45 = vpop.f32.mrf.mxu1  ;;  %v3378_v8 = vld [vmem:[%s19995_s3 + $0xb40] sm:$0xff] }
 0x28d   :  { %4812 = vmatmul.mubr.f32.vlgmr.msra.gmra.mxu0 %v13487_v53  ;;  %4901 = vmatmul.mubr.f32.vlgmr.msra.gmra.mxu1 %v13540_v16  ;;  %v14895_v28 = vadd.f32 %v4382_v45, %v4293_v60  ;;  %v3387_v53 = vld [vmem:[%s19995_s3 + $0xb88] sm:$0xff]  ;;  %v3130_v16 = vld [vmem:[%s19995_s3 + $0x380] sm:$0xff] }
 0x28e   :  { %5081 = vmatprep.subr.mxu0 %v3139_v15  ;;  %5170 = vmatprep.subr.mxu1 %v3395_v56  ;;  %v3115_v56 = vld [vmem:[%s19995_s3 + $0x308] sm:$0xff]  ;;  %v3370_v60 = vld [vmem:[%s19995_s3 + $0xb00] sm:$0xff] }
 0x28f   :  { %4817 = vmatprep.mubr.f32.mxu0 %v13553_v63  ;;  %4906 = vmatprep.mubr.f32.mxu1 %v13555_v46  ;;  %v3123_v63 = vld [vmem:[%s19995_s3 + $0x348] sm:$0xff] }
 0x290   :  { %5082 = vmatpush1.msra.mxu0 %v3138_v32  ;;  %5171 = vmatpush1.msra.mxu1 %v3394_v25  ;;  %v4297_v58 = vpop.f32.mrf.mxu0  ;;  %v4386_v38 = vpop.f32.mrf.mxu1  ;;  %v3379_v46 = vld [vmem:[%s19995_s3 + $0xb48] sm:$0xff]  ;;  %v3362_v32 = vld [vmem:[%s19995_s3 + $0xac0] sm:$0xff] }
 0x291   :  { %5083 = vmatprep.subr.mxu0 %v3131_v48  ;;  %5172 = vmatprep.subr.mxu1 %v3387_v53  ;;  %v14917_v49 = vadd.f32 %v4386_v38, %v4297_v58  ;;  %v3107_v45 = vld [vmem:[%s19995_s3 + $0x2c8] sm:$0xff]  ;;  %v3354_v48 = vld [vmem:[%s19995_s3 + $0xa80] sm:$0xff] }
 0x292   :  { %5084 = vmatpush1.msra.mxu0 %v3130_v16  ;;  %5173 = vmatpush1.msra.mxu1 %v3386_v9  ;;  %v4299_v0 = vpop.f32.mrf.mxu0  ;;  %v4388_v2 = vpop.f32.mrf.mxu1  ;;  %v3099_v25 = vld [vmem:[%s19995_s3 + $0x288] sm:$0xff]  ;;  %v3346_v16 = vld [vmem:[%s19995_s3 + $0xa40] sm:$0xff] }
 0x293   :  { %4818 = vmatmul.mubr.f32.gmra.mxu0 %v13561_v34  ;;  %4907 = vmatmul.mubr.f32.gmra.mxu1 %v13563_v5  ;;  %v14927_v15 = vadd.f32 %v4388_v2, %v4299_v0  ;;  %v3371_v34 = vld [vmem:[%s19995_s3 + $0xb08] sm:$0xff]  ;;  %v3114_v5 = vld [vmem:[%s19995_s3 + $0x300] sm:$0xff] }
 0x294   :  { %5085 = vmatprep.subr.mxu0 %v3123_v63  ;;  %5174 = vmatprep.subr.mxu1 %v3379_v46  ;;  %v3091_v53 = vld [vmem:[%s19995_s3 + $0x248] sm:$0xff]  ;;  %v3074_v46 = vld [vmem:[%s19995_s3 + $0x1c0] sm:$0xff] }
 0x295   :  { %4823 = vmatprep.mubr.f32.mxu0 %v13595_v43  ;;  %4912 = vmatprep.mubr.f32.mxu1 %v13608_v1  ;;  %v3363_v43 = vld [vmem:[%s19995_s3 + $0xac8] sm:$0xff]  ;;  %v3106_v1 = vld [vmem:[%s19995_s3 + $0x2c0] sm:$0xff] }
 0x296   :  { %5086 = vmatpush1.msra.mxu0 %v3122_v50  ;;  %5175 = vmatpush1.msra.mxu1 %v3378_v8  ;;  %v3083_v9 = vld [vmem:[%s19995_s3 + $0x208] sm:$0xff]  ;;  %v3330_v0 = vld [vmem:[%s19995_s3 + $0x9c0] sm:$0xff] }
 0x297   :  { %5087 = vmatprep.subr.mxu0 %v3115_v56  ;;  %5176 = vmatprep.subr.mxu1 %v3371_v34  ;;  %v3339_v58 = vld [vmem:[%s19995_s3 + $0xa08] sm:$0xff]  ;;  %v3066_v8 = vld [vmem:[%s19995_s3 + $0x180] sm:$0xff] }
 0x298   :  { %5088 = vmatpush1.msra.mxu0 %v3114_v5  ;;  %5177 = vmatpush1.msra.mxu1 %v3370_v60  ;;  %v3075_v38 = vld [vmem:[%s19995_s3 + $0x1c8] sm:$0xff]  ;;  %v3322_v56 = vld [vmem:[%s19995_s3 + $0x980] sm:$0xff] }
 0x299   :  { %4824 = vmatmul.mubr.f32.gmra.mxu0 %v13597_v35  ;;  %4913 = vmatmul.mubr.f32.gmra.mxu1 %v13610_v59  ;;  %v3355_v35 = vld [vmem:[%s19995_s3 + $0xa88] sm:$0xff]  ;;  %v3098_v59 = vld [vmem:[%s19995_s3 + $0x280] sm:$0xff] }
 0x29a   :  { %5089 = vmatprep.subr.mxu0 %v3107_v45  ;;  %5178 = vmatprep.subr.mxu1 %v3363_v43  ;;  %v3331_v63 = vld [vmem:[%s19995_s3 + $0x9c8] sm:$0xff]  ;;  %v3058_v60 = vld [vmem:[%s19995_s3 + $0x140] sm:$0xff] }
 0x29b   :  { %4829 = vmatprep.mubr.f32.mxu0 %v13730_v24  ;;  %4918 = vmatprep.mubr.f32.mxu1 %v13745_v14  ;;  %v3347_v24 = vld [vmem:[%s19995_s3 + $0xa48] sm:$0xff]  ;;  %v3090_v14 = vld [vmem:[%s19995_s3 + $0x240] sm:$0xff] }
 0x29c   :  { %5090 = vmatpush1.msra.mxu0 %v3106_v1  ;;  %5179 = vmatpush1.msra.mxu1 %v3362_v32  ;;  %v3067_v2 = vld [vmem:[%s19995_s3 + $0x188] sm:$0xff]  ;;  %v3314_v45 = vld [vmem:[%s19995_s3 + $0x940] sm:$0xff] }
 0x29d   :  { %5091 = vmatprep.subr.mxu0 %v3099_v25  ;;  %5180 = vmatprep.subr.mxu1 %v3355_v35  ;;  %v3323_v50 = vld [vmem:[%s19995_s3 + $0x988] sm:$0xff]  ;;  %v3050_v32 = vld [vmem:[%s19995_s3 + $0x100] sm:$0xff] }
 0x29e   :  { %5092 = vmatpush1.msra.mxu0 %v3098_v59  ;;  %5181 = vmatpush1.msra.mxu1 %v3354_v48  ;;  %v3059_v34 = vld [vmem:[%s19995_s3 + $0x148] sm:$0xff]  ;;  %v3306_v25 = vld [vmem:[%s19995_s3 + $0x900] sm:$0xff] }
 0x29f   :  { %4830 = vmatmul.mubr.f32.gmra.mxu0 %v13600_v26  ;;  %4919 = vmatmul.mubr.f32.gmra.mxu1 %v13613_v57  ;;  %v3082_v26 = vld [vmem:[%s19995_s3 + $0x200] sm:$0xff]  ;;  %v3315_v5 = vld [vmem:[%s19995_s3 + $0x948] sm:$0xff] }
 0x2a0   :  { %5093 = vmatprep.subr.mxu0 %v3091_v53  ;;  %5182 = vmatprep.subr.mxu1 %v3347_v24  ;;  %v3338_v57 = vld [vmem:[%s19995_s3 + $0xa00] sm:$0xff]  ;;  %v3051_v43 = vld [vmem:[%s19995_s3 + $0x108] sm:$0xff] }
 0x2a1   :  { %5094 = vmatpush1.msra.mxu0 %v3090_v14  ;;  %5145 = vmatprep.mubr.f32.mxu0 %v13677_v37  ;;  %v3307_v1 = vld [vmem:[%s19995_s3 + $0x908] sm:$0xff]  ;;  %v3042_v48 = vld [vmem:[%s19995_s3 + $0xc0] sm:$0xff] }
 0x2a2   :  { %5183 = vmatpush1.msra.mxu1 %v3346_v16  ;;  %5234 = vmatprep.mubr.f32.mxu1 %v13691_v3  ;;  %v3043_v35 = vld [vmem:[%s19995_s3 + $0xc8] sm:$0xff]  ;;  %v3298_v53 = vld [vmem:[%s19995_s3 + $0x8c0] sm:$0xff] }
 0x2a3   :  { %5095 = vmatprep.subr.mxu0 %v3083_v9  ;;  %5184 = vmatprep.subr.mxu1 %v3339_v58  ;;  %v3299_v59 = vld [vmem:[%s19995_s3 + $0x8c8] sm:$0xff]  ;;  %v3034_v16 = vld [vmem:[%s19995_s3 + $0x80] sm:$0xff] }
 0x2a4   :  { %5096 = vmatpush1.msra.mxu0 %v3082_v26  ;;  %5185 = vmatpush1.msra.mxu1 %v3338_v57  ;;  %v3035_v24 = vld [vmem:[%s19995_s3 + $0x88] sm:$0xff]  ;;  %v3290_v9 = vld [vmem:[%s19995_s3 + $0x880] sm:$0xff] }
 0x2a5   :  { %5097 = vmatprep.subr.mxu0 %v3075_v38  ;;  %5186 = vmatprep.subr.mxu1 %v3331_v63  ;;  %v3291_v14 = vld [vmem:[%s19995_s3 + $0x888] sm:$0xff]  ;;  %v3026_v57 = vld [vmem:[%s19995_s3 + $0x40] sm:$0xff] }
 0x2a6   :  { %5098 = vmatpush1.msra.mxu0 %v3074_v46  ;;  %5187 = vmatpush1.msra.mxu1 %v3330_v0  ;;  %v3027_v58 = vld [vmem:[%s19995_s3 + $0x48] sm:$0xff]  ;;  %v3282_v38 = vld [vmem:[%s19995_s3 + $0x840] sm:$0xff] }
 0x2a7   :  { %5099 = vmatprep.subr.mxu0 %v3067_v2  ;;  %5188 = vmatprep.subr.mxu1 %v3323_v50  ;;  %v3283_v26 = vld [vmem:[%s19995_s3 + $0x848] sm:$0xff]  ;;  %v3018_v0 = vld [vmem:[%s19995_s3] sm:$0xff] }
 0x2a8   :  { %5100 = vmatpush1.msra.mxu0 %v3066_v8  ;;  %5189 = vmatpush1.msra.mxu1 %v3322_v56  ;;  %v3019_v63 = vld [vmem:[%s19995_s3 + $0x8] sm:$0xff]  ;;  %v3274_v2 = vld [vmem:[%s19995_s3 + $0x800] sm:$0xff] }
 0x2a9   :  { %5101 = vmatprep.subr.mxu0 %v3059_v34  ;;  %5190 = vmatprep.subr.mxu1 %v3315_v5  ;;  %v3275_v46 = vld [vmem:[%s19995_s3 + $0x808] sm:$0xff]  ;;  %v3266_v56 = vld [vmem:[%s19995_s3 + $0x7c0] sm:$0xff] }
 0x2aa   :  { %5102 = vmatpush1.msra.mxu0 %v3058_v60  ;;  %5191 = vmatpush1.msra.mxu1 %v3314_v45  ;;  %v3267_v50 = vld [vmem:[%s19995_s3 + $0x7c8] sm:$0xff]  ;;  %v3522_v34 = vld [vmem:[%s19995_s3 + $0xfc0] sm:$0xff] }
 0x2ab   :  { %5103 = vmatprep.subr.mxu0 %v3051_v43  ;;  %5192 = vmatprep.subr.mxu1 %v3307_v1  ;;  %v3523_v8 = vld [vmem:[%s19995_s3 + $0xfc8] sm:$0xff]  ;;  %v3258_v45 = vld [vmem:[%s19995_s3 + $0x780] sm:$0xff] }
 0x2ac   :  { %5104 = vmatpush1.msra.mxu0 %v3050_v32  ;;  %5193 = vmatpush1.msra.mxu1 %v3306_v25  ;;  %v3259_v5 = vld [vmem:[%s19995_s3 + $0x788] sm:$0xff]  ;;  %v3514_v43 = vld [vmem:[%s19995_s3 + $0xf80] sm:$0xff] }
 0x2ad   :  { %5105 = vmatprep.subr.mxu0 %v3043_v35  ;;  %5194 = vmatprep.subr.mxu1 %v3299_v59  ;;  %v3515_v60 = vld [vmem:[%s19995_s3 + $0xf88] sm:$0xff]  ;;  %v3250_v25 = vld [vmem:[%s19995_s3 + $0x740] sm:$0xff] }
 0x2ae   :  { %5106 = vmatpush1.msra.mxu0 %v3042_v48  ;;  %5195 = vmatpush1.msra.mxu1 %v3298_v53  ;;  %v3251_v1 = vld [vmem:[%s19995_s3 + $0x748] sm:$0xff]  ;;  %v3506_v35 = vld [vmem:[%s19995_s3 + $0xf40] sm:$0xff] }
 0x2af   :  { %5107 = vmatprep.subr.mxu0 %v3035_v24  ;;  %5196 = vmatprep.subr.mxu1 %v3291_v14  ;;  %v3507_v32 = vld [vmem:[%s19995_s3 + $0xf48] sm:$0xff]  ;;  %v3242_v53 = vld [vmem:[%s19995_s3 + $0x700] sm:$0xff] }
 0x2b0   :  { %5108 = vmatpush1.msra.mxu0 %v3034_v16  ;;  %5197 = vmatpush1.msra.mxu1 %v3290_v9  ;;  %v3243_v59 = vld [vmem:[%s19995_s3 + $0x708] sm:$0xff]  ;;  %v3498_v24 = vld [vmem:[%s19995_s3 + $0xf00] sm:$0xff] }
 0x2b1   :  { %5109 = vmatprep.subr.mxu0 %v3027_v58  ;;  %5198 = vmatprep.subr.mxu1 %v3283_v26  ;;  %v3499_v48 = vld [vmem:[%s19995_s3 + $0xf08] sm:$0xff]  ;;  %v3234_v9 = vld [vmem:[%s19995_s3 + $0x6c0] sm:$0xff] }
 0x2b2   :  { %5110 = vmatpush1.msra.mxu0 %v3026_v57  ;;  %5199 = vmatpush1.msra.mxu1 %v3282_v38  ;;  %v3235_v14 = vld [vmem:[%s19995_s3 + $0x6c8] sm:$0xff]  ;;  %v3490_v58 = vld [vmem:[%s19995_s3 + $0xec0] sm:$0xff] }
 0x2b3   :  { %5111 = vmatprep.subr.mxu0 %v3019_v63  ;;  %5200 = vmatprep.subr.mxu1 %v3275_v46  ;;  %v3491_v16 = vld [vmem:[%s19995_s3 + $0xec8] sm:$0xff]  ;;  %v3226_v38 = vld [vmem:[%s19995_s3 + $0x680] sm:$0xff] }
 0x2b4   :  { %5112 = vmatpush1.msra.mxu0 %v3018_v0  ;;  %5201 = vmatpush1.msra.mxu1 %v3274_v2  ;;  %v3227_v26 = vld [vmem:[%s19995_s3 + $0x688] sm:$0xff]  ;;  %v3482_v63 = vld [vmem:[%s19995_s3 + $0xe80] sm:$0xff] }
 0x2b5   :  { %5113 = vmatprep.subr.mxu0 %v3267_v50  ;;  %5202 = vmatprep.subr.mxu1 %v3523_v8  ;;  %v3483_v57 = vld [vmem:[%s19995_s3 + $0xe88] sm:$0xff] }
 0x2b6   :  { %5114 = vmatpush2.msra.mxu0 %v3266_v56  ;;  %5203 = vmatpush2.msra.mxu1 %v3522_v34  ;;  %v3219_v2 = vld [vmem:[%s19995_s3 + $0x648] sm:$0xff]  ;;  %v3218_v56 = vld [vmem:[%s19995_s3 + $0x640] sm:$0xff] }
 0x2b7   :  { %5115 = vmatprep.subr.mxu0 %v3259_v5  ;;  %5204 = vmatprep.subr.mxu1 %v3515_v60  ;;  %v3475_v50 = vld [vmem:[%s19995_s3 + $0xe48] sm:$0xff]  ;;  %v3474_v34 = vld [vmem:[%s19995_s3 + $0xe40] sm:$0xff] }
 0x2b8   :  { %5116 = vmatpush2.msra.mxu0 %v3258_v45  ;;  %5205 = vmatpush2.msra.mxu1 %v3514_v43  ;;  %v3211_v45 = vld [vmem:[%s19995_s3 + $0x608] sm:$0xff] }
 0x2b9   :  { %5117 = vmatprep.subr.mxu0 %v3251_v1  ;;  %5206 = vmatprep.subr.mxu1 %v3507_v32  ;;  %v3467_v43 = vld [vmem:[%s19995_s3 + $0xe08] sm:$0xff]  ;;  %v3210_v32 = vld [vmem:[%s19995_s3 + $0x600] sm:$0xff] }
 0x2ba   :  { %5118 = vmatpush2.msra.mxu0 %v3250_v25  ;;  %5207 = vmatpush2.msra.mxu1 %v3506_v35  ;;  %v3466_v25 = vld [vmem:[%s19995_s3 + $0xe00] sm:$0xff]  ;;  %v3203_v35 = vld [vmem:[%s19995_s3 + $0x5c8] sm:$0xff] }
 0x2bb   :  { %5119 = vmatprep.subr.mxu0 %v3243_v59  ;;  %5208 = vmatprep.subr.mxu1 %v3499_v48  ;;  %v3459_v59 = vld [vmem:[%s19995_s3 + $0xdc8] sm:$0xff]  ;;  %v3202_v48 = vld [vmem:[%s19995_s3 + $0x5c0] sm:$0xff] }
 0x2bc   :  { %5120 = vmatpush2.msra.mxu0 %v3242_v53  ;;  %5209 = vmatpush2.msra.mxu1 %v3498_v24  ;;  %v3458_v53 = vld [vmem:[%s19995_s3 + $0xdc0] sm:$0xff] }
 0x2bd   :  { %5121 = vmatprep.subr.mxu0 %v3235_v14  ;;  %5210 = vmatprep.subr.mxu1 %v3491_v16  ;;  %v4457_v46 = vpop.f32.mrf.mxu0  ;;  %v4546_v0 = vpop.f32.mrf.mxu1  ;;  %v3195_v16 = vld [vmem:[%s19995_s3 + $0x588] sm:$0xff] }
 0x2be   :  { %5122 = vmatpush2.msra.mxu0 %v3234_v9  ;;  %5211 = vmatpush2.msra.mxu1 %v3490_v58  ;;  %v15173_v8 = vadd.f32 %v4546_v0, %v4457_v46  ;;  %v3451_v9 = vld [vmem:[%s19995_s3 + $0xd88] sm:$0xff] }
 0x2bf   :  { %5123 = vmatprep.subr.mxu0 %v3227_v26  ;;  %5212 = vmatprep.subr.mxu1 %v3483_v57  ;;  %v4459_v5 = vpop.f32.mrf.mxu0  ;;  %v4548_v60 = vpop.f32.mrf.mxu1  ;;  %v3194_v26 = vld [vmem:[%s19995_s3 + $0x580] sm:$0xff]  ;;  %v3187_v46 = vld [vmem:[%s19995_s3 + $0x548] sm:$0xff] }
 0x2c0   :  { %5124 = vmatpush2.msra.mxu0 %v3226_v38  ;;  %5213 = vmatpush2.msra.mxu1 %v3482_v63  ;;  %v15187_v1 = vadd.f32 %v4548_v60, %v4459_v5  ;;  %v3450_v57 = vld [vmem:[%s19995_s3 + $0xd80] sm:$0xff]  ;;  %v3443_v0 = vld [vmem:[%s19995_s3 + $0xd48] sm:$0xff] }
 0x2c1   :  { %5125 = vmatprep.subr.mxu0 %v3219_v2  ;;  %5214 = vmatprep.subr.mxu1 %v3475_v50  ;;  %v3186_v50 = vld [vmem:[%s19995_s3 + $0x540] sm:$0xff]  ;;  %v3435_v5 = vld [vmem:[%s19995_s3 + $0xd08] sm:$0xff] }
 0x2c2   :  { %5126 = vmatpush2.msra.mxu0 %v3218_v56  ;;  %5215 = vmatpush2.msra.mxu1 %v3474_v34  ;;  %v3442_v56 = vld [vmem:[%s19995_s3 + $0xd40] sm:$0xff]  ;;  %v3179_v34 = vld [vmem:[%s19995_s3 + $0x508] sm:$0xff] }
 0x2c3   :  { %5127 = vmatprep.subr.mxu0 %v3211_v45  ;;  %5216 = vmatprep.subr.mxu1 %v3467_v43  ;;  %v4463_v24 = vpop.f32.mrf.mxu0  ;;  %v4552_v14 = vpop.f32.mrf.mxu1  ;;  %v3178_v60 = vld [vmem:[%s19995_s3 + $0x500] sm:$0xff] }
 0x2c4   :  { %5128 = vmatpush2.msra.mxu0 %v3210_v32  ;;  %5217 = vmatpush2.msra.mxu1 %v3466_v25  ;;  %v15213_v58 = vadd.f32 %v4552_v14, %v4463_v24  ;;  %v3434_v45 = vld [vmem:[%s19995_s3 + $0xd00] sm:$0xff]  ;;  %v3171_v25 = vld [vmem:[%s19995_s3 + $0x4c8] sm:$0xff] }
 0x2c5   :  { %5129 = vmatprep.subr.mxu0 %v3203_v35  ;;  %5218 = vmatprep.subr.mxu1 %v3459_v59  ;;  %v4465_v38 = vpop.f32.mrf.mxu0  ;;  %v4554_v63 = vpop.f32.mrf.mxu1  ;;  %v3427_v35 = vld [vmem:[%s19995_s3 + $0xcc8] sm:$0xff] }
 0x2c6   :  { %5130 = vmatpush2.msra.mxu0 %v3202_v48  ;;  %5219 = vmatpush2.msra.mxu1 %v3458_v53  ;;  %v15227_v2 = vadd.f32 %v4554_v63, %v4465_v38  ;;  %v3170_v48 = vld [vmem:[%s19995_s3 + $0x4c0] sm:$0xff]  ;;  %v3155_v63 = vld [vmem:[%s19995_s3 + $0x448] sm:$0xff] }
 0x2c7   :  { %5131 = vmatprep.subr.mxu0 %v3195_v16  ;;  %5220 = vmatprep.subr.mxu1 %v3451_v9  ;;  %v3426_v53 = vld [vmem:[%s19995_s3 + $0xcc0] sm:$0xff]  ;;  %v3163_v16 = vld [vmem:[%s19995_s3 + $0x488] sm:$0xff] }
 0x2c8   :  { %5132 = vmatpush2.msra.mxu0 %v3194_v26  ;;  %5221 = vmatpush2.msra.mxu1 %v3450_v57  ;;  %v3419_v9 = vld [vmem:[%s19995_s3 + $0xc88] sm:$0xff]  ;;  %v3162_v57 = vld [vmem:[%s19995_s3 + $0x480] sm:$0xff] }
 0x2c9   :  { %5133 = vmatprep.subr.mxu0 %v3187_v46  ;;  %5222 = vmatprep.subr.mxu1 %v3443_v0  ;;  %v4469_v43 = vpop.f32.mrf.mxu0  ;;  %v4558_v32 = vpop.f32.mrf.mxu1  ;;  %v3418_v38 = vld [vmem:[%s19995_s3 + $0xc80] sm:$0xff]  ;;  %v3411_v46 = vld [vmem:[%s19995_s3 + $0xc48] sm:$0xff] }
 0x2ca   :  { %5134 = vmatpush2.msra.mxu0 %v3186_v50  ;;  %5223 = vmatpush2.msra.mxu1 %v3442_v56  ;;  %v15253_v59 = vadd.f32 %v4558_v32, %v4469_v43  ;;  %v3154_v0 = vld [vmem:[%s19995_s3 + $0x440] sm:$0xff] }
 0x2cb   :  { %5135 = vmatprep.subr.mxu0 %v3179_v34  ;;  %5224 = vmatprep.subr.mxu1 %v3435_v5  ;;  %v4471_v24 = vpop.f32.mrf.mxu0  ;;  %v4560_v14 = vpop.f32.mrf.mxu1  ;;  %v3410_v50 = vld [vmem:[%s19995_s3 + $0xc40] sm:$0xff]  ;;  %v3147_v5 = vld [vmem:[%s19995_s3 + $0x408] sm:$0xff] }
 0x2cc   :  { %5136 = vmatpush2.msra.mxu0 %v3178_v60  ;;  %5225 = vmatpush2.msra.mxu1 %v3434_v45  ;;  %v15267_v26 = vadd.f32 %v4560_v14, %v4471_v24  ;;  %v3403_v60 = vld [vmem:[%s19995_s3 + $0xc08] sm:$0xff]  ;;  %v3146_v43 = vld [vmem:[%s19995_s3 + $0x400] sm:$0xff]  ;;  %v3397_v24 = vld [vmem:[%s19995_s3 + $0xbd8] sm:$0xff] }
 0x2cd   :  { %5137 = vmatprep.subr.mxu0 %v3171_v25  ;;  %5226 = vmatprep.subr.mxu1 %v3427_v35  ;;  %v3402_v32 = vld [vmem:[%s19995_s3 + $0xc00] sm:$0xff]  ;;  %v3140_v14 = vld [vmem:[%s19995_s3 + $0x3d0] sm:$0xff] }
 0x2ce   :  { %5138 = vmatpush2.msra.mxu0 %v3170_v48  ;;  %5227 = vmatpush2.msra.mxu1 %v3426_v53  ;;  %v3141_v53 = vld [vmem:[%s19995_s3 + $0x3d8] sm:$0xff] }
 0x2cf   :  { %5139 = vmatprep.subr.mxu0 %v3163_v16  ;;  %5228 = vmatprep.subr.mxu1 %v3419_v9  ;;  %v4475_v56 = vpop.f32.mrf.mxu0  ;;  %v4564_v34 = vpop.f32.mrf.mxu1  ;;  %v3396_v16 = vld [vmem:[%s19995_s3 + $0xbd0] sm:$0xff]  ;;  %v3133_v9 = vld [vmem:[%s19995_s3 + $0x398] sm:$0xff] }
 0x2d0   :  { %5140 = vmatpush2.msra.mxu0 %v3162_v57  ;;  %5229 = vmatpush2.msra.mxu1 %v3418_v38  ;;  %v15293_v45 = vadd.f32 %v4564_v34, %v4475_v56  ;;  %v3389_v57 = vld [vmem:[%s19995_s3 + $0xb98] sm:$0xff]  ;;  %v3132_v38 = vld [vmem:[%s19995_s3 + $0x390] sm:$0xff] }
 0x2d1   :  { %5141 = vmatprep.subr.mxu0 %v3155_v63  ;;  %5230 = vmatprep.subr.mxu1 %v3411_v46  ;;  %v4477_v25 = vpop.f32.mrf.mxu0  ;;  %v4566_v35 = vpop.f32.mrf.mxu1  ;;  %v3388_v63 = vld [vmem:[%s19995_s3 + $0xb90] sm:$0xff]  ;;  %v3125_v46 = vld [vmem:[%s19995_s3 + $0x358] sm:$0xff] }
 0x2d2   :  { %5142 = vmatpush2.msra.mxu0 %v3154_v0  ;;  %5231 = vmatpush2.msra.mxu1 %v3410_v50  ;;  %v15301_v48 = vadd.f32 %v4566_v35, %v4477_v25  ;;  %v3381_v0 = vld [vmem:[%s19995_s3 + $0xb58] sm:$0xff]  ;;  %v3124_v50 = vld [vmem:[%s19995_s3 + $0x350] sm:$0xff] }
 0x2d3   :  { %5143 = vmatprep.subr.mxu0 %v3147_v5  ;;  %5232 = vmatprep.subr.mxu1 %v3403_v60  ;;  %v3380_v56 = vld [vmem:[%s19995_s3 + $0xb50] sm:$0xff]  ;;  %v3117_v34 = vld [vmem:[%s19995_s3 + $0x318] sm:$0xff]  ;;  %v15355_v60 = vrot.slane %v5047_v62, %v20075_v31 }
 0x2d4   :  { %5144 = vmatpush2.msra.mxu0 %v3146_v43  ;;  %5233 = vmatpush2.msra.mxu1 %v3402_v32  ;;  %v3373_v5 = vld [vmem:[%s19995_s3 + $0xb18] sm:$0xff]  ;;  %v15361_v43 = vrot.slane %v5048_v6, %v20075_v31  ;;  %v3116_v32 = vld [vmem:[%s19995_s3 + $0x310] sm:$0xff] }
 0x2d5   :  { %5146 = vmatmul.mubr.f32.vlgmr.msra.gmra.mxu0 %v13674_v47  ;;  %5235 = vmatmul.mubr.f32.vlgmr.msra.gmra.mxu1 %v13688_v17  ;;  %v3372_v25 = vld [vmem:[%s19995_s3 + $0xb10] sm:$0xff]  ;;  %v15381_v62 = vcombine.high %v15355_v60, %v15355_v60 }
 0x2d6   :  { %5259 = vmatprep.subr.mxu0 %v3141_v53  ;;  %5348 = vmatprep.subr.mxu1 %v3397_v24  ;;  %v15385_v6 = vcombine.high %v15361_v43, %v15361_v43  ;;  %v3108_v35 = vld [vmem:[%s19995_s3 + $0x2d0] sm:$0xff]  ;;  %v3101_v24 = vld [vmem:[%s19995_s3 + $0x298] sm:$0xff] }
 0x2d7   :  { %5151 = vmatprep.mubr.f32.mxu0 %v13695_v55  ;;  %5240 = vmatprep.mubr.f32.mxu1 %v13721_v7  ;;  %v3364_v53 = vld [vmem:[%s19995_s3 + $0xad0] sm:$0xff] }
 0x2d8   :  { %5260 = vmatpush1.msra.mxu0 %v3140_v14  ;;  %5349 = vmatpush1.msra.mxu1 %v3396_v16  ;;  %v3357_v14 = vld [vmem:[%s19995_s3 + $0xa98] sm:$0xff]  ;;  %v3100_v16 = vld [vmem:[%s19995_s3 + $0x290] sm:$0xff] }
 0x2d9   :  { %5261 = vmatprep.subr.mxu0 %v3133_v9  ;;  %5350 = vmatprep.subr.mxu1 %v3389_v57  ;;  %v3356_v9 = vld [vmem:[%s19995_s3 + $0xa90] sm:$0xff]  ;;  %v3093_v57 = vld [vmem:[%s19995_s3 + $0x258] sm:$0xff] }
 0x2da   :  { %5262 = vmatpush1.msra.mxu0 %v3132_v38  ;;  %5351 = vmatpush1.msra.mxu1 %v3388_v63  ;;  %v3349_v38 = vld [vmem:[%s19995_s3 + $0xa58] sm:$0xff]  ;;  %v3092_v63 = vld [vmem:[%s19995_s3 + $0x250] sm:$0xff] }
 0x2db   :  { %5152 = vmatmul.mubr.f32.gmra.mxu0 %v13704_v42  ;;  %5241 = vmatmul.mubr.f32.gmra.mxu1 %v13723_v22 }
 0x2dc   :  { %5263 = vmatprep.subr.mxu0 %v3125_v46  ;;  %5352 = vmatprep.subr.mxu1 %v3381_v0  ;;  %v3348_v46 = vld [vmem:[%s19995_s3 + $0xa50] sm:$0xff]  ;;  %v3085_v0 = vld [vmem:[%s19995_s3 + $0x218] sm:$0xff] }
 0x2dd   :  { %5157 = vmatprep.mubr.f32.mxu0 %v13758_v27  ;;  %5246 = vmatprep.mubr.f32.mxu1 %v13776_v18 }
 0x2de   :  { %5264 = vmatpush1.msra.mxu0 %v3124_v50  ;;  %5353 = vmatpush1.msra.mxu1 %v3380_v56  ;;  %v3341_v50 = vld [vmem:[%s19995_s3 + $0xa18] sm:$0xff]  ;;  %v3084_v56 = vld [vmem:[%s19995_s3 + $0x210] sm:$0xff] }
 0x2df   :  { %5265 = vmatprep.subr.mxu0 %v3117_v34  ;;  %5354 = vmatprep.subr.mxu1 %v3373_v5  ;;  %v3340_v34 = vld [vmem:[%s19995_s3 + $0xa10] sm:$0xff]  ;;  %v3077_v5 = vld [vmem:[%s19995_s3 + $0x1d8] sm:$0xff] }
 0x2e0   :  { %5266 = vmatpush1.msra.mxu0 %v3116_v32  ;;  %5355 = vmatpush1.msra.mxu1 %v3372_v25  ;;  %v3333_v32 = vld [vmem:[%s19995_s3 + $0x9d8] sm:$0xff]  ;;  %v3076_v25 = vld [vmem:[%s19995_s3 + $0x1d0] sm:$0xff] }
 0x2e1   :  { %5158 = vmatmul.mubr.f32.gmra.mxu0 %v13761_v11  ;;  %5247 = vmatmul.mubr.f32.gmra.mxu1 %v13779_v61 }
 0x2e2   :  { %5267 = vmatprep.subr.mxu0 %v3109_v4  ;;  %5356 = vmatprep.subr.mxu1 %v3365_v44  ;;  %v3332_v4 = vld [vmem:[%s19995_s3 + $0x9d0] sm:$0xff]  ;;  %v3069_v44 = vld [vmem:[%s19995_s3 + $0x198] sm:$0xff] }
 0x2e3   :  { %5163 = vmatprep.mubr.f32.mxu0 %v15381_v62  ;;  %5252 = vmatprep.mubr.f32.mxu1 %v15385_v6 }
 0x2e4   :  { %5268 = vmatpush1.msra.mxu0 %v3108_v35  ;;  %5357 = vmatpush1.msra.mxu1 %v3364_v53  ;;  %v3325_v35 = vld [vmem:[%s19995_s3 + $0x998] sm:$0xff]  ;;  %v3068_v53 = vld [vmem:[%s19995_s3 + $0x190] sm:$0xff] }
 0x2e5   :  { %5269 = vmatprep.subr.mxu0 %v3101_v24  ;;  %5358 = vmatprep.subr.mxu1 %v3357_v14  ;;  %v3324_v24 = vld [vmem:[%s19995_s3 + $0x990] sm:$0xff]  ;;  %v3061_v14 = vld [vmem:[%s19995_s3 + $0x158] sm:$0xff] }
 0x2e6   :  { %5270 = vmatpush1.msra.mxu0 %v3100_v16  ;;  %5359 = vmatpush1.msra.mxu1 %v3356_v9  ;;  %v3317_v16 = vld [vmem:[%s19995_s3 + $0x958] sm:$0xff]  ;;  %v3060_v9 = vld [vmem:[%s19995_s3 + $0x150] sm:$0xff] }
 0x2e7   :  { %5164 = vmatmul.mubr.f32.gmra.mxu0 %v15355_v60  ;;  %5253 = vmatmul.mubr.f32.gmra.mxu1 %v15361_v43 }
 0x2e8   :  { %5271 = vmatprep.subr.mxu0 %v3093_v57  ;;  %5360 = vmatprep.subr.mxu1 %v3349_v38  ;;  %v3316_v57 = vld [vmem:[%s19995_s3 + $0x950] sm:$0xff]  ;;  %v3053_v38 = vld [vmem:[%s19995_s3 + $0x118] sm:$0xff] }
 0x2e9   :  { %5272 = vmatpush1.msra.mxu0 %v3092_v63  ;;  %5323 = vmatprep.mubr.f32.mxu0 %v13677_v37  ;;  %v3309_v63 = vld [vmem:[%s19995_s3 + $0x918] sm:$0xff] }
 0x2ea   :  { %5361 = vmatpush1.msra.mxu1 %v3348_v46  ;;  %5412 = vmatprep.mubr.f32.mxu1 %v13691_v3  ;;  %v3052_v46 = vld [vmem:[%s19995_s3 + $0x110] sm:$0xff] }
 0x2eb   :  { %5273 = vmatprep.subr.mxu0 %v3085_v0  ;;  %5362 = vmatprep.subr.mxu1 %v3341_v50  ;;  %v3308_v0 = vld [vmem:[%s19995_s3 + $0x910] sm:$0xff]  ;;  %v3045_v50 = vld [vmem:[%s19995_s3 + $0xd8] sm:$0xff] }
 0x2ec   :  { %5274 = vmatpush1.msra.mxu0 %v3084_v56  ;;  %5363 = vmatpush1.msra.mxu1 %v3340_v34  ;;  %v3301_v56 = vld [vmem:[%s19995_s3 + $0x8d8] sm:$0xff]  ;;  %v3044_v34 = vld [vmem:[%s19995_s3 + $0xd0] sm:$0xff] }
 0x2ed   :  { %5275 = vmatprep.subr.mxu0 %v3077_v5  ;;  %5364 = vmatprep.subr.mxu1 %v3333_v32  ;;  %v3300_v5 = vld [vmem:[%s19995_s3 + $0x8d0] sm:$0xff]  ;;  %v3037_v32 = vld [vmem:[%s19995_s3 + $0x98] sm:$0xff] }
 0x2ee   :  { %5276 = vmatpush1.msra.mxu0 %v3076_v25  ;;  %5365 = vmatpush1.msra.mxu1 %v3332_v4  ;;  %v3293_v25 = vld [vmem:[%s19995_s3 + $0x898] sm:$0xff]  ;;  %v3036_v4 = vld [vmem:[%s19995_s3 + $0x90] sm:$0xff] }
 0x2ef   :  { %5277 = vmatprep.subr.mxu0 %v3069_v44  ;;  %5366 = vmatprep.subr.mxu1 %v3325_v35  ;;  %v3292_v44 = vld [vmem:[%s19995_s3 + $0x890] sm:$0xff]  ;;  %v3029_v35 = vld [vmem:[%s19995_s3 + $0x58] sm:$0xff] }
 0x2f0   :  { %5278 = vmatpush1.msra.mxu0 %v3068_v53  ;;  %5367 = vmatpush1.msra.mxu1 %v3324_v24  ;;  %v3285_v53 = vld [vmem:[%s19995_s3 + $0x858] sm:$0xff]  ;;  %v3028_v24 = vld [vmem:[%s19995_s3 + $0x50] sm:$0xff] }
 0x2f1   :  { %5279 = vmatprep.subr.mxu0 %v3061_v14  ;;  %5368 = vmatprep.subr.mxu1 %v3317_v16  ;;  %v3284_v14 = vld [vmem:[%s19995_s3 + $0x850] sm:$0xff]  ;;  %v3021_v16 = vld [vmem:[%s19995_s3 + $0x18] sm:$0xff] }
 0x2f2   :  { %5280 = vmatpush1.msra.mxu0 %v3060_v9  ;;  %5369 = vmatpush1.msra.mxu1 %v3316_v57  ;;  %v3277_v9 = vld [vmem:[%s19995_s3 + $0x818] sm:$0xff]  ;;  %v3020_v57 = vld [vmem:[%s19995_s3 + $0x10] sm:$0xff] }
 0x2f3   :  { %5281 = vmatprep.subr.mxu0 %v3053_v38  ;;  %5370 = vmatprep.subr.mxu1 %v3309_v63  ;;  %v3276_v38 = vld [vmem:[%s19995_s3 + $0x810] sm:$0xff]  ;;  %v3269_v63 = vld [vmem:[%s19995_s3 + $0x7d8] sm:$0xff] }
 0x2f4   :  { %5282 = vmatpush1.msra.mxu0 %v3052_v46  ;;  %5371 = vmatpush1.msra.mxu1 %v3308_v0  ;;  %v3525_v46 = vld [vmem:[%s19995_s3 + $0xfd8] sm:$0xff]  ;;  %v3268_v0 = vld [vmem:[%s19995_s3 + $0x7d0] sm:$0xff] }
 0x2f5   :  { %5283 = vmatprep.subr.mxu0 %v3045_v50  ;;  %5372 = vmatprep.subr.mxu1 %v3301_v56  ;;  %v3524_v50 = vld [vmem:[%s19995_s3 + $0xfd0] sm:$0xff]  ;;  %v3261_v56 = vld [vmem:[%s19995_s3 + $0x798] sm:$0xff] }
 0x2f6   :  { %5284 = vmatpush1.msra.mxu0 %v3044_v34  ;;  %5373 = vmatpush1.msra.mxu1 %v3300_v5  ;;  %v3517_v34 = vld [vmem:[%s19995_s3 + $0xf98] sm:$0xff]  ;;  %v3260_v5 = vld [vmem:[%s19995_s3 + $0x790] sm:$0xff] }
 0x2f7   :  { %5285 = vmatprep.subr.mxu0 %v3037_v32  ;;  %5374 = vmatprep.subr.mxu1 %v3293_v25  ;;  %v3516_v32 = vld [vmem:[%s19995_s3 + $0xf90] sm:$0xff]  ;;  %v3253_v25 = vld [vmem:[%s19995_s3 + $0x758] sm:$0xff] }
 0x2f8   :  { %5286 = vmatpush1.msra.mxu0 %v3036_v4  ;;  %5375 = vmatpush1.msra.mxu1 %v3292_v44  ;;  %v3509_v4 = vld [vmem:[%s19995_s3 + $0xf58] sm:$0xff]  ;;  %v3252_v44 = vld [vmem:[%s19995_s3 + $0x750] sm:$0xff] }
 0x2f9   :  { %5287 = vmatprep.subr.mxu0 %v3029_v35  ;;  %5376 = vmatprep.subr.mxu1 %v3285_v53  ;;  %v3508_v35 = vld [vmem:[%s19995_s3 + $0xf50] sm:$0xff]  ;;  %v3245_v53 = vld [vmem:[%s19995_s3 + $0x718] sm:$0xff] }
 0x2fa   :  { %5288 = vmatpush1.msra.mxu0 %v3028_v24  ;;  %5377 = vmatpush1.msra.mxu1 %v3284_v14  ;;  %v3501_v24 = vld [vmem:[%s19995_s3 + $0xf18] sm:$0xff]  ;;  %v3244_v14 = vld [vmem:[%s19995_s3 + $0x710] sm:$0xff] }
 0x2fb   :  { %5289 = vmatprep.subr.mxu0 %v3021_v16  ;;  %5378 = vmatprep.subr.mxu1 %v3277_v9  ;;  %v3500_v16 = vld [vmem:[%s19995_s3 + $0xf10] sm:$0xff]  ;;  %v3237_v9 = vld [vmem:[%s19995_s3 + $0x6d8] sm:$0xff] }
 0x2fc   :  { %5290 = vmatpush1.msra.mxu0 %v3020_v57  ;;  %5379 = vmatpush1.msra.mxu1 %v3276_v38  ;;  %v3493_v57 = vld [vmem:[%s19995_s3 + $0xed8] sm:$0xff]  ;;  %v3236_v38 = vld [vmem:[%s19995_s3 + $0x6d0] sm:$0xff] }
 0x2fd   :  { %5291 = vmatprep.subr.mxu0 %v3269_v63  ;;  %5380 = vmatprep.subr.mxu1 %v3525_v46  ;;  %v3492_v63 = vld [vmem:[%s19995_s3 + $0xed0] sm:$0xff]  ;;  %v3229_v46 = vld [vmem:[%s19995_s3 + $0x698] sm:$0xff] }
 0x2fe   :  { %5292 = vmatpush2.msra.mxu0 %v3268_v0  ;;  %5381 = vmatpush2.msra.mxu1 %v3524_v50  ;;  %v3485_v0 = vld [vmem:[%s19995_s3 + $0xe98] sm:$0xff]  ;;  %v3228_v50 = vld [vmem:[%s19995_s3 + $0x690] sm:$0xff] }
 0x2ff   :  { %5293 = vmatprep.subr.mxu0 %v3261_v56  ;;  %5382 = vmatprep.subr.mxu1 %v3517_v34  ;;  %v3484_v56 = vld [vmem:[%s19995_s3 + $0xe90] sm:$0xff] }
 0x300   :  { %5294 = vmatpush2.msra.mxu0 %v3260_v5  ;;  %5383 = vmatpush2.msra.mxu1 %v3516_v32  ;;  %v3221_v32 = vld [vmem:[%s19995_s3 + $0x658] sm:$0xff] }
 0x301   :  { %5295 = vmatprep.subr.mxu0 %v3253_v25  ;;  %5384 = vmatprep.subr.mxu1 %v3509_v4  ;;  %v3477_v25 = vld [vmem:[%s19995_s3 + $0xe58] sm:$0xff] }
 0x302   :  { %5296 = vmatpush2.msra.mxu0 %v3252_v44  ;;  %5385 = vmatpush2.msra.mxu1 %v3508_v35  ;;  %v3220_v44 = vld [vmem:[%s19995_s3 + $0x650] sm:$0xff] }
 0x303   :  { %5297 = vmatprep.subr.mxu0 %v3245_v53  ;;  %5386 = vmatprep.subr.mxu1 %v3501_v24  ;;  %v3476_v35 = vld [vmem:[%s19995_s3 + $0xe50] sm:$0xff] }
 0x304   :  { %5298 = vmatpush2.msra.mxu0 %v3244_v14  ;;  %5387 = vmatpush2.msra.mxu1 %v3500_v16  ;;  %v3213_v14 = vld [vmem:[%s19995_s3 + $0x618] sm:$0xff] }
 0x305   :  { %5299 = vmatprep.subr.mxu0 %v3237_v9  ;;  %5388 = vmatprep.subr.mxu1 %v3493_v57  ;;  %v4635_v34 = vpop.f32.mrf.mxu0  ;;  %v4724_v5 = vpop.f32.mrf.mxu1  ;;  %v3469_v16 = vld [vmem:[%s19995_s3 + $0xe18] sm:$0xff]  ;;  %v3212_v57 = vld [vmem:[%s19995_s3 + $0x610] sm:$0xff] }
 0x306   :  { %5300 = vmatpush2.msra.mxu0 %v3236_v38  ;;  %5389 = vmatpush2.msra.mxu1 %v3492_v63  ;;  %v15609_v4 = vadd.f32 %v4724_v5, %v4635_v34  ;;  %v3468_v38 = vld [vmem:[%s19995_s3 + $0xe10] sm:$0xff]  ;;  %v3205_v63 = vld [vmem:[%s19995_s3 + $0x5d8] sm:$0xff] }
 0x307   :  { %5301 = vmatprep.subr.mxu0 %v3229_v46  ;;  %5390 = vmatprep.subr.mxu1 %v3485_v0  ;;  %v4637_v53 = vpop.f32.mrf.mxu0  ;;  %v4726_v24 = vpop.f32.mrf.mxu1  ;;  %v3461_v46 = vld [vmem:[%s19995_s3 + $0xdd8] sm:$0xff]  ;;  %v3204_v0 = vld [vmem:[%s19995_s3 + $0x5d0] sm:$0xff] }
 0x308   :  { %5302 = vmatpush2.msra.mxu0 %v3228_v50  ;;  %5391 = vmatpush2.msra.mxu1 %v3484_v56  ;;  %v15623_v9 = vadd.f32 %v4726_v24, %v4637_v53  ;;  %v3460_v50 = vld [vmem:[%s19995_s3 + $0xdd0] sm:$0xff]  ;;  %v3197_v5 = vld [vmem:[%s19995_s3 + $0x598] sm:$0xff] }
 0x309   :  { %5303 = vmatprep.subr.mxu0 %v3221_v32  ;;  %5392 = vmatprep.subr.mxu1 %v3477_v25  ;;  %v3453_v32 = vld [vmem:[%s19995_s3 + $0xd98] sm:$0xff] }
 0x30a   :  { %5304 = vmatpush2.msra.mxu0 %v3220_v44  ;;  %5393 = vmatpush2.msra.mxu1 %v3476_v35  ;;  %v3196_v44 = vld [vmem:[%s19995_s3 + $0x590] sm:$0xff] }
 0x30b   :  { %5305 = vmatprep.subr.mxu0 %v3213_v14  ;;  %5394 = vmatprep.subr.mxu1 %v3469_v16  ;;  %v4641_v56 = vpop.f32.mrf.mxu0  ;;  %v4730_v34 = vpop.f32.mrf.mxu1  ;;  %v3452_v35 = vld [vmem:[%s19995_s3 + $0xd90] sm:$0xff]  ;;  %v3189_v14 = vld [vmem:[%s19995_s3 + $0x558] sm:$0xff] }
 0x30c   :  { %5306 = vmatpush2.msra.mxu0 %v3212_v57  ;;  %5395 = vmatpush2.msra.mxu1 %v3468_v38  ;;  %v15649_v25 = vadd.f32 %v4730_v34, %v4641_v56  ;;  %v3445_v16 = vld [vmem:[%s19995_s3 + $0xd58] sm:$0xff]  ;;  %v3188_v38 = vld [vmem:[%s19995_s3 + $0x550] sm:$0xff] }
 0x30d   :  { %5307 = vmatprep.subr.mxu0 %v3205_v63  ;;  %5396 = vmatprep.subr.mxu1 %v3461_v46  ;;  %v4643_v53 = vpop.f32.mrf.mxu0  ;;  %v4732_v24 = vpop.f32.mrf.mxu1  ;;  %v3444_v63 = vld [vmem:[%s19995_s3 + $0xd50] sm:$0xff]  ;;  %v3181_v46 = vld [vmem:[%s19995_s3 + $0x518] sm:$0xff] }
 0x30e   :  { %5308 = vmatpush2.msra.mxu0 %v3204_v0  ;;  %5397 = vmatpush2.msra.mxu1 %v3460_v50  ;;  %v15663_v57 = vadd.f32 %v4732_v24, %v4643_v53  ;;  %v3437_v0 = vld [vmem:[%s19995_s3 + $0xd18] sm:$0xff]  ;;  %v3180_v50 = vld [vmem:[%s19995_s3 + $0x510] sm:$0xff] }
 0x30f   :  { %5309 = vmatprep.subr.mxu0 %v3197_v5  ;;  %5398 = vmatprep.subr.mxu1 %v3453_v32  ;;  %v3436_v56 = vld [vmem:[%s19995_s3 + $0xd10] sm:$0xff]  ;;  %v3173_v32 = vld [vmem:[%s19995_s3 + $0x4d8] sm:$0xff] }
 0x310   :  { %5310 = vmatpush2.msra.mxu0 %v3196_v44  ;;  %5399 = vmatpush2.msra.mxu1 %v3452_v35  ;;  %v3429_v44 = vld [vmem:[%s19995_s3 + $0xcd8] sm:$0xff]  ;;  %v3172_v53 = vld [vmem:[%s19995_s3 + $0x4d0] sm:$0xff] }
 0x311   :  { %5311 = vmatprep.subr.mxu0 %v3189_v14  ;;  %5400 = vmatprep.subr.mxu1 %v3445_v16  ;;  %v4647_v34 = vpop.f32.mrf.mxu0  ;;  %v4736_v5 = vpop.f32.mrf.mxu1  ;;  %v3428_v24 = vld [vmem:[%s19995_s3 + $0xcd0] sm:$0xff] }
 0x312   :  { %5312 = vmatpush2.msra.mxu0 %v3188_v38  ;;  %5401 = vmatpush2.msra.mxu1 %v3444_v63  ;;  %v15689_v35 = vadd.f32 %v4736_v5, %v4647_v34  ;;  %v3165_v38 = vld [vmem:[%s19995_s3 + $0x498] sm:$0xff]  ;;  %v3156_v5 = vld [vmem:[%s19995_s3 + $0x450] sm:$0xff] }
 0x313   :  { %5313 = vmatprep.subr.mxu0 %v3181_v46  ;;  %5402 = vmatprep.subr.mxu1 %v3437_v0  ;;  %v4649_v14 = vpop.f32.mrf.mxu0  ;;  %v4738_v16 = vpop.f32.mrf.mxu1  ;;  %v3421_v63 = vld [vmem:[%s19995_s3 + $0xc98] sm:$0xff]  ;;  %v3164_v0 = vld [vmem:[%s19995_s3 + $0x490] sm:$0xff] }
 0x314   :  { %5314 = vmatpush2.msra.mxu0 %v3180_v50  ;;  %5403 = vmatpush2.msra.mxu1 %v3436_v56  ;;  %v15703_v46 = vadd.f32 %v4738_v16, %v4649_v14  ;;  %v3420_v50 = vld [vmem:[%s19995_s3 + $0xc90] sm:$0xff]  ;;  %v3157_v56 = vld [vmem:[%s19995_s3 + $0x458] sm:$0xff] }
 0x315   :  { %5315 = vmatprep.subr.mxu0 %v3173_v32  ;;  %5404 = vmatprep.subr.mxu1 %v3429_v44  ;;  %v3413_v34 = vld [vmem:[%s19995_s3 + $0xc58] sm:$0xff]  ;;  %v3412_v32 = vld [vmem:[%s19995_s3 + $0xc50] sm:$0xff] }
 0x316   :  { %20128 = vst [vmem:[#allocation15_spill] sm:$0xff] %v15703_v46  ;;  %5316 = vmatpush2.msra.mxu0 %v3172_v53  ;;  %5405 = vmatpush2.msra.mxu1 %v3428_v24  ;;  %v3149_v24 = vld [vmem:[%s19995_s3 + $0x418] sm:$0xff] }
 0x317   :  { %5317 = vmatprep.subr.mxu0 %v3165_v38  ;;  %5406 = vmatprep.subr.mxu1 %v3421_v63  ;;  %v4653_v44 = vpop.f32.mrf.mxu0  ;;  %v4742_v53 = vpop.f32.mrf.mxu1  ;;  %v3405_v14 = vld [vmem:[%s19995_s3 + $0xc18] sm:$0xff]  ;;  %v3148_v38 = vld [vmem:[%s19995_s3 + $0x410] sm:$0xff] }
 0x318   :  { %5318 = vmatpush2.msra.mxu0 %v3164_v0  ;;  %5407 = vmatpush2.msra.mxu1 %v3420_v50  ;;  %v15729_v16 = vadd.f32 %v4742_v53, %v4653_v44  ;;  %v3404_v63 = vld [vmem:[%s19995_s3 + $0xc10] sm:$0xff]  ;;  %v3135_v44 = vld [vmem:[%s19995_s3 + $0x3a8] sm:$0xff] }
 0x319   :  { %5319 = vmatprep.subr.mxu0 %v3157_v56  ;;  %5408 = vmatprep.subr.mxu1 %v3413_v34  ;;  %v4655_v0 = vpop.f32.mrf.mxu0  ;;  %v4744_v50 = vpop.f32.mrf.mxu1  ;;  %v3143_v56 = vld [vmem:[%s19995_s3 + $0x3e8] sm:$0xff] }
 0x31a   :  { %20129 = vst [vmem:[#allocation24_spill] sm:$0xff] %v15729_v16  ;;  %5320 = vmatpush2.msra.mxu0 %v3156_v5  ;;  %5409 = vmatpush2.msra.mxu1 %v3412_v32  ;;  %v15737_v46 = vadd.f32 %v4744_v50, %v4655_v0  ;;  %v3399_v34 = vld [vmem:[%s19995_s3 + $0xbe8] sm:$0xff]  ;;  %v3142_v5 = vld [vmem:[%s19995_s3 + $0x3e0] sm:$0xff] }
 0x31b   :  { %5321 = vmatprep.subr.mxu0 %v3149_v24  ;;  %5410 = vmatprep.subr.mxu1 %v3405_v14  ;;  %v3398_v32 = vld [vmem:[%s19995_s3 + $0xbe0] sm:$0xff]  ;;  %v3391_v53 = vld [vmem:[%s19995_s3 + $0xba8] sm:$0xff] }
 0x31c   :  { %20130 = vst [vmem:[#allocation16_spill] sm:$0xff] %v15737_v46  ;;  %5322 = vmatpush2.msra.mxu0 %v3148_v38  ;;  %5411 = vmatpush2.msra.mxu1 %v3404_v63  ;;  %v3134_v24 = vld [vmem:[%s19995_s3 + $0x3a0] sm:$0xff]  ;;  %v3127_v38 = vld [vmem:[%s19995_s3 + $0x368] sm:$0xff] }
 0x31d   :  { %5324 = vmatmul.mubr.f32.vlgmr.msra.gmra.mxu0 %v13674_v47  ;;  %5413 = vmatmul.mubr.f32.vlgmr.msra.gmra.mxu1 %v13688_v17  ;;  %v3390_v14 = vld [vmem:[%s19995_s3 + $0xba0] sm:$0xff]  ;;  %v3383_v63 = vld [vmem:[%s19995_s3 + $0xb68] sm:$0xff] }
 0x31e   :  { %5437 = vmatprep.subr.mxu0 %v3143_v56  ;;  %5526 = vmatprep.subr.mxu1 %v3399_v34  ;;  %v3126_v0 = vld [vmem:[%s19995_s3 + $0x360] sm:$0xff]  ;;  %v3119_v56 = vld [vmem:[%s19995_s3 + $0x328] sm:$0xff] }
 0x31f   :  { %5329 = vmatprep.mubr.f32.mxu0 %v13695_v55  ;;  %5418 = vmatprep.mubr.f32.mxu1 %v13721_v7  ;;  %v3382_v50 = vld [vmem:[%s19995_s3 + $0xb60] sm:$0xff]  ;;  %v3375_v34 = vld [vmem:[%s19995_s3 + $0xb28] sm:$0xff] }
 0x320   :  { %5438 = vmatpush1.msra.mxu0 %v3142_v5  ;;  %5527 = vmatpush1.msra.mxu1 %v3398_v32  ;;  %v3118_v5 = vld [vmem:[%s19995_s3 + $0x320] sm:$0xff]  ;;  %v3215_v16 = vld [vmem:[%s19995_s3 + $0x628] sm:$0xff] }
 0x321   :  { %5439 = vmatprep.subr.mxu0 %v3135_v44  ;;  %5528 = vmatprep.subr.mxu1 %v3391_v53  ;;  %v3374_v32 = vld [vmem:[%s19995_s3 + $0xb20] sm:$0xff]  ;;  %v3111_v44 = vld [vmem:[%s19995_s3 + $0x2e8] sm:$0xff] }
 0x322   :  { %5440 = vmatpush1.msra.mxu0 %v3134_v24  ;;  %5529 = vmatpush1.msra.mxu1 %v3390_v14  ;;  %v3367_v53 = vld [vmem:[%s19995_s3 + $0xae8] sm:$0xff]  ;;  %v3110_v24 = vld [vmem:[%s19995_s3 + $0x2e0] sm:$0xff] }
 0x323   :  { %5330 = vmatmul.mubr.f32.gmra.mxu0 %v13704_v42  ;;  %5419 = vmatmul.mubr.f32.gmra.mxu1 %v13723_v22  ;;  %v3366_v14 = vld [vmem:[%s19995_s3 + $0xae0] sm:$0xff] }
 0x324   :  { %5441 = vmatprep.subr.mxu0 %v3127_v38  ;;  %5530 = vmatprep.subr.mxu1 %v3383_v63  ;;  %v3103_v38 = vld [vmem:[%s19995_s3 + $0x2a8] sm:$0xff] }
 0x325   :  { %5335 = vmatprep.mubr.f32.mxu0 %v13758_v27  ;;  %5424 = vmatprep.mubr.f32.mxu1 %v13776_v18  ;;  %v3359_v63 = vld [vmem:[%s19995_s3 + $0xaa8] sm:$0xff] }
 0x326   :  { %5442 = vmatpush1.msra.mxu0 %v3126_v0  ;;  %5531 = vmatpush1.msra.mxu1 %v3382_v50  ;;  %v3102_v0 = vld [vmem:[%s19995_s3 + $0x2a0] sm:$0xff] }
 0x327   :  { %5443 = vmatprep.subr.mxu0 %v3119_v56  ;;  %5532 = vmatprep.subr.mxu1 %v3375_v34  ;;  %v3358_v50 = vld [vmem:[%s19995_s3 + $0xaa0] sm:$0xff]  ;;  %v3095_v56 = vld [vmem:[%s19995_s3 + $0x268] sm:$0xff] }
 0x328   :  { %5444 = vmatpush1.msra.mxu0 %v3118_v5  ;;  %5533 = vmatpush1.msra.mxu1 %v3374_v32  ;;  %v3351_v34 = vld [vmem:[%s19995_s3 + $0xa68] sm:$0xff]  ;;  %v3094_v5 = vld [vmem:[%s19995_s3 + $0x260] sm:$0xff] }
 0x329   :  { %5336 = vmatmul.mubr.f32.gmra.mxu0 %v13761_v11  ;;  %5425 = vmatmul.mubr.f32.gmra.mxu1 %v13779_v61  ;;  %v3350_v32 = vld [vmem:[%s19995_s3 + $0xa60] sm:$0xff] }
 0x32a   :  { %5445 = vmatprep.subr.mxu0 %v3111_v44  ;;  %5534 = vmatprep.subr.mxu1 %v3367_v53  ;;  %v3087_v44 = vld [vmem:[%s19995_s3 + $0x228] sm:$0xff] }
 0x32b   :  { %5341 = vmatprep.mubr.f32.mxu0 %v15381_v62  ;;  %5430 = vmatprep.mubr.f32.mxu1 %v15385_v6  ;;  %v3343_v53 = vld [vmem:[%s19995_s3 + $0xa28] sm:$0xff] }
 0x32c   :  { %5446 = vmatpush1.msra.mxu0 %v3110_v24  ;;  %5535 = vmatpush1.msra.mxu1 %v3366_v14  ;;  %v3086_v24 = vld [vmem:[%s19995_s3 + $0x220] sm:$0xff] }
 0x32d   :  { %5447 = vmatprep.subr.mxu0 %v3103_v38  ;;  %5536 = vmatprep.subr.mxu1 %v3359_v63  ;;  %v3342_v14 = vld [vmem:[%s19995_s3 + $0xa20] sm:$0xff]  ;;  %v3079_v38 = vld [vmem:[%s19995_s3 + $0x1e8] sm:$0xff] }
 0x32e   :  { %5448 = vmatpush1.msra.mxu0 %v3102_v0  ;;  %5537 = vmatpush1.msra.mxu1 %v3358_v50  ;;  %v3335_v63 = vld [vmem:[%s19995_s3 + $0x9e8] sm:$0xff]  ;;  %v3078_v0 = vld [vmem:[%s19995_s3 + $0x1e0] sm:$0xff] }
 0x32f   :  { %5342 = vmatmul.mubr.f32.gmra.mxu0 %v15355_v60  ;;  %5431 = vmatmul.mubr.f32.gmra.mxu1 %v15361_v43  ;;  %v3334_v50 = vld [vmem:[%s19995_s3 + $0x9e0] sm:$0xff] }
 0x330   :  { %5449 = vmatprep.subr.mxu0 %v3095_v56  ;;  %5538 = vmatprep.subr.mxu1 %v3351_v34  ;;  %v3071_v56 = vld [vmem:[%s19995_s3 + $0x1a8] sm:$0xff] }
 0x331   :  { %5450 = vmatpush1.msra.mxu0 %v3094_v5  ;;  %5501 = vmatprep.mubr.f32.mxu0 %v13677_v37  ;;  %v3327_v34 = vld [vmem:[%s19995_s3 + $0x9a8] sm:$0xff]  ;;  %v3070_v5 = vld [vmem:[%s19995_s3 + $0x1a0] sm:$0xff] }
 0x332   :  { %5539 = vmatpush1.msra.mxu1 %v3350_v32  ;;  %5590 = vmatprep.mubr.f32.mxu1 %v13691_v3  ;;  %v3326_v32 = vld [vmem:[%s19995_s3 + $0x9a0] sm:$0xff] }
 0x333   :  { %5451 = vmatprep.subr.mxu0 %v3087_v44  ;;  %5540 = vmatprep.subr.mxu1 %v3343_v53  ;;  %v3063_v44 = vld [vmem:[%s19995_s3 + $0x168] sm:$0xff] }
 0x334   :  { %5452 = vmatpush1.msra.mxu0 %v3086_v24  ;;  %5541 = vmatpush1.msra.mxu1 %v3342_v14  ;;  %v3319_v53 = vld [vmem:[%s19995_s3 + $0x968] sm:$0xff]  ;;  %v3062_v24 = vld [vmem:[%s19995_s3 + $0x160] sm:$0xff] }
 0x335   :  { %5453 = vmatprep.subr.mxu0 %v3079_v38  ;;  %5542 = vmatprep.subr.mxu1 %v3335_v63  ;;  %v3318_v14 = vld [vmem:[%s19995_s3 + $0x960] sm:$0xff]  ;;  %v3055_v38 = vld [vmem:[%s19995_s3 + $0x128] sm:$0xff] }
 0x336   :  { %5454 = vmatpush1.msra.mxu0 %v3078_v0  ;;  %5543 = vmatpush1.msra.mxu1 %v3334_v50  ;;  %v3311_v63 = vld [vmem:[%s19995_s3 + $0x928] sm:$0xff]  ;;  %v3054_v0 = vld [vmem:[%s19995_s3 + $0x120] sm:$0xff] }
 0x337   :  { %5455 = vmatprep.subr.mxu0 %v3071_v56  ;;  %5544 = vmatprep.subr.mxu1 %v3327_v34  ;;  %v3310_v50 = vld [vmem:[%s19995_s3 + $0x920] sm:$0xff]  ;;  %v3047_v56 = vld [vmem:[%s19995_s3 + $0xe8] sm:$0xff] }
 0x338   :  { %5456 = vmatpush1.msra.mxu0 %v3070_v5  ;;  %5545 = vmatpush1.msra.mxu1 %v3326_v32  ;;  %v3303_v34 = vld [vmem:[%s19995_s3 + $0x8e8] sm:$0xff]  ;;  %v3046_v5 = vld [vmem:[%s19995_s3 + $0xe0] sm:$0xff] }
 0x339   :  { %5457 = vmatprep.subr.mxu0 %v3063_v44  ;;  %5546 = vmatprep.subr.mxu1 %v3319_v53  ;;  %v3302_v32 = vld [vmem:[%s19995_s3 + $0x8e0] sm:$0xff]  ;;  %v3039_v44 = vld [vmem:[%s19995_s3 + $0xa8] sm:$0xff] }
 0x33a   :  { %5458 = vmatpush1.msra.mxu0 %v3062_v24  ;;  %5547 = vmatpush1.msra.mxu1 %v3318_v14  ;;  %v3295_v53 = vld [vmem:[%s19995_s3 + $0x8a8] sm:$0xff]  ;;  %v3038_v24 = vld [vmem:[%s19995_s3 + $0xa0] sm:$0xff] }
 0x33b   :  { %5459 = vmatprep.subr.mxu0 %v3055_v38  ;;  %5548 = vmatprep.subr.mxu1 %v3311_v63  ;;  %v3294_v14 = vld [vmem:[%s19995_s3 + $0x8a0] sm:$0xff]  ;;  %v3031_v38 = vld [vmem:[%s19995_s3 + $0x68] sm:$0xff] }
 0x33c   :  { %5460 = vmatpush1.msra.mxu0 %v3054_v0  ;;  %5549 = vmatpush1.msra.mxu1 %v3310_v50  ;;  %v3287_v63 = vld [vmem:[%s19995_s3 + $0x868] sm:$0xff]  ;;  %v3030_v0 = vld [vmem:[%s19995_s3 + $0x60] sm:$0xff] }
 0x33d   :  { %5461 = vmatprep.subr.mxu0 %v3047_v56  ;;  %5550 = vmatprep.subr.mxu1 %v3303_v34  ;;  %v3286_v50 = vld [vmem:[%s19995_s3 + $0x860] sm:$0xff]  ;;  %v3023_v56 = vld [vmem:[%s19995_s3 + $0x28] sm:$0xff] }
 0x33e   :  { %5462 = vmatpush1.msra.mxu0 %v3046_v5  ;;  %5551 = vmatpush1.msra.mxu1 %v3302_v32  ;;  %v3279_v34 = vld [vmem:[%s19995_s3 + $0x828] sm:$0xff]  ;;  %v3022_v5 = vld [vmem:[%s19995_s3 + $0x20] sm:$0xff] }
 0x33f   :  { %5463 = vmatprep.subr.mxu0 %v3039_v44  ;;  %5552 = vmatprep.subr.mxu1 %v3295_v53  ;;  %v3278_v32 = vld [vmem:[%s19995_s3 + $0x820] sm:$0xff]  ;;  %v3271_v44 = vld [vmem:[%s19995_s3 + $0x7e8] sm:$0xff] }
 0x340   :  { %5464 = vmatpush1.msra.mxu0 %v3038_v24  ;;  %5553 = vmatpush1.msra.mxu1 %v3294_v14  ;;  %v3527_v53 = vld [vmem:[%s19995_s3 + $0xfe8] sm:$0xff]  ;;  %v3270_v24 = vld [vmem:[%s19995_s3 + $0x7e0] sm:$0xff] }
 0x341   :  { %5465 = vmatprep.subr.mxu0 %v3031_v38  ;;  %5554 = vmatprep.subr.mxu1 %v3287_v63  ;;  %v3526_v14 = vld [vmem:[%s19995_s3 + $0xfe0] sm:$0xff]  ;;  %v3263_v38 = vld [vmem:[%s19995_s3 + $0x7a8] sm:$0xff] }
 0x342   :  { %5466 = vmatpush1.msra.mxu0 %v3030_v0  ;;  %5555 = vmatpush1.msra.mxu1 %v3286_v50  ;;  %v3519_v63 = vld [vmem:[%s19995_s3 + $0xfa8] sm:$0xff]  ;;  %v3262_v0 = vld [vmem:[%s19995_s3 + $0x7a0] sm:$0xff] }
 0x343   :  { %5467 = vmatprep.subr.mxu0 %v3023_v56  ;;  %5556 = vmatprep.subr.mxu1 %v3279_v34  ;;  %v3518_v50 = vld [vmem:[%s19995_s3 + $0xfa0] sm:$0xff]  ;;  %v3255_v56 = vld [vmem:[%s19995_s3 + $0x768] sm:$0xff] }
 0x344   :  { %5468 = vmatpush1.msra.mxu0 %v3022_v5  ;;  %5557 = vmatpush1.msra.mxu1 %v3278_v32  ;;  %v3511_v34 = vld [vmem:[%s19995_s3 + $0xf68] sm:$0xff]  ;;  %v3254_v5 = vld [vmem:[%s19995_s3 + $0x760] sm:$0xff] }
 0x345   :  { %5469 = vmatprep.subr.mxu0 %v3271_v44  ;;  %5558 = vmatprep.subr.mxu1 %v3527_v53  ;;  %v3510_v32 = vld [vmem:[%s19995_s3 + $0xf60] sm:$0xff]  ;;  %v3247_v44 = vld [vmem:[%s19995_s3 + $0x728] sm:$0xff] }
 0x346   :  { %5470 = vmatpush2.msra.mxu0 %v3270_v24  ;;  %5559 = vmatpush2.msra.mxu1 %v3526_v14  ;;  %v3503_v53 = vld [vmem:[%s19995_s3 + $0xf28] sm:$0xff]  ;;  %v3246_v24 = vld [vmem:[%s19995_s3 + $0x720] sm:$0xff] }
 0x347   :  { %5471 = vmatprep.subr.mxu0 %v3263_v38  ;;  %5560 = vmatprep.subr.mxu1 %v3519_v63  ;;  %v3502_v14 = vld [vmem:[%s19995_s3 + $0xf20] sm:$0xff]  ;;  %v3239_v38 = vld [vmem:[%s19995_s3 + $0x6e8] sm:$0xff] }
 0x348   :  { %5472 = vmatpush2.msra.mxu0 %v3262_v0  ;;  %5561 = vmatpush2.msra.mxu1 %v3518_v50  ;;  %v3495_v63 = vld [vmem:[%s19995_s3 + $0xee8] sm:$0xff]  ;;  %v3238_v0 = vld [vmem:[%s19995_s3 + $0x6e0] sm:$0xff] }
 0x349   :  { %5473 = vmatprep.subr.mxu0 %v3255_v56  ;;  %5562 = vmatprep.subr.mxu1 %v3511_v34  ;;  %v3494_v50 = vld [vmem:[%s19995_s3 + $0xee0] sm:$0xff]  ;;  %v3231_v56 = vld [vmem:[%s19995_s3 + $0x6a8] sm:$0xff] }
 0x34a   :  { %5474 = vmatpush2.msra.mxu0 %v3254_v5  ;;  %5563 = vmatpush2.msra.mxu1 %v3510_v32  ;;  %v3487_v34 = vld [vmem:[%s19995_s3 + $0xea8] sm:$0xff]  ;;  %v3230_v5 = vld [vmem:[%s19995_s3 + $0x6a0] sm:$0xff] }
 0x34b   :  { %5475 = vmatprep.subr.mxu0 %v3247_v44  ;;  %5564 = vmatprep.subr.mxu1 %v3503_v53  ;;  %v3486_v32 = vld [vmem:[%s19995_s3 + $0xea0] sm:$0xff] }
 0x34c   :  { %5476 = vmatpush2.msra.mxu0 %v3246_v24  ;;  %5565 = vmatpush2.msra.mxu1 %v3502_v14  ;;  %v3223_v24 = vld [vmem:[%s19995_s3 + $0x668] sm:$0xff] }
 0x34d   :  { %5477 = vmatprep.subr.mxu0 %v3239_v38  ;;  %5566 = vmatprep.subr.mxu1 %v3495_v63  ;;  %v4813_v44 = vpop.f32.mrf.mxu0  ;;  %v4902_v53 = vpop.f32.mrf.mxu1  ;;  %v3479_v14 = vld [vmem:[%s19995_s3 + $0xe68] sm:$0xff]  ;;  %v3222_v63 = vld [vmem:[%s19995_s3 + $0x660] sm:$0xff] }
 0x34e   :  { %5478 = vmatpush2.msra.mxu0 %v3238_v0  ;;  %5567 = vmatpush2.msra.mxu1 %v3494_v50  ;;  %v16025_v38 = vadd.f32 %v4902_v53, %v4813_v44  ;;  %v3478_v0 = vld [vmem:[%s19995_s3 + $0xe60] sm:$0xff] }
 0x34f   :  { %5479 = vmatprep.subr.mxu0 %v3231_v56  ;;  %5568 = vmatprep.subr.mxu1 %v3487_v34  ;;  %v4815_v50 = vpop.f32.mrf.mxu0  ;;  %v4904_v46 = vpop.f32.mrf.mxu1  ;;  %v3471_v56 = vld [vmem:[%s19995_s3 + $0xe28] sm:$0xff]  ;;  %v3214_v44 = vld [vmem:[%s19995_s3 + $0x620] sm:$0xff] }
 0x350   :  { %20131 = vst [vmem:[#allocation23_spill] sm:$0xff] %v16025_v38  ;;  %5480 = vmatpush2.msra.mxu0 %v3230_v5  ;;  %5569 = vmatpush2.msra.mxu1 %v3486_v32  ;;  %v16039_v34 = vadd.f32 %v4904_v46, %v4815_v50  ;;  %v3470_v5 = vld [vmem:[%s19995_s3 + $0xe20] sm:$0xff]  ;;  %v3207_v32 = vld [vmem:[%s19995_s3 + $0x5e8] sm:$0xff] }
 0x351   :  { %5481 = vmatprep.subr.mxu0 %v3223_v24  ;;  %5570 = vmatprep.subr.mxu1 %v3479_v14  ;;  %v3463_v46 = vld [vmem:[%s19995_s3 + $0xde8] sm:$0xff]  ;;  %v3206_v53 = vld [vmem:[%s19995_s3 + $0x5e0] sm:$0xff] }
 0x352   :  { %20132 = vst [vmem:[#allocation17_spill] sm:$0xff] %v16039_v34  ;;  %5482 = vmatpush2.msra.mxu0 %v3222_v63  ;;  %5571 = vmatpush2.msra.mxu1 %v3478_v0  ;;  %v3462_v24 = vld [vmem:[%s19995_s3 + $0xde0] sm:$0xff]  ;;  %v3199_v0 = vld [vmem:[%s19995_s3 + $0x5a8] sm:$0xff] }
 0x353   :  { %5483 = vmatprep.subr.mxu0 %v3215_v16  ;;  %5572 = vmatprep.subr.mxu1 %v3471_v56  ;;  %v4819_v14 = vpop.f32.mrf.mxu0  ;;  %v4908_v63 = vpop.f32.mrf.mxu1  ;;  %v3455_v16 = vld [vmem:[%s19995_s3 + $0xda8] sm:$0xff]  ;;  %v3198_v56 = vld [vmem:[%s19995_s3 + $0x5a0] sm:$0xff] }
 0x354   :  { %5484 = vmatpush2.msra.mxu0 %v3214_v44  ;;  %5573 = vmatpush2.msra.mxu1 %v3470_v5  ;;  %v16065_v50 = vadd.f32 %v4908_v63, %v4819_v14  ;;  %v3454_v44 = vld [vmem:[%s19995_s3 + $0xda0] sm:$0xff]  ;;  %v3191_v38 = vld [vmem:[%s19995_s3 + $0x568] sm:$0xff] }
 0x355   :  { %5485 = vmatprep.subr.mxu0 %v3207_v32  ;;  %5574 = vmatprep.subr.mxu1 %v3463_v46  ;;  %v4821_v5 = vpop.f32.mrf.mxu0  ;;  %v4910_v34 = vpop.f32.mrf.mxu1  ;;  %v3447_v32 = vld [vmem:[%s19995_s3 + $0xd68] sm:$0xff]  ;;  %v3190_v14 = vld [vmem:[%s19995_s3 + $0x560] sm:$0xff] }
 0x356   :  { %20133 = vst [vmem:[#allocation19_spill] sm:$0xff] %v16065_v50  ;;  %5486 = vmatpush2.msra.mxu0 %v3206_v53  ;;  %5575 = vmatpush2.msra.mxu1 %v3462_v24  ;;  %v16079_v46 = vadd.f32 %v4910_v34, %v4821_v5  ;;  %v3446_v53 = vld [vmem:[%s19995_s3 + $0xd60] sm:$0xff]  ;;  %v3183_v24 = vld [vmem:[%s19995_s3 + $0x528] sm:$0xff] }
 0x357   :  { %5487 = vmatprep.subr.mxu0 %v3199_v0  ;;  %5576 = vmatprep.subr.mxu1 %v3455_v16  ;;  %v3439_v34 = vld [vmem:[%s19995_s3 + $0xd28] sm:$0xff]  ;;  %v3182_v63 = vld [vmem:[%s19995_s3 + $0x520] sm:$0xff] }
 0x358   :  { %20134 = vst [vmem:[#allocation20_spill] sm:$0xff] %v16079_v46  ;;  %5488 = vmatpush2.msra.mxu0 %v3198_v56  ;;  %5577 = vmatpush2.msra.mxu1 %v3454_v44  ;;  %v3438_v0 = vld [vmem:[%s19995_s3 + $0xd20] sm:$0xff]  ;;  %v3175_v44 = vld [vmem:[%s19995_s3 + $0x4e8] sm:$0xff] }
 0x359   :  { %5489 = vmatprep.subr.mxu0 %v3191_v38  ;;  %5578 = vmatprep.subr.mxu1 %v3447_v32  ;;  %v4825_v16 = vpop.f32.mrf.mxu0  ;;  %v4914_v56 = vpop.f32.mrf.mxu1  ;;  %v3431_v38 = vld [vmem:[%s19995_s3 + $0xce8] sm:$0xff]  ;;  %v3174_v32 = vld [vmem:[%s19995_s3 + $0x4e0] sm:$0xff] }
 0x35a   :  { %5490 = vmatpush2.msra.mxu0 %v3190_v14  ;;  %5579 = vmatpush2.msra.mxu1 %v3446_v53  ;;  %v16105_v5 = vadd.f32 %v4914_v56, %v4825_v16  ;;  %v3430_v14 = vld [vmem:[%s19995_s3 + $0xce0] sm:$0xff]  ;;  %v3167_v50 = vld [vmem:[%s19995_s3 + $0x4a8] sm:$0xff] }
 0x35b   :  { %5491 = vmatprep.subr.mxu0 %v3183_v24  ;;  %5580 = vmatprep.subr.mxu1 %v3439_v34  ;;  %v4827_v53 = vpop.f32.mrf.mxu0  ;;  %v4916_v46 = vpop.f32.mrf.mxu1  ;;  %v3423_v24 = vld [vmem:[%s19995_s3 + $0xca8] sm:$0xff]  ;;  %v3166_v16 = vld [vmem:[%s19995_s3 + $0x4a0] sm:$0xff] }
 0x35c   :  { %20135 = vst [vmem:[#allocation27_spill] sm:$0xff] %v16105_v5  ;;  %5492 = vmatpush2.msra.mxu0 %v3182_v63  ;;  %5581 = vmatpush2.msra.mxu1 %v3438_v0  ;;  %v16119_v34 = vadd.f32 %v4916_v46, %v4827_v53  ;;  %v3422_v63 = vld [vmem:[%s19995_s3 + $0xca0] sm:$0xff]  ;;  %v3159_v0 = vld [vmem:[%s19995_s3 + $0x468] sm:$0xff] }
 0x35d   :  { %5493 = vmatprep.subr.mxu0 %v3175_v44  ;;  %5582 = vmatprep.subr.mxu1 %v3431_v38  ;;  %v3415_v46 = vld [vmem:[%s19995_s3 + $0xc68] sm:$0xff]  ;;  %v3158_v56 = vld [vmem:[%s19995_s3 + $0x460] sm:$0xff] }
 0x35e   :  { %20136 = vst [vmem:[#allocation22_spill] sm:$0xff] %v16119_v34  ;;  %5494 = vmatpush2.msra.mxu0 %v3174_v32  ;;  %5583 = vmatpush2.msra.mxu1 %v3430_v14  ;;  %v3414_v44 = vld [vmem:[%s19995_s3 + $0xc60] sm:$0xff]  ;;  %v3151_v14 = vld [vmem:[%s19995_s3 + $0x428] sm:$0xff] }
 0x35f   :  { %5495 = vmatprep.subr.mxu0 %v3167_v50  ;;  %5584 = vmatprep.subr.mxu1 %v3423_v24  ;;  %v4831_v38 = vpop.f32.mrf.mxu0  ;;  %v4920_v32 = vpop.f32.mrf.mxu1  ;;  %v3407_v50 = vld [vmem:[%s19995_s3 + $0xc28] sm:$0xff]  ;;  %v3150_v24 = vld [vmem:[%s19995_s3 + $0x420] sm:$0xff] }
 0x360   :  { %5496 = vmatpush2.msra.mxu0 %v3166_v16  ;;  %5585 = vmatpush2.msra.mxu1 %v3422_v63  ;;  %v16145_v53 = vadd.f32 %v4920_v32, %v4831_v38  ;;  %v3406_v16 = vld [vmem:[%s19995_s3 + $0xc20] sm:$0xff]  ;;  %v3393_v38 = vld [vmem:[%s19995_s3 + $0xbb8] sm:$0xff]  ;;  %v3136_v32 = vld [vmem:[%s19995_s3 + $0x3b0] sm:$0xff] }
 0x361   :  { %5497 = vmatprep.subr.mxu0 %v3159_v0  ;;  %5586 = vmatprep.subr.mxu1 %v3415_v46  ;;  %v4833_v63 = vpop.f32.mrf.mxu0  ;;  %v4922_v34 = vpop.f32.mrf.mxu1  ;;  %v3145_v0 = vld [vmem:[%s19995_s3 + $0x3f8] sm:$0xff] }
 0x362   :  { %5498 = vmatpush2.msra.mxu0 %v3158_v56  ;;  %5587 = vmatpush2.msra.mxu1 %v3414_v44  ;;  %v16153_v5 = vadd.f32 %v4922_v34, %v4833_v63  ;;  %v3401_v46 = vld [vmem:[%s19995_s3 + $0xbf8] sm:$0xff]  ;;  %v3144_v34 = vld [vmem:[%s19995_s3 + $0x3f0] sm:$0xff] }
 0x363   :  { %5499 = vmatprep.subr.mxu0 %v3151_v14  ;;  %5588 = vmatprep.subr.mxu1 %v3407_v50  ;;  %v3400_v56 = vld [vmem:[%s19995_s3 + $0xbf0] sm:$0xff]  ;;  %v3137_v44 = vld [vmem:[%s19995_s3 + $0x3b8] sm:$0xff] }
 0x364   :  { %5500 = vmatpush2.msra.mxu0 %v3150_v24  ;;  %5589 = vmatpush2.msra.mxu1 %v3406_v16  ;;  %v3392_v14 = vld [vmem:[%s19995_s3 + $0xbb0] sm:$0xff]  ;;  %v3129_v50 = vld [vmem:[%s19995_s3 + $0x378] sm:$0xff] }
 0x365   :  { %5502 = vmatmul.mubr.f32.vlgmr.msra.gmra.mxu0 %v13674_v47  ;;  %5591 = vmatmul.mubr.f32.vlgmr.msra.gmra.mxu1 %v13688_v17  ;;  %v3385_v24 = vld [vmem:[%s19995_s3 + $0xb78] sm:$0xff]  ;;  %v3128_v16 = vld [vmem:[%s19995_s3 + $0x370] sm:$0xff] }
 0x366   :  { %5615 = vmatprep.subr.mxu0 %v3145_v0  ;;  %5704 = vmatprep.subr.mxu1 %v3401_v46  ;;  %v3384_v63 = vld [vmem:[%s19995_s3 + $0xb70] sm:$0xff]  ;;  %v3121_v0 = vld [vmem:[%s19995_s3 + $0x338] sm:$0xff] }
 0x367   :  { %5507 = vmatprep.mubr.f32.mxu0 %v13695_v55  ;;  %5596 = vmatprep.mubr.f32.mxu1 %v13721_v7  ;;  %v3377_v46 = vld [vmem:[%s19995_s3 + $0xb38] sm:$0xff] }
 0x368   :  { %5616 = vmatpush1.msra.mxu0 %v3144_v34  ;;  %5705 = vmatpush1.msra.mxu1 %v3400_v56  ;;  %v3120_v34 = vld [vmem:[%s19995_s3 + $0x330] sm:$0xff] }
 0x369   :  { %5617 = vmatprep.subr.mxu0 %v3137_v44  ;;  %5706 = vmatprep.subr.mxu1 %v3393_v38  ;;  %v3376_v56 = vld [vmem:[%s19995_s3 + $0xb30] sm:$0xff]  ;;  %v3113_v44 = vld [vmem:[%s19995_s3 + $0x2f8] sm:$0xff] }
 0x36a   :  { %5618 = vmatpush1.msra.mxu0 %v3136_v32  ;;  %5707 = vmatpush1.msra.mxu1 %v3392_v14  ;;  %v3369_v38 = vld [vmem:[%s19995_s3 + $0xaf8] sm:$0xff]  ;;  %v3112_v32 = vld [vmem:[%s19995_s3 + $0x2f0] sm:$0xff] }
 0x36b   :  { %5508 = vmatmul.mubr.f32.gmra.mxu0 %v13704_v42  ;;  %5597 = vmatmul.mubr.f32.gmra.mxu1 %v13723_v22  ;;  %v3368_v14 = vld [vmem:[%s19995_s3 + $0xaf0] sm:$0xff] }
 0x36c   :  { %5619 = vmatprep.subr.mxu0 %v3129_v50  ;;  %5708 = vmatprep.subr.mxu1 %v3385_v24  ;;  %v3105_v50 = vld [vmem:[%s19995_s3 + $0x2b8] sm:$0xff] }
 0x36d   :  { %5513 = vmatprep.mubr.f32.mxu0 %v13758_v27  ;;  %5602 = vmatprep.mubr.f32.mxu1 %v13776_v18  ;;  %v3361_v24 = vld [vmem:[%s19995_s3 + $0xab8] sm:$0xff] }
 0x36e   :  { %5620 = vmatpush1.msra.mxu0 %v3128_v16  ;;  %5709 = vmatpush1.msra.mxu1 %v3384_v63  ;;  %v3104_v16 = vld [vmem:[%s19995_s3 + $0x2b0] sm:$0xff] }
 0x36f   :  { %5621 = vmatprep.subr.mxu0 %v3121_v0  ;;  %5710 = vmatprep.subr.mxu1 %v3377_v46  ;;  %v3360_v63 = vld [vmem:[%s19995_s3 + $0xab0] sm:$0xff]  ;;  %v3097_v0 = vld [vmem:[%s19995_s3 + $0x278] sm:$0xff] }
 0x370   :  { %5622 = vmatpush1.msra.mxu0 %v3120_v34  ;;  %5711 = vmatpush1.msra.mxu1 %v3376_v56  ;;  %v3353_v46 = vld [vmem:[%s19995_s3 + $0xa78] sm:$0xff]  ;;  %v3096_v34 = vld [vmem:[%s19995_s3 + $0x270] sm:$0xff] }
 0x371   :  { %5514 = vmatmul.mubr.f32.gmra.mxu0 %v13761_v11  ;;  %5603 = vmatmul.mubr.f32.gmra.mxu1 %v13779_v61  ;;  %v3352_v56 = vld [vmem:[%s19995_s3 + $0xa70] sm:$0xff] }
 0x372   :  { %5623 = vmatprep.subr.mxu0 %v3113_v44  ;;  %5712 = vmatprep.subr.mxu1 %v3369_v38  ;;  %v3089_v44 = vld [vmem:[%s19995_s3 + $0x238] sm:$0xff] }
 0x373   :  { %5519 = vmatprep.mubr.f32.mxu0 %v15381_v62  ;;  %5608 = vmatprep.mubr.f32.mxu1 %v15385_v6  ;;  %v3345_v38 = vld [vmem:[%s19995_s3 + $0xa38] sm:$0xff] }
 0x374   :  { %5624 = vmatpush1.msra.mxu0 %v3112_v32  ;;  %5713 = vmatpush1.msra.mxu1 %v3368_v14  ;;  %v3088_v32 = vld [vmem:[%s19995_s3 + $0x230] sm:$0xff] }
 0x375   :  { %5625 = vmatprep.subr.mxu0 %v3105_v50  ;;  %5714 = vmatprep.subr.mxu1 %v3361_v24  ;;  %v3344_v14 = vld [vmem:[%s19995_s3 + $0xa30] sm:$0xff]  ;;  %v3081_v50 = vld [vmem:[%s19995_s3 + $0x1f8] sm:$0xff] }
 0x376   :  { %5626 = vmatpush1.msra.mxu0 %v3104_v16  ;;  %5715 = vmatpush1.msra.mxu1 %v3360_v63  ;;  %v3337_v24 = vld [vmem:[%s19995_s3 + $0x9f8] sm:$0xff]  ;;  %v3336_v16 = vld [vmem:[%s19995_s3 + $0x9f0] sm:$0xff] }
 0x377   :  { %5520 = vmatmul.mubr.f32.gmra.mxu0 %v15355_v60  ;;  %5609 = vmatmul.mubr.f32.gmra.mxu1 %v15361_v43  ;;  %v3329_v63 = vld [vmem:[%s19995_s3 + $0x9b8] sm:$0xff] }
 0x378   :  { %5627 = vmatprep.subr.mxu0 %v3097_v0  ;;  %5716 = vmatprep.subr.mxu1 %v3353_v46  ;;  %v3072_v0 = vld [vmem:[%s19995_s3 + $0x1b0] sm:$0xff] }
 0x379   :  { %5628 = vmatpush1.msra.mxu0 %v3096_v34  ;;  %5679 = vmatprep.mubr.f32.mxu0 %v13677_v37  ;;  %v3080_v37 = vld [vmem:[%s19995_s3 + $0x1f0] sm:$0xff]  ;;  %v3065_v34 = vld [vmem:[%s19995_s3 + $0x178] sm:$0xff] }
 0x37a   :  { %5717 = vmatpush1.msra.mxu1 %v3352_v56  ;;  %5768 = vmatprep.mubr.f32.mxu1 %v13691_v3  ;;  %v3073_v3 = vld [vmem:[%s19995_s3 + $0x1b8] sm:$0xff]  ;;  %v3328_v46 = vld [vmem:[%s19995_s3 + $0x9b0] sm:$0xff] }
 0x37b   :  { %5629 = vmatprep.subr.mxu0 %v3089_v44  ;;  %5718 = vmatprep.subr.mxu1 %v3345_v38  ;;  %v3321_v56 = vld [vmem:[%s19995_s3 + $0x978] sm:$0xff]  ;;  %v3064_v44 = vld [vmem:[%s19995_s3 + $0x170] sm:$0xff] }
 0x37c   :  { %5630 = vmatpush1.msra.mxu0 %v3088_v32  ;;  %5719 = vmatpush1.msra.mxu1 %v3344_v14  ;;  %v3320_v38 = vld [vmem:[%s19995_s3 + $0x970] sm:$0xff]  ;;  %v3057_v32 = vld [vmem:[%s19995_s3 + $0x138] sm:$0xff] }
 0x37d   :  { %5631 = vmatprep.subr.mxu0 %v3081_v50  ;;  %5720 = vmatprep.subr.mxu1 %v3337_v24  ;;  %v3313_v14 = vld [vmem:[%s19995_s3 + $0x938] sm:$0xff]  ;;  %v3056_v50 = vld [vmem:[%s19995_s3 + $0x130] sm:$0xff] }
 0x37e   :  { %5632 = vmatpush1.msra.mxu0 %v3080_v37  ;;  %5721 = vmatpush1.msra.mxu1 %v3336_v16  ;;  %v3312_v24 = vld [vmem:[%s19995_s3 + $0x930] sm:$0xff]  ;;  %v3049_v37 = vld [vmem:[%s19995_s3 + $0xf8] sm:$0xff] }
 0x37f   :  { %5633 = vmatprep.subr.mxu0 %v3073_v3  ;;  %5722 = vmatprep.subr.mxu1 %v3329_v63  ;;  %v3305_v16 = vld [vmem:[%s19995_s3 + $0x8f8] sm:$0xff]  ;;  %v3048_v3 = vld [vmem:[%s19995_s3 + $0xf0] sm:$0xff] }
 0x380   :  { %5634 = vmatpush1.msra.mxu0 %v3072_v0  ;;  %5723 = vmatpush1.msra.mxu1 %v3328_v46  ;;  %v3304_v63 = vld [vmem:[%s19995_s3 + $0x8f0] sm:$0xff]  ;;  %v3041_v0 = vld [vmem:[%s19995_s3 + $0xb8] sm:$0xff] }
 0x381   :  { %5635 = vmatprep.subr.mxu0 %v3065_v34  ;;  %5724 = vmatprep.subr.mxu1 %v3321_v56  ;;  %v3297_v46 = vld [vmem:[%s19995_s3 + $0x8b8] sm:$0xff]  ;;  %v3040_v34 = vld [vmem:[%s19995_s3 + $0xb0] sm:$0xff] }
 0x382   :  { %5636 = vmatpush1.msra.mxu0 %v3064_v44  ;;  %5725 = vmatpush1.msra.mxu1 %v3320_v38  ;;  %v3296_v56 = vld [vmem:[%s19995_s3 + $0x8b0] sm:$0xff]  ;;  %v3033_v44 = vld [vmem:[%s19995_s3 + $0x78] sm:$0xff] }
 0x383   :  { %5637 = vmatprep.subr.mxu0 %v3057_v32  ;;  %5726 = vmatprep.subr.mxu1 %v3313_v14  ;;  %v3289_v38 = vld [vmem:[%s19995_s3 + $0x878] sm:$0xff]  ;;  %v3032_v32 = vld [vmem:[%s19995_s3 + $0x70] sm:$0xff] }
 0x384   :  { %5638 = vmatpush1.msra.mxu0 %v3056_v50  ;;  %5727 = vmatpush1.msra.mxu1 %v3312_v24  ;;  %v3288_v14 = vld [vmem:[%s19995_s3 + $0x870] sm:$0xff]  ;;  %v3025_v50 = vld [vmem:[%s19995_s3 + $0x38] sm:$0xff] }
 0x385   :  { %5639 = vmatprep.subr.mxu0 %v3049_v37  ;;  %5728 = vmatprep.subr.mxu1 %v3305_v16  ;;  %v3281_v24 = vld [vmem:[%s19995_s3 + $0x838] sm:$0xff]  ;;  %v3024_v37 = vld [vmem:[%s19995_s3 + $0x30] sm:$0xff] }
 0x386   :  { %5640 = vmatpush1.msra.mxu0 %v3048_v3  ;;  %5729 = vmatpush1.msra.mxu1 %v3304_v63  ;;  %v3280_v16 = vld [vmem:[%s19995_s3 + $0x830] sm:$0xff]  ;;  %v3273_v3 = vld [vmem:[%s19995_s3 + $0x7f8] sm:$0xff] }
 0x387   :  { %5641 = vmatprep.subr.mxu0 %v3041_v0  ;;  %5730 = vmatprep.subr.mxu1 %v3297_v46  ;;  %v3529_v63 = vld [vmem:[%s19995_s3 + $0xff8] sm:$0xff]  ;;  %v3272_v0 = vld [vmem:[%s19995_s3 + $0x7f0] sm:$0xff] }
 0x388   :  { %5642 = vmatpush1.msra.mxu0 %v3040_v34  ;;  %5731 = vmatpush1.msra.mxu1 %v3296_v56  ;;  %v3528_v46 = vld [vmem:[%s19995_s3 + $0xff0] sm:$0xff]  ;;  %v3265_v34 = vld [vmem:[%s19995_s3 + $0x7b8] sm:$0xff] }
 0x389   :  { %5643 = vmatprep.subr.mxu0 %v3033_v44  ;;  %5732 = vmatprep.subr.mxu1 %v3289_v38  ;;  %v3521_v56 = vld [vmem:[%s19995_s3 + $0xfb8] sm:$0xff]  ;;  %v3264_v44 = vld [vmem:[%s19995_s3 + $0x7b0] sm:$0xff] }
 0x38a   :  { %5644 = vmatpush1.msra.mxu0 %v3032_v32  ;;  %5733 = vmatpush1.msra.mxu1 %v3288_v14  ;;  %v3520_v38 = vld [vmem:[%s19995_s3 + $0xfb0] sm:$0xff]  ;;  %v3257_v32 = vld [vmem:[%s19995_s3 + $0x778] sm:$0xff] }
 0x38b   :  { %5645 = vmatprep.subr.mxu0 %v3025_v50  ;;  %5734 = vmatprep.subr.mxu1 %v3281_v24  ;;  %v3513_v14 = vld [vmem:[%s19995_s3 + $0xf78] sm:$0xff]  ;;  %v3256_v50 = vld [vmem:[%s19995_s3 + $0x770] sm:$0xff] }
 0x38c   :  { %5646 = vmatpush1.msra.mxu0 %v3024_v37  ;;  %5735 = vmatpush1.msra.mxu1 %v3280_v16  ;;  %v3512_v24 = vld [vmem:[%s19995_s3 + $0xf70] sm:$0xff]  ;;  %v3249_v37 = vld [vmem:[%s19995_s3 + $0x738] sm:$0xff] }
 0x38d   :  { %5647 = vmatprep.subr.mxu0 %v3273_v3  ;;  %5736 = vmatprep.subr.mxu1 %v3529_v63  ;;  %v3505_v16 = vld [vmem:[%s19995_s3 + $0xf38] sm:$0xff]  ;;  %v3248_v3 = vld [vmem:[%s19995_s3 + $0x730] sm:$0xff] }
 0x38e   :  { %5648 = vmatpush2.msra.mxu0 %v3272_v0  ;;  %5737 = vmatpush2.msra.mxu1 %v3528_v46  ;;  %v3504_v63 = vld [vmem:[%s19995_s3 + $0xf30] sm:$0xff]  ;;  %v3241_v0 = vld [vmem:[%s19995_s3 + $0x6f8] sm:$0xff] }
 0x38f   :  { %5649 = vmatprep.subr.mxu0 %v3265_v34  ;;  %5738 = vmatprep.subr.mxu1 %v3521_v56  ;;  %v3497_v46 = vld [vmem:[%s19995_s3 + $0xef8] sm:$0xff]  ;;  %v3240_v34 = vld [vmem:[%s19995_s3 + $0x6f0] sm:$0xff] }
 0x390   :  { %5650 = vmatpush2.msra.mxu0 %v3264_v44  ;;  %5739 = vmatpush2.msra.mxu1 %v3520_v38  ;;  %v3496_v56 = vld [vmem:[%s19995_s3 + $0xef0] sm:$0xff]  ;;  %v3233_v44 = vld [vmem:[%s19995_s3 + $0x6b8] sm:$0xff] }
 0x391   :  { %5651 = vmatprep.subr.mxu0 %v3257_v32  ;;  %5740 = vmatprep.subr.mxu1 %v3513_v14  ;;  %v3489_v38 = vld [vmem:[%s19995_s3 + $0xeb8] sm:$0xff]  ;;  %v3232_v32 = vld [vmem:[%s19995_s3 + $0x6b0] sm:$0xff] }
 0x392   :  { %5652 = vmatpush2.msra.mxu0 %v3256_v50  ;;  %5741 = vmatpush2.msra.mxu1 %v3512_v24  ;;  %v3488_v14 = vld [vmem:[%s19995_s3 + $0xeb0] sm:$0xff] }
 0x393   :  { %5653 = vmatprep.subr.mxu0 %v3249_v37  ;;  %5742 = vmatprep.subr.mxu1 %v3505_v16  ;;  %v3225_v37 = vld [vmem:[%s19995_s3 + $0x678] sm:$0xff] }
 0x394   :  { %5654 = vmatpush2.msra.mxu0 %v3248_v3  ;;  %5743 = vmatpush2.msra.mxu1 %v3504_v63  ;;  %v3481_v16 = vld [vmem:[%s19995_s3 + $0xe78] sm:$0xff]  ;;  %v3224_v63 = vld [vmem:[%s19995_s3 + $0x670] sm:$0xff] }
 0x395   :  { %5655 = vmatprep.subr.mxu0 %v3241_v0  ;;  %5744 = vmatprep.subr.mxu1 %v3497_v46  ;;  %v5147_v50 = vpop.f32.mrf.mxu0  ;;  %v5236_v24 = vpop.f32.mrf.mxu1  ;;  %v3480_v0 = vld [vmem:[%s19995_s3 + $0xe70] sm:$0xff] }
 0x396   :  { %5656 = vmatpush2.msra.mxu0 %v3240_v34  ;;  %5745 = vmatpush2.msra.mxu1 %v3496_v56  ;;  %v5148_v3 = vadd.f32 %v5147_v50, %v14781_v33  ;;  %v3217_v56 = vld [vmem:[%s19995_s3 + $0x638] sm:$0xff]  ;;  %v3216_v50 = vld [vmem:[%s19995_s3 + $0x630] sm:$0xff] }
 0x397   :  { %5657 = vmatprep.subr.mxu0 %v3233_v44  ;;  %5746 = vmatprep.subr.mxu1 %v3489_v38  ;;  %v5149_v46 = vpop.f32.mrf.mxu0  ;;  %v5238_v34 = vpop.f32.mrf.mxu1  ;;  %v3473_v33 = vld [vmem:[%s19995_s3 + $0xe38] sm:$0xff] }
 0x398   :  { %5658 = vmatpush2.msra.mxu0 %v3232_v32  ;;  %5747 = vmatpush2.msra.mxu1 %v3488_v14  ;;  %v16454_v44 = vadd.f32 %v5236_v24, %v5148_v3  ;;  %v5150_v38 = vadd.f32 %v5149_v46, %v14795_v10  ;;  %v3472_v32 = vld [vmem:[%s19995_s3 + $0xe30] sm:$0xff]  ;;  %v3209_v14 = vld [vmem:[%s19995_s3 + $0x5f8] sm:$0xff] }
 0x399   :  { %5659 = vmatprep.subr.mxu0 %v3225_v37  ;;  %5748 = vmatprep.subr.mxu1 %v3481_v16  ;;  %v3465_v10 = vld [vmem:[%s19995_s3 + $0xdf8] sm:$0xff]  ;;  %v3208_v37 = vld [vmem:[%s19995_s3 + $0x5f0] sm:$0xff] }
 0x39a   :  { %5660 = vmatpush2.msra.mxu0 %v3224_v63  ;;  %5749 = vmatpush2.msra.mxu1 %v3480_v0  ;;  %v16469_v24 = vadd.f32 %v5238_v34, %v5150_v38  ;;  %v3464_v16 = vld [vmem:[%s19995_s3 + $0xdf0] sm:$0xff]  ;;  %v3201_v0 = vld [vmem:[%s19995_s3 + $0x5b8] sm:$0xff] }
 0x39b   :  { %5661 = vmatprep.subr.mxu0 %v3217_v56  ;;  %5750 = vmatprep.subr.mxu1 %v3473_v33  ;;  %v5153_v3 = vpop.f32.mrf.mxu0  ;;  %v5242_v63 = vpop.f32.mrf.mxu1  ;;  %v3457_v46 = vld [vmem:[%s19995_s3 + $0xdb8] sm:$0xff]  ;;  %v3200_v56 = vld [vmem:[%s19995_s3 + $0x5b0] sm:$0xff] }
 0x39c   :  { %5662 = vmatpush2.msra.mxu0 %v3216_v50  ;;  %5751 = vmatpush2.msra.mxu1 %v3472_v32  ;;  %v5154_v34 = vadd.f32 %v5153_v3, %v14821_v36  ;;  %v3456_v33 = vld [vmem:[%s19995_s3 + $0xdb0] sm:$0xff]  ;;  %v3193_v32 = vld [vmem:[%s19995_s3 + $0x578] sm:$0xff] }
 0x39d   :  { %5663 = vmatprep.subr.mxu0 %v3209_v14  ;;  %5752 = vmatprep.subr.mxu1 %v3465_v10  ;;  %v5155_v38 = vpop.f32.mrf.mxu0  ;;  %v5244_v50 = vpop.f32.mrf.mxu1  ;;  %v3449_v36 = vld [vmem:[%s19995_s3 + $0xd78] sm:$0xff]  ;;  %v3192_v3 = vld [vmem:[%s19995_s3 + $0x570] sm:$0xff] }
 0x39e   :  { %5664 = vmatpush2.msra.mxu0 %v3208_v37  ;;  %5753 = vmatpush2.msra.mxu1 %v3464_v16  ;;  %v16496_v14 = vadd.f32 %v5242_v63, %v5154_v34  ;;  %v5156_v10 = vadd.f32 %v5155_v38, %v14835_v39  ;;  %v3448_v37 = vld [vmem:[%s19995_s3 + $0xd70] sm:$0xff]  ;;  %v3185_v16 = vld [vmem:[%s19995_s3 + $0x538] sm:$0xff] }
 0x39f   :  { %5665 = vmatprep.subr.mxu0 %v3201_v0  ;;  %5754 = vmatprep.subr.mxu1 %v3457_v46  ;;  %v3441_v39 = vld [vmem:[%s19995_s3 + $0xd38] sm:$0xff]  ;;  %v3184_v0 = vld [vmem:[%s19995_s3 + $0x530] sm:$0xff] }
 0x3a0   :  { %5666 = vmatpush2.msra.mxu0 %v3200_v56  ;;  %5755 = vmatpush2.msra.mxu1 %v3456_v33  ;;  %v16511_v63 = vadd.f32 %v5244_v50, %v5156_v10  ;;  %v3440_v46 = vld [vmem:[%s19995_s3 + $0xd30] sm:$0xff]  ;;  %v3177_v33 = vld [vmem:[%s19995_s3 + $0x4f8] sm:$0xff] }
 0x3a1   :  { %5667 = vmatprep.subr.mxu0 %v3193_v32  ;;  %5756 = vmatprep.subr.mxu1 %v3449_v36  ;;  %v5159_v34 = vpop.f32.mrf.mxu0  ;;  %v5248_v56 = vpop.f32.mrf.mxu1  ;;  %v3433_v38 = vld [vmem:[%s19995_s3 + $0xcf8] sm:$0xff]  ;;  %v3176_v32 = vld [vmem:[%s19995_s3 + $0x4f0] sm:$0xff] }
 0x3a2   :  { %5668 = vmatpush2.msra.mxu0 %v3192_v3  ;;  %5757 = vmatpush2.msra.mxu1 %v3448_v37  ;;  %v5160_v50 = vadd.f32 %v5159_v34, %v14885_v13  ;;  %v3432_v36 = vld [vmem:[%s19995_s3 + $0xcf0] sm:$0xff]  ;;  %v3169_v37 = vld [vmem:[%s19995_s3 + $0x4b8] sm:$0xff] }
 0x3a3   :  { %5669 = vmatprep.subr.mxu0 %v3185_v16  ;;  %5758 = vmatprep.subr.mxu1 %v3441_v39  ;;  %v5161_v10 = vpop.f32.mrf.mxu0  ;;  %v5250_v3 = vpop.f32.mrf.mxu1  ;;  %v3425_v13 = vld [vmem:[%s19995_s3 + $0xcb8] sm:$0xff]  ;;  %v3168_v34 = vld [vmem:[%s19995_s3 + $0x4b0] sm:$0xff] }
 0x3a4   :  { %5670 = vmatpush2.msra.mxu0 %v3184_v0  ;;  %5759 = vmatpush2.msra.mxu1 %v3440_v46  ;;  %v16538_v16 = vadd.f32 %v5248_v56, %v5160_v50  ;;  %v5162_v39 = vadd.f32 %v5161_v10, %v14895_v28  ;;  %v3424_v0 = vld [vmem:[%s19995_s3 + $0xcb0] sm:$0xff]  ;;  %v3161_v46 = vld [vmem:[%s19995_s3 + $0x478] sm:$0xff] }
 0x3a5   :  { %5671 = vmatprep.subr.mxu0 %v3177_v33  ;;  %5760 = vmatprep.subr.mxu1 %v3433_v38  ;;  %v3417_v28 = vld [vmem:[%s19995_s3 + $0xc78] sm:$0xff]  ;;  %v3160_v33 = vld [vmem:[%s19995_s3 + $0x470] sm:$0xff] }
 0x3a6   :  { %5672 = vmatpush2.msra.mxu0 %v3176_v32  ;;  %5761 = vmatpush2.msra.mxu1 %v3432_v36  ;;  %v16553_v56 = vadd.f32 %v5250_v3, %v5162_v39  ;;  %v3416_v38 = vld [vmem:[%s19995_s3 + $0xc70] sm:$0xff]  ;;  %v3153_v36 = vld [vmem:[%s19995_s3 + $0x438] sm:$0xff] }
 0x3a7   :  { %5673 = vmatprep.subr.mxu0 %v3169_v37  ;;  %5762 = vmatprep.subr.mxu1 %v3425_v13  ;;  %v5165_v50 = vpop.f32.mrf.mxu0  ;;  %v5254_v32 = vpop.f32.mrf.mxu1  ;;  %v3409_v10 = vld [vmem:[%s19995_s3 + $0xc38] sm:$0xff]  ;;  %v3152_v37 = vld [vmem:[%s19995_s3 + $0x430] sm:$0xff] }
 0x3a8   :  { %5674 = vmatpush2.msra.mxu0 %v3168_v34  ;;  %5763 = vmatpush2.msra.mxu1 %v3424_v0  ;;  %v5166_v3 = vadd.f32 %v5165_v50, %v14917_v49  ;;  %v3408_v13 = vld [vmem:[%s19995_s3 + $0xc30] sm:$0xff]  ;;  %v10175_v49 = vld [vmem:[%s19995_s3 + $0x23c8] sm:$0xff] }
 0x3a9   :  { %5675 = vmatprep.subr.mxu0 %v3161_v46  ;;  %5764 = vmatprep.subr.mxu1 %v3417_v28  ;;  %v5167_v39 = vpop.f32.mrf.mxu0  ;;  %v10431_v46 = vld [vmem:[%s19995_s3 + $0x2bc8] sm:$0xff]  ;;  %v5256_v28 = vpop.f32.mrf.mxu1 }
 0x3aa   :  { %5676 = vmatpush2.msra.mxu0 %v3160_v33  ;;  %5765 = vmatpush2.msra.mxu1 %v3416_v38  ;;  %v16574_v34 = vadd.f32 %v5254_v32, %v5166_v3  ;;  %v5168_v0 = vadd.f32 %v5167_v39, %v14927_v15  ;;  %v10174_v15 = vld [vmem:[%s19995_s3 + $0x23c0] sm:$0xff]  ;;  %v10167_v38 = vld [vmem:[%s19995_s3 + $0x2388] sm:$0xff] }
 0x3ab   :  { %5677 = vmatprep.subr.mxu0 %v3153_v36  ;;  %5766 = vmatprep.subr.mxu1 %v3409_v10  ;;  %v10430_v33 = vld [vmem:[%s19995_s3 + $0x2bc0] sm:$0xff]  ;;  %v10159_v36 = vld [vmem:[%s19995_s3 + $0x2348] sm:$0xff] }
 0x3ac   :  { %5678 = vmatpush2.msra.mxu0 %v3152_v37  ;;  %5767 = vmatpush2.msra.mxu1 %v3408_v13  ;;  %v16583_v50 = vadd.f32 %v5256_v28, %v5168_v0  ;;  %v10422_v32 = vld [vmem:[%s19995_s3 + $0x2b80] sm:$0xff]  ;;  %v10151_v3 = vld [vmem:[%s19995_s3 + $0x2308] sm:$0xff] }
 0x3ad   :  { %5680 = vmatmul.mubr.f32.vlgmr.msra.gmra.mxu0 %v13674_v47  ;;  %5769 = vmatmul.mubr.f32.vlgmr.msra.gmra.mxu1 %v13688_v17  ;;  %v10423_v47 = vld [vmem:[%s19995_s3 + $0x2b88] sm:$0xff]  ;;  %v10166_v17 = vld [vmem:[%s19995_s3 + $0x2380] sm:$0xff] }
 0x3ae   :  { %6477 = vmatprep.subr.mxu0 %v10175_v49  ;;  %6566 = vmatprep.subr.mxu1 %v10431_v46  ;;  %v10414_v10 = vld [vmem:[%s19995_s3 + $0x2b40] sm:$0xff]  ;;  %v10143_v13 = vld [vmem:[%s19995_s3 + $0x22c8] sm:$0xff] }
 0x3af   :  { %5685 = vmatprep.mubr.f32.mxu0 %v13695_v55  ;;  %5774 = vmatprep.mubr.f32.mxu1 %v13721_v7  ;;  %v10415_v55 = vld [vmem:[%s19995_s3 + $0x2b48] sm:$0xff]  ;;  %v10158_v7 = vld [vmem:[%s19995_s3 + $0x2340] sm:$0xff] }
 0x3b0   :  { %6478 = vmatpush1.msra.mxu0 %v10174_v15  ;;  %6567 = vmatpush1.msra.mxu1 %v10430_v33  ;;  %v10406_v37 = vld [vmem:[%s19995_s3 + $0x2b00] sm:$0xff]  ;;  %v10135_v0 = vld [vmem:[%s19995_s3 + $0x2288] sm:$0xff] }
 0x3b1   :  { %6479 = vmatprep.subr.mxu0 %v10167_v38  ;;  %6568 = vmatprep.subr.mxu1 %v10423_v47  ;;  %v10398_v39 = vld [vmem:[%s19995_s3 + $0x2ac0] sm:$0xff]  ;;  %v10127_v46 = vld [vmem:[%s19995_s3 + $0x2248] sm:$0xff] }
 0x3b2   :  { %6480 = vmatpush1.msra.mxu0 %v10166_v17  ;;  %6569 = vmatpush1.msra.mxu1 %v10422_v32  ;;  %v10390_v49 = vld [vmem:[%s19995_s3 + $0x2a80] sm:$0xff]  ;;  %v10119_v15 = vld [vmem:[%s19995_s3 + $0x2208] sm:$0xff] }
 0x3b3   :  { %5686 = vmatmul.mubr.f32.gmra.mxu0 %v13704_v42  ;;  %5775 = vmatmul.mubr.f32.gmra.mxu1 %v13723_v22  ;;  %v10407_v42 = vld [vmem:[%s19995_s3 + $0x2b08] sm:$0xff]  ;;  %v10150_v22 = vld [vmem:[%s19995_s3 + $0x2300] sm:$0xff] }
 0x3b4   :  { %6481 = vmatprep.subr.mxu0 %v10159_v36  ;;  %6570 = vmatprep.subr.mxu1 %v10415_v55  ;;  %v10382_v28 = vld [vmem:[%s19995_s3 + $0x2a40] sm:$0xff]  ;;  %v10375_v33 = vld [vmem:[%s19995_s3 + $0x2a08] sm:$0xff] }
 0x3b5   :  { %5691 = vmatprep.mubr.f32.mxu0 %v13758_v27  ;;  %5780 = vmatprep.mubr.f32.mxu1 %v13776_v18  ;;  %v10399_v27 = vld [vmem:[%s19995_s3 + $0x2ac8] sm:$0xff]  ;;  %v10142_v18 = vld [vmem:[%s19995_s3 + $0x22c0] sm:$0xff] }
 0x3b6   :  { %6482 = vmatpush1.msra.mxu0 %v10158_v7  ;;  %6571 = vmatpush1.msra.mxu1 %v10414_v10  ;;  %v10118_v38 = vld [vmem:[%s19995_s3 + $0x2200] sm:$0xff]  ;;  %v10111_v17 = vld [vmem:[%s19995_s3 + $0x21c8] sm:$0xff] }
 0x3b7   :  { %6483 = vmatprep.subr.mxu0 %v10151_v3  ;;  %6572 = vmatprep.subr.mxu1 %v10407_v42  ;;  %v10374_v47 = vld [vmem:[%s19995_s3 + $0x2a00] sm:$0xff]  ;;  %v10367_v32 = vld [vmem:[%s19995_s3 + $0x29c8] sm:$0xff] }
 0x3b8   :  { %6484 = vmatpush1.msra.mxu0 %v10150_v22  ;;  %6573 = vmatpush1.msra.mxu1 %v10406_v37  ;;  %v10110_v36 = vld [vmem:[%s19995_s3 + $0x21c0] sm:$0xff]  ;;  %v10103_v7 = vld [vmem:[%s19995_s3 + $0x2188] sm:$0xff] }
 0x3b9   :  { %5692 = vmatmul.mubr.f32.gmra.mxu0 %v13761_v11  ;;  %5781 = vmatmul.mubr.f32.gmra.mxu1 %v13779_v61  ;;  %v10391_v11 = vld [vmem:[%s19995_s3 + $0x2a88] sm:$0xff]  ;;  %v10134_v61 = vld [vmem:[%s19995_s3 + $0x2280] sm:$0xff] }
 0x3ba   :  { %6485 = vmatprep.subr.mxu0 %v10143_v13  ;;  %6574 = vmatprep.subr.mxu1 %v10399_v27  ;;  %v10366_v55 = vld [vmem:[%s19995_s3 + $0x29c0] sm:$0xff]  ;;  %v10359_v10 = vld [vmem:[%s19995_s3 + $0x2988] sm:$0xff] }
 0x3bb   :  { %5697 = vmatprep.mubr.f32.mxu0 %v15381_v62  ;;  %5786 = vmatprep.mubr.f32.mxu1 %v15385_v6  ;;  %v10383_v62 = vld [vmem:[%s19995_s3 + $0x2a48] sm:$0xff]  ;;  %v10126_v6 = vld [vmem:[%s19995_s3 + $0x2240] sm:$0xff] }
 0x3bc   :  { %6486 = vmatpush1.msra.mxu0 %v10142_v18  ;;  %6575 = vmatpush1.msra.mxu1 %v10398_v39  ;;  %v10102_v3 = vld [vmem:[%s19995_s3 + $0x2180] sm:$0xff]  ;;  %v10095_v22 = vld [vmem:[%s19995_s3 + $0x2148] sm:$0xff] }
 0x3bd   :  { %6487 = vmatprep.subr.mxu0 %v10135_v0  ;;  %6576 = vmatprep.subr.mxu1 %v10391_v11  ;;  %v10358_v42 = vld [vmem:[%s19995_s3 + $0x2980] sm:$0xff]  ;;  %v10351_v37 = vld [vmem:[%s19995_s3 + $0x2948] sm:$0xff] }
 0x3be   :  { %6488 = vmatpush1.msra.mxu0 %v10134_v61  ;;  %6577 = vmatpush1.msra.mxu1 %v10390_v49  ;;  %v10094_v13 = vld [vmem:[%s19995_s3 + $0x2140] sm:$0xff]  ;;  %v10087_v18 = vld [vmem:[%s19995_s3 + $0x2108] sm:$0xff] }
 0x3bf   :  { %5698 = vmatmul.mubr.f32.gmra.mxu0 %v15355_v60  ;;  %5787 = vmatmul.mubr.f32.gmra.mxu1 %v15361_v43  ;;  %v10350_v27 = vld [vmem:[%s19995_s3 + $0x2940] sm:$0xff]  ;;  %v10343_v39 = vld [vmem:[%s19995_s3 + $0x2908] sm:$0xff] }
 0x3c0   :  { %6489 = vmatprep.subr.mxu0 %v10127_v46  ;;  %6578 = vmatprep.subr.mxu1 %v10383_v62  ;;  %v10086_v0 = vld [vmem:[%s19995_s3 + $0x2100] sm:$0xff]  ;;  %v10079_v61 = vld [vmem:[%s19995_s3 + $0x20c8] sm:$0xff] }
 0x3c1   :  { %6490 = vmatpush1.msra.mxu0 %v10126_v6  ;;  %6541 = vmatprep.mubr.f32.mxu0 %v13765_v19  ;;  %v10342_v11 = vld [vmem:[%s19995_s3 + $0x2900] sm:$0xff]  ;;  %v10335_v49 = vld [vmem:[%s19995_s3 + $0x28c8] sm:$0xff] }
 0x3c2   :  { %6579 = vmatpush1.msra.mxu1 %v10382_v28  ;;  %6630 = vmatprep.mubr.f32.mxu1 %v13782_v41  ;;  %v10078_v46 = vld [vmem:[%s19995_s3 + $0x20c0] sm:$0xff]  ;;  %v10071_v6 = vld [vmem:[%s19995_s3 + $0x2088] sm:$0xff] }
 0x3c3   :  { %6491 = vmatprep.subr.mxu0 %v10119_v15  ;;  %6580 = vmatprep.subr.mxu1 %v10375_v33  ;;  %v10334_v62 = vld [vmem:[%s19995_s3 + $0x28c0] sm:$0xff]  ;;  %v10327_v28 = vld [vmem:[%s19995_s3 + $0x2888] sm:$0xff] }
 0x3c4   :  { %6492 = vmatpush1.msra.mxu0 %v10118_v38  ;;  %6581 = vmatpush1.msra.mxu1 %v10374_v47  ;;  %v10070_v15 = vld [vmem:[%s19995_s3 + $0x2080] sm:$0xff]  ;;  %v10063_v38 = vld [vmem:[%s19995_s3 + $0x2048] sm:$0xff] }
 0x3c5   :  { %6493 = vmatprep.subr.mxu0 %v10111_v17  ;;  %6582 = vmatprep.subr.mxu1 %v10367_v32  ;;  %v10326_v33 = vld [vmem:[%s19995_s3 + $0x2880] sm:$0xff]  ;;  %v10319_v47 = vld [vmem:[%s19995_s3 + $0x2848] sm:$0xff] }
 0x3c6   :  { %6494 = vmatpush1.msra.mxu0 %v10110_v36  ;;  %6583 = vmatpush1.msra.mxu1 %v10366_v55  ;;  %v10062_v17 = vld [vmem:[%s19995_s3 + $0x2040] sm:$0xff]  ;;  %v10055_v36 = vld [vmem:[%s19995_s3 + $0x2008] sm:$0xff] }
 0x3c7   :  { %6495 = vmatprep.subr.mxu0 %v10103_v7  ;;  %6584 = vmatprep.subr.mxu1 %v10359_v10  ;;  %v10318_v32 = vld [vmem:[%s19995_s3 + $0x2840] sm:$0xff]  ;;  %v10311_v55 = vld [vmem:[%s19995_s3 + $0x2808] sm:$0xff] }
 0x3c8   :  { %6496 = vmatpush1.msra.mxu0 %v10102_v3  ;;  %6585 = vmatpush1.msra.mxu1 %v10358_v42  ;;  %v10054_v7 = vld [vmem:[%s19995_s3 + $0x2000] sm:$0xff]  ;;  %v10303_v3 = vld [vmem:[%s19995_s3 + $0x27c8] sm:$0xff] }
 0x3c9   :  { %6497 = vmatprep.subr.mxu0 %v10095_v22  ;;  %6586 = vmatprep.subr.mxu1 %v10351_v37  ;;  %v10310_v10 = vld [vmem:[%s19995_s3 + $0x2800] sm:$0xff]  ;;  %v10559_v42 = vld [vmem:[%s19995_s3 + $0x2fc8] sm:$0xff] }
 0x3ca   :  { %6498 = vmatpush1.msra.mxu0 %v10094_v13  ;;  %6587 = vmatpush1.msra.mxu1 %v10350_v27  ;;  %v10302_v22 = vld [vmem:[%s19995_s3 + $0x27c0] sm:$0xff]  ;;  %v10295_v13 = vld [vmem:[%s19995_s3 + $0x2788] sm:$0xff] }
 0x3cb   :  { %6499 = vmatprep.subr.mxu0 %v10087_v18  ;;  %6588 = vmatprep.subr.mxu1 %v10343_v39  ;;  %v10558_v37 = vld [vmem:[%s19995_s3 + $0x2fc0] sm:$0xff]  ;;  %v10551_v27 = vld [vmem:[%s19995_s3 + $0x2f88] sm:$0xff] }
 0x3cc   :  { %6500 = vmatpush1.msra.mxu0 %v10086_v0  ;;  %6589 = vmatpush1.msra.mxu1 %v10342_v11  ;;  %v10294_v18 = vld [vmem:[%s19995_s3 + $0x2780] sm:$0xff]  ;;  %v10287_v0 = vld [vmem:[%s19995_s3 + $0x2748] sm:$0xff] }
 0x3cd   :  { %6501 = vmatprep.subr.mxu0 %v10079_v61  ;;  %6590 = vmatprep.subr.mxu1 %v10335_v49  ;;  %v10550_v39 = vld [vmem:[%s19995_s3 + $0x2f80] sm:$0xff]  ;;  %v10543_v11 = vld [vmem:[%s19995_s3 + $0x2f48] sm:$0xff] }
 0x3ce   :  { %6502 = vmatpush1.msra.mxu0 %v10078_v46  ;;  %6591 = vmatpush1.msra.mxu1 %v10334_v62  ;;  %v10286_v61 = vld [vmem:[%s19995_s3 + $0x2740] sm:$0xff]  ;;  %v10279_v46 = vld [vmem:[%s19995_s3 + $0x2708] sm:$0xff] }
 0x3cf   :  { %6503 = vmatprep.subr.mxu0 %v10071_v6  ;;  %6592 = vmatprep.subr.mxu1 %v10327_v28  ;;  %v10542_v49 = vld [vmem:[%s19995_s3 + $0x2f40] sm:$0xff]  ;;  %v10535_v62 = vld [vmem:[%s19995_s3 + $0x2f08] sm:$0xff] }
 0x3d0   :  { %6504 = vmatpush1.msra.mxu0 %v10070_v15  ;;  %6593 = vmatpush1.msra.mxu1 %v10326_v33  ;;  %v10278_v6 = vld [vmem:[%s19995_s3 + $0x2700] sm:$0xff]  ;;  %v10271_v15 = vld [vmem:[%s19995_s3 + $0x26c8] sm:$0xff] }
 0x3d1   :  { %6505 = vmatprep.subr.mxu0 %v10063_v38  ;;  %6594 = vmatprep.subr.mxu1 %v10319_v47  ;;  %v10534_v28 = vld [vmem:[%s19995_s3 + $0x2f00] sm:$0xff]  ;;  %v10527_v33 = vld [vmem:[%s19995_s3 + $0x2ec8] sm:$0xff] }
 0x3d2   :  { %6506 = vmatpush1.msra.mxu0 %v10062_v17  ;;  %6595 = vmatpush1.msra.mxu1 %v10318_v32  ;;  %v10270_v38 = vld [vmem:[%s19995_s3 + $0x26c0] sm:$0xff]  ;;  %v10263_v17 = vld [vmem:[%s19995_s3 + $0x2688] sm:$0xff] }
 0x3d3   :  { %6507 = vmatprep.subr.mxu0 %v10055_v36  ;;  %6596 = vmatprep.subr.mxu1 %v10311_v55  ;;  %v10526_v47 = vld [vmem:[%s19995_s3 + $0x2ec0] sm:$0xff]  ;;  %v10519_v32 = vld [vmem:[%s19995_s3 + $0x2e88] sm:$0xff] }
 0x3d4   :  { %6508 = vmatpush1.msra.mxu0 %v10054_v7  ;;  %6597 = vmatpush1.msra.mxu1 %v10310_v10  ;;  %v10262_v36 = vld [vmem:[%s19995_s3 + $0x2680] sm:$0xff] }
 0x3d5   :  { %6509 = vmatprep.subr.mxu0 %v10303_v3  ;;  %6598 = vmatprep.subr.mxu1 %v10559_v42  ;;  %v10518_v55 = vld [vmem:[%s19995_s3 + $0x2e80] sm:$0xff]  ;;  %v10255_v3 = vld [vmem:[%s19995_s3 + $0x2648] sm:$0xff] }
 0x3d6   :  { %6510 = vmatpush2.msra.mxu0 %v10302_v22  ;;  %6599 = vmatpush2.msra.mxu1 %v10558_v37  ;;  %v10511_v42 = vld [vmem:[%s19995_s3 + $0x2e48] sm:$0xff]  ;;  %v10254_v37 = vld [vmem:[%s19995_s3 + $0x2640] sm:$0xff] }
 0x3d7   :  { %6511 = vmatprep.subr.mxu0 %v10295_v13  ;;  %6600 = vmatprep.subr.mxu1 %v10551_v27  ;;  %v10510_v13 = vld [vmem:[%s19995_s3 + $0x2e40] sm:$0xff] }
 0x3d8   :  { %6512 = vmatpush2.msra.mxu0 %v10294_v18  ;;  %6601 = vmatpush2.msra.mxu1 %v10550_v39  ;;  %v10247_v39 = vld [vmem:[%s19995_s3 + $0x2608] sm:$0xff] }
 0x3d9   :  { %6513 = vmatprep.subr.mxu0 %v10287_v0  ;;  %6602 = vmatprep.subr.mxu1 %v10543_v11 }
 0x3da   :  { %6514 = vmatpush2.msra.mxu0 %v10286_v61  ;;  %6603 = vmatpush2.msra.mxu1 %v10542_v49  ;;  %v10246_v61 = vld [vmem:[%s19995_s3 + $0x2600] sm:$0xff] }
 0x3db   :  { %6515 = vmatprep.subr.mxu0 %v10279_v46  ;;  %6604 = vmatprep.subr.mxu1 %v10535_v62  ;;  %v10502_v49 = vld [vmem:[%s19995_s3 + $0x2e00] sm:$0xff]  ;;  %v10239_v46 = vld [vmem:[%s19995_s3 + $0x25c8] sm:$0xff] }
 0x3dc   :  { %6516 = vmatpush2.msra.mxu0 %v10278_v6  ;;  %6605 = vmatpush2.msra.mxu1 %v10534_v28  ;;  %v10238_v6 = vld [vmem:[%s19995_s3 + $0x25c0] sm:$0xff] }
 0x3dd   :  { %6517 = vmatprep.subr.mxu0 %v10271_v15  ;;  %6606 = vmatprep.subr.mxu1 %v10527_v33  ;;  %v5325_v7 = vpop.f32.mrf.mxu0  ;;  %v5414_v10 = vpop.f32.mrf.mxu1  ;;  %v10494_v28 = vld [vmem:[%s19995_s3 + $0x2dc0] sm:$0xff] }
 0x3de   :  { %6518 = vmatpush2.msra.mxu0 %v10270_v38  ;;  %6607 = vmatpush2.msra.mxu1 %v10526_v47  ;;  %v5326_v22 = vadd.f32 %v5325_v7, %v15173_v8  ;;  %v10503_v8 = vld [vmem:[%s19995_s3 + $0x2e08] sm:$0xff] }
 0x3df   :  { %6519 = vmatprep.subr.mxu0 %v10263_v17  ;;  %6608 = vmatprep.subr.mxu1 %v10519_v32  ;;  %v5327_v27 = vpop.f32.mrf.mxu0  ;;  %v5416_v18 = vpop.f32.mrf.mxu1  ;;  %v10231_v38 = vld [vmem:[%s19995_s3 + $0x2588] sm:$0xff]  ;;  %v10230_v32 = vld [vmem:[%s19995_s3 + $0x2580] sm:$0xff] }
 0x3e0   :  { %6520 = vmatpush2.msra.mxu0 %v10262_v36  ;;  %6609 = vmatpush2.msra.mxu1 %v10518_v55  ;;  %v16878_v0 = vadd.f32 %v5414_v10, %v5326_v22  ;;  %v5328_v11 = vadd.f32 %v5327_v27, %v15187_v1  ;;  %v10495_v1 = vld [vmem:[%s19995_s3 + $0x2dc8] sm:$0xff]  ;;  %v10486_v36 = vld [vmem:[%s19995_s3 + $0x2d80] sm:$0xff] }
 0x3e1   :  { %6521 = vmatprep.subr.mxu0 %v10255_v3  ;;  %6610 = vmatprep.subr.mxu1 %v10511_v42  ;;  %v10487_v47 = vld [vmem:[%s19995_s3 + $0x2d88] sm:$0xff]  ;;  %v10222_v22 = vld [vmem:[%s19995_s3 + $0x2540] sm:$0xff] }
 0x3e2   :  { %6522 = vmatpush2.msra.mxu0 %v10254_v37  ;;  %6611 = vmatpush2.msra.mxu1 %v10510_v13  ;;  %v16893_v62 = vadd.f32 %v5416_v18, %v5328_v11  ;;  %v10223_v10 = vld [vmem:[%s19995_s3 + $0x2548] sm:$0xff]  ;;  %v10478_v37 = vld [vmem:[%s19995_s3 + $0x2d40] sm:$0xff] }
 0x3e3   :  { %6523 = vmatprep.subr.mxu0 %v10247_v39  ;;  %6612 = vmatprep.subr.mxu1 %v10503_v8  ;;  %v5331_v15 = vpop.f32.mrf.mxu0  ;;  %v5420_v33 = vpop.f32.mrf.mxu1  ;;  %v10215_v13 = vld [vmem:[%s19995_s3 + $0x2508] sm:$0xff]  ;;  %v10214_v18 = vld [vmem:[%s19995_s3 + $0x2500] sm:$0xff] }
 0x3e4   :  { %6524 = vmatpush2.msra.mxu0 %v10246_v61  ;;  %6613 = vmatpush2.msra.mxu1 %v10502_v49  ;;  %v5332_v17 = vadd.f32 %v5331_v15, %v15213_v58  ;;  %v10479_v58 = vld [vmem:[%s19995_s3 + $0x2d48] sm:$0xff]  ;;  %v10470_v39 = vld [vmem:[%s19995_s3 + $0x2d00] sm:$0xff] }
 0x3e5   :  { %6525 = vmatprep.subr.mxu0 %v10239_v46  ;;  %6614 = vmatprep.subr.mxu1 %v10495_v1  ;;  %v5333_v55 = vpop.f32.mrf.mxu0  ;;  %v5422_v7 = vpop.f32.mrf.mxu1  ;;  %v10207_v61 = vld [vmem:[%s19995_s3 + $0x24c8] sm:$0xff]  ;;  %v10206_v1 = vld [vmem:[%s19995_s3 + $0x24c0] sm:$0xff] }
 0x3e6   :  { %6526 = vmatpush2.msra.mxu0 %v10238_v6  ;;  %6615 = vmatpush2.msra.mxu1 %v10494_v28  ;;  %v16920_v3 = vadd.f32 %v5420_v33, %v5332_v17  ;;  %v5334_v42 = vadd.f32 %v5333_v55, %v15227_v2  ;;  %v10471_v2 = vld [vmem:[%s19995_s3 + $0x2d08] sm:$0xff]  ;;  %v10462_v6 = vld [vmem:[%s19995_s3 + $0x2cc0] sm:$0xff] }
 0x3e7   :  { %6527 = vmatprep.subr.mxu0 %v10231_v38  ;;  %6616 = vmatprep.subr.mxu1 %v10487_v47  ;;  %v10463_v49 = vld [vmem:[%s19995_s3 + $0x2cc8] sm:$0xff]  ;;  %v10198_v17 = vld [vmem:[%s19995_s3 + $0x2480] sm:$0xff] }
 0x3e8   :  { %6528 = vmatpush2.msra.mxu0 %v10230_v32  ;;  %6617 = vmatpush2.msra.mxu1 %v10486_v36  ;;  %v16935_v27 = vadd.f32 %v5422_v7, %v5334_v42  ;;  %v10199_v33 = vld [vmem:[%s19995_s3 + $0x2488] sm:$0xff]  ;;  %v10454_v32 = vld [vmem:[%s19995_s3 + $0x2c80] sm:$0xff] }
 0x3e9   :  { %6529 = vmatprep.subr.mxu0 %v10223_v10  ;;  %6618 = vmatprep.subr.mxu1 %v10479_v58  ;;  %v5337_v8 = vpop.f32.mrf.mxu0  ;;  %v5426_v11 = vpop.f32.mrf.mxu1  ;;  %v10191_v36 = vld [vmem:[%s19995_s3 + $0x2448] sm:$0xff]  ;;  %v10190_v7 = vld [vmem:[%s19995_s3 + $0x2440] sm:$0xff] }
 0x3ea   :  { %6530 = vmatpush2.msra.mxu0 %v10222_v22  ;;  %6619 = vmatpush2.msra.mxu1 %v10478_v37  ;;  %v5338_v46 = vadd.f32 %v5337_v8, %v15253_v59  ;;  %v10455_v59 = vld [vmem:[%s19995_s3 + $0x2c88] sm:$0xff]  ;;  %v10446_v10 = vld [vmem:[%s19995_s3 + $0x2c40] sm:$0xff] }
 0x3eb   :  { %6531 = vmatprep.subr.mxu0 %v10215_v13  ;;  %6620 = vmatprep.subr.mxu1 %v10471_v2  ;;  %v5339_v28 = vpop.f32.mrf.mxu0  ;;  %v5428_v15 = vpop.f32.mrf.mxu1  ;;  %v10183_v22 = vld [vmem:[%s19995_s3 + $0x2408] sm:$0xff]  ;;  %v10182_v2 = vld [vmem:[%s19995_s3 + $0x2400] sm:$0xff] }
 0x3ec   :  { %6532 = vmatpush2.msra.mxu0 %v10214_v18  ;;  %6621 = vmatpush2.msra.mxu1 %v10470_v39  ;;  %v16962_v38 = vadd.f32 %v5426_v11, %v5338_v46  ;;  %v5340_v47 = vadd.f32 %v5339_v28, %v15267_v26  ;;  %v10447_v26 = vld [vmem:[%s19995_s3 + $0x2c48] sm:$0xff]  ;;  %v10438_v18 = vld [vmem:[%s19995_s3 + $0x2c00] sm:$0xff]  ;;  %v10425_v28 = vld [vmem:[%s19995_s3 + $0x2b98] sm:$0xff] }
 0x3ed   :  { %6533 = vmatprep.subr.mxu0 %v10207_v61  ;;  %6622 = vmatprep.subr.mxu1 %v10463_v49  ;;  %v10439_v37 = vld [vmem:[%s19995_s3 + $0x2c08] sm:$0xff]  ;;  %v10433_v61 = vld [vmem:[%s19995_s3 + $0x2bd8] sm:$0xff] }
 0x3ee   :  { %6534 = vmatpush2.msra.mxu0 %v10206_v1  ;;  %6623 = vmatpush2.msra.mxu1 %v10462_v6  ;;  %v16977_v55 = vadd.f32 %v5428_v15, %v5340_v47  ;;  %v10432_v1 = vld [vmem:[%s19995_s3 + $0x2bd0] sm:$0xff]  ;;  %v10169_v6 = vld [vmem:[%s19995_s3 + $0x2398] sm:$0xff]  ;;  %v6444_v47 = vcombine.high %v13513_v21, %v20127_v29 }
 0x3ef   :  { %6535 = vmatprep.subr.mxu0 %v10199_v33  ;;  %6624 = vmatprep.subr.mxu1 %v10455_v59  ;;  %v5343_v58 = vpop.f32.mrf.mxu0  ;;  %v5432_v42 = vpop.f32.mrf.mxu1  ;;  %v10168_v15 = vld [vmem:[%s19995_s3 + $0x2390] sm:$0xff]  ;;  %v6443_v59 = vcombine.low %v13513_v21, %v20127_v29  ;;  %v17049_v21 = vcombine.high %v13749_v23, %v15361_v43 }
 0x3f0   :  { %6536 = vmatpush2.msra.mxu0 %v10198_v17  ;;  %6625 = vmatpush2.msra.mxu1 %v10454_v32  ;;  %v5344_v13 = vadd.f32 %v5343_v58, %v15293_v45  ;;  %v10177_v45 = vld [vmem:[%s19995_s3 + $0x23d8] sm:$0xff]  ;;  %v10424_v33 = vld [vmem:[%s19995_s3 + $0x2b90] sm:$0xff] }
 0x3f1   :  { %6537 = vmatprep.subr.mxu0 %v10191_v36  ;;  %6626 = vmatprep.subr.mxu1 %v10447_v26  ;;  %v5345_v39 = vpop.f32.mrf.mxu0  ;;  %v5434_v49 = vpop.f32.mrf.mxu1  ;;  %v10161_v17 = vld [vmem:[%s19995_s3 + $0x2358] sm:$0xff]  ;;  %v17045_v36 = vcombine.high %v13734_v30, %v15355_v60  ;;  %v10160_v26 = vld [vmem:[%s19995_s3 + $0x2350] sm:$0xff] }
 0x3f2   :  { %6538 = vmatpush2.msra.mxu0 %v10190_v7  ;;  %6627 = vmatpush2.msra.mxu1 %v10446_v10  ;;  %v16998_v8 = vadd.f32 %v5432_v42, %v5344_v13  ;;  %v5346_v11 = vadd.f32 %v5345_v39, %v15301_v48  ;;  %v10176_v48 = vld [vmem:[%s19995_s3 + $0x23d0] sm:$0xff]  ;;  %v10417_v32 = vld [vmem:[%s19995_s3 + $0x2b58] sm:$0xff]  ;;  %v17075_v13 = vrot.slane %v6444_v47, %v20075_v31 }
 0x3f3   :  { %6539 = vmatprep.subr.mxu0 %v10183_v22  ;;  %6628 = vmatprep.subr.mxu1 %v10439_v37  ;;  %v10416_v7 = vld [vmem:[%s19995_s3 + $0x2b50] sm:$0xff]  ;;  %v10153_v10 = vld [vmem:[%s19995_s3 + $0x2318] sm:$0xff]  ;;  %v17072_v37 = vrot.slane %v6443_v59, %v20075_v31 }
 0x3f4   :  { %6540 = vmatpush2.msra.mxu0 %v10182_v2  ;;  %6629 = vmatpush2.msra.mxu1 %v10438_v18  ;;  %v17007_v46 = vadd.f32 %v5434_v49, %v5346_v11  ;;  %v10409_v58 = vld [vmem:[%s19995_s3 + $0x2b18] sm:$0xff]  ;;  %v10152_v42 = vld [vmem:[%s19995_s3 + $0x2310] sm:$0xff]  ;;  %v17079_v2 = vcombine.low %v13734_v30, %v15355_v60  ;;  %v17083_v18 = vcombine.low %v13749_v23, %v15361_v43 }
 0x3f5   :  { %6542 = vmatmul.mubr.f32.vlgmr.msra.gmra.mxu0 %v13786_v20  ;;  %6631 = vmatmul.mubr.f32.vlgmr.msra.gmra.mxu1 %v13789_v40  ;;  %v10408_v22 = vld [vmem:[%s19995_s3 + $0x2b10] sm:$0xff]  ;;  %v10145_v39 = vld [vmem:[%s19995_s3 + $0x22d8] sm:$0xff]  ;;  %v17095_v30 = vcombine.high %v17072_v37, %v17072_v37  ;;  %v17099_v23 = vcombine.high %v17075_v13, %v17075_v13 }
 0x3f6   :  { %6655 = vmatprep.subr.mxu0 %v10177_v45  ;;  %6744 = vmatprep.subr.mxu1 %v10433_v61  ;;  %v10401_v11 = vld [vmem:[%s19995_s3 + $0x2ad8] sm:$0xff]  ;;  %v10144_v60 = vld [vmem:[%s19995_s3 + $0x22d0] sm:$0xff] }
 0x3f7   :  { %6547 = vmatprep.mubr.f32.mxu0 %v13792_v54  ;;  %6636 = vmatprep.mubr.f32.mxu1 %v13800_v12  ;;  %v10400_v43 = vld [vmem:[%s19995_s3 + $0x2ad0] sm:$0xff]  ;;  %v10137_v45 = vld [vmem:[%s19995_s3 + $0x2298] sm:$0xff] }
 0x3f8   :  { %6656 = vmatpush1.msra.mxu0 %v10176_v48  ;;  %6745 = vmatpush1.msra.mxu1 %v10432_v1  ;;  %v10393_v61 = vld [vmem:[%s19995_s3 + $0x2a98] sm:$0xff]  ;;  %v10136_v49 = vld [vmem:[%s19995_s3 + $0x2290] sm:$0xff] }
 0x3f9   :  { %6657 = vmatprep.subr.mxu0 %v10169_v6  ;;  %6746 = vmatprep.subr.mxu1 %v10425_v28  ;;  %v10392_v48 = vld [vmem:[%s19995_s3 + $0x2a90] sm:$0xff]  ;;  %v10129_v1 = vld [vmem:[%s19995_s3 + $0x2258] sm:$0xff] }
 0x3fa   :  { %6658 = vmatpush1.msra.mxu0 %v10168_v15  ;;  %6747 = vmatpush1.msra.mxu1 %v10424_v33  ;;  %v10385_v6 = vld [vmem:[%s19995_s3 + $0x2a58] sm:$0xff]  ;;  %v10128_v28 = vld [vmem:[%s19995_s3 + $0x2250] sm:$0xff] }
 0x3fb   :  { %6548 = vmatmul.mubr.f32.gmra.mxu0 %v13803_v52  ;;  %6637 = vmatmul.mubr.f32.gmra.mxu1 %v13805_v51  ;;  %v10384_v15 = vld [vmem:[%s19995_s3 + $0x2a50] sm:$0xff]  ;;  %v10121_v33 = vld [vmem:[%s19995_s3 + $0x2218] sm:$0xff] }
 0x3fc   :  { %6659 = vmatprep.subr.mxu0 %v10161_v17  ;;  %6748 = vmatprep.subr.mxu1 %v10417_v32  ;;  %v10377_v59 = vld [vmem:[%s19995_s3 + $0x2a18] sm:$0xff]  ;;  %v10120_v47 = vld [vmem:[%s19995_s3 + $0x2210] sm:$0xff] }
 0x3fd   :  { %6553 = vmatprep.mubr.f32.mxu0 %v17045_v36  ;;  %6642 = vmatprep.mubr.f32.mxu1 %v17049_v21  ;;  %v10376_v17 = vld [vmem:[%s19995_s3 + $0x2a10] sm:$0xff]  ;;  %v10113_v32 = vld [vmem:[%s19995_s3 + $0x21d8] sm:$0xff] }
 0x3fe   :  { %6660 = vmatpush1.msra.mxu0 %v10160_v26  ;;  %6749 = vmatpush1.msra.mxu1 %v10416_v7  ;;  %v10369_v26 = vld [vmem:[%s19995_s3 + $0x29d8] sm:$0xff]  ;;  %v10112_v7 = vld [vmem:[%s19995_s3 + $0x21d0] sm:$0xff] }
 0x3ff   :  { %6661 = vmatprep.subr.mxu0 %v10153_v10  ;;  %6750 = vmatprep.subr.mxu1 %v10409_v58  ;;  %v10368_v10 = vld [vmem:[%s19995_s3 + $0x29d0] sm:$0xff]  ;;  %v10105_v58 = vld [vmem:[%s19995_s3 + $0x2198] sm:$0xff] }
 0x400   :  { %6662 = vmatpush1.msra.mxu0 %v10152_v42  ;;  %6751 = vmatpush1.msra.mxu1 %v10408_v22  ;;  %v10361_v42 = vld [vmem:[%s19995_s3 + $0x2998] sm:$0xff]  ;;  %v10104_v22 = vld [vmem:[%s19995_s3 + $0x2190] sm:$0xff] }
 0x401   :  { %6554 = vmatmul.mubr.f32.gmra.mxu0 %v17079_v2  ;;  %6643 = vmatmul.mubr.f32.gmra.mxu1 %v17083_v18 }
 0x402   :  { %6663 = vmatprep.subr.mxu0 %v10145_v39  ;;  %6752 = vmatprep.subr.mxu1 %v10401_v11  ;;  %v10360_v39 = vld [vmem:[%s19995_s3 + $0x2990] sm:$0xff]  ;;  %v10097_v11 = vld [vmem:[%s19995_s3 + $0x2158] sm:$0xff] }
 0x403   :  { %6559 = vmatprep.mubr.f32.mxu0 %v17095_v30  ;;  %6648 = vmatprep.mubr.f32.mxu1 %v17099_v23 }
 0x404   :  { %6664 = vmatpush1.msra.mxu0 %v10144_v60  ;;  %6753 = vmatpush1.msra.mxu1 %v10400_v43  ;;  %v10353_v60 = vld [vmem:[%s19995_s3 + $0x2958] sm:$0xff]  ;;  %v10096_v43 = vld [vmem:[%s19995_s3 + $0x2150] sm:$0xff] }
 0x405   :  { %6665 = vmatprep.subr.mxu0 %v10137_v45  ;;  %6754 = vmatprep.subr.mxu1 %v10393_v61  ;;  %v10352_v45 = vld [vmem:[%s19995_s3 + $0x2950] sm:$0xff]  ;;  %v10089_v61 = vld [vmem:[%s19995_s3 + $0x2118] sm:$0xff] }
 0x406   :  { %6666 = vmatpush1.msra.mxu0 %v10136_v49  ;;  %6755 = vmatpush1.msra.mxu1 %v10392_v48  ;;  %v10345_v49 = vld [vmem:[%s19995_s3 + $0x2918] sm:$0xff]  ;;  %v10088_v48 = vld [vmem:[%s19995_s3 + $0x2110] sm:$0xff] }
 0x407   :  { %6560 = vmatmul.mubr.f32.gmra.mxu0 %v17072_v37  ;;  %6649 = vmatmul.mubr.f32.gmra.mxu1 %v17075_v13 }
 0x408   :  { %6667 = vmatprep.subr.mxu0 %v10129_v1  ;;  %6756 = vmatprep.subr.mxu1 %v10385_v6  ;;  %v10344_v1 = vld [vmem:[%s19995_s3 + $0x2910] sm:$0xff]  ;;  %v10081_v6 = vld [vmem:[%s19995_s3 + $0x20d8] sm:$0xff] }
 0x409   :  { %6668 = vmatpush1.msra.mxu0 %v10128_v28  ;;  %6719 = vmatprep.mubr.f32.mxu0 %v13765_v19  ;;  %v10337_v28 = vld [vmem:[%s19995_s3 + $0x28d8] sm:$0xff] }
 0x40a   :  { %6757 = vmatpush1.msra.mxu1 %v10384_v15  ;;  %6808 = vmatprep.mubr.f32.mxu1 %v13782_v41  ;;  %v10080_v15 = vld [vmem:[%s19995_s3 + $0x20d0] sm:$0xff] }
 0x40b   :  { %6669 = vmatprep.subr.mxu0 %v10121_v33  ;;  %6758 = vmatprep.subr.mxu1 %v10377_v59  ;;  %v10336_v33 = vld [vmem:[%s19995_s3 + $0x28d0] sm:$0xff]  ;;  %v10073_v59 = vld [vmem:[%s19995_s3 + $0x2098] sm:$0xff] }
 0x40c   :  { %6670 = vmatpush1.msra.mxu0 %v10120_v47  ;;  %6759 = vmatpush1.msra.mxu1 %v10376_v17  ;;  %v10329_v47 = vld [vmem:[%s19995_s3 + $0x2898] sm:$0xff]  ;;  %v10072_v17 = vld [vmem:[%s19995_s3 + $0x2090] sm:$0xff] }
 0x40d   :  { %6671 = vmatprep.subr.mxu0 %v10113_v32  ;;  %6760 = vmatprep.subr.mxu1 %v10369_v26  ;;  %v10328_v32 = vld [vmem:[%s19995_s3 + $0x2890] sm:$0xff]  ;;  %v10065_v26 = vld [vmem:[%s19995_s3 + $0x2058] sm:$0xff] }
 0x40e   :  { %6672 = vmatpush1.msra.mxu0 %v10112_v7  ;;  %6761 = vmatpush1.msra.mxu1 %v10368_v10  ;;  %v10321_v7 = vld [vmem:[%s19995_s3 + $0x2858] sm:$0xff]  ;;  %v10064_v10 = vld [vmem:[%s19995_s3 + $0x2050] sm:$0xff] }
 0x40f   :  { %6673 = vmatprep.subr.mxu0 %v10105_v58  ;;  %6762 = vmatprep.subr.mxu1 %v10361_v42  ;;  %v10320_v58 = vld [vmem:[%s19995_s3 + $0x2850] sm:$0xff]  ;;  %v10057_v42 = vld [vmem:[%s19995_s3 + $0x2018] sm:$0xff] }
 0x410   :  { %6674 = vmatpush1.msra.mxu0 %v10104_v22  ;;  %6763 = vmatpush1.msra.mxu1 %v10360_v39  ;;  %v10313_v22 = vld [vmem:[%s19995_s3 + $0x2818] sm:$0xff]  ;;  %v10056_v39 = vld [vmem:[%s19995_s3 + $0x2010] sm:$0xff] }
 0x411   :  { %6675 = vmatprep.subr.mxu0 %v10097_v11  ;;  %6764 = vmatprep.subr.mxu1 %v10353_v60  ;;  %v10312_v11 = vld [vmem:[%s19995_s3 + $0x2810] sm:$0xff]  ;;  %v10305_v60 = vld [vmem:[%s19995_s3 + $0x27d8] sm:$0xff] }
 0x412   :  { %6676 = vmatpush1.msra.mxu0 %v10096_v43  ;;  %6765 = vmatpush1.msra.mxu1 %v10352_v45  ;;  %v10561_v43 = vld [vmem:[%s19995_s3 + $0x2fd8] sm:$0xff]  ;;  %v10304_v45 = vld [vmem:[%s19995_s3 + $0x27d0] sm:$0xff] }
 0x413   :  { %6677 = vmatprep.subr.mxu0 %v10089_v61  ;;  %6766 = vmatprep.subr.mxu1 %v10345_v49  ;;  %v10560_v61 = vld [vmem:[%s19995_s3 + $0x2fd0] sm:$0xff]  ;;  %v10297_v49 = vld [vmem:[%s19995_s3 + $0x2798] sm:$0xff] }
 0x414   :  { %6678 = vmatpush1.msra.mxu0 %v10088_v48  ;;  %6767 = vmatpush1.msra.mxu1 %v10344_v1  ;;  %v10553_v48 = vld [vmem:[%s19995_s3 + $0x2f98] sm:$0xff]  ;;  %v10296_v1 = vld [vmem:[%s19995_s3 + $0x2790] sm:$0xff] }
 0x415   :  { %6679 = vmatprep.subr.mxu0 %v10081_v6  ;;  %6768 = vmatprep.subr.mxu1 %v10337_v28  ;;  %v10552_v6 = vld [vmem:[%s19995_s3 + $0x2f90] sm:$0xff]  ;;  %v10289_v28 = vld [vmem:[%s19995_s3 + $0x2758] sm:$0xff] }
 0x416   :  { %6680 = vmatpush1.msra.mxu0 %v10080_v15  ;;  %6769 = vmatpush1.msra.mxu1 %v10336_v33  ;;  %v10545_v15 = vld [vmem:[%s19995_s3 + $0x2f58] sm:$0xff]  ;;  %v10288_v33 = vld [vmem:[%s19995_s3 + $0x2750] sm:$0xff] }
 0x417   :  { %6681 = vmatprep.subr.mxu0 %v10073_v59  ;;  %6770 = vmatprep.subr.mxu1 %v10329_v47  ;;  %v10544_v59 = vld [vmem:[%s19995_s3 + $0x2f50] sm:$0xff]  ;;  %v10281_v47 = vld [vmem:[%s19995_s3 + $0x2718] sm:$0xff] }
 0x418   :  { %6682 = vmatpush1.msra.mxu0 %v10072_v17  ;;  %6771 = vmatpush1.msra.mxu1 %v10328_v32  ;;  %v10537_v17 = vld [vmem:[%s19995_s3 + $0x2f18] sm:$0xff]  ;;  %v10280_v32 = vld [vmem:[%s19995_s3 + $0x2710] sm:$0xff] }
 0x419   :  { %6683 = vmatprep.subr.mxu0 %v10065_v26  ;;  %6772 = vmatprep.subr.mxu1 %v10321_v7  ;;  %v10536_v26 = vld [vmem:[%s19995_s3 + $0x2f10] sm:$0xff]  ;;  %v10273_v7 = vld [vmem:[%s19995_s3 + $0x26d8] sm:$0xff] }
 0x41a   :  { %6684 = vmatpush1.msra.mxu0 %v10064_v10  ;;  %6773 = vmatpush1.msra.mxu1 %v10320_v58  ;;  %v10529_v10 = vld [vmem:[%s19995_s3 + $0x2ed8] sm:$0xff]  ;;  %v10272_v58 = vld [vmem:[%s19995_s3 + $0x26d0] sm:$0xff] }
 0x41b   :  { %6685 = vmatprep.subr.mxu0 %v10057_v42  ;;  %6774 = vmatprep.subr.mxu1 %v10313_v22  ;;  %v10528_v42 = vld [vmem:[%s19995_s3 + $0x2ed0] sm:$0xff]  ;;  %v10265_v22 = vld [vmem:[%s19995_s3 + $0x2698] sm:$0xff] }
 0x41c   :  { %6686 = vmatpush1.msra.mxu0 %v10056_v39  ;;  %6775 = vmatpush1.msra.mxu1 %v10312_v11  ;;  %v10521_v39 = vld [vmem:[%s19995_s3 + $0x2e98] sm:$0xff]  ;;  %v10264_v11 = vld [vmem:[%s19995_s3 + $0x2690] sm:$0xff] }
 0x41d   :  { %6687 = vmatprep.subr.mxu0 %v10305_v60  ;;  %6776 = vmatprep.subr.mxu1 %v10561_v43  ;;  %v10520_v60 = vld [vmem:[%s19995_s3 + $0x2e90] sm:$0xff] }
 0x41e   :  { %6688 = vmatpush2.msra.mxu0 %v10304_v45  ;;  %6777 = vmatpush2.msra.mxu1 %v10560_v61  ;;  %v10257_v61 = vld [vmem:[%s19995_s3 + $0x2658] sm:$0xff] }
 0x41f   :  { %6689 = vmatprep.subr.mxu0 %v10297_v49  ;;  %6778 = vmatprep.subr.mxu1 %v10553_v48  ;;  %v10513_v49 = vld [vmem:[%s19995_s3 + $0x2e58] sm:$0xff] }
 0x420   :  { %6690 = vmatpush2.msra.mxu0 %v10296_v1  ;;  %6779 = vmatpush2.msra.mxu1 %v10552_v6  ;;  %v10256_v1 = vld [vmem:[%s19995_s3 + $0x2650] sm:$0xff] }
 0x421   :  { %6691 = vmatprep.subr.mxu0 %v10289_v28  ;;  %6780 = vmatprep.subr.mxu1 %v10545_v15  ;;  %v10512_v6 = vld [vmem:[%s19995_s3 + $0x2e50] sm:$0xff] }
 0x422   :  { %6692 = vmatpush2.msra.mxu0 %v10288_v33  ;;  %6781 = vmatpush2.msra.mxu1 %v10544_v59  ;;  %v10249_v33 = vld [vmem:[%s19995_s3 + $0x2618] sm:$0xff] }
 0x423   :  { %6693 = vmatprep.subr.mxu0 %v10281_v47  ;;  %6782 = vmatprep.subr.mxu1 %v10537_v17  ;;  %v10248_v17 = vld [vmem:[%s19995_s3 + $0x2610] sm:$0xff] }
 0x424   :  { %6694 = vmatpush2.msra.mxu0 %v10280_v32  ;;  %6783 = vmatpush2.msra.mxu1 %v10536_v26  ;;  %v10504_v32 = vld [vmem:[%s19995_s3 + $0x2e10] sm:$0xff]  ;;  %v10241_v26 = vld [vmem:[%s19995_s3 + $0x25d8] sm:$0xff] }
 0x425   :  { %6695 = vmatprep.subr.mxu0 %v10273_v7  ;;  %6784 = vmatprep.subr.mxu1 %v10529_v10  ;;  %v5503_v43 = vpop.f32.mrf.mxu0  ;;  %v5592_v45 = vpop.f32.mrf.mxu1  ;;  %v10240_v10 = vld [vmem:[%s19995_s3 + $0x25d0] sm:$0xff] }
 0x426   :  { %6696 = vmatpush2.msra.mxu0 %v10272_v58  ;;  %6785 = vmatpush2.msra.mxu1 %v10528_v42  ;;  %v5504_v48 = vadd.f32 %v5503_v43, %v15609_v4  ;;  %v10505_v4 = vld [vmem:[%s19995_s3 + $0x2e18] sm:$0xff]  ;;  %v10496_v58 = vld [vmem:[%s19995_s3 + $0x2dd0] sm:$0xff] }
 0x427   :  { %6697 = vmatprep.subr.mxu0 %v10265_v22  ;;  %6786 = vmatprep.subr.mxu1 %v10521_v39  ;;  %v5505_v28 = vpop.f32.mrf.mxu0  ;;  %v5594_v15 = vpop.f32.mrf.mxu1  ;;  %v10233_v39 = vld [vmem:[%s19995_s3 + $0x2598] sm:$0xff]  ;;  %v10232_v43 = vld [vmem:[%s19995_s3 + $0x2590] sm:$0xff] }
 0x428   :  { %6698 = vmatpush2.msra.mxu0 %v10264_v11  ;;  %6787 = vmatpush2.msra.mxu1 %v10520_v60  ;;  %v17336_v59 = vadd.f32 %v5592_v45, %v5504_v48  ;;  %v5506_v47 = vadd.f32 %v5505_v28, %v15623_v9  ;;  %v10497_v9 = vld [vmem:[%s19995_s3 + $0x2dd8] sm:$0xff]  ;;  %v10488_v45 = vld [vmem:[%s19995_s3 + $0x2d90] sm:$0xff] }
 0x429   :  { %6699 = vmatprep.subr.mxu0 %v10257_v61  ;;  %6788 = vmatprep.subr.mxu1 %v10513_v49  ;;  %v10489_v11 = vld [vmem:[%s19995_s3 + $0x2d98] sm:$0xff]  ;;  %v10224_v28 = vld [vmem:[%s19995_s3 + $0x2550] sm:$0xff] }
 0x42a   :  { %6700 = vmatpush2.msra.mxu0 %v10256_v1  ;;  %6789 = vmatpush2.msra.mxu1 %v10512_v6  ;;  %v17351_v7 = vadd.f32 %v5594_v15, %v5506_v47  ;;  %v10225_v48 = vld [vmem:[%s19995_s3 + $0x2558] sm:$0xff]  ;;  %v10480_v15 = vld [vmem:[%s19995_s3 + $0x2d50] sm:$0xff] }
 0x42b   :  { %6701 = vmatprep.subr.mxu0 %v10249_v33  ;;  %6790 = vmatprep.subr.mxu1 %v10505_v4  ;;  %v5509_v42 = vpop.f32.mrf.mxu0  ;;  %v5598_v22 = vpop.f32.mrf.mxu1  ;;  %v10217_v33 = vld [vmem:[%s19995_s3 + $0x2518] sm:$0xff]  ;;  %v10216_v47 = vld [vmem:[%s19995_s3 + $0x2510] sm:$0xff] }
 0x42c   :  { %6702 = vmatpush2.msra.mxu0 %v10248_v17  ;;  %6791 = vmatpush2.msra.mxu1 %v10504_v32  ;;  %v5510_v60 = vadd.f32 %v5509_v42, %v15649_v25  ;;  %v10481_v25 = vld [vmem:[%s19995_s3 + $0x2d58] sm:$0xff]  ;;  %v10472_v17 = vld [vmem:[%s19995_s3 + $0x2d10] sm:$0xff] }
 0x42d   :  { %6703 = vmatprep.subr.mxu0 %v10241_v26  ;;  %6792 = vmatprep.subr.mxu1 %v10497_v9  ;;  %v5511_v61 = vpop.f32.mrf.mxu0  ;;  %v5600_v49 = vpop.f32.mrf.mxu1  ;;  %v10209_v9 = vld [vmem:[%s19995_s3 + $0x24d8] sm:$0xff]  ;;  %v10208_v42 = vld [vmem:[%s19995_s3 + $0x24d0] sm:$0xff] }
 0x42e   :  { %6704 = vmatpush2.msra.mxu0 %v10240_v10  ;;  %6793 = vmatpush2.msra.mxu1 %v10496_v58  ;;  %v17378_v1 = vadd.f32 %v5598_v22, %v5510_v60  ;;  %v5512_v6 = vadd.f32 %v5511_v61, %v15663_v57  ;;  %v10473_v57 = vld [vmem:[%s19995_s3 + $0x2d18] sm:$0xff]  ;;  %v10464_v22 = vld [vmem:[%s19995_s3 + $0x2cd0] sm:$0xff] }
 0x42f   :  { %6705 = vmatprep.subr.mxu0 %v10233_v39  ;;  %6794 = vmatprep.subr.mxu1 %v10489_v11  ;;  %v10465_v10 = vld [vmem:[%s19995_s3 + $0x2cd8] sm:$0xff] }
 0x430   :  { %6706 = vmatpush2.msra.mxu0 %v10232_v43  ;;  %6795 = vmatpush2.msra.mxu1 %v10488_v45  ;;  %v17393_v4 = vadd.f32 %v5600_v49, %v5512_v6  ;;  %v10201_v60 = vld [vmem:[%s19995_s3 + $0x2498] sm:$0xff]  ;;  %v10200_v49 = vld [vmem:[%s19995_s3 + $0x2490] sm:$0xff] }
 0x431   :  { %6707 = vmatprep.subr.mxu0 %v10225_v48  ;;  %6796 = vmatprep.subr.mxu1 %v10481_v25  ;;  %v5515_v32 = vpop.f32.mrf.mxu0  ;;  %v5604_v26 = vpop.f32.mrf.mxu1  ;;  %v20137_v45 = vld [vmem:[#allocation15_spill] sm:$0xff]  ;;  %v10456_v48 = vld [vmem:[%s19995_s3 + $0x2c90] sm:$0xff] }
 0x432   :  { %6708 = vmatpush2.msra.mxu0 %v10224_v28  ;;  %6797 = vmatpush2.msra.mxu1 %v10480_v15  ;;  %v5516_v58 = vadd.f32 %v5515_v32, %v15689_v35  ;;  %v10457_v35 = vld [vmem:[%s19995_s3 + $0x2c98] sm:$0xff]  ;;  %v10192_v15 = vld [vmem:[%s19995_s3 + $0x2450] sm:$0xff] }
 0x433   :  { %6709 = vmatprep.subr.mxu0 %v10217_v33  ;;  %6798 = vmatprep.subr.mxu1 %v10473_v57  ;;  %v5517_v39 = vpop.f32.mrf.mxu0  ;;  %v5606_v11 = vpop.f32.mrf.mxu1  ;;  %v10193_v25 = vld [vmem:[%s19995_s3 + $0x2458] sm:$0xff]  ;;  %v10448_v33 = vld [vmem:[%s19995_s3 + $0x2c50] sm:$0xff] }
 0x434   :  { %6710 = vmatpush2.msra.mxu0 %v10216_v47  ;;  %6799 = vmatpush2.msra.mxu1 %v10472_v17  ;;  %v17420_v43 = vadd.f32 %v5604_v26, %v5516_v58  ;;  %v5518_v61 = vadd.f32 %v5517_v39, %v20137_v45  ;;  %v10449_v6 = vld [vmem:[%s19995_s3 + $0x2c58] sm:$0xff]  ;;  %v20138_v26 = vld [vmem:[#allocation24_spill] sm:$0xff]  ;;  %v10440_v58 = vld [vmem:[%s19995_s3 + $0x2c10] sm:$0xff] }
 0x435   :  { %6711 = vmatprep.subr.mxu0 %v10209_v9  ;;  %6800 = vmatprep.subr.mxu1 %v10465_v10  ;;  %v10185_v17 = vld [vmem:[%s19995_s3 + $0x2418] sm:$0xff]  ;;  %v10184_v10 = vld [vmem:[%s19995_s3 + $0x2410] sm:$0xff]  ;;  %v20139_v39 = vld [vmem:[#allocation16_spill] sm:$0xff] }
 0x436   :  { %6712 = vmatpush2.msra.mxu0 %v10208_v42  ;;  %6801 = vmatpush2.msra.mxu1 %v10464_v22  ;;  %v17435_v28 = vadd.f32 %v5606_v11, %v5518_v61  ;;  %v10441_v32 = vld [vmem:[%s19995_s3 + $0x2c18] sm:$0xff] }
 0x437   :  { %6713 = vmatprep.subr.mxu0 %v10201_v60  ;;  %6802 = vmatprep.subr.mxu1 %v10457_v35  ;;  %v5521_v57 = vpop.f32.mrf.mxu0  ;;  %v5610_v47 = vpop.f32.mrf.mxu1  ;;  %v10179_v60 = vld [vmem:[%s19995_s3 + $0x23e8] sm:$0xff] }
 0x438   :  { %6714 = vmatpush2.msra.mxu0 %v10200_v49  ;;  %6803 = vmatpush2.msra.mxu1 %v10456_v48  ;;  %v5522_v9 = vadd.f32 %v5521_v57, %v20138_v26  ;;  %v10435_v35 = vld [vmem:[%s19995_s3 + $0x2be8] sm:$0xff]  ;;  %v10178_v49 = vld [vmem:[%s19995_s3 + $0x23e0] sm:$0xff] }
 0x439   :  { %6715 = vmatprep.subr.mxu0 %v10193_v25  ;;  %6804 = vmatprep.subr.mxu1 %v10449_v6  ;;  %v5523_v42 = vpop.f32.mrf.mxu0  ;;  %v5612_v45 = vpop.f32.mrf.mxu1  ;;  %v10434_v48 = vld [vmem:[%s19995_s3 + $0x2be0] sm:$0xff]  ;;  %v10171_v25 = vld [vmem:[%s19995_s3 + $0x23a8] sm:$0xff] }
 0x43a   :  { %6716 = vmatpush2.msra.mxu0 %v10192_v15  ;;  %6805 = vmatpush2.msra.mxu1 %v10448_v33  ;;  %v17456_v22 = vadd.f32 %v5610_v47, %v5522_v9  ;;  %v5524_v11 = vadd.f32 %v5523_v42, %v20139_v39  ;;  %v10427_v6 = vld [vmem:[%s19995_s3 + $0x2ba8] sm:$0xff]  ;;  %v10170_v15 = vld [vmem:[%s19995_s3 + $0x23a0] sm:$0xff] }
 0x43b   :  { %6717 = vmatprep.subr.mxu0 %v10185_v17  ;;  %6806 = vmatprep.subr.mxu1 %v10441_v32  ;;  %v10426_v33 = vld [vmem:[%s19995_s3 + $0x2ba0] sm:$0xff]  ;;  %v10163_v57 = vld [vmem:[%s19995_s3 + $0x2368] sm:$0xff] }
 0x43c   :  { %6718 = vmatpush2.msra.mxu0 %v10184_v10  ;;  %6807 = vmatpush2.msra.mxu1 %v10440_v58  ;;  %v17465_v61 = vadd.f32 %v5612_v45, %v5524_v11  ;;  %v10419_v47 = vld [vmem:[%s19995_s3 + $0x2b68] sm:$0xff]  ;;  %v10162_v17 = vld [vmem:[%s19995_s3 + $0x2360] sm:$0xff] }
 0x43d   :  { %6720 = vmatmul.mubr.f32.vlgmr.msra.gmra.mxu0 %v13786_v20  ;;  %6809 = vmatmul.mubr.f32.vlgmr.msra.gmra.mxu1 %v13789_v40  ;;  %v10418_v32 = vld [vmem:[%s19995_s3 + $0x2b60] sm:$0xff]  ;;  %v10155_v26 = vld [vmem:[%s19995_s3 + $0x2328] sm:$0xff] }
 0x43e   :  { %6833 = vmatprep.subr.mxu0 %v10179_v60  ;;  %6922 = vmatprep.subr.mxu1 %v10435_v35  ;;  %v10411_v9 = vld [vmem:[%s19995_s3 + $0x2b28] sm:$0xff]  ;;  %v10154_v10 = vld [vmem:[%s19995_s3 + $0x2320] sm:$0xff] }
 0x43f   :  { %6725 = vmatprep.mubr.f32.mxu0 %v13792_v54  ;;  %6814 = vmatprep.mubr.f32.mxu1 %v13800_v12  ;;  %v10410_v58 = vld [vmem:[%s19995_s3 + $0x2b20] sm:$0xff]  ;;  %v10147_v42 = vld [vmem:[%s19995_s3 + $0x22e8] sm:$0xff] }
 0x440   :  { %6834 = vmatpush1.msra.mxu0 %v10178_v49  ;;  %6923 = vmatpush1.msra.mxu1 %v10434_v48  ;;  %v10403_v39 = vld [vmem:[%s19995_s3 + $0x2ae8] sm:$0xff]  ;;  %v10146_v11 = vld [vmem:[%s19995_s3 + $0x22e0] sm:$0xff] }
 0x441   :  { %6835 = vmatprep.subr.mxu0 %v10171_v25  ;;  %6924 = vmatprep.subr.mxu1 %v10427_v6  ;;  %v10402_v60 = vld [vmem:[%s19995_s3 + $0x2ae0] sm:$0xff]  ;;  %v10139_v35 = vld [vmem:[%s19995_s3 + $0x22a8] sm:$0xff] }
 0x442   :  { %6836 = vmatpush1.msra.mxu0 %v10170_v15  ;;  %6925 = vmatpush1.msra.mxu1 %v10426_v33  ;;  %v10395_v45 = vld [vmem:[%s19995_s3 + $0x2aa8] sm:$0xff]  ;;  %v10138_v49 = vld [vmem:[%s19995_s3 + $0x22a0] sm:$0xff] }
 0x443   :  { %6726 = vmatmul.mubr.f32.gmra.mxu0 %v13803_v52  ;;  %6815 = vmatmul.mubr.f32.gmra.mxu1 %v13805_v51  ;;  %v10394_v48 = vld [vmem:[%s19995_s3 + $0x2aa0] sm:$0xff]  ;;  %v10131_v25 = vld [vmem:[%s19995_s3 + $0x2268] sm:$0xff] }
 0x444   :  { %6837 = vmatprep.subr.mxu0 %v10163_v57  ;;  %6926 = vmatprep.subr.mxu1 %v10419_v47  ;;  %v10387_v6 = vld [vmem:[%s19995_s3 + $0x2a68] sm:$0xff]  ;;  %v10130_v15 = vld [vmem:[%s19995_s3 + $0x2260] sm:$0xff] }
 0x445   :  { %6731 = vmatprep.mubr.f32.mxu0 %v17045_v36  ;;  %6820 = vmatprep.mubr.f32.mxu1 %v17049_v21  ;;  %v10386_v33 = vld [vmem:[%s19995_s3 + $0x2a60] sm:$0xff]  ;;  %v10123_v57 = vld [vmem:[%s19995_s3 + $0x2228] sm:$0xff] }
 0x446   :  { %6838 = vmatpush1.msra.mxu0 %v10162_v17  ;;  %6927 = vmatpush1.msra.mxu1 %v10418_v32  ;;  %v10379_v47 = vld [vmem:[%s19995_s3 + $0x2a28] sm:$0xff]  ;;  %v10122_v17 = vld [vmem:[%s19995_s3 + $0x2220] sm:$0xff] }
 0x447   :  { %6839 = vmatprep.subr.mxu0 %v10155_v26  ;;  %6928 = vmatprep.subr.mxu1 %v10411_v9  ;;  %v10378_v32 = vld [vmem:[%s19995_s3 + $0x2a20] sm:$0xff]  ;;  %v10115_v26 = vld [vmem:[%s19995_s3 + $0x21e8] sm:$0xff] }
 0x448   :  { %6840 = vmatpush1.msra.mxu0 %v10154_v10  ;;  %6929 = vmatpush1.msra.mxu1 %v10410_v58  ;;  %v10371_v9 = vld [vmem:[%s19995_s3 + $0x29e8] sm:$0xff]  ;;  %v10114_v10 = vld [vmem:[%s19995_s3 + $0x21e0] sm:$0xff] }
 0x449   :  { %6732 = vmatmul.mubr.f32.gmra.mxu0 %v17079_v2  ;;  %6821 = vmatmul.mubr.f32.gmra.mxu1 %v17083_v18  ;;  %v10370_v58 = vld [vmem:[%s19995_s3 + $0x29e0] sm:$0xff] }
 0x44a   :  { %6841 = vmatprep.subr.mxu0 %v10147_v42  ;;  %6930 = vmatprep.subr.mxu1 %v10403_v39  ;;  %v10107_v42 = vld [vmem:[%s19995_s3 + $0x21a8] sm:$0xff] }
 0x44b   :  { %6737 = vmatprep.mubr.f32.mxu0 %v17095_v30  ;;  %6826 = vmatprep.mubr.f32.mxu1 %v17099_v23  ;;  %v10363_v39 = vld [vmem:[%s19995_s3 + $0x29a8] sm:$0xff] }
 0x44c   :  { %6842 = vmatpush1.msra.mxu0 %v10146_v11  ;;  %6931 = vmatpush1.msra.mxu1 %v10402_v60  ;;  %v10106_v11 = vld [vmem:[%s19995_s3 + $0x21a0] sm:$0xff] }
 0x44d   :  { %6843 = vmatprep.subr.mxu0 %v10139_v35  ;;  %6932 = vmatprep.subr.mxu1 %v10395_v45  ;;  %v10362_v60 = vld [vmem:[%s19995_s3 + $0x29a0] sm:$0xff]  ;;  %v10099_v35 = vld [vmem:[%s19995_s3 + $0x2168] sm:$0xff] }
 0x44e   :  { %6844 = vmatpush1.msra.mxu0 %v10138_v49  ;;  %6933 = vmatpush1.msra.mxu1 %v10394_v48  ;;  %v10355_v45 = vld [vmem:[%s19995_s3 + $0x2968] sm:$0xff]  ;;  %v10098_v49 = vld [vmem:[%s19995_s3 + $0x2160] sm:$0xff] }
 0x44f   :  { %6738 = vmatmul.mubr.f32.gmra.mxu0 %v17072_v37  ;;  %6827 = vmatmul.mubr.f32.gmra.mxu1 %v17075_v13  ;;  %v10354_v48 = vld [vmem:[%s19995_s3 + $0x2960] sm:$0xff] }
 0x450   :  { %6845 = vmatprep.subr.mxu0 %v10131_v25  ;;  %6934 = vmatprep.subr.mxu1 %v10387_v6  ;;  %v10091_v25 = vld [vmem:[%s19995_s3 + $0x2128] sm:$0xff] }
 0x451   :  { %6846 = vmatpush1.msra.mxu0 %v10130_v15  ;;  %6897 = vmatprep.mubr.f32.mxu0 %v13765_v19  ;;  %v10347_v6 = vld [vmem:[%s19995_s3 + $0x2928] sm:$0xff]  ;;  %v10090_v15 = vld [vmem:[%s19995_s3 + $0x2120] sm:$0xff] }
 0x452   :  { %6935 = vmatpush1.msra.mxu1 %v10386_v33  ;;  %6986 = vmatprep.mubr.f32.mxu1 %v13782_v41  ;;  %v10346_v33 = vld [vmem:[%s19995_s3 + $0x2920] sm:$0xff] }
 0x453   :  { %6847 = vmatprep.subr.mxu0 %v10123_v57  ;;  %6936 = vmatprep.subr.mxu1 %v10379_v47  ;;  %v10083_v57 = vld [vmem:[%s19995_s3 + $0x20e8] sm:$0xff] }
 0x454   :  { %6848 = vmatpush1.msra.mxu0 %v10122_v17  ;;  %6937 = vmatpush1.msra.mxu1 %v10378_v32  ;;  %v10339_v47 = vld [vmem:[%s19995_s3 + $0x28e8] sm:$0xff]  ;;  %v10082_v17 = vld [vmem:[%s19995_s3 + $0x20e0] sm:$0xff] }
 0x455   :  { %6849 = vmatprep.subr.mxu0 %v10115_v26  ;;  %6938 = vmatprep.subr.mxu1 %v10371_v9  ;;  %v10338_v32 = vld [vmem:[%s19995_s3 + $0x28e0] sm:$0xff]  ;;  %v10075_v26 = vld [vmem:[%s19995_s3 + $0x20a8] sm:$0xff] }
 0x456   :  { %6850 = vmatpush1.msra.mxu0 %v10114_v10  ;;  %6939 = vmatpush1.msra.mxu1 %v10370_v58  ;;  %v10331_v9 = vld [vmem:[%s19995_s3 + $0x28a8] sm:$0xff]  ;;  %v10074_v10 = vld [vmem:[%s19995_s3 + $0x20a0] sm:$0xff] }
 0x457   :  { %6851 = vmatprep.subr.mxu0 %v10107_v42  ;;  %6940 = vmatprep.subr.mxu1 %v10363_v39  ;;  %v10330_v58 = vld [vmem:[%s19995_s3 + $0x28a0] sm:$0xff]  ;;  %v10067_v42 = vld [vmem:[%s19995_s3 + $0x2068] sm:$0xff] }
 0x458   :  { %6852 = vmatpush1.msra.mxu0 %v10106_v11  ;;  %6941 = vmatpush1.msra.mxu1 %v10362_v60  ;;  %v10323_v39 = vld [vmem:[%s19995_s3 + $0x2868] sm:$0xff]  ;;  %v10066_v11 = vld [vmem:[%s19995_s3 + $0x2060] sm:$0xff] }
 0x459   :  { %6853 = vmatprep.subr.mxu0 %v10099_v35  ;;  %6942 = vmatprep.subr.mxu1 %v10355_v45  ;;  %v10322_v60 = vld [vmem:[%s19995_s3 + $0x2860] sm:$0xff]  ;;  %v10059_v35 = vld [vmem:[%s19995_s3 + $0x2028] sm:$0xff] }
 0x45a   :  { %6854 = vmatpush1.msra.mxu0 %v10098_v49  ;;  %6943 = vmatpush1.msra.mxu1 %v10354_v48  ;;  %v10315_v45 = vld [vmem:[%s19995_s3 + $0x2828] sm:$0xff]  ;;  %v10058_v49 = vld [vmem:[%s19995_s3 + $0x2020] sm:$0xff] }
 0x45b   :  { %6855 = vmatprep.subr.mxu0 %v10091_v25  ;;  %6944 = vmatprep.subr.mxu1 %v10347_v6  ;;  %v10314_v48 = vld [vmem:[%s19995_s3 + $0x2820] sm:$0xff]  ;;  %v10307_v25 = vld [vmem:[%s19995_s3 + $0x27e8] sm:$0xff] }
 0x45c   :  { %6856 = vmatpush1.msra.mxu0 %v10090_v15  ;;  %6945 = vmatpush1.msra.mxu1 %v10346_v33  ;;  %v10563_v6 = vld [vmem:[%s19995_s3 + $0x2fe8] sm:$0xff]  ;;  %v10306_v15 = vld [vmem:[%s19995_s3 + $0x27e0] sm:$0xff] }
 0x45d   :  { %6857 = vmatprep.subr.mxu0 %v10083_v57  ;;  %6946 = vmatprep.subr.mxu1 %v10339_v47  ;;  %v10562_v33 = vld [vmem:[%s19995_s3 + $0x2fe0] sm:$0xff]  ;;  %v10299_v57 = vld [vmem:[%s19995_s3 + $0x27a8] sm:$0xff] }
 0x45e   :  { %6858 = vmatpush1.msra.mxu0 %v10082_v17  ;;  %6947 = vmatpush1.msra.mxu1 %v10338_v32  ;;  %v10555_v47 = vld [vmem:[%s19995_s3 + $0x2fa8] sm:$0xff]  ;;  %v10298_v17 = vld [vmem:[%s19995_s3 + $0x27a0] sm:$0xff] }
 0x45f   :  { %6859 = vmatprep.subr.mxu0 %v10075_v26  ;;  %6948 = vmatprep.subr.mxu1 %v10331_v9  ;;  %v10554_v32 = vld [vmem:[%s19995_s3 + $0x2fa0] sm:$0xff]  ;;  %v10291_v26 = vld [vmem:[%s19995_s3 + $0x2768] sm:$0xff] }
 0x460   :  { %6860 = vmatpush1.msra.mxu0 %v10074_v10  ;;  %6949 = vmatpush1.msra.mxu1 %v10330_v58  ;;  %v10547_v9 = vld [vmem:[%s19995_s3 + $0x2f68] sm:$0xff]  ;;  %v10290_v10 = vld [vmem:[%s19995_s3 + $0x2760] sm:$0xff] }
 0x461   :  { %6861 = vmatprep.subr.mxu0 %v10067_v42  ;;  %6950 = vmatprep.subr.mxu1 %v10323_v39  ;;  %v10546_v58 = vld [vmem:[%s19995_s3 + $0x2f60] sm:$0xff]  ;;  %v10283_v42 = vld [vmem:[%s19995_s3 + $0x2728] sm:$0xff] }
 0x462   :  { %6862 = vmatpush1.msra.mxu0 %v10066_v11  ;;  %6951 = vmatpush1.msra.mxu1 %v10322_v60  ;;  %v10539_v39 = vld [vmem:[%s19995_s3 + $0x2f28] sm:$0xff]  ;;  %v10282_v11 = vld [vmem:[%s19995_s3 + $0x2720] sm:$0xff] }
 0x463   :  { %6863 = vmatprep.subr.mxu0 %v10059_v35  ;;  %6952 = vmatprep.subr.mxu1 %v10315_v45  ;;  %v10538_v60 = vld [vmem:[%s19995_s3 + $0x2f20] sm:$0xff]  ;;  %v10275_v35 = vld [vmem:[%s19995_s3 + $0x26e8] sm:$0xff] }
 0x464   :  { %6864 = vmatpush1.msra.mxu0 %v10058_v49  ;;  %6953 = vmatpush1.msra.mxu1 %v10314_v48  ;;  %v10531_v45 = vld [vmem:[%s19995_s3 + $0x2ee8] sm:$0xff]  ;;  %v10274_v49 = vld [vmem:[%s19995_s3 + $0x26e0] sm:$0xff] }
 0x465   :  { %6865 = vmatprep.subr.mxu0 %v10307_v25  ;;  %6954 = vmatprep.subr.mxu1 %v10563_v6  ;;  %v10530_v48 = vld [vmem:[%s19995_s3 + $0x2ee0] sm:$0xff]  ;;  %v10267_v25 = vld [vmem:[%s19995_s3 + $0x26a8] sm:$0xff] }
 0x466   :  { %6866 = vmatpush2.msra.mxu0 %v10306_v15  ;;  %6955 = vmatpush2.msra.mxu1 %v10562_v33  ;;  %v10523_v6 = vld [vmem:[%s19995_s3 + $0x2ea8] sm:$0xff]  ;;  %v10266_v15 = vld [vmem:[%s19995_s3 + $0x26a0] sm:$0xff] }
 0x467   :  { %6867 = vmatprep.subr.mxu0 %v10299_v57  ;;  %6956 = vmatprep.subr.mxu1 %v10555_v47  ;;  %v10522_v33 = vld [vmem:[%s19995_s3 + $0x2ea0] sm:$0xff] }
 0x468   :  { %6868 = vmatpush2.msra.mxu0 %v10298_v17  ;;  %6957 = vmatpush2.msra.mxu1 %v10554_v32  ;;  %v10259_v17 = vld [vmem:[%s19995_s3 + $0x2668] sm:$0xff] }
 0x469   :  { %6869 = vmatprep.subr.mxu0 %v10291_v26  ;;  %6958 = vmatprep.subr.mxu1 %v10547_v9  ;;  %v10515_v32 = vld [vmem:[%s19995_s3 + $0x2e68] sm:$0xff]  ;;  %v20140_v26 = vld [vmem:[#allocation23_spill] sm:$0xff] }
 0x46a   :  { %6870 = vmatpush2.msra.mxu0 %v10290_v10  ;;  %6959 = vmatpush2.msra.mxu1 %v10546_v58  ;;  %v10258_v10 = vld [vmem:[%s19995_s3 + $0x2660] sm:$0xff] }
 0x46b   :  { %6871 = vmatprep.subr.mxu0 %v10283_v42  ;;  %6960 = vmatprep.subr.mxu1 %v10539_v39  ;;  %v10514_v58 = vld [vmem:[%s19995_s3 + $0x2e60] sm:$0xff] }
 0x46c   :  { %6872 = vmatpush2.msra.mxu0 %v10282_v11  ;;  %6961 = vmatpush2.msra.mxu1 %v10538_v60  ;;  %v10251_v11 = vld [vmem:[%s19995_s3 + $0x2628] sm:$0xff] }
 0x46d   :  { %6873 = vmatprep.subr.mxu0 %v10275_v35  ;;  %6962 = vmatprep.subr.mxu1 %v10531_v45  ;;  %v5681_v57 = vpop.f32.mrf.mxu0  ;;  %v5770_v47 = vpop.f32.mrf.mxu1  ;;  %v10507_v60 = vld [vmem:[%s19995_s3 + $0x2e28] sm:$0xff] }
 0x46e   :  { %6874 = vmatpush2.msra.mxu0 %v10274_v49  ;;  %6963 = vmatpush2.msra.mxu1 %v10530_v48  ;;  %v5682_v9 = vadd.f32 %v5681_v57, %v20140_v26  ;;  %v20141_v45 = vld [vmem:[#allocation17_spill] sm:$0xff]  ;;  %v10250_v48 = vld [vmem:[%s19995_s3 + $0x2620] sm:$0xff] }
 0x46f   :  { %6875 = vmatprep.subr.mxu0 %v10267_v25  ;;  %6964 = vmatprep.subr.mxu1 %v10523_v6  ;;  %v5683_v42 = vpop.f32.mrf.mxu0  ;;  %v5772_v39 = vpop.f32.mrf.mxu1  ;;  %v10506_v25 = vld [vmem:[%s19995_s3 + $0x2e20] sm:$0xff]  ;;  %v10243_v6 = vld [vmem:[%s19995_s3 + $0x25e8] sm:$0xff] }
 0x470   :  { %6876 = vmatpush2.msra.mxu0 %v10266_v15  ;;  %6965 = vmatpush2.msra.mxu1 %v10522_v33  ;;  %v17760_v35 = vadd.f32 %v5770_v47, %v5682_v9  ;;  %v5684_v49 = vadd.f32 %v5683_v42, %v20141_v45  ;;  %v10499_v15 = vld [vmem:[%s19995_s3 + $0x2de8] sm:$0xff]  ;;  %v10242_v57 = vld [vmem:[%s19995_s3 + $0x25e0] sm:$0xff] }
 0x471   :  { %6877 = vmatprep.subr.mxu0 %v10259_v17  ;;  %6966 = vmatprep.subr.mxu1 %v10515_v32  ;;  %v10498_v47 = vld [vmem:[%s19995_s3 + $0x2de0] sm:$0xff]  ;;  %v10235_v26 = vld [vmem:[%s19995_s3 + $0x25a8] sm:$0xff] }
 0x472   :  { %6878 = vmatpush2.msra.mxu0 %v10258_v10  ;;  %6967 = vmatpush2.msra.mxu1 %v10514_v58  ;;  %v17775_v33 = vadd.f32 %v5772_v39, %v5684_v49  ;;  %v10491_v9 = vld [vmem:[%s19995_s3 + $0x2da8] sm:$0xff]  ;;  %v20142_v10 = vld [vmem:[#allocation19_spill] sm:$0xff] }
 0x473   :  { %6879 = vmatprep.subr.mxu0 %v10251_v11  ;;  %6968 = vmatprep.subr.mxu1 %v10507_v60  ;;  %v5687_v17 = vpop.f32.mrf.mxu0  ;;  %v5776_v32 = vpop.f32.mrf.mxu1  ;;  %v10234_v42 = vld [vmem:[%s19995_s3 + $0x25a0] sm:$0xff]  ;;  %v10227_v45 = vld [vmem:[%s19995_s3 + $0x2568] sm:$0xff] }
 0x474   :  { %6880 = vmatpush2.msra.mxu0 %v10250_v48  ;;  %6969 = vmatpush2.msra.mxu1 %v10506_v25  ;;  %v5688_v58 = vadd.f32 %v5687_v17, %v20142_v10  ;;  %v10490_v39 = vld [vmem:[%s19995_s3 + $0x2da0] sm:$0xff]  ;;  %v10483_v49 = vld [vmem:[%s19995_s3 + $0x2d68] sm:$0xff] }
 0x475   :  { %6881 = vmatprep.subr.mxu0 %v10243_v6  ;;  %6970 = vmatprep.subr.mxu1 %v10499_v15  ;;  %v5689_v11 = vpop.f32.mrf.mxu0  ;;  %v5778_v60 = vpop.f32.mrf.mxu1  ;;  %v20143_v25 = vld [vmem:[#allocation20_spill] sm:$0xff] }
 0x476   :  { %6882 = vmatpush2.msra.mxu0 %v10242_v57  ;;  %6971 = vmatpush2.msra.mxu1 %v10498_v47  ;;  %v17802_v48 = vadd.f32 %v5776_v32, %v5688_v58  ;;  %v5690_v6 = vadd.f32 %v5689_v11, %v20143_v25  ;;  %v10226_v15 = vld [vmem:[%s19995_s3 + $0x2560] sm:$0xff]  ;;  %v10219_v47 = vld [vmem:[%s19995_s3 + $0x2528] sm:$0xff] }
 0x477   :  { %6883 = vmatprep.subr.mxu0 %v10235_v26  ;;  %6972 = vmatprep.subr.mxu1 %v10491_v9  ;;  %v10482_v57 = vld [vmem:[%s19995_s3 + $0x2d60] sm:$0xff]  ;;  %v10475_v17 = vld [vmem:[%s19995_s3 + $0x2d28] sm:$0xff] }
 0x478   :  { %6884 = vmatpush2.msra.mxu0 %v10234_v42  ;;  %6973 = vmatpush2.msra.mxu1 %v10490_v39  ;;  %v17817_v32 = vadd.f32 %v5778_v60, %v5690_v6  ;;  %v10218_v26 = vld [vmem:[%s19995_s3 + $0x2520] sm:$0xff]  ;;  %v10211_v42 = vld [vmem:[%s19995_s3 + $0x24e8] sm:$0xff] }
 0x479   :  { %6885 = vmatprep.subr.mxu0 %v10227_v45  ;;  %6974 = vmatprep.subr.mxu1 %v10483_v49  ;;  %v10474_v9 = vld [vmem:[%s19995_s3 + $0x2d20] sm:$0xff]  ;;  %v5693_v10 = vpop.f32.mrf.mxu0  ;;  %v5782_v58 = vpop.f32.mrf.mxu1  ;;  %v10467_v39 = vld [vmem:[%s19995_s3 + $0x2ce8] sm:$0xff] }
 0x47a   :  { %6886 = vmatpush2.msra.mxu0 %v10226_v15  ;;  %6975 = vmatpush2.msra.mxu1 %v10482_v57  ;;  %v20144_v11 = vld [vmem:[#allocation27_spill] sm:$0xff]  ;;  %v10203_v15 = vld [vmem:[%s19995_s3 + $0x24a8] sm:$0xff] }
 0x47b   :  { %v5694_v60 = vadd.f32 %v5693_v10, %v20144_v11  ;;  %6887 = vmatprep.subr.mxu0 %v10219_v47  ;;  %6976 = vmatprep.subr.mxu1 %v10475_v17  ;;  %v10210_v45 = vld [vmem:[%s19995_s3 + $0x24e0] sm:$0xff]  ;;  %v5695_v25 = vpop.f32.mrf.mxu0  ;;  %v5784_v6 = vpop.f32.mrf.mxu1  ;;  %v10459_v57 = vld [vmem:[%s19995_s3 + $0x2ca8] sm:$0xff]  ;;  %v20146_v17 = vld [vmem:[#allocation22_spill] sm:$0xff] }
 0x47c   :  { %v10466_v49 = vld [vmem:[%s19995_s3 + $0x2ce0] sm:$0xff]  ;;  %6888 = vmatpush2.msra.mxu0 %v10218_v26  ;;  %6977 = vmatpush2.msra.mxu1 %v10474_v9  ;;  %v5696_v10 = vadd.f32 %v5695_v25, %v20146_v17  ;;  %v10195_v9 = vld [vmem:[%s19995_s3 + $0x2468] sm:$0xff] }
 0x47d   :  { %v17844_v47 = vadd.f32 %v5782_v58, %v5694_v60  ;;  %6889 = vmatprep.subr.mxu0 %v10211_v42  ;;  %6978 = vmatprep.subr.mxu1 %v10467_v39  ;;  %v10202_v11 = vld [vmem:[%s19995_s3 + $0x24a0] sm:$0xff]  ;;  %v10451_v58 = vld [vmem:[%s19995_s3 + $0x2c68] sm:$0xff] }
 0x47e   :  { %v10458_v26 = vld [vmem:[%s19995_s3 + $0x2ca0] sm:$0xff]  ;;  %6890 = vmatpush2.msra.mxu0 %v10210_v45  ;;  %6979 = vmatpush2.msra.mxu1 %v10466_v49  ;;  %v17859_v42 = vadd.f32 %v5784_v6, %v5696_v10  ;;  %v10187_v25 = vld [vmem:[%s19995_s3 + $0x2428] sm:$0xff] }
 0x47f   :  { %20145 = vst [vmem:[#allocation29_spill] sm:$0xff] %v17844_v47  ;;  %6891 = vmatprep.subr.mxu0 %v10203_v15  ;;  %6980 = vmatprep.subr.mxu1 %v10459_v57  ;;  %v10194_v39 = vld [vmem:[%s19995_s3 + $0x2460] sm:$0xff]  ;;  %v5699_v45 = vpop.f32.mrf.mxu0  ;;  %v5788_v49 = vpop.f32.mrf.mxu1  ;;  %v10443_v6 = vld [vmem:[%s19995_s3 + $0x2c28] sm:$0xff] }
 0x480   :  { %20147 = vst [vmem:[#allocation25_spill] sm:$0xff] %v17859_v42  ;;  %v10450_v60 = vld [vmem:[%s19995_s3 + $0x2c60] sm:$0xff]  ;;  %6892 = vmatpush2.msra.mxu0 %v10202_v11  ;;  %6981 = vmatpush2.msra.mxu1 %v10458_v26  ;;  %v5700_v15 = vadd.f32 %v5699_v45, %v16145_v53  ;;  %v10181_v53 = vld [vmem:[%s19995_s3 + $0x23f8] sm:$0xff] }
 0x481   :  { %6893 = vmatprep.subr.mxu0 %v10195_v9  ;;  %6982 = vmatprep.subr.mxu1 %v10451_v58  ;;  %v10186_v57 = vld [vmem:[%s19995_s3 + $0x2420] sm:$0xff]  ;;  %v5701_v10 = vpop.f32.mrf.mxu0  ;;  %v10437_v9 = vld [vmem:[%s19995_s3 + $0x2bf8] sm:$0xff]  ;;  %v5790_v58 = vpop.f32.mrf.mxu1 }
 0x482   :  { %v10442_v17 = vld [vmem:[%s19995_s3 + $0x2c20] sm:$0xff]  ;;  %6894 = vmatpush2.msra.mxu0 %v10194_v39  ;;  %6983 = vmatpush2.msra.mxu1 %v10450_v60  ;;  %v17880_v11 = vadd.f32 %v5788_v49, %v5700_v15  ;;  %v5702_v26 = vadd.f32 %v5701_v10, %v16153_v5  ;;  %v10180_v5 = vld [vmem:[%s19995_s3 + $0x23f0] sm:$0xff]  ;;  %v10173_v60 = vld [vmem:[%s19995_s3 + $0x23b8] sm:$0xff] }
 0x483   :  { %6895 = vmatprep.subr.mxu0 %v10187_v25  ;;  %6984 = vmatprep.subr.mxu1 %v10443_v6  ;;  %v10436_v39 = vld [vmem:[%s19995_s3 + $0x2bf0] sm:$0xff]  ;;  %v10429_v49 = vld [vmem:[%s19995_s3 + $0x2bb8] sm:$0xff] }
 0x484   :  { %20148 = vst [vmem:[#allocation44_spill] sm:$0xff] %v17880_v11  ;;  %6896 = vmatpush2.msra.mxu0 %v10186_v57  ;;  %6985 = vmatpush2.msra.mxu1 %v10442_v17  ;;  %v17889_v45 = vadd.f32 %v5790_v58, %v5702_v26  ;;  %v10172_v25 = vld [vmem:[%s19995_s3 + $0x23b0] sm:$0xff]  ;;  %v10165_v15 = vld [vmem:[%s19995_s3 + $0x2378] sm:$0xff] }
 0x485   :  { %6898 = vmatmul.mubr.f32.vlgmr.msra.gmra.mxu0 %v13786_v20  ;;  %6987 = vmatmul.mubr.f32.vlgmr.msra.gmra.mxu1 %v13789_v40  ;;  %v10428_v6 = vld [vmem:[%s19995_s3 + $0x2bb0] sm:$0xff]  ;;  %v10421_v57 = vld [vmem:[%s19995_s3 + $0x2b78] sm:$0xff] }
 0x486   :  { %20149 = vst [vmem:[#allocation26_spill] sm:$0xff] %v17889_v45  ;;  %7011 = vmatprep.subr.mxu0 %v10181_v53  ;;  %7100 = vmatprep.subr.mxu1 %v10437_v9  ;;  %v10164_v17 = vld [vmem:[%s19995_s3 + $0x2370] sm:$0xff]  ;;  %v10157_v26 = vld [vmem:[%s19995_s3 + $0x2338] sm:$0xff] }
 0x487   :  { %6903 = vmatprep.mubr.f32.mxu0 %v13792_v54  ;;  %6992 = vmatprep.mubr.f32.mxu1 %v13800_v12  ;;  %v10420_v10 = vld [vmem:[%s19995_s3 + $0x2b70] sm:$0xff]  ;;  %v10413_v53 = vld [vmem:[%s19995_s3 + $0x2b38] sm:$0xff] }
 0x488   :  { %7012 = vmatpush1.msra.mxu0 %v10180_v5  ;;  %7101 = vmatpush1.msra.mxu1 %v10436_v39  ;;  %v10156_v9 = vld [vmem:[%s19995_s3 + $0x2330] sm:$0xff]  ;;  %v10149_v5 = vld [vmem:[%s19995_s3 + $0x22f8] sm:$0xff] }
 0x489   :  { %7013 = vmatprep.subr.mxu0 %v10173_v60  ;;  %7102 = vmatprep.subr.mxu1 %v10429_v49  ;;  %v10412_v58 = vld [vmem:[%s19995_s3 + $0x2b30] sm:$0xff]  ;;  %v10405_v39 = vld [vmem:[%s19995_s3 + $0x2af8] sm:$0xff] }
 0x48a   :  { %7014 = vmatpush1.msra.mxu0 %v10172_v25  ;;  %7103 = vmatpush1.msra.mxu1 %v10428_v6  ;;  %v10148_v60 = vld [vmem:[%s19995_s3 + $0x22f0] sm:$0xff]  ;;  %v10141_v25 = vld [vmem:[%s19995_s3 + $0x22b8] sm:$0xff] }
 0x48b   :  { %6904 = vmatmul.mubr.f32.gmra.mxu0 %v13803_v52  ;;  %6993 = vmatmul.mubr.f32.gmra.mxu1 %v13805_v51  ;;  %v10404_v49 = vld [vmem:[%s19995_s3 + $0x2af0] sm:$0xff]  ;;  %v10397_v6 = vld [vmem:[%s19995_s3 + $0x2ab8] sm:$0xff] }
 0x48c   :  { %7015 = vmatprep.subr.mxu0 %v10165_v15  ;;  %7104 = vmatprep.subr.mxu1 %v10421_v57  ;;  %v10140_v15 = vld [vmem:[%s19995_s3 + $0x22b0] sm:$0xff]  ;;  %v10229_v11 = vld [vmem:[%s19995_s3 + $0x2578] sm:$0xff] }
 0x48d   :  { %6909 = vmatprep.mubr.f32.mxu0 %v17045_v36  ;;  %6998 = vmatprep.mubr.f32.mxu1 %v17049_v21  ;;  %v10396_v57 = vld [vmem:[%s19995_s3 + $0x2ab0] sm:$0xff]  ;;  %v10197_v42 = vld [vmem:[%s19995_s3 + $0x2478] sm:$0xff] }
 0x48e   :  { %7016 = vmatpush1.msra.mxu0 %v10164_v17  ;;  %7105 = vmatpush1.msra.mxu1 %v10420_v10  ;;  %v10133_v17 = vld [vmem:[%s19995_s3 + $0x2278] sm:$0xff] }
 0x48f   :  { %7017 = vmatprep.subr.mxu0 %v10157_v26  ;;  %7106 = vmatprep.subr.mxu1 %v10413_v53  ;;  %v10389_v10 = vld [vmem:[%s19995_s3 + $0x2a78] sm:$0xff]  ;;  %v10132_v26 = vld [vmem:[%s19995_s3 + $0x2270] sm:$0xff] }
 0x490   :  { %7018 = vmatpush1.msra.mxu0 %v10156_v9  ;;  %7107 = vmatpush1.msra.mxu1 %v10412_v58  ;;  %v10388_v53 = vld [vmem:[%s19995_s3 + $0x2a70] sm:$0xff]  ;;  %v10125_v9 = vld [vmem:[%s19995_s3 + $0x2238] sm:$0xff] }
 0x491   :  { %6910 = vmatmul.mubr.f32.gmra.mxu0 %v17079_v2  ;;  %6999 = vmatmul.mubr.f32.gmra.mxu1 %v17083_v18  ;;  %v10381_v58 = vld [vmem:[%s19995_s3 + $0x2a38] sm:$0xff] }
 0x492   :  { %7019 = vmatprep.subr.mxu0 %v10149_v5  ;;  %7108 = vmatprep.subr.mxu1 %v10405_v39  ;;  %v10124_v5 = vld [vmem:[%s19995_s3 + $0x2230] sm:$0xff] }
 0x493   :  { %6915 = vmatprep.mubr.f32.mxu0 %v17095_v30  ;;  %7004 = vmatprep.mubr.f32.mxu1 %v17099_v23  ;;  %v10380_v39 = vld [vmem:[%s19995_s3 + $0x2a30] sm:$0xff] }
 0x494   :  { %7020 = vmatpush1.msra.mxu0 %v10148_v60  ;;  %7109 = vmatpush1.msra.mxu1 %v10404_v49  ;;  %v10117_v60 = vld [vmem:[%s19995_s3 + $0x21f8] sm:$0xff] }
 0x495   :  { %7021 = vmatprep.subr.mxu0 %v10141_v25  ;;  %7110 = vmatprep.subr.mxu1 %v10397_v6  ;;  %v10373_v49 = vld [vmem:[%s19995_s3 + $0x29f8] sm:$0xff]  ;;  %v10372_v25 = vld [vmem:[%s19995_s3 + $0x29f0] sm:$0xff] }
 0x496   :  { %7022 = vmatpush1.msra.mxu0 %v10140_v15  ;;  %7111 = vmatpush1.msra.mxu1 %v10396_v57  ;;  %v10365_v6 = vld [vmem:[%s19995_s3 + $0x29b8] sm:$0xff]  ;;  %v10108_v15 = vld [vmem:[%s19995_s3 + $0x21b0] sm:$0xff] }
 0x497   :  { %6916 = vmatmul.mubr.f32.gmra.mxu0 %v17072_v37  ;;  %7005 = vmatmul.mubr.f32.gmra.mxu1 %v17075_v13  ;;  %v10364_v57 = vld [vmem:[%s19995_s3 + $0x29b0] sm:$0xff] }
 0x498   :  { %7023 = vmatprep.subr.mxu0 %v10133_v17  ;;  %7112 = vmatprep.subr.mxu1 %v10389_v10  ;;  %v10101_v17 = vld [vmem:[%s19995_s3 + $0x2178] sm:$0xff] }
 0x499   :  { %7024 = vmatpush1.msra.mxu0 %v10132_v26  ;;  %7075 = vmatprep.mubr.f32.mxu0 %v13765_v19  ;;  %v10116_v19 = vld [vmem:[%s19995_s3 + $0x21f0] sm:$0xff]  ;;  %v10357_v10 = vld [vmem:[%s19995_s3 + $0x2978] sm:$0xff] }
 0x49a   :  { %7113 = vmatpush1.msra.mxu1 %v10388_v53  ;;  %7164 = vmatprep.mubr.f32.mxu1 %v13782_v41  ;;  %v10109_v41 = vld [vmem:[%s19995_s3 + $0x21b8] sm:$0xff]  ;;  %v10100_v26 = vld [vmem:[%s19995_s3 + $0x2170] sm:$0xff] }
 0x49b   :  { %7025 = vmatprep.subr.mxu0 %v10125_v9  ;;  %7114 = vmatprep.subr.mxu1 %v10381_v58  ;;  %v10356_v53 = vld [vmem:[%s19995_s3 + $0x2970] sm:$0xff]  ;;  %v10093_v9 = vld [vmem:[%s19995_s3 + $0x2138] sm:$0xff] }
 0x49c   :  { %7026 = vmatpush1.msra.mxu0 %v10124_v5  ;;  %7115 = vmatpush1.msra.mxu1 %v10380_v39  ;;  %v10349_v58 = vld [vmem:[%s19995_s3 + $0x2938] sm:$0xff]  ;;  %v10092_v5 = vld [vmem:[%s19995_s3 + $0x2130] sm:$0xff] }
 0x49d   :  { %7027 = vmatprep.subr.mxu0 %v10117_v60  ;;  %7116 = vmatprep.subr.mxu1 %v10373_v49  ;;  %v10348_v39 = vld [vmem:[%s19995_s3 + $0x2930] sm:$0xff]  ;;  %v10085_v60 = vld [vmem:[%s19995_s3 + $0x20f8] sm:$0xff] }
 0x49e   :  { %7028 = vmatpush1.msra.mxu0 %v10116_v19  ;;  %7117 = vmatpush1.msra.mxu1 %v10372_v25  ;;  %v10341_v49 = vld [vmem:[%s19995_s3 + $0x28f8] sm:$0xff]  ;;  %v10084_v19 = vld [vmem:[%s19995_s3 + $0x20f0] sm:$0xff] }
 0x49f   :  { %7029 = vmatprep.subr.mxu0 %v10109_v41  ;;  %7118 = vmatprep.subr.mxu1 %v10365_v6  ;;  %v10340_v25 = vld [vmem:[%s19995_s3 + $0x28f0] sm:$0xff]  ;;  %v10077_v41 = vld [vmem:[%s19995_s3 + $0x20b8] sm:$0xff] }
 0x4a0   :  { %7030 = vmatpush1.msra.mxu0 %v10108_v15  ;;  %7119 = vmatpush1.msra.mxu1 %v10364_v57  ;;  %v10333_v6 = vld [vmem:[%s19995_s3 + $0x28b8] sm:$0xff]  ;;  %v10076_v15 = vld [vmem:[%s19995_s3 + $0x20b0] sm:$0xff] }
 0x4a1   :  { %7031 = vmatprep.subr.mxu0 %v10101_v17  ;;  %7120 = vmatprep.subr.mxu1 %v10357_v10  ;;  %v10332_v57 = vld [vmem:[%s19995_s3 + $0x28b0] sm:$0xff]  ;;  %v10069_v17 = vld [vmem:[%s19995_s3 + $0x2078] sm:$0xff] }
 0x4a2   :  { %7032 = vmatpush1.msra.mxu0 %v10100_v26  ;;  %7121 = vmatpush1.msra.mxu1 %v10356_v53  ;;  %v10325_v10 = vld [vmem:[%s19995_s3 + $0x2878] sm:$0xff]  ;;  %v10068_v26 = vld [vmem:[%s19995_s3 + $0x2070] sm:$0xff] }
 0x4a3   :  { %7033 = vmatprep.subr.mxu0 %v10093_v9  ;;  %7122 = vmatprep.subr.mxu1 %v10349_v58  ;;  %v10324_v53 = vld [vmem:[%s19995_s3 + $0x2870] sm:$0xff]  ;;  %v10061_v9 = vld [vmem:[%s19995_s3 + $0x2038] sm:$0xff] }
 0x4a4   :  { %7034 = vmatpush1.msra.mxu0 %v10092_v5  ;;  %7123 = vmatpush1.msra.mxu1 %v10348_v39  ;;  %v10317_v58 = vld [vmem:[%s19995_s3 + $0x2838] sm:$0xff]  ;;  %v10060_v5 = vld [vmem:[%s19995_s3 + $0x2030] sm:$0xff] }
 0x4a5   :  { %7035 = vmatprep.subr.mxu0 %v10085_v60  ;;  %7124 = vmatprep.subr.mxu1 %v10341_v49  ;;  %v10316_v39 = vld [vmem:[%s19995_s3 + $0x2830] sm:$0xff]  ;;  %v10309_v60 = vld [vmem:[%s19995_s3 + $0x27f8] sm:$0xff] }
 0x4a6   :  { %7036 = vmatpush1.msra.mxu0 %v10084_v19  ;;  %7125 = vmatpush1.msra.mxu1 %v10340_v25  ;;  %v10565_v49 = vld [vmem:[%s19995_s3 + $0x2ff8] sm:$0xff]  ;;  %v10308_v19 = vld [vmem:[%s19995_s3 + $0x27f0] sm:$0xff] }
 0x4a7   :  { %7037 = vmatprep.subr.mxu0 %v10077_v41  ;;  %7126 = vmatprep.subr.mxu1 %v10333_v6  ;;  %v10564_v25 = vld [vmem:[%s19995_s3 + $0x2ff0] sm:$0xff]  ;;  %v10301_v41 = vld [vmem:[%s19995_s3 + $0x27b8] sm:$0xff] }
 0x4a8   :  { %7038 = vmatpush1.msra.mxu0 %v10076_v15  ;;  %7127 = vmatpush1.msra.mxu1 %v10332_v57  ;;  %v10557_v6 = vld [vmem:[%s19995_s3 + $0x2fb8] sm:$0xff]  ;;  %v10300_v15 = vld [vmem:[%s19995_s3 + $0x27b0] sm:$0xff] }
 0x4a9   :  { %7039 = vmatprep.subr.mxu0 %v10069_v17  ;;  %7128 = vmatprep.subr.mxu1 %v10325_v10  ;;  %v10556_v57 = vld [vmem:[%s19995_s3 + $0x2fb0] sm:$0xff]  ;;  %v10293_v17 = vld [vmem:[%s19995_s3 + $0x2778] sm:$0xff] }
 0x4aa   :  { %7040 = vmatpush1.msra.mxu0 %v10068_v26  ;;  %7129 = vmatpush1.msra.mxu1 %v10324_v53  ;;  %v10549_v10 = vld [vmem:[%s19995_s3 + $0x2f78] sm:$0xff]  ;;  %v10292_v26 = vld [vmem:[%s19995_s3 + $0x2770] sm:$0xff] }
 0x4ab   :  { %7041 = vmatprep.subr.mxu0 %v10061_v9  ;;  %7130 = vmatprep.subr.mxu1 %v10317_v58  ;;  %v10548_v53 = vld [vmem:[%s19995_s3 + $0x2f70] sm:$0xff]  ;;  %v10285_v9 = vld [vmem:[%s19995_s3 + $0x2738] sm:$0xff] }
 0x4ac   :  { %7042 = vmatpush1.msra.mxu0 %v10060_v5  ;;  %7131 = vmatpush1.msra.mxu1 %v10316_v39  ;;  %v10541_v58 = vld [vmem:[%s19995_s3 + $0x2f38] sm:$0xff]  ;;  %v10284_v5 = vld [vmem:[%s19995_s3 + $0x2730] sm:$0xff] }
 0x4ad   :  { %7043 = vmatprep.subr.mxu0 %v10309_v60  ;;  %7132 = vmatprep.subr.mxu1 %v10565_v49  ;;  %v10540_v39 = vld [vmem:[%s19995_s3 + $0x2f30] sm:$0xff]  ;;  %v10277_v60 = vld [vmem:[%s19995_s3 + $0x26f8] sm:$0xff] }
 0x4ae   :  { %7044 = vmatpush2.msra.mxu0 %v10308_v19  ;;  %7133 = vmatpush2.msra.mxu1 %v10564_v25  ;;  %v10533_v49 = vld [vmem:[%s19995_s3 + $0x2ef8] sm:$0xff]  ;;  %v10276_v19 = vld [vmem:[%s19995_s3 + $0x26f0] sm:$0xff] }
 0x4af   :  { %7045 = vmatprep.subr.mxu0 %v10301_v41  ;;  %7134 = vmatprep.subr.mxu1 %v10557_v6  ;;  %v10532_v25 = vld [vmem:[%s19995_s3 + $0x2ef0] sm:$0xff]  ;;  %v18156_v41 = vld [vmem:[%s19996_s4] sm:$0xff]  ;;  %v10269_v6 = vld [vmem:[%s19995_s3 + $0x26b8] sm:$0xff]  ;;  %s11506_s4 = scalar_lea.vmem %s9363_s23, 32 }
 0x4b0   :  { %7046 = vmatpush2.msra.mxu0 %v10300_v15  ;;  %7135 = vmatpush2.msra.mxu1 %v10556_v57  ;;  %v10525_v15 = vld [vmem:[%s19995_s3 + $0x2eb8] sm:$0xff]  ;;  %v10268_v57 = vld [vmem:[%s19995_s3 + $0x26b0] sm:$0xff]  ;;  %p11507_p0 = scmp.ne.s32.totalorder %s9363_s23, %s11506_s4  ;;  %p11512_p2 = scmp.lt.s32.totalorder %s11506_s4, %s11506_s4 }
 0x4b1   :  { %7047 = vmatprep.subr.mxu0 %v10293_v17  ;;  %7136 = vmatprep.subr.mxu1 %v10549_v10  ;;  %v10524_v17 = vld [vmem:[%s19995_s3 + $0x2eb0] sm:$0xff] }
 0x4b2   :  { %7048 = vmatpush2.msra.mxu0 %v10292_v26  ;;  %7137 = vmatpush2.msra.mxu1 %v10548_v53  ;;  %v10261_v53 = vld [vmem:[%s19995_s3 + $0x2678] sm:$0xff]  ;;  %p11513_p3 = por %p11512_p2, %p11511_p1 }
 0x4b3   :  { %7049 = vmatprep.subr.mxu0 %v10285_v9  ;;  %7138 = vmatprep.subr.mxu1 %v10541_v58  ;;  %v10517_v9 = vld [vmem:[%s19995_s3 + $0x2e78] sm:$0xff] }
 0x4b4   :  { %7050 = vmatpush2.msra.mxu0 %v10284_v5  ;;  %7139 = vmatpush2.msra.mxu1 %v10540_v39  ;;  %v20150_v5 = vld [vmem:[#allocation7_spill] sm:$0xff]  ;;  %p11514_p4 = pnand %p11513_p3, %p11507_p0 }
 0x4b5   :  { %7051 = vmatprep.subr.mxu0 %v10277_v60  ;;  %7140 = vmatprep.subr.mxu1 %v10533_v49  ;;  %v6543_v10 = vpop.f32.mrf.mxu0  ;;  %v6632_v26 = vpop.f32.mrf.mxu1  ;;  %v20151_v39 = vsub.s32 0, %v20150_v5  ;;  %v10260_v49 = vld [vmem:[%s19995_s3 + $0x2670] sm:$0xff] }
 0x4b6   :  { %7052 = vmatpush2.msra.mxu0 %v10276_v19  ;;  %7141 = vmatpush2.msra.mxu1 %v10532_v25  ;;  %v6633_v58 = vadd.f32 %v6632_v26, %v6543_v10  ;;  %v10516_v19 = vld [vmem:[%s19995_s3 + $0x2e70] sm:$0xff]  ;;  %v10253_v10 = vld [vmem:[%s19995_s3 + $0x2638] sm:$0xff] }
 0x4b7   :  { %v18179_v60 = vrot.slane %v18156_v41, %v20151_v39  ;;  %7053 = vmatprep.subr.mxu0 %v10269_v6  ;;  %7142 = vmatprep.subr.mxu1 %v10525_v15  ;;  %v6545_v25 = vpop.f32.mrf.mxu0  ;;  %v6634_v29 = vpop.f32.mrf.mxu1  ;;  %v10509_v6 = vld [vmem:[%s19995_s3 + $0x2e38] sm:$0xff]  ;;  %v20152_v39 = vsub.s32 1, %v20150_v5 }
 0x4b8   :  { %7054 = vmatpush2.msra.mxu0 %v10268_v57  ;;  %7143 = vmatpush2.msra.mxu1 %v10524_v17  ;;  %v7189_v15 = vadd.f32 %v6633_v58, %v16454_v44  ;;  %v6635_v26 = vadd.f32 %v6634_v29, %v6545_v25  ;;  %v10252_v57 = vld [vmem:[%s19995_s3 + $0x2630] sm:$0xff]  ;;  %v10245_v29 = vld [vmem:[%s19995_s3 + $0x25f8] sm:$0xff] }
 0x4b9   :  { %v18197_v45 = vrot.slane %v18156_v41, %v20152_v39  ;;  %7055 = vmatprep.subr.mxu0 %v10261_v53  ;;  %7144 = vmatprep.subr.mxu1 %v10517_v9  ;;  %v10508_v17 = vld [vmem:[%s19995_s3 + $0x2e30] sm:$0xff]  ;;  %v10501_v44 = vld [vmem:[%s19995_s3 + $0x2df8] sm:$0xff] }
 0x4ba   :  { %7056 = vmatpush2.msra.mxu0 %v10260_v49  ;;  %7145 = vmatpush2.msra.mxu1 %v10516_v19  ;;  %v7263_v53 = vadd.f32 %v18179_v60, %v7189_v15  ;;  %v7190_v9 = vadd.f32 %v6635_v26, %v16469_v24  ;;  %v10244_v58 = vld [vmem:[%s19995_s3 + $0x25f0] sm:$0xff]  ;;  %v10237_v15 = vld [vmem:[%s19995_s3 + $0x25b8] sm:$0xff] }
 0x4bb   :  { %7057 = vmatprep.subr.mxu0 %v10253_v10  ;;  %7146 = vmatprep.subr.mxu1 %v10509_v6  ;;  %v10500_v49 = vld [vmem:[%s19995_s3 + $0x2df0] sm:$0xff]  ;;  %v6549_v19 = vpop.f32.mrf.mxu0  ;;  %v6638_v25 = vpop.f32.mrf.mxu1  ;;  %v10493_v24 = vld [vmem:[%s19995_s3 + $0x2db8] sm:$0xff] }
 0x4bc   :  { %7058 = vmatpush2.msra.mxu0 %v10252_v57  ;;  %7147 = vmatpush2.msra.mxu1 %v10508_v17  ;;  %v7264_v10 = vadd.f32 %v18197_v45, %v7190_v9  ;;  %v6639_v6 = vadd.f32 %v6638_v25, %v6549_v19  ;;  %v10236_v26 = vld [vmem:[%s19995_s3 + $0x25b0] sm:$0xff] }
 0x4bd   :  { %7059 = vmatprep.subr.mxu0 %v10245_v29  ;;  %7148 = vmatprep.subr.mxu1 %v10501_v44  ;;  %v10492_v39 = vld [vmem:[%s19995_s3 + $0x2db0] sm:$0xff]  ;;  %v6551_v57 = vpop.f32.mrf.mxu0  ;;  %v6640_v17 = vpop.f32.mrf.mxu1  ;;  %v10485_v29 = vld [vmem:[%s19995_s3 + $0x2d78] sm:$0xff]  ;;  %v7295_v44 = vmax.f32 %v7263_v53, 0.0 }
 0x4be   :  { %7060 = vmatpush2.msra.mxu0 %v10244_v58  ;;  %7149 = vmatpush2.msra.mxu1 %v10500_v49  ;;  %v7296_v9 = vmax.f32 %v7264_v10, 0.0  ;;  %v7197_v19 = vadd.f32 %v6639_v6, %v16496_v14  ;;  %v6641_v25 = vadd.f32 %v6640_v17, %v6551_v57  ;;  %v10228_v58 = vld [vmem:[%s19995_s3 + $0x2570] sm:$0xff]  ;;  %v10221_v53 = vld [vmem:[%s19995_s3 + $0x2538] sm:$0xff] }
 0x4bf   :  { %7061 = vmatprep.subr.mxu0 %v10237_v15  ;;  %7150 = vmatprep.subr.mxu1 %v10493_v24  ;;  %v10484_v49 = vld [vmem:[%s19995_s3 + $0x2d70] sm:$0xff]  ;;  %v10477_v14 = vld [vmem:[%s19995_s3 + $0x2d38] sm:$0xff] }
 0x4c0   :  { %7062 = vmatpush2.msra.mxu0 %v10236_v26  ;;  %7151 = vmatpush2.msra.mxu1 %v10492_v39  ;;  %v18251_v15 = vcombine.low %v7295_v44, %v7296_v9  ;;  %v18253_v24 = vcombine.high %v7295_v44, %v7296_v9  ;;  %v10220_v10 = vld [vmem:[%s19995_s3 + $0x2530] sm:$0xff]  ;;  %v7271_v26 = vadd.f32 %v18179_v60, %v7197_v19 }
 0x4c1   :  { %7063 = vmatprep.subr.mxu0 %v10229_v11  ;;  %7152 = vmatprep.subr.mxu1 %v10485_v29  ;;  %v10476_v6 = vld [vmem:[%s19995_s3 + $0x2d30] sm:$0xff]  ;;  %v7198_v39 = vadd.f32 %v6641_v25, %v16511_v63  ;;  %v6555_v57 = vpop.f32.mrf.mxu0  ;;  %v6644_v17 = vpop.f32.mrf.mxu1  ;;  %v10213_v11 = vld [vmem:[%s19995_s3 + $0x24f8] sm:$0xff] }
 0x4c2   :  { %7064 = vmatpush2.msra.mxu0 %v10228_v58  ;;  %7153 = vmatpush2.msra.mxu1 %v10484_v49  ;;  %v10469_v29 = vld [vmem:[%s19995_s3 + $0x2cf8] sm:$0xff]  ;;  %v6645_v44 = vadd.f32 %v6644_v17, %v6555_v57  ;;  %v10212_v9 = vld [vmem:[%s19995_s3 + $0x24f0] sm:$0xff] }
 0x4c3   :  { %7065 = vmatprep.subr.mxu0 %v10221_v53  ;;  %7154 = vmatprep.subr.mxu1 %v10477_v14  ;;  %v10468_v63 = vld [vmem:[%s19995_s3 + $0x2cf0] sm:$0xff]  ;;  %v7272_v19 = vadd.f32 %v18197_v45, %v7198_v39  ;;  %v6557_v25 = vpop.f32.mrf.mxu0  ;;  %v6646_v58 = vpop.f32.mrf.mxu1  ;;  %v10205_v49 = vld [vmem:[%s19995_s3 + $0x24b8] sm:$0xff] }
 0x4c4   :  { %7066 = vmatpush2.msra.mxu0 %v10220_v10  ;;  %7155 = vmatpush2.msra.mxu1 %v10476_v6  ;;  %v10461_v53 = vld [vmem:[%s19995_s3 + $0x2cb8] sm:$0xff]  ;;  %v7205_v14 = vadd.f32 %v6645_v44, %v16538_v16  ;;  %v6647_v57 = vadd.f32 %v6646_v58, %v6557_v25  ;;  %v10204_v39 = vld [vmem:[%s19995_s3 + $0x24b0] sm:$0xff]  ;;  %v7303_v6 = vmax.f32 %v7271_v26, 0.0 }
 0x4c5   :  { %7067 = vmatprep.subr.mxu0 %v10213_v11  ;;  %7156 = vmatprep.subr.mxu1 %v10469_v29  ;;  %v10460_v10 = vld [vmem:[%s19995_s3 + $0x2cb0] sm:$0xff]  ;;  %v7304_v17 = vmax.f32 %v7272_v19, 0.0  ;;  %v10453_v16 = vld [vmem:[%s19995_s3 + $0x2c78] sm:$0xff] }
 0x4c6   :  { %7068 = vmatpush2.msra.mxu0 %v10212_v9  ;;  %7157 = vmatpush2.msra.mxu1 %v10468_v63  ;;  %v7279_v11 = vadd.f32 %v18179_v60, %v7205_v14  ;;  %v7206_v29 = vadd.f32 %v6647_v57, %v16553_v56  ;;  %v10196_v26 = vld [vmem:[%s19995_s3 + $0x2470] sm:$0xff]  ;;  %v10189_v56 = vld [vmem:[%s19995_s3 + $0x2438] sm:$0xff] }
 0x4c7   :  { %7069 = vmatprep.subr.mxu0 %v10205_v49  ;;  %7158 = vmatprep.subr.mxu1 %v10461_v53  ;;  %v10452_v44 = vld [vmem:[%s19995_s3 + $0x2c70] sm:$0xff]  ;;  %v18303_v9 = vcombine.low %v7303_v6, %v7304_v17  ;;  %v18305_v63 = vcombine.high %v7303_v6, %v7304_v17  ;;  %v6561_v19 = vpop.f32.mrf.mxu0  ;;  %v6650_v25 = vpop.f32.mrf.mxu1  ;;  %v10445_v58 = vld [vmem:[%s19995_s3 + $0x2c38] sm:$0xff] }
 0x4c8   :  { %7070 = vmatpush2.msra.mxu0 %v10204_v39  ;;  %7159 = vmatpush2.msra.mxu1 %v10460_v10  ;;  %v7280_v49 = vadd.f32 %v18197_v45, %v7206_v29  ;;  %v6651_v53 = vadd.f32 %v6650_v25, %v6561_v19  ;;  %v10188_v14 = vld [vmem:[%s19995_s3 + $0x2430] sm:$0xff]  ;;  %v7311_v6 = vmax.f32 %v7279_v11, 0.0 }
 0x4c9   :  { %7071 = vmatprep.subr.mxu0 %v10197_v42  ;;  %7160 = vmatprep.subr.mxu1 %v10453_v16  ;;  %v10444_v57 = vld [vmem:[%s19995_s3 + $0x2c30] sm:$0xff]  ;;  %v6563_v39 = vpop.f32.mrf.mxu0  ;;  %v6652_v10 = vpop.f32.mrf.mxu1 }
 0x4ca   :  { %7072 = vmatpush2.msra.mxu0 %v10196_v26  ;;  %7161 = vmatpush2.msra.mxu1 %v10452_v44  ;;  %v7312_v17 = vmax.f32 %v7280_v49, 0.0  ;;  %v7213_v47 = vadd.f32 %v6651_v53, %v16574_v34  ;;  %v6653_v29 = vadd.f32 %v6652_v10, %v6563_v39  ;;  %v20154_v53 = vsub.s32 3, %v20150_v5 }
 0x4cb   :  { %7073 = vmatprep.subr.mxu0 %v10189_v56  ;;  %7162 = vmatprep.subr.mxu1 %v10445_v58 }
 0x4cc   :  { %7074 = vmatpush2.msra.mxu0 %v10188_v14  ;;  %7163 = vmatpush2.msra.mxu1 %v10444_v57  ;;  %v18321_v42 = vcombine.low %v7311_v6, %v7312_v17  ;;  %v18323_v16 = vcombine.high %v7311_v6, %v7312_v17  ;;  %v7287_v19 = vadd.f32 %v18179_v60, %v7213_v47 }
 0x4cd   :  { %7076 = vmatmul.mubr.f32.vlgmr.msra.gmra.mxu0 %v13786_v20  ;;  %7165 = vmatmul.mubr.f32.vlgmr.msra.gmra.mxu1 %v13789_v40  ;;  %v7214_v11 = vadd.f32 %v6653_v29, %v16583_v50  ;;  %v10597_v40 = vld [vmem:[%s19997_s5 + $0x2f8] sm:$0xff]  ;;  %v18389_v14 = vrot.slane %v18156_v41, %v20154_v53  ;;  %v10626_v53 = vld [vmem:[%s19997_s5 + $0x3e0] sm:$0xff] }
 0x4ce   :  { %7081 = vmatprep.mubr.f32.mxu0 %v13792_v54  ;;  %7170 = vmatprep.mubr.f32.mxu1 %v13800_v12  ;;  %v7319_v26 = vmax.f32 %v7287_v19, 0.0  ;;  %v10581_v54 = vld [vmem:[%s19997_s5 + $0x278] sm:$0xff]  ;;  %v10596_v12 = vld [vmem:[%s19997_s5 + $0x2f0] sm:$0xff] }
 0x4cf   :  { %v7288_v34 = vadd.f32 %v18197_v45, %v7214_v11  ;;  %10952 = vmatprep.subr.mxu0 %v10597_v40  ;;  %v10613_v50 = vld [vmem:[%s19997_s5 + $0x378] sm:$0xff]  ;;  %v20153_v45 = vsub.s32 2, %v20150_v5 }
 0x4d0   :  { %10953 = vmatpush3.msra.mxu0 %v10581_v54 }
 0x4d1   :  { %7082 = vmatmul.mubr.f32.gmra.mxu0 %v13803_v52  ;;  %7171 = vmatmul.mubr.f32.gmra.mxu1 %v13805_v51  ;;  %v7320_v44 = vmax.f32 %v7288_v34, 0.0  ;;  %v10629_v52 = vld [vmem:[%s19997_s5 + $0x3f8] sm:$0xff]  ;;  %v10580_v51 = vld [vmem:[%s19997_s5 + $0x270] sm:$0xff]  ;;  %v18383_v60 = vrot.slane %v18156_v41, %v20153_v45 }
 0x4d2   :  { %7087 = vmatprep.mubr.f32.mxu0 %v17045_v36  ;;  %7176 = vmatprep.mubr.f32.mxu1 %v17049_v21  ;;  %v10595_v36 = vld [vmem:[%s19997_s5 + $0x2e8] sm:$0xff]  ;;  %v10628_v21 = vld [vmem:[%s19997_s5 + $0x3f0] sm:$0xff] }
 0x4d3   :  { %v18336_v20 = vcombine.low %v7319_v26, %v7320_v44  ;;  %10987 = vmatprep.subr.mxu1 %v10629_v52  ;;  %10954 = vmatprep.subr.mxu0 %v10596_v12  ;;  %v7369_v52 = vrot.slane %v18251_v15, %v20075_v31 }
 0x4d4   :  { %10988 = vmatpush3.msra.mxu1 %v10613_v50  ;;  %10955 = vmatpush3.msra.mxu0 %v10580_v51 }
 0x4d5   :  { %7088 = vmatmul.mubr.f32.gmra.mxu0 %v17079_v2  ;;  %7177 = vmatmul.mubr.f32.gmra.mxu1 %v17083_v18  ;;  %v10627_v2 = vld [vmem:[%s19997_s5 + $0x3e8] sm:$0xff]  ;;  %v10594_v18 = vld [vmem:[%s19997_s5 + $0x2e0] sm:$0xff] }
 0x4d6   :  { %7093 = vmatprep.mubr.f32.mxu0 %v17095_v30  ;;  %7182 = vmatprep.mubr.f32.mxu1 %v17099_v23 }
 0x4d7   :  { %10989 = vmatprep.subr.mxu1 %v10628_v21  ;;  %10956 = vmatprep.subr.mxu0 %v10595_v36  ;;  %v7376_v36 = vrot.slane %v18253_v24, %v20075_v31  ;;  %v10611_v24 = vld [vmem:[%s19997_s5 + $0x368] sm:$0xff] }
 0x4d9   :  { %7094 = vmatmul.mubr.f32.gmra.mxu0 %v17072_v37  ;;  %7183 = vmatmul.mubr.f32.gmra.mxu1 %v17075_v13  ;;  %v10579_v37 = vld [vmem:[%s19997_s5 + $0x268] sm:$0xff]  ;;  %v10612_v13 = vld [vmem:[%s19997_s5 + $0x370] sm:$0xff] }
 0x4da   :  { %10990 = vmatpush3.msra.mxu1 %v10612_v13  ;;  %10957 = vmatpush3.msra.mxu0 %v10579_v37 }
 0x4db   :  { %10991 = vmatprep.subr.mxu1 %v10627_v2  ;;  %10958 = vmatprep.subr.mxu0 %v10594_v18 }
 0x4dc   :  { %10992 = vmatpush3.msra.mxu1 %v10611_v24  ;;  %v10590_v24 = vld [vmem:[%s19997_s5 + $0x2c0] sm:$0xff] }
 0x4dd   :  { %10993 = vmatprep.subr.mxu1 %v10626_v53 }
 0x4fd   :  { %v6721_v30 = vpop.f32.mrf.mxu0  ;;  %v6810_v23 = vpop.f32.mrf.mxu1 }
 0x4fe   :  { %v6811_v47 = vadd.f32 %v6810_v23, %v6721_v30 }
 0x4ff   :  { %v6723_v25 = vpop.f32.mrf.mxu0  ;;  %v6812_v56 = vpop.f32.mrf.mxu1 }
 0x500   :  { %v7191_v58 = vadd.f32 %v6811_v47, %v16878_v0  ;;  %v6813_v49 = vadd.f32 %v6812_v56, %v6723_v25  ;;  %v10578_v47 = vld [vmem:[%s19997_s5 + $0x260] sm:$0xff] }
 0x501   :  { %10959 = vmatpush3.msra.mxu0 %v10578_v47 }
 0x502   :  { %v7265_v57 = vadd.f32 %v18383_v60, %v7191_v58  ;;  %v7192_v39 = vadd.f32 %v6813_v49, %v16893_v62  ;;  %v10593_v49 = vld [vmem:[%s19997_s5 + $0x2d8] sm:$0xff] }
 0x503   :  { %v6727_v10 = vpop.f32.mrf.mxu0  ;;  %v6816_v6 = vpop.f32.mrf.mxu1  ;;  %10960 = vmatprep.subr.mxu0 %v10593_v49 }
 0x504   :  { %v7266_v17 = vadd.f32 %v18389_v14, %v7192_v39  ;;  %v6817_v29 = vadd.f32 %v6816_v6, %v6727_v10  ;;  %v7297_v34 = vmax.f32 %v7265_v57, 0.0  ;;  %v10577_v57 = vld [vmem:[%s19997_s5 + $0x258] sm:$0xff] }
 0x505   :  { %v6729_v19 = vpop.f32.mrf.mxu0  ;;  %v6818_v11 = vpop.f32.mrf.mxu1  ;;  %10961 = vmatpush3.msra.mxu0 %v10577_v57  ;;  %v10589_v57 = vld [vmem:[%s19997_s5 + $0x2b8] sm:$0xff] }
 0x506   :  { %v7298_v26 = vmax.f32 %v7266_v17, 0.0  ;;  %v7199_v0 = vadd.f32 %v6817_v29, %v16920_v3  ;;  %v6819_v44 = vadd.f32 %v6818_v11, %v6729_v19 }
 0x508   :  { %v7361_v40 = vcombine.low %v7297_v34, %v7298_v26  ;;  %v7362_v54 = vcombine.high %v7297_v34, %v7298_v26  ;;  %v7200_v12 = vadd.f32 %v6819_v44, %v16935_v27  ;;  %v7273_v62 = vadd.f32 %v18383_v60, %v7199_v0  ;;  %v10592_v26 = vld [vmem:[%s19997_s5 + $0x2d0] sm:$0xff]  ;;  %v10625_v0 = vld [vmem:[%s19997_s5 + $0x3d8] sm:$0xff] }
 0x509   :  { %v6733_v51 = vpop.f32.mrf.mxu0  ;;  %v6822_v50 = vpop.f32.mrf.mxu1  ;;  %v7441_v44 = vrot.slane %v18303_v9, %v20075_v31  ;;  %10962 = vmatprep.subr.mxu0 %v10592_v26 }
 0x50a   :  { %v7383_v21 = vrot.slane %v7361_v40, %v20075_v31  ;;  %v7390_v37 = vrot.slane %v7362_v54, %v20075_v31  ;;  %v7274_v3 = vadd.f32 %v18389_v14, %v7200_v12  ;;  %v6823_v13 = vadd.f32 %v6822_v50, %v6733_v51  ;;  %v10609_v12 = vld [vmem:[%s19997_s5 + $0x358] sm:$0xff] }
 0x50b   :  { %v6735_v2 = vpop.f32.mrf.mxu0  ;;  %v6824_v18 = vpop.f32.mrf.mxu1  ;;  %v7305_v45 = vmax.f32 %v7273_v62, 0.0  ;;  %v7448_v40 = vrot.slane %v18305_v63, %v20075_v31  ;;  %v10591_v63 = vld [vmem:[%s19997_s5 + $0x2c8] sm:$0xff] }
 0x50c   :  { %v7391_v27 = vcombine.low %v7369_v52, %v7383_v21  ;;  %v7392_v30 = vcombine.high %v7369_v52, %v7383_v21  ;;  %v7393_v23 = vcombine.low %v7376_v36, %v7390_v37  ;;  %v7394_v15 = vcombine.high %v7376_v36, %v7390_v37  ;;  %v10624_v36 = vld [vmem:[%s19997_s5 + $0x3d0] sm:$0xff] }
 0x50d   :  { %v7306_v25 = vmax.f32 %v7274_v3, 0.0  ;;  %v7207_v56 = vadd.f32 %v6823_v13, %v16962_v38  ;;  %v6825_v58 = vadd.f32 %v6824_v18, %v6735_v2  ;;  %v10610_v38 = vld [vmem:[%s19997_s5 + $0x360] sm:$0xff] }
 0x50e   :  { %v18423_v39 = vmax.f32 %v7393_v23, %v7394_v15  ;;  %v18425_v10 = vmax.f32 %v7391_v27, %v7392_v30  ;;  %10994 = vmatpush3.msra.mxu1 %v10610_v38  ;;  %v10575_v27 = vld [vmem:[%s19997_s5 + $0x248] sm:$0xff]  ;;  %v10608_v30 = vld [vmem:[%s19997_s5 + $0x350] sm:$0xff]  ;;  %v10622_v38 = vld [vmem:[%s19997_s5 + $0x3c0] sm:$0xff] }
 0x50f   :  { %v7433_v6 = vcombine.low %v7305_v45, %v7306_v25  ;;  %v7434_v17 = vcombine.high %v7305_v45, %v7306_v25  ;;  %v7281_v29 = vadd.f32 %v18383_v60, %v7207_v56  ;;  %v7208_v19 = vadd.f32 %v6825_v58, %v16977_v55  ;;  %v6739_v11 = vpop.f32.mrf.mxu0  ;;  %v6828_v34 = vpop.f32.mrf.mxu1  ;;  %v10576_v55 = vld [vmem:[%s19997_s5 + $0x250] sm:$0xff]  ;;  %10995 = vmatprep.subr.mxu1 %v10625_v0  ;;  %v10623_v45 = vld [vmem:[%s19997_s5 + $0x3c8] sm:$0xff]  ;;  %v10574_v25 = vld [vmem:[%s19997_s5 + $0x240] sm:$0xff] }
 0x510   :  { %v6829_v54 = vadd.f32 %v6828_v34, %v6739_v11  ;;  %10963 = vmatpush3.msra.mxu0 %v10576_v55  ;;  %10996 = vmatpush3.msra.mxu1 %v10609_v12  ;;  %v10573_v11 = vld [vmem:[%s19997_s5 + $0x238] sm:$0xff]  ;;  %v10606_v34 = vld [vmem:[%s19997_s5 + $0x340] sm:$0xff]  ;;  %v10572_v55 = vld [vmem:[%s19997_s5 + $0x230] sm:$0xff] }
 0x511   :  { %v7455_v52 = vrot.slane %v7433_v6, %v20075_v31  ;;  %v7462_v62 = vrot.slane %v7434_v17, %v20075_v31  ;;  %v7282_v9 = vadd.f32 %v18389_v14, %v7208_v19  ;;  %v6741_v51 = vpop.f32.mrf.mxu0  ;;  %v6830_v50 = vpop.f32.mrf.mxu1  ;;  %10964 = vmatprep.subr.mxu0 %v10591_v63  ;;  %10997 = vmatprep.subr.mxu1 %v10624_v36  ;;  %v7313_v23 = vmax.f32 %v7281_v29, 0.0  ;;  %v10605_v12 = vld [vmem:[%s19997_s5 + $0x338] sm:$0xff] }
 0x512   :  { %v7215_v21 = vadd.f32 %v6829_v54, %v16998_v8  ;;  %v6831_v37 = vadd.f32 %v6830_v50, %v6741_v51  ;;  %10965 = vmatpush3.msra.mxu0 %v10575_v27  ;;  %10998 = vmatpush3.msra.mxu1 %v10608_v30  ;;  %v7513_v6 = vrot.slane %v18321_v42, %v20075_v31  ;;  %v10588_v42 = vld [vmem:[%s19997_s5 + $0x2b0] sm:$0xff]  ;;  %v10603_v27 = vld [vmem:[%s19997_s5 + $0x328] sm:$0xff]  ;;  %v10585_v30 = vld [vmem:[%s19997_s5 + $0x298] sm:$0xff] }
 0x513   :  { %v7463_v3 = vcombine.low %v7441_v44, %v7455_v52  ;;  %v7464_v13 = vcombine.high %v7441_v44, %v7455_v52  ;;  %v7465_v2 = vcombine.low %v7448_v40, %v7462_v62  ;;  %v7466_v18 = vcombine.high %v7448_v40, %v7462_v62  ;;  %10966 = vmatprep.subr.mxu0 %v10590_v24  ;;  %v10587_v62 = vld [vmem:[%s19997_s5 + $0x2a8] sm:$0xff]  ;;  %v10584_v24 = vld [vmem:[%s19997_s5 + $0x290] sm:$0xff] }
 0x514   :  { %v7314_v15 = vmax.f32 %v7282_v9, 0.0  ;;  %v7289_v8 = vadd.f32 %v18383_v60, %v7215_v21  ;;  %v7216_v47 = vadd.f32 %v6831_v37, %v17007_v46  ;;  %10999 = vmatprep.subr.mxu1 %v10623_v45  ;;  %v10607_v46 = vld [vmem:[%s19997_s5 + $0x348] sm:$0xff]  ;;  %10967 = vmatpush3.msra.mxu0 %v10574_v25  ;;  %v7520_v17 = vrot.slane %v18323_v16, %v20075_v31  ;;  %v10621_v16 = vld [vmem:[%s19997_s5 + $0x3b8] sm:$0xff]  ;;  %v10620_v9 = vld [vmem:[%s19997_s5 + $0x3b0] sm:$0xff] }
 0x515   :  { %v18475_v60 = vmax.f32 %v7463_v3, %v7464_v13  ;;  %v18477_v56 = vmax.f32 %v7465_v2, %v7466_v18  ;;  %11000 = vmatpush3.msra.mxu1 %v10607_v46  ;;  %10968 = vmatprep.subr.mxu0 %v10589_v57  ;;  %v7583_v63 = vrot.slane %v18336_v20, %v20075_v31  ;;  %v10571_v21 = vld [vmem:[%s19997_s5 + $0x228] sm:$0xff]  ;;  %v10604_v37 = vld [vmem:[%s19997_s5 + $0x330] sm:$0xff]  ;;  %v10586_v3 = vld [vmem:[%s19997_s5 + $0x2a0] sm:$0xff] }
 0x516   :  { %v7505_v58 = vcombine.low %v7313_v23, %v7314_v15  ;;  %v7506_v49 = vcombine.high %v7313_v23, %v7314_v15  ;;  %v7290_v53 = vadd.f32 %v18389_v14, %v7216_v47  ;;  %11001 = vmatprep.subr.mxu1 %v10622_v38  ;;  %v7321_v26 = vmax.f32 %v7289_v8, 0.0  ;;  %10969 = vmatpush3.msra.mxu0 %v10573_v11  ;;  %v10619_v20 = vld [vmem:[%s19997_s5 + $0x3a8] sm:$0xff]  ;;  %v10570_v18 = vld [vmem:[%s19997_s5 + $0x220] sm:$0xff]  ;;  %v10569_v15 = vld [vmem:[%s19997_s5 + $0x218] sm:$0xff] }
 0x517   :  { %11002 = vmatpush3.msra.mxu1 %v10606_v34  ;;  %10970 = vmatprep.subr.mxu0 %v10588_v42  ;;  %v10618_v23 = vld [vmem:[%s19997_s5 + $0x3a0] sm:$0xff]  ;;  %v10617_v45 = vld [vmem:[%s19997_s5 + $0x398] sm:$0xff]  ;;  %v10568_v25 = vld [vmem:[%s19997_s5 + $0x210] sm:$0xff] }
 0x518   :  { %v7527_v14 = vrot.slane %v7505_v58, %v20075_v31  ;;  %v7534_v29 = vrot.slane %v7506_v49, %v20075_v31  ;;  %v7322_v19 = vmax.f32 %v7290_v53, 0.0  ;;  %11003 = vmatprep.subr.mxu1 %v10621_v16  ;;  %10971 = vmatpush3.msra.mxu0 %v10572_v55  ;;  %v10602_v8 = vld [vmem:[%s19997_s5 + $0x320] sm:$0xff]  ;;  %v10601_v46 = vld [vmem:[%s19997_s5 + $0x318] sm:$0xff]  ;;  %v10583_v58 = vld [vmem:[%s19997_s5 + $0x288] sm:$0xff] }
 0x519   :  { %11004 = vmatpush3.msra.mxu1 %v10605_v12  ;;  %10972 = vmatprep.subr.mxu0 %v10587_v62  ;;  %v10616_v49 = vld [vmem:[%s19997_s5 + $0x390] sm:$0xff]  ;;  %v10567_v53 = vld [vmem:[%s19997_s5 + $0x208] sm:$0xff]  ;;  %v10582_v38 = vld [vmem:[%s19997_s5 + $0x280] sm:$0xff] }
 0x51a   :  { %v7535_v0 = vcombine.low %v7513_v6, %v7527_v14  ;;  %v7536_v44 = vcombine.high %v7513_v6, %v7527_v14  ;;  %v7537_v40 = vcombine.low %v7520_v17, %v7534_v29  ;;  %v7538_v54 = vcombine.high %v7520_v17, %v7534_v29  ;;  %11005 = vmatprep.subr.mxu1 %v10620_v9  ;;  %v10600_v57 = vld [vmem:[%s19997_s5 + $0x310] sm:$0xff]  ;;  %v10615_v6 = vld [vmem:[%s19997_s5 + $0x388] sm:$0xff]  ;;  %v10566_v17 = vld [vmem:[%s19997_s5 + $0x200] sm:$0xff] }
 0x51b   :  { %v7576_v52 = vcombine.low %v7321_v26, %v7322_v19  ;;  %10973 = vmatpush3.msra.mxu0 %v10571_v21  ;;  %11006 = vmatpush3.msra.mxu1 %v10604_v37  ;;  %v10599_v14 = vld [vmem:[%s19997_s5 + $0x308] sm:$0xff]  ;;  %v10614_v29 = vld [vmem:[%s19997_s5 + $0x380] sm:$0xff]  ;;  %v7691_v19 = vld [vmem:[%s19997_s5 + $0xf8] sm:$0xff] }
 0x51c   :  { %v18516_v51 = vmax.f32 %v7535_v0, %v7536_v44  ;;  %v18518_v50 = vmax.f32 %v7537_v40, %v7538_v54  ;;  %10974 = vmatprep.subr.mxu0 %v10586_v3  ;;  %11007 = vmatprep.subr.mxu1 %v10619_v20  ;;  %v10598_v11 = vld [vmem:[%s19997_s5 + $0x300] sm:$0xff]  ;;  %v7723_v34 = vld [vmem:[%s19997_s5 + $0x1f8] sm:$0xff]  ;;  %v20155_v0 = vsub.s32 4, %v20150_v5 }
 0x51d   :  { %v7590_v36 = vrot.slane %v7576_v52, %v20075_v31  ;;  %10975 = vmatpush3.msra.mxu0 %v10570_v18  ;;  %11008 = vmatpush3.msra.mxu1 %v10603_v27  ;;  %v20156_v52 = vsub.s32 5, %v20150_v5 }
 0x51e   :  { %10976 = vmatprep.subr.mxu0 %v10585_v30  ;;  %11009 = vmatprep.subr.mxu1 %v10618_v23  ;;  %v7242_v44 = vrot.slane %v18156_v41, %v20155_v0 }
 0x51f   :  { %v7591_v13 = vcombine.low %v7583_v63, %v7590_v36  ;;  %v7592_v2 = vcombine.high %v7583_v63, %v7590_v36  ;;  %10977 = vmatpush3.msra.mxu0 %v10569_v15  ;;  %11010 = vmatpush3.msra.mxu1 %v10602_v8  ;;  %v7246_v62 = vrot.slane %v18156_v41, %v20156_v52 }
 0x520   :  { %10978 = vmatprep.subr.mxu0 %v10584_v24  ;;  %11011 = vmatprep.subr.mxu1 %v10617_v45 }
 0x521   :  { %v18553_v47 = vmax.f32 %v7591_v13, %v7592_v2  ;;  %10979 = vmatpush3.msra.mxu0 %v10568_v25  ;;  %11012 = vmatpush3.msra.mxu1 %v10601_v46 }
 0x522   :  { %10980 = vmatprep.subr.mxu0 %v10583_v58  ;;  %11013 = vmatprep.subr.mxu1 %v10616_v49 }
 0x523   :  { %10981 = vmatpush3.msra.mxu0 %v10567_v53  ;;  %11014 = vmatpush3.msra.mxu1 %v10600_v57 }
 0x524   :  { %10982 = vmatprep.subr.mxu0 %v10582_v38  ;;  %11015 = vmatprep.subr.mxu1 %v10615_v6 }
 0x525   :  { %10983 = vmatpush3.msra.mxu0 %v10566_v17  ;;  %11016 = vmatpush3.msra.mxu1 %v10599_v14 }
 0x526   :  { %11017 = vmatprep.subr.mxu1 %v10614_v29  ;;  %11022 = vmatprep.subr.mxu0 %v7691_v19 }
 0x527   :  { %11018 = vmatpush3.msra.mxu1 %v10598_v11 }
 0x528   :  { %11057 = vmatprep.subr.mxu1 %v7723_v34 }
 0x545   :  { %v6899_v26 = vpop.f32.mrf.mxu0  ;;  %v6988_v42 = vpop.f32.mrf.mxu1 }
 0x546   :  { %v6989_v16 = vadd.f32 %v6988_v42, %v6899_v26 }
 0x547   :  { %v6901_v40 = vpop.f32.mrf.mxu0  ;;  %v6990_v54 = vpop.f32.mrf.mxu1 }
 0x548   :  { %v7193_v55 = vadd.f32 %v6989_v16, %v17336_v59  ;;  %v6991_v12 = vadd.f32 %v6990_v54, %v6901_v40 }
 0x54a   :  { %v7267_v9 = vadd.f32 %v7242_v44, %v7193_v55  ;;  %v7194_v63 = vadd.f32 %v6991_v12, %v17351_v7 }
 0x54b   :  { %v6905_v36 = vpop.f32.mrf.mxu0  ;;  %v6994_v21 = vpop.f32.mrf.mxu1 }
 0x54c   :  { %v7268_v37 = vadd.f32 %v7246_v62, %v7194_v63  ;;  %v6995_v3 = vadd.f32 %v6994_v21, %v6905_v36  ;;  %v7299_v2 = vmax.f32 %v7267_v9, 0.0 }
 0x54d   :  { %v6907_v20 = vpop.f32.mrf.mxu0  ;;  %v6996_v13 = vpop.f32.mrf.mxu1 }
 0x54e   :  { %v7300_v18 = vmax.f32 %v7268_v37, 0.0  ;;  %v7201_v27 = vadd.f32 %v6995_v3, %v17378_v1  ;;  %v6997_v30 = vadd.f32 %v6996_v13, %v6907_v20  ;;  %v20157_v3 = vsub.s32 6, %v20150_v5 }
 0x550   :  { %v18612_v59 = vcombine.low %v7299_v2, %v7300_v18  ;;  %v18614_v23 = vcombine.high %v7299_v2, %v7300_v18  ;;  %v7275_v15 = vadd.f32 %v7242_v44, %v7201_v27  ;;  %v7202_v8 = vadd.f32 %v6997_v30, %v17393_v4 }
 0x551   :  { %v6911_v24 = vpop.f32.mrf.mxu0  ;;  %v7000_v7 = vpop.f32.mrf.mxu1  ;;  %v7250_v20 = vrot.slane %v18156_v41, %v20157_v3 }
 0x552   :  { %v7276_v45 = vadd.f32 %v7246_v62, %v7202_v8  ;;  %v7001_v25 = vadd.f32 %v7000_v7, %v6911_v24  ;;  %v7307_v49 = vmax.f32 %v7275_v15, 0.0 }
 0x553   :  { %v6913_v46 = vpop.f32.mrf.mxu0  ;;  %v7002_v58 = vpop.f32.mrf.mxu1 }
 0x554   :  { %v7308_v53 = vmax.f32 %v7276_v45, 0.0  ;;  %v7003_v57 = vadd.f32 %v7002_v58, %v6913_v46  ;;  %v7209_v38 = vadd.f32 %v7001_v25, %v17420_v43 }
 0x556   :  { %v7467_v1 = vcombine.low %v7307_v49, %v7308_v53  ;;  %v18618_v6 = vcombine.high %v7307_v49, %v7308_v53  ;;  %v7210_v17 = vadd.f32 %v7003_v57, %v17435_v28  ;;  %v7283_v14 = vadd.f32 %v7242_v44, %v7209_v38 }
 0x557   :  { %v6917_v29 = vpop.f32.mrf.mxu0  ;;  %v7006_v19 = vpop.f32.mrf.mxu1 }
 0x558   :  { %v7284_v4 = vadd.f32 %v7246_v62, %v7210_v17  ;;  %v7007_v11 = vadd.f32 %v7006_v19, %v6917_v29  ;;  %v7315_v42 = vmax.f32 %v7283_v14, 0.0 }
 0x559   :  { %v6919_v34 = vpop.f32.mrf.mxu0  ;;  %v7008_v26 = vpop.f32.mrf.mxu1 }
 0x55a   :  { %v7316_v16 = vmax.f32 %v7284_v4, 0.0  ;;  %v7217_v0 = vadd.f32 %v7007_v11, %v17456_v22  ;;  %v7009_v40 = vadd.f32 %v7008_v26, %v6919_v34  ;;  %v7477_v4 = vrot.slane %v7467_v1, %v20075_v31  ;;  %v20159_v11 = vld [vmem:[#allocation29_spill] sm:$0xff] }
 0x55c   :  { %v7539_v54 = vcombine.low %v7315_v42, %v7316_v16  ;;  %v18622_v55 = vcombine.high %v7315_v42, %v7316_v16  ;;  %v7291_v43 = vadd.f32 %v7242_v44, %v7217_v0  ;;  %v7218_v12 = vadd.f32 %v7009_v40, %v17465_v61 }
 0x55d   :  { %v20158_v44 = vsub.s32 7, %v20150_v5 }
 0x55e   :  { %v7292_v52 = vadd.f32 %v7246_v62, %v7218_v12  ;;  %v7323_v28 = vmax.f32 %v7291_v43, 0.0  ;;  %v7484_v43 = vrot.slane %v18618_v6, %v20075_v31 }
 0x55f   :  { %v18634_v61 = vrot.slane %v18156_v41, %v20158_v44  ;;  %v20161_v44 = vld [vmem:[#allocation44_spill] sm:$0xff] }
 0x560   :  { %v7324_v9 = vmax.f32 %v7292_v52, 0.0 }
 0x562   :  { %v18625_v63 = vcombine.low %v7323_v28, %v7324_v9  ;;  %v20160_v28 = vld [vmem:[#allocation25_spill] sm:$0xff] }
 0x58d   :  { %v7077_v36 = vpop.f32.mrf.mxu0  ;;  %v7166_v21 = vpop.f32.mrf.mxu1 }
 0x58e   :  { %v7167_v37 = vadd.f32 %v7166_v21, %v7077_v36 }
 0x58f   :  { %v7079_v22 = vpop.f32.mrf.mxu0  ;;  %v7168_v13 = vpop.f32.mrf.mxu1 }
 0x590   :  { %v7195_v2 = vadd.f32 %v7167_v37, %v17760_v35  ;;  %v7169_v18 = vadd.f32 %v7168_v13, %v7079_v22  ;;  %v7549_v22 = vrot.slane %v7539_v54, %v20075_v31 }
 0x591   :  { %v7083_v62 = vpop.f32.mrf.mxu0  ;;  %v7172_v27 = vpop.f32.mrf.mxu1 }
 0x592   :  { %v7269_v30 = vadd.f32 %v7250_v20, %v7195_v2  ;;  %v7196_v15 = vadd.f32 %v7169_v18, %v17775_v33  ;;  %v7173_v8 = vadd.f32 %v7172_v27, %v7083_v62  ;;  %v7405_v33 = vrot.slane %v18612_v59, %v20075_v31 }
 0x593   :  { %v7085_v24 = vpop.f32.mrf.mxu0  ;;  %v7174_v7 = vpop.f32.mrf.mxu1 }
 0x594   :  { %v7270_v45 = vadd.f32 %v18634_v61, %v7196_v15  ;;  %v7203_v25 = vadd.f32 %v7173_v8, %v17802_v48  ;;  %v7175_v46 = vadd.f32 %v7174_v7, %v7085_v24  ;;  %v7301_v49 = vmax.f32 %v7269_v30, 0.0 }
 0x595   :  { %v7089_v35 = vpop.f32.mrf.mxu0  ;;  %v7178_v58 = vpop.f32.mrf.mxu1  ;;  %v7412_v48 = vrot.slane %v18614_v23, %v20075_v31 }
 0x596   :  { %v7302_v5 = vmax.f32 %v7270_v45, 0.0  ;;  %v7204_v41 = vadd.f32 %v7175_v46, %v17817_v32  ;;  %v7179_v53 = vadd.f32 %v7178_v58, %v7089_v35  ;;  %v7277_v57 = vadd.f32 %v7250_v20, %v7203_v25  ;;  %v20162_v25 = vld [vmem:[#allocation26_spill] sm:$0xff] }
 0x597   :  { %v7091_v38 = vpop.f32.mrf.mxu0  ;;  %v7180_v17 = vpop.f32.mrf.mxu1 }
 0x598   :  { %v7397_v14 = vcombine.low %v7301_v49, %v7302_v5  ;;  %v7398_v29 = vcombine.high %v7301_v49, %v7302_v5  ;;  %v7278_v19 = vadd.f32 %v18634_v61, %v7204_v41  ;;  %v7211_v34 = vadd.f32 %v7179_v53, %v20159_v11 }
 0x599   :  { %v7181_v26 = vadd.f32 %v7180_v17, %v7091_v38  ;;  %v7095_v32 = vpop.f32.mrf.mxu0  ;;  %v7184_v42 = vpop.f32.mrf.mxu1  ;;  %v7309_v12 = vmax.f32 %v7277_v57, 0.0  ;;  %v7556_v53 = vrot.slane %v18622_v55, %v20075_v31 }
 0x59a   :  { %v7419_v16 = vrot.slane %v7397_v14, %v20075_v31  ;;  %v7426_v0 = vrot.slane %v7398_v29, %v20075_v31  ;;  %v7310_v40 = vmax.f32 %v7278_v19, 0.0  ;;  %v7185_v59 = vadd.f32 %v7184_v42, %v7095_v32  ;;  %v7675_v42 = vld [vmem:[%s19997_s5 + $0x78] sm:$0xff] }
 0x59b   :  { %v7285_v52 = vadd.f32 %v7250_v20, %v7211_v34  ;;  %v7212_v23 = vadd.f32 %v7181_v26, %v20160_v28  ;;  %v7097_v9 = vpop.f32.mrf.mxu0  ;;  %v7186_v1 = vpop.f32.mrf.mxu1 }
 0x59c   :  { %v7427_v36 = vcombine.low %v7405_v33, %v7419_v16  ;;  %v7428_v21 = vcombine.high %v7405_v33, %v7419_v16  ;;  %v7429_v37 = vcombine.low %v7412_v48, %v7426_v0  ;;  %v7430_v3 = vcombine.high %v7412_v48, %v7426_v0 }
 0x59d   :  { %v7469_v13 = vcombine.low %v7309_v12, %v7310_v40  ;;  %v7470_v2 = vcombine.high %v7309_v12, %v7310_v40  ;;  %v7286_v18 = vadd.f32 %v18634_v61, %v7212_v23  ;;  %v7219_v62 = vadd.f32 %v7185_v59, %v20161_v44  ;;  %v7690_v40 = vld [vmem:[%s19997_s5 + $0xf0] sm:$0xff]  ;;  %v7673_v44 = vld [vmem:[%s19997_s5 + $0x68] sm:$0xff] }
 0x59e   :  { %v7187_v27 = vadd.f32 %v7186_v1, %v7097_v9  ;;  %v7642_v6 = vmax.f32 %v7429_v37, %v7430_v3  ;;  %v7640_v30 = vmax.f32 %v7427_v36, %v7428_v21  ;;  %v7317_v24 = vmax.f32 %v7285_v52, 0.0  ;;  %v7674_v52 = vld [vmem:[%s19997_s5 + $0x70] sm:$0xff]  ;;  %v7689_v21 = vld [vmem:[%s19997_s5 + $0xe8] sm:$0xff] }
 0x59f   :  { %v7491_v15 = vrot.slane %v7469_v13, %v20075_v31  ;;  %v7498_v8 = vrot.slane %v7470_v2, %v20075_v31  ;;  %v7318_v7 = vmax.f32 %v7286_v18, 0.0  ;;  %v7293_v45 = vadd.f32 %v7250_v20, %v7219_v62  ;;  %v7722_v37 = vld [vmem:[%s19997_s5 + $0x1f0] sm:$0xff]  ;;  %v7672_v62 = vld [vmem:[%s19997_s5 + $0x60] sm:$0xff] }
 0x5a0   :  { %v7220_v46 = vadd.f32 %v7187_v27, %v20162_v25  ;;  %v7654_v54 = vmax.f32 %v18423_v39, %v7642_v6  ;;  %v7653_v35 = vmax.f32 %v18425_v10, %v7640_v30  ;;  %v7601_v1 = vrot.slane %v18625_v63, %v20075_v31  ;;  %v7705_v27 = vld [vmem:[%s19997_s5 + $0x168] sm:$0xff]  ;;  %v7687_v6 = vld [vmem:[%s19997_s5 + $0xd8] sm:$0xff]  ;;  %v7720_v30 = vld [vmem:[%s19997_s5 + $0x1e0] sm:$0xff] }
 0x5a1   :  { %v7499_v58 = vcombine.low %v7477_v4, %v7491_v15  ;;  %v7500_v49 = vcombine.high %v7477_v4, %v7491_v15  ;;  %v7501_v5 = vcombine.low %v7484_v43, %v7498_v8  ;;  %v7502_v41 = vcombine.high %v7484_v43, %v7498_v8  ;;  %v7671_v15 = vld [vmem:[%s19997_s5 + $0x58] sm:$0xff]  ;;  %v7704_v8 = vld [vmem:[%s19997_s5 + $0x160] sm:$0xff]  ;;  %v7670_v25 = vld [vmem:[%s19997_s5 + $0x50] sm:$0xff] }
 0x5a2   :  { %v7541_v57 = vcombine.low %v7317_v24, %v7318_v7  ;;  %v7542_v38 = vcombine.high %v7317_v24, %v7318_v7  ;;  %v7294_v17 = vadd.f32 %v18634_v61, %v7220_v46  ;;  %v7797_v33 = vrot.slane %v7654_v54, %v20075_v31  ;;  %v7686_v24 = vld [vmem:[%s19997_s5 + $0xd0] sm:$0xff]  ;;  %v7719_v7 = vld [vmem:[%s19997_s5 + $0x1d8] sm:$0xff] }
 0x5a3   :  { %v7790_v20 = vcombine.high %v7654_v54, %v7654_v54  ;;  %v18665_v14 = vrot.slane %v7653_v35, %v20075_v31  ;;  %v7952_v39 = vcombine.high %v7653_v35, %v7653_v35  ;;  %v7644_v48 = vmax.f32 %v7499_v58, %v7500_v49  ;;  %v7703_v46 = vld [vmem:[%s19997_s5 + $0x158] sm:$0xff]  ;;  %v7685_v54 = vld [vmem:[%s19997_s5 + $0xc8] sm:$0xff]  ;;  %v7718_v35 = vld [vmem:[%s19997_s5 + $0x1d0] sm:$0xff] }
 0x5a4   :  { %v7563_v10 = vrot.slane %v7541_v57, %v20075_v31  ;;  %v7570_v29 = vrot.slane %v7542_v38, %v20075_v31  ;;  %v7326_v19 = vmax.f32 %v7294_v17, 0.0  ;;  %v7325_v4 = vmax.f32 %v7293_v45, 0.0  ;;  %v7669_v49 = vld [vmem:[%s19997_s5 + $0x48] sm:$0xff]  ;;  %v7683_v38 = vld [vmem:[%s19997_s5 + $0xb8] sm:$0xff]  ;;  %v7716_v17 = vld [vmem:[%s19997_s5 + $0x1c0] sm:$0xff] }
 0x5a5   :  { %v7805_v11 = vcombine.high %v7797_v33, %v7797_v33  ;;  %v7804_v55 = vrot.slane %v7790_v20, %v20075_v31  ;;  %v18677_v59 = vrot.slane %v7952_v39, %v20075_v31  ;;  %v18680_v43 = vmax.f32 %v18475_v60, %v7644_v48  ;;  %v7707_v60 = vld [vmem:[%s19997_s5 + $0x178] sm:$0xff]  ;;  %v7701_v57 = vld [vmem:[%s19997_s5 + $0x148] sm:$0xff]  ;;  %v7700_v20 = vld [vmem:[%s19997_s5 + $0x140] sm:$0xff] }
 0x5a6   :  { %v7571_v34 = vcombine.low %v7549_v22, %v7563_v10  ;;  %v7572_v26 = vcombine.high %v7549_v22, %v7563_v10  ;;  %v7573_v61 = vcombine.low %v7556_v53, %v7570_v29  ;;  %v7574_v32 = vcombine.high %v7556_v53, %v7570_v29  ;;  %v7668_v53 = vld [vmem:[%s19997_s5 + $0x40] sm:$0xff]  ;;  %v7682_v39 = vld [vmem:[%s19997_s5 + $0xb0] sm:$0xff]  ;;  %v7715_v10 = vld [vmem:[%s19997_s5 + $0x1b8] sm:$0xff] }
 0x5a7   :  { %v7594_v16 = vcombine.low %v7325_v4, %v7326_v19  ;;  %7875 = vmatprep.mubr.f32.mxu0 %v7805_v11  ;;  %v7806_v0 = vcombine.high %v7804_v55, %v7804_v55  ;;  %v7967_v12 = vcombine.high %v18665_v14, %v18665_v14  ;;  %v7646_v28 = vmax.f32 %v7501_v5, %v7502_v41  ;;  %v7702_v5 = vld [vmem:[%s19997_s5 + $0x150] sm:$0xff]  ;;  %v7684_v41 = vld [vmem:[%s19997_s5 + $0xc0] sm:$0xff]  ;;  %v7699_v19 = vld [vmem:[%s19997_s5 + $0x138] sm:$0xff] }
 0x5a8   :  { %7876 = vmatmul.mubr.f32.vlgmr.msra.gmra.mxu0 %v7797_v33  ;;  %v7648_v23 = vmax.f32 %v7571_v34, %v7572_v26  ;;  %v7650_v9 = vmax.f32 %v7573_v61, %v7574_v32  ;;  %v7968_v18 = vcombine.high %v18677_v59, %v18677_v59  ;;  %v7667_v33 = vld [vmem:[%s19997_s5 + $0x38] sm:$0xff]  ;;  %v7666_v29 = vld [vmem:[%s19997_s5 + $0x30] sm:$0xff]  ;;  %v7681_v48 = vld [vmem:[%s19997_s5 + $0xa8] sm:$0xff] }
 0x5a9   :  { %v7608_v36 = vrot.slane %v7594_v16, %v20075_v31  ;;  %11023 = vmatpush3.msra.mxu0 %v7675_v42  ;;  %7945 = vmatprep.mubr.f32.mxu1 %v7806_v0  ;;  %v18700_v63 = vmax.f32 %v18477_v56, %v7646_v28  ;;  %v7706_v56 = vld [vmem:[%s19997_s5 + $0x170] sm:$0xff]  ;;  %v7665_v11 = vld [vmem:[%s19997_s5 + $0x28] sm:$0xff]  ;;  %v7680_v34 = vld [vmem:[%s19997_s5 + $0xa0] sm:$0xff] }
 0x5aa   :  { %11024 = vmatprep.subr.mxu0 %v7690_v40  ;;  %8037 = vmatprep.mubr.f32.mxu0 %v7967_v12  ;;  %v18703_v3 = vmax.f32 %v18516_v51, %v7648_v23  ;;  %v18706_v22 = vmax.f32 %v18518_v50, %v7650_v9  ;;  %v7688_v51 = vld [vmem:[%s19997_s5 + $0xe0] sm:$0xff]  ;;  %v7721_v50 = vld [vmem:[%s19997_s5 + $0x1e8] sm:$0xff]  ;;  %v7714_v4 = vld [vmem:[%s19997_s5 + $0x1b0] sm:$0xff] }
 0x5ab   :  { %v7609_v13 = vcombine.low %v7601_v1, %v7608_v36  ;;  %v7610_v2 = vcombine.high %v7601_v1, %v7608_v36  ;;  %7946 = vmatmul.mubr.f32.vlgmr.msra.gmra.mxu1 %v7804_v55  ;;  %11025 = vmatpush3.msra.mxu0 %v7674_v52  ;;  %v7698_v55 = vld [vmem:[%s19997_s5 + $0x130] sm:$0xff]  ;;  %v7713_v26 = vld [vmem:[%s19997_s5 + $0x1a8] sm:$0xff]  ;;  %v7664_v61 = vld [vmem:[%s19997_s5 + $0x20] sm:$0xff] }
 0x5ac   :  { %11058 = vmatpush3.msra.mxu1 %v7707_v60  ;;  %11026 = vmatprep.subr.mxu0 %v7689_v21  ;;  %v7697_v32 = vld [vmem:[%s19997_s5 + $0x128] sm:$0xff]  ;;  %v7679_v42 = vld [vmem:[%s19997_s5 + $0x98] sm:$0xff]  ;;  %v7712_v16 = vld [vmem:[%s19997_s5 + $0x1a0] sm:$0xff] }
 0x5ad   :  { %11059 = vmatprep.subr.mxu1 %v7722_v37  ;;  %8107 = vmatprep.mubr.f32.mxu1 %v7968_v18  ;;  %v7652_v45 = vmax.f32 %v7609_v13, %v7610_v2  ;;  %v7663_v0 = vld [vmem:[%s19997_s5 + $0x18] sm:$0xff]  ;;  %v7696_v40 = vld [vmem:[%s19997_s5 + $0x120] sm:$0xff]  ;;  %v7678_v12 = vld [vmem:[%s19997_s5 + $0x90] sm:$0xff]  ;;  %v8179_v13 = vcombine.high %v18680_v43, %v18680_v43 }
 0x5ae   :  { %11027 = vmatpush3.msra.mxu0 %v7673_v44  ;;  %11060 = vmatpush3.msra.mxu1 %v7706_v56  ;;  %v7711_v52 = vld [vmem:[%s19997_s5 + $0x198] sm:$0xff]  ;;  %v7662_v28 = vld [vmem:[%s19997_s5 + $0x10] sm:$0xff]  ;;  %v7677_v9 = vld [vmem:[%s19997_s5 + $0x88] sm:$0xff]  ;;  %v18879_v44 = vrot.slane %v18680_v43, %v20075_v31 }
 0x5af   :  { %11028 = vmatprep.subr.mxu0 %v7688_v51  ;;  %11061 = vmatprep.subr.mxu1 %v7721_v50  ;;  %v18759_v58 = vmax.f32 %v18553_v47, %v7652_v45  ;;  %v7717_v47 = vld [vmem:[%s19997_s5 + $0x1c8] sm:$0xff]  ;;  %v7695_v23 = vld [vmem:[%s19997_s5 + $0x118] sm:$0xff]  ;;  %v7710_v1 = vld [vmem:[%s19997_s5 + $0x190] sm:$0xff] }
 0x5b0   :  { %11029 = vmatpush3.msra.mxu0 %v7672_v62  ;;  %11062 = vmatpush3.msra.mxu1 %v7705_v27  ;;  %v7661_v36 = vld [vmem:[%s19997_s5 + $0x8] sm:$0xff]  ;;  %v7694_v60 = vld [vmem:[%s19997_s5 + $0x110] sm:$0xff]  ;;  %v7676_v21 = vld [vmem:[%s19997_s5 + $0x80] sm:$0xff]  ;;  %v18894_v62 = vrot.slane %v8179_v13, %v20075_v31  ;;  %v8194_v27 = vcombine.high %v18879_v44, %v18879_v44 }
 0x5b1   :  { %11030 = vmatprep.subr.mxu0 %v7687_v6  ;;  %11063 = vmatprep.subr.mxu1 %v7720_v30  ;;  %v7709_v37 = vld [vmem:[%s19997_s5 + $0x188] sm:$0xff]  ;;  %v7660_v2 = vld [vmem:[%s19997_s5] sm:$0xff]  ;;  %v10661_v51 = vld [vmem:[%s19997_s5 + $0x4f8] sm:$0xff] }
 0x5b2   :  { %11031 = vmatpush3.msra.mxu0 %v7671_v15  ;;  %11064 = vmatpush3.msra.mxu1 %v7704_v8  ;;  %v7693_v18 = vld [vmem:[%s19997_s5 + $0x108] sm:$0xff]  ;;  %v7708_v56 = vld [vmem:[%s19997_s5 + $0x180] sm:$0xff]  ;;  %v10645_v43 = vld [vmem:[%s19997_s5 + $0x478] sm:$0xff]  ;;  %v8195_v8 = vcombine.high %v18894_v62, %v18894_v62 }
 0x5b3   :  { %11032 = vmatprep.subr.mxu0 %v7686_v24  ;;  %11065 = vmatprep.subr.mxu1 %v7719_v7  ;;  %v7692_v50 = vld [vmem:[%s19997_s5 + $0x100] sm:$0xff]  ;;  %v10660_v6 = vld [vmem:[%s19997_s5 + $0x4f0] sm:$0xff]  ;;  %v10693_v30 = vld [vmem:[%s19997_s5 + $0x5f8] sm:$0xff] }
 0x5b4   :  { %11033 = vmatpush3.msra.mxu0 %v7670_v25  ;;  %11066 = vmatpush3.msra.mxu1 %v7703_v46  ;;  %v10644_v15 = vld [vmem:[%s19997_s5 + $0x470] sm:$0xff]  ;;  %v10659_v24 = vld [vmem:[%s19997_s5 + $0x4e8] sm:$0xff]  ;;  %v10658_v25 = vld [vmem:[%s19997_s5 + $0x4e0] sm:$0xff] }
 0x5b5   :  { %11034 = vmatprep.subr.mxu0 %v7685_v54  ;;  %11067 = vmatprep.subr.mxu1 %v7718_v35  ;;  %v10692_v7 = vld [vmem:[%s19997_s5 + $0x5f0] sm:$0xff]  ;;  %v10643_v45 = vld [vmem:[%s19997_s5 + $0x468] sm:$0xff]  ;;  %v10642_v54 = vld [vmem:[%s19997_s5 + $0x460] sm:$0xff] }
 0x5b6   :  { %11035 = vmatpush3.msra.mxu0 %v7669_v49  ;;  %11068 = vmatpush3.msra.mxu1 %v7702_v5  ;;  %v10691_v46 = vld [vmem:[%s19997_s5 + $0x5e8] sm:$0xff]  ;;  %v10657_v49 = vld [vmem:[%s19997_s5 + $0x4d8] sm:$0xff]  ;;  %v10690_v5 = vld [vmem:[%s19997_s5 + $0x5e0] sm:$0xff] }
 0x5b7   :  { %11036 = vmatprep.subr.mxu0 %v7684_v41  ;;  %11069 = vmatprep.subr.mxu1 %v7717_v47  ;;  %v10675_v35 = vld [vmem:[%s19997_s5 + $0x568] sm:$0xff]  ;;  %v10641_v41 = vld [vmem:[%s19997_s5 + $0x458] sm:$0xff]  ;;  %v10674_v47 = vld [vmem:[%s19997_s5 + $0x560] sm:$0xff] }
 0x5b8   :  { %11037 = vmatpush3.msra.mxu0 %v7668_v53  ;;  %11070 = vmatpush3.msra.mxu1 %v7701_v57  ;;  %v10656_v53 = vld [vmem:[%s19997_s5 + $0x4d0] sm:$0xff]  ;;  %v10689_v57 = vld [vmem:[%s19997_s5 + $0x5d8] sm:$0xff] }
 0x5b9   :  { %11038 = vmatprep.subr.mxu0 %v7683_v38  ;;  %11071 = vmatprep.subr.mxu1 %v7716_v17  ;;  %v10640_v38 = vld [vmem:[%s19997_s5 + $0x450] sm:$0xff]  ;;  %v10673_v17 = vld [vmem:[%s19997_s5 + $0x558] sm:$0xff] }
 0x5ba   :  { %11039 = vmatpush3.msra.mxu0 %v7667_v33  ;;  %11072 = vmatpush3.msra.mxu1 %v7700_v20  ;;  %v10655_v33 = vld [vmem:[%s19997_s5 + $0x4c8] sm:$0xff]  ;;  %v10688_v20 = vld [vmem:[%s19997_s5 + $0x5d0] sm:$0xff] }
 0x5bb   :  { %11040 = vmatprep.subr.mxu0 %v7682_v39  ;;  %11073 = vmatprep.subr.mxu1 %v7715_v10  ;;  %v10639_v39 = vld [vmem:[%s19997_s5 + $0x448] sm:$0xff]  ;;  %v10672_v10 = vld [vmem:[%s19997_s5 + $0x550] sm:$0xff] }
 0x5bc   :  { %11041 = vmatpush3.msra.mxu0 %v7666_v29  ;;  %11074 = vmatpush3.msra.mxu1 %v7699_v19  ;;  %v10654_v29 = vld [vmem:[%s19997_s5 + $0x4c0] sm:$0xff]  ;;  %v10687_v19 = vld [vmem:[%s19997_s5 + $0x5c8] sm:$0xff]  ;;  %v10648_v13 = vld [vmem:[%s19997_s5 + $0x490] sm:$0xff] }
 0x5bd   :  { %11042 = vmatprep.subr.mxu0 %v7681_v48  ;;  %11075 = vmatprep.subr.mxu1 %v7714_v4  ;;  %v10638_v48 = vld [vmem:[%s19997_s5 + $0x440] sm:$0xff]  ;;  %v10671_v4 = vld [vmem:[%s19997_s5 + $0x548] sm:$0xff] }
 0x5be   :  { %11043 = vmatpush3.msra.mxu0 %v7665_v11  ;;  %11076 = vmatpush3.msra.mxu1 %v7698_v55  ;;  %v10653_v11 = vld [vmem:[%s19997_s5 + $0x4b8] sm:$0xff]  ;;  %v10686_v55 = vld [vmem:[%s19997_s5 + $0x5c0] sm:$0xff] }
 0x5bf   :  { %11044 = vmatprep.subr.mxu0 %v7680_v34  ;;  %11077 = vmatprep.subr.mxu1 %v7713_v26  ;;  %v10637_v34 = vld [vmem:[%s19997_s5 + $0x438] sm:$0xff]  ;;  %v10670_v26 = vld [vmem:[%s19997_s5 + $0x540] sm:$0xff] }
 0x5c0   :  { %11045 = vmatpush3.msra.mxu0 %v7664_v61  ;;  %11078 = vmatpush3.msra.mxu1 %v7697_v32  ;;  %v10652_v61 = vld [vmem:[%s19997_s5 + $0x4b0] sm:$0xff]  ;;  %v10685_v32 = vld [vmem:[%s19997_s5 + $0x5b8] sm:$0xff] }
 0x5c1   :  { %11046 = vmatprep.subr.mxu0 %v7679_v42  ;;  %11079 = vmatprep.subr.mxu1 %v7712_v16  ;;  %v10636_v42 = vld [vmem:[%s19997_s5 + $0x430] sm:$0xff]  ;;  %v10669_v16 = vld [vmem:[%s19997_s5 + $0x538] sm:$0xff] }
 0x5c2   :  { %11047 = vmatpush3.msra.mxu0 %v7663_v0  ;;  %11080 = vmatpush3.msra.mxu1 %v7696_v40  ;;  %v10651_v0 = vld [vmem:[%s19997_s5 + $0x4a8] sm:$0xff]  ;;  %v10684_v40 = vld [vmem:[%s19997_s5 + $0x5b0] sm:$0xff] }
 0x5c3   :  { %11048 = vmatprep.subr.mxu0 %v7678_v12  ;;  %11081 = vmatprep.subr.mxu1 %v7711_v52  ;;  %v10635_v12 = vld [vmem:[%s19997_s5 + $0x428] sm:$0xff]  ;;  %v10668_v52 = vld [vmem:[%s19997_s5 + $0x530] sm:$0xff] }
 0x5c4   :  { %11049 = vmatpush3.msra.mxu0 %v7662_v28  ;;  %11082 = vmatpush3.msra.mxu1 %v7695_v23  ;;  %v10650_v28 = vld [vmem:[%s19997_s5 + $0x4a0] sm:$0xff]  ;;  %v10683_v23 = vld [vmem:[%s19997_s5 + $0x5a8] sm:$0xff] }
 0x5c5   :  { %11050 = vmatprep.subr.mxu0 %v7677_v9  ;;  %11083 = vmatprep.subr.mxu1 %v7710_v1  ;;  %v10634_v9 = vld [vmem:[%s19997_s5 + $0x420] sm:$0xff]  ;;  %v10667_v1 = vld [vmem:[%s19997_s5 + $0x528] sm:$0xff] }
 0x5c6   :  { %11051 = vmatpush3.msra.mxu0 %v7661_v36  ;;  %11084 = vmatpush3.msra.mxu1 %v7694_v60  ;;  %v10649_v36 = vld [vmem:[%s19997_s5 + $0x498] sm:$0xff]  ;;  %v10682_v60 = vld [vmem:[%s19997_s5 + $0x5a0] sm:$0xff] }
 0x5c7   :  { %11052 = vmatprep.subr.mxu0 %v7676_v21  ;;  %11085 = vmatprep.subr.mxu1 %v7709_v37  ;;  %v10633_v21 = vld [vmem:[%s19997_s5 + $0x418] sm:$0xff]  ;;  %v10666_v37 = vld [vmem:[%s19997_s5 + $0x520] sm:$0xff] }
 0x5c8   :  { %11053 = vmatpush3.msra.mxu0 %v7660_v2  ;;  %11086 = vmatpush3.msra.mxu1 %v7693_v18  ;;  %v10681_v2 = vld [vmem:[%s19997_s5 + $0x598] sm:$0xff]  ;;  %v10632_v18 = vld [vmem:[%s19997_s5 + $0x410] sm:$0xff] }
 0x5c9   :  { %8038 = vmatmul.mubr.f32.vlgmr.msra.gmra.mxu0 %v18665_v14  ;;  %11087 = vmatprep.subr.mxu1 %v7708_v56  ;;  %v10677_v14 = vld [vmem:[%s19997_s5 + $0x578] sm:$0xff] }
 0x5ca   :  { %11092 = vmatprep.subr.mxu0 %v10661_v51  ;;  %11088 = vmatpush3.msra.mxu1 %v7692_v50  ;;  %v10665_v56 = vld [vmem:[%s19997_s5 + $0x518] sm:$0xff]  ;;  %v10647_v51 = vld [vmem:[%s19997_s5 + $0x488] sm:$0xff]  ;;  %v10680_v50 = vld [vmem:[%s19997_s5 + $0x590] sm:$0xff] }
 0x5cb   :  { %11093 = vmatpush3.msra.mxu0 %v10645_v43  ;;  %8264 = vmatprep.mubr.f32.mxu0 %v8194_v27  ;;  %v10631_v43 = vld [vmem:[%s19997_s5 + $0x408] sm:$0xff]  ;;  %v10664_v27 = vld [vmem:[%s19997_s5 + $0x510] sm:$0xff] }
 0x5cc   :  { %8108 = vmatmul.mubr.f32.vlgmr.msra.gmra.mxu1 %v18677_v59  ;;  %11094 = vmatprep.subr.mxu0 %v10660_v6  ;;  %v10676_v59 = vld [vmem:[%s19997_s5 + $0x570] sm:$0xff]  ;;  %v10646_v6 = vld [vmem:[%s19997_s5 + $0x480] sm:$0xff] }
 0x5cd   :  { %11127 = vmatprep.subr.mxu1 %v10693_v30  ;;  %11095 = vmatpush3.msra.mxu0 %v10644_v15  ;;  %v10679_v30 = vld [vmem:[%s19997_s5 + $0x588] sm:$0xff]  ;;  %v8407_v15 = vcombine.high %v18700_v63, %v18700_v63 }
 0x5ce   :  { %11128 = vmatpush3.msra.mxu1 %v10677_v14  ;;  %8334 = vmatprep.mubr.f32.mxu1 %v8195_v8  ;;  %v10630_v14 = vld [vmem:[%s19997_s5 + $0x400] sm:$0xff]  ;;  %v10663_v8 = vld [vmem:[%s19997_s5 + $0x508] sm:$0xff] }
 0x5cf   :  { %11096 = vmatprep.subr.mxu0 %v10659_v24  ;;  %11129 = vmatprep.subr.mxu1 %v10692_v7  ;;  %v19086_v24 = vrot.slane %v18700_v63, %v20075_v31  ;;  %v10678_v7 = vld [vmem:[%s19997_s5 + $0x580] sm:$0xff]  ;;  %v10709_v63 = vld [vmem:[%s19997_s5 + $0x678] sm:$0xff] }
 0x5d0   :  { %11097 = vmatpush3.msra.mxu0 %v10643_v45  ;;  %11130 = vmatpush3.msra.mxu1 %v10676_v59  ;;  %v10725_v45 = vld [vmem:[%s19997_s5 + $0x6f8] sm:$0xff]  ;;  %v10662_v59 = vld [vmem:[%s19997_s5 + $0x500] sm:$0xff] }
 0x5d1   :  { %11098 = vmatprep.subr.mxu0 %v10658_v25  ;;  %11131 = vmatprep.subr.mxu1 %v10691_v46  ;;  %v19101_v25 = vrot.slane %v8407_v15, %v20075_v31  ;;  %v8422_v46 = vcombine.high %v19086_v24, %v19086_v24  ;;  %v10745_v15 = vld [vmem:[%s19997_s5 + $0x798] sm:$0xff] }
 0x5d2   :  { %11099 = vmatpush3.msra.mxu0 %v10642_v54  ;;  %11132 = vmatpush3.msra.mxu1 %v10675_v35  ;;  %v10724_v54 = vld [vmem:[%s19997_s5 + $0x6f0] sm:$0xff]  ;;  %v10757_v35 = vld [vmem:[%s19997_s5 + $0x7f8] sm:$0xff] }
 0x5d3   :  { %11100 = vmatprep.subr.mxu0 %v10657_v49  ;;  %11133 = vmatprep.subr.mxu1 %v10690_v5  ;;  %v10708_v49 = vld [vmem:[%s19997_s5 + $0x670] sm:$0xff]  ;;  %v8423_v5 = vcombine.high %v19101_v25, %v19101_v25 }
 0x5d4   :  { %11101 = vmatpush3.msra.mxu0 %v10641_v41  ;;  %11134 = vmatpush3.msra.mxu1 %v10674_v47  ;;  %v10723_v41 = vld [vmem:[%s19997_s5 + $0x6e8] sm:$0xff]  ;;  %v10756_v47 = vld [vmem:[%s19997_s5 + $0x7f0] sm:$0xff] }
 0x5d5   :  { %11102 = vmatprep.subr.mxu0 %v10656_v53  ;;  %11135 = vmatprep.subr.mxu1 %v10689_v57  ;;  %v10707_v53 = vld [vmem:[%s19997_s5 + $0x668] sm:$0xff]  ;;  %v10722_v57 = vld [vmem:[%s19997_s5 + $0x6e0] sm:$0xff] }
 0x5d6   :  { %11103 = vmatpush3.msra.mxu0 %v10640_v38  ;;  %11136 = vmatpush3.msra.mxu1 %v10673_v17  ;;  %v10755_v38 = vld [vmem:[%s19997_s5 + $0x7e8] sm:$0xff]  ;;  %v10706_v17 = vld [vmem:[%s19997_s5 + $0x660] sm:$0xff] }
 0x5d7   :  { %11104 = vmatprep.subr.mxu0 %v10655_v33  ;;  %11137 = vmatprep.subr.mxu1 %v10688_v20  ;;  %v10739_v33 = vld [vmem:[%s19997_s5 + $0x768] sm:$0xff]  ;;  %v10721_v20 = vld [vmem:[%s19997_s5 + $0x6d8] sm:$0xff] }
 0x5d8   :  { %11105 = vmatpush3.msra.mxu0 %v10639_v39  ;;  %11138 = vmatpush3.msra.mxu1 %v10672_v10  ;;  %v10754_v39 = vld [vmem:[%s19997_s5 + $0x7e0] sm:$0xff]  ;;  %v10705_v10 = vld [vmem:[%s19997_s5 + $0x658] sm:$0xff] }
 0x5d9   :  { %11106 = vmatprep.subr.mxu0 %v10654_v29  ;;  %11139 = vmatprep.subr.mxu1 %v10687_v19  ;;  %v10738_v29 = vld [vmem:[%s19997_s5 + $0x760] sm:$0xff]  ;;  %v10720_v19 = vld [vmem:[%s19997_s5 + $0x6d0] sm:$0xff] }
 0x5da   :  { %11107 = vmatpush3.msra.mxu0 %v10638_v48  ;;  %11140 = vmatpush3.msra.mxu1 %v10671_v4  ;;  %v10753_v48 = vld [vmem:[%s19997_s5 + $0x7d8] sm:$0xff]  ;;  %v10704_v4 = vld [vmem:[%s19997_s5 + $0x650] sm:$0xff] }
 0x5db   :  { %11108 = vmatprep.subr.mxu0 %v10653_v11  ;;  %11141 = vmatprep.subr.mxu1 %v10686_v55  ;;  %v10737_v11 = vld [vmem:[%s19997_s5 + $0x758] sm:$0xff]  ;;  %v10719_v55 = vld [vmem:[%s19997_s5 + $0x6c8] sm:$0xff] }
 0x5dc   :  { %11109 = vmatpush3.msra.mxu0 %v10637_v34  ;;  %11142 = vmatpush3.msra.mxu1 %v10670_v26  ;;  %v10752_v34 = vld [vmem:[%s19997_s5 + $0x7d0] sm:$0xff]  ;;  %v10703_v26 = vld [vmem:[%s19997_s5 + $0x648] sm:$0xff] }
 0x5dd   :  { %11110 = vmatprep.subr.mxu0 %v10652_v61  ;;  %11143 = vmatprep.subr.mxu1 %v10685_v32  ;;  %v10736_v61 = vld [vmem:[%s19997_s5 + $0x750] sm:$0xff]  ;;  %v10718_v32 = vld [vmem:[%s19997_s5 + $0x6c0] sm:$0xff] }
 0x5de   :  { %11111 = vmatpush3.msra.mxu0 %v10636_v42  ;;  %11144 = vmatpush3.msra.mxu1 %v10669_v16  ;;  %v10751_v42 = vld [vmem:[%s19997_s5 + $0x7c8] sm:$0xff]  ;;  %v10702_v16 = vld [vmem:[%s19997_s5 + $0x640] sm:$0xff] }
 0x5df   :  { %11112 = vmatprep.subr.mxu0 %v10651_v0  ;;  %11145 = vmatprep.subr.mxu1 %v10684_v40  ;;  %v10735_v0 = vld [vmem:[%s19997_s5 + $0x748] sm:$0xff]  ;;  %v10717_v40 = vld [vmem:[%s19997_s5 + $0x6b8] sm:$0xff] }
 0x5e0   :  { %11113 = vmatpush3.msra.mxu0 %v10635_v12  ;;  %11146 = vmatpush3.msra.mxu1 %v10668_v52  ;;  %v10750_v12 = vld [vmem:[%s19997_s5 + $0x7c0] sm:$0xff]  ;;  %v10701_v52 = vld [vmem:[%s19997_s5 + $0x638] sm:$0xff] }
 0x5e1   :  { %11114 = vmatprep.subr.mxu0 %v10650_v28  ;;  %11147 = vmatprep.subr.mxu1 %v10683_v23  ;;  %v10734_v28 = vld [vmem:[%s19997_s5 + $0x740] sm:$0xff]  ;;  %v10716_v23 = vld [vmem:[%s19997_s5 + $0x6b0] sm:$0xff] }
 0x5e2   :  { %11115 = vmatpush3.msra.mxu0 %v10634_v9  ;;  %11148 = vmatpush3.msra.mxu1 %v10667_v1  ;;  %v10749_v9 = vld [vmem:[%s19997_s5 + $0x7b8] sm:$0xff]  ;;  %v10700_v1 = vld [vmem:[%s19997_s5 + $0x630] sm:$0xff] }
 0x5e3   :  { %11116 = vmatprep.subr.mxu0 %v10649_v36  ;;  %11149 = vmatprep.subr.mxu1 %v10682_v60  ;;  %v10733_v36 = vld [vmem:[%s19997_s5 + $0x738] sm:$0xff]  ;;  %v10715_v60 = vld [vmem:[%s19997_s5 + $0x6a8] sm:$0xff] }
 0x5e4   :  { %11117 = vmatpush3.msra.mxu0 %v10633_v21  ;;  %11150 = vmatpush3.msra.mxu1 %v10666_v37  ;;  %v10748_v21 = vld [vmem:[%s19997_s5 + $0x7b0] sm:$0xff]  ;;  %v10699_v37 = vld [vmem:[%s19997_s5 + $0x628] sm:$0xff] }
 0x5e5   :  { %11118 = vmatprep.subr.mxu0 %v10648_v13  ;;  %11151 = vmatprep.subr.mxu1 %v10681_v2  ;;  %v10732_v13 = vld [vmem:[%s19997_s5 + $0x730] sm:$0xff]  ;;  %v10714_v2 = vld [vmem:[%s19997_s5 + $0x6a0] sm:$0xff] }
 0x5e6   :  { %11119 = vmatpush3.msra.mxu0 %v10632_v18  ;;  %11152 = vmatpush3.msra.mxu1 %v10665_v56  ;;  %v10747_v18 = vld [vmem:[%s19997_s5 + $0x7a8] sm:$0xff]  ;;  %v10698_v56 = vld [vmem:[%s19997_s5 + $0x620] sm:$0xff] }
 0x5e7   :  { %11120 = vmatprep.subr.mxu0 %v10647_v51  ;;  %11153 = vmatprep.subr.mxu1 %v10680_v50  ;;  %v10731_v51 = vld [vmem:[%s19997_s5 + $0x728] sm:$0xff]  ;;  %v10713_v50 = vld [vmem:[%s19997_s5 + $0x698] sm:$0xff] }
 0x5e8   :  { %11121 = vmatpush3.msra.mxu0 %v10631_v43  ;;  %11154 = vmatpush3.msra.mxu1 %v10664_v27  ;;  %v10746_v43 = vld [vmem:[%s19997_s5 + $0x7a0] sm:$0xff]  ;;  %v10697_v27 = vld [vmem:[%s19997_s5 + $0x618] sm:$0xff] }
 0x5e9   :  { %11122 = vmatprep.subr.mxu0 %v10646_v6  ;;  %11155 = vmatprep.subr.mxu1 %v10679_v30  ;;  %v10730_v6 = vld [vmem:[%s19997_s5 + $0x720] sm:$0xff]  ;;  %v10712_v30 = vld [vmem:[%s19997_s5 + $0x690] sm:$0xff] }
 0x5ea   :  { %11123 = vmatpush3.msra.mxu0 %v10630_v14  ;;  %11156 = vmatpush3.msra.mxu1 %v10663_v8  ;;  %v10696_v14 = vld [vmem:[%s19997_s5 + $0x610] sm:$0xff]  ;;  %v10729_v8 = vld [vmem:[%s19997_s5 + $0x718] sm:$0xff] }
 0x5eb   :  { %8265 = vmatmul.mubr.f32.vlgmr.msra.gmra.mxu0 %v18879_v44  ;;  %11157 = vmatprep.subr.mxu1 %v10678_v7  ;;  %v10741_v44 = vld [vmem:[%s19997_s5 + $0x778] sm:$0xff]  ;;  %v10711_v7 = vld [vmem:[%s19997_s5 + $0x688] sm:$0xff] }
 0x5ec   :  { %11162 = vmatprep.subr.mxu0 %v10725_v45  ;;  %11158 = vmatpush3.msra.mxu1 %v10662_v59  ;;  %v10744_v45 = vld [vmem:[%s19997_s5 + $0x790] sm:$0xff]  ;;  %v10695_v59 = vld [vmem:[%s19997_s5 + $0x608] sm:$0xff] }
 0x5ed   :  { %11163 = vmatpush3.msra.mxu0 %v10709_v63  ;;  %8492 = vmatprep.mubr.f32.mxu0 %v8422_v46  ;;  %v10728_v63 = vld [vmem:[%s19997_s5 + $0x710] sm:$0xff]  ;;  %v10710_v46 = vld [vmem:[%s19997_s5 + $0x680] sm:$0xff] }
 0x5ee   :  { %8335 = vmatmul.mubr.f32.vlgmr.msra.gmra.mxu1 %v18894_v62  ;;  %11164 = vmatprep.subr.mxu0 %v10724_v54  ;;  %v10740_v62 = vld [vmem:[%s19997_s5 + $0x770] sm:$0xff]  ;;  %v10743_v54 = vld [vmem:[%s19997_s5 + $0x788] sm:$0xff] }
 0x5ef   :  { %11197 = vmatprep.subr.mxu1 %v10757_v35  ;;  %11165 = vmatpush3.msra.mxu0 %v10708_v49  ;;  %v8635_v35 = vcombine.high %v18703_v3, %v18703_v3  ;;  %v10694_v49 = vld [vmem:[%s19997_s5 + $0x600] sm:$0xff] }
 0x5f0   :  { %11198 = vmatpush3.msra.mxu1 %v10741_v44  ;;  %8562 = vmatprep.mubr.f32.mxu1 %v8423_v5  ;;  %v10727_v44 = vld [vmem:[%s19997_s5 + $0x708] sm:$0xff]  ;;  %v19293_v5 = vrot.slane %v18703_v3, %v20075_v31  ;;  %v10773_v3 = vld [vmem:[%s19997_s5 + $0x878] sm:$0xff] }
 0x5f1   :  { %11166 = vmatprep.subr.mxu0 %v10723_v41  ;;  %11199 = vmatprep.subr.mxu1 %v10756_v47  ;;  %v10742_v41 = vld [vmem:[%s19997_s5 + $0x780] sm:$0xff]  ;;  %v10789_v47 = vld [vmem:[%s19997_s5 + $0x8f8] sm:$0xff] }
 0x5f2   :  { %11167 = vmatpush3.msra.mxu0 %v10707_v53  ;;  %11200 = vmatpush3.msra.mxu1 %v10740_v62  ;;  %v10726_v53 = vld [vmem:[%s19997_s5 + $0x700] sm:$0xff]  ;;  %v19308_v62 = vrot.slane %v8635_v35, %v20075_v31  ;;  %v10760_v35 = vld [vmem:[%s19997_s5 + $0x810] sm:$0xff] }
 0x5f3   :  { %11168 = vmatprep.subr.mxu0 %v10722_v57  ;;  %11201 = vmatprep.subr.mxu1 %v10755_v38  ;;  %v8650_v57 = vcombine.high %v19293_v5, %v19293_v5  ;;  %v10788_v38 = vld [vmem:[%s19997_s5 + $0x8f0] sm:$0xff] }
 0x5f4   :  { %11169 = vmatpush3.msra.mxu0 %v10706_v17  ;;  %11202 = vmatpush3.msra.mxu1 %v10739_v33  ;;  %v10821_v17 = vld [vmem:[%s19997_s5 + $0x9f8] sm:$0xff]  ;;  %v10772_v33 = vld [vmem:[%s19997_s5 + $0x870] sm:$0xff] }
 0x5f5   :  { %11170 = vmatprep.subr.mxu0 %v10721_v20  ;;  %11203 = vmatprep.subr.mxu1 %v10754_v39  ;;  %v8651_v20 = vcombine.high %v19308_v62, %v19308_v62  ;;  %v10787_v39 = vld [vmem:[%s19997_s5 + $0x8e8] sm:$0xff] }
 0x5f6   :  { %11171 = vmatpush3.msra.mxu0 %v10705_v10  ;;  %11204 = vmatpush3.msra.mxu1 %v10738_v29  ;;  %v10820_v10 = vld [vmem:[%s19997_s5 + $0x9f0] sm:$0xff]  ;;  %v10771_v29 = vld [vmem:[%s19997_s5 + $0x868] sm:$0xff] }
 0x5f7   :  { %11172 = vmatprep.subr.mxu0 %v10720_v19  ;;  %11205 = vmatprep.subr.mxu1 %v10753_v48  ;;  %v10786_v19 = vld [vmem:[%s19997_s5 + $0x8e0] sm:$0xff]  ;;  %v10819_v48 = vld [vmem:[%s19997_s5 + $0x9e8] sm:$0xff] }
 0x5f8   :  { %11173 = vmatpush3.msra.mxu0 %v10704_v4  ;;  %11206 = vmatpush3.msra.mxu1 %v10737_v11  ;;  %v10770_v4 = vld [vmem:[%s19997_s5 + $0x860] sm:$0xff]  ;;  %v10803_v11 = vld [vmem:[%s19997_s5 + $0x968] sm:$0xff] }
 0x5f9   :  { %11174 = vmatprep.subr.mxu0 %v10719_v55  ;;  %11207 = vmatprep.subr.mxu1 %v10752_v34  ;;  %v10785_v55 = vld [vmem:[%s19997_s5 + $0x8d8] sm:$0xff]  ;;  %v10818_v34 = vld [vmem:[%s19997_s5 + $0x9e0] sm:$0xff] }
 0x5fa   :  { %11175 = vmatpush3.msra.mxu0 %v10703_v26  ;;  %11208 = vmatpush3.msra.mxu1 %v10736_v61  ;;  %v10769_v26 = vld [vmem:[%s19997_s5 + $0x858] sm:$0xff]  ;;  %v10802_v61 = vld [vmem:[%s19997_s5 + $0x960] sm:$0xff] }
 0x5fb   :  { %11176 = vmatprep.subr.mxu0 %v10718_v32  ;;  %11209 = vmatprep.subr.mxu1 %v10751_v42  ;;  %v10784_v32 = vld [vmem:[%s19997_s5 + $0x8d0] sm:$0xff]  ;;  %v10817_v42 = vld [vmem:[%s19997_s5 + $0x9d8] sm:$0xff] }
 0x5fc   :  { %11177 = vmatpush3.msra.mxu0 %v10702_v16  ;;  %11210 = vmatpush3.msra.mxu1 %v10735_v0  ;;  %v10768_v16 = vld [vmem:[%s19997_s5 + $0x850] sm:$0xff]  ;;  %v10801_v0 = vld [vmem:[%s19997_s5 + $0x958] sm:$0xff] }
 0x5fd   :  { %11178 = vmatprep.subr.mxu0 %v10717_v40  ;;  %11211 = vmatprep.subr.mxu1 %v10750_v12  ;;  %v10783_v40 = vld [vmem:[%s19997_s5 + $0x8c8] sm:$0xff]  ;;  %v10816_v12 = vld [vmem:[%s19997_s5 + $0x9d0] sm:$0xff] }
 0x5fe   :  { %11179 = vmatpush3.msra.mxu0 %v10701_v52  ;;  %11212 = vmatpush3.msra.mxu1 %v10734_v28  ;;  %v10767_v52 = vld [vmem:[%s19997_s5 + $0x848] sm:$0xff]  ;;  %v10800_v28 = vld [vmem:[%s19997_s5 + $0x950] sm:$0xff] }
 0x5ff   :  { %11180 = vmatprep.subr.mxu0 %v10716_v23  ;;  %11213 = vmatprep.subr.mxu1 %v10749_v9  ;;  %v10782_v23 = vld [vmem:[%s19997_s5 + $0x8c0] sm:$0xff]  ;;  %v10815_v9 = vld [vmem:[%s19997_s5 + $0x9c8] sm:$0xff] }
 0x600   :  { %11181 = vmatpush3.msra.mxu0 %v10700_v1  ;;  %11214 = vmatpush3.msra.mxu1 %v10733_v36  ;;  %v10766_v1 = vld [vmem:[%s19997_s5 + $0x840] sm:$0xff]  ;;  %v10799_v36 = vld [vmem:[%s19997_s5 + $0x948] sm:$0xff] }
 0x601   :  { %11182 = vmatprep.subr.mxu0 %v10715_v60  ;;  %11215 = vmatprep.subr.mxu1 %v10748_v21  ;;  %v10781_v60 = vld [vmem:[%s19997_s5 + $0x8b8] sm:$0xff]  ;;  %v10814_v21 = vld [vmem:[%s19997_s5 + $0x9c0] sm:$0xff] }
 0x602   :  { %11183 = vmatpush3.msra.mxu0 %v10699_v37  ;;  %11216 = vmatpush3.msra.mxu1 %v10732_v13  ;;  %v10765_v37 = vld [vmem:[%s19997_s5 + $0x838] sm:$0xff]  ;;  %v10798_v13 = vld [vmem:[%s19997_s5 + $0x940] sm:$0xff] }
 0x603   :  { %11184 = vmatprep.subr.mxu0 %v10714_v2  ;;  %11217 = vmatprep.subr.mxu1 %v10747_v18  ;;  %v10780_v2 = vld [vmem:[%s19997_s5 + $0x8b0] sm:$0xff]  ;;  %v10813_v18 = vld [vmem:[%s19997_s5 + $0x9b8] sm:$0xff] }
 0x604   :  { %11185 = vmatpush3.msra.mxu0 %v10698_v56  ;;  %11218 = vmatpush3.msra.mxu1 %v10731_v51  ;;  %v10764_v56 = vld [vmem:[%s19997_s5 + $0x830] sm:$0xff]  ;;  %v10797_v51 = vld [vmem:[%s19997_s5 + $0x938] sm:$0xff] }
 0x605   :  { %11186 = vmatprep.subr.mxu0 %v10713_v50  ;;  %11219 = vmatprep.subr.mxu1 %v10746_v43  ;;  %v10779_v50 = vld [vmem:[%s19997_s5 + $0x8a8] sm:$0xff]  ;;  %v10812_v43 = vld [vmem:[%s19997_s5 + $0x9b0] sm:$0xff] }
 0x606   :  { %11187 = vmatpush3.msra.mxu0 %v10697_v27  ;;  %11220 = vmatpush3.msra.mxu1 %v10730_v6  ;;  %v10763_v27 = vld [vmem:[%s19997_s5 + $0x828] sm:$0xff]  ;;  %v10796_v6 = vld [vmem:[%s19997_s5 + $0x930] sm:$0xff] }
 0x607   :  { %11188 = vmatprep.subr.mxu0 %v10712_v30  ;;  %11221 = vmatprep.subr.mxu1 %v10745_v15  ;;  %v10778_v30 = vld [vmem:[%s19997_s5 + $0x8a0] sm:$0xff]  ;;  %v10811_v15 = vld [vmem:[%s19997_s5 + $0x9a8] sm:$0xff] }
 0x608   :  { %11189 = vmatpush3.msra.mxu0 %v10696_v14  ;;  %11222 = vmatpush3.msra.mxu1 %v10729_v8  ;;  %v10762_v14 = vld [vmem:[%s19997_s5 + $0x820] sm:$0xff]  ;;  %v10795_v8 = vld [vmem:[%s19997_s5 + $0x928] sm:$0xff] }
 0x609   :  { %11190 = vmatprep.subr.mxu0 %v10711_v7  ;;  %11223 = vmatprep.subr.mxu1 %v10744_v45  ;;  %v10777_v7 = vld [vmem:[%s19997_s5 + $0x898] sm:$0xff]  ;;  %v10810_v45 = vld [vmem:[%s19997_s5 + $0x9a0] sm:$0xff] }
 0x60a   :  { %11191 = vmatpush3.msra.mxu0 %v10695_v59  ;;  %11224 = vmatpush3.msra.mxu1 %v10728_v63  ;;  %v10761_v59 = vld [vmem:[%s19997_s5 + $0x818] sm:$0xff]  ;;  %v10794_v63 = vld [vmem:[%s19997_s5 + $0x920] sm:$0xff] }
 0x60b   :  { %11192 = vmatprep.subr.mxu0 %v10710_v46  ;;  %11225 = vmatprep.subr.mxu1 %v10743_v54  ;;  %v10776_v46 = vld [vmem:[%s19997_s5 + $0x890] sm:$0xff]  ;;  %v10809_v54 = vld [vmem:[%s19997_s5 + $0x998] sm:$0xff] }
 0x60c   :  { %11193 = vmatpush3.msra.mxu0 %v10694_v49  ;;  %11226 = vmatpush3.msra.mxu1 %v10727_v44  ;;  %v10793_v49 = vld [vmem:[%s19997_s5 + $0x918] sm:$0xff]  ;;  %v10775_v44 = vld [vmem:[%s19997_s5 + $0x888] sm:$0xff] }
 0x60d   :  { %8493 = vmatmul.mubr.f32.vlgmr.msra.gmra.mxu0 %v19086_v24  ;;  %11227 = vmatprep.subr.mxu1 %v10742_v41  ;;  %v10805_v24 = vld [vmem:[%s19997_s5 + $0x978] sm:$0xff]  ;;  %v10808_v41 = vld [vmem:[%s19997_s5 + $0x990] sm:$0xff] }
 0x60e   :  { %11232 = vmatprep.subr.mxu0 %v10789_v47  ;;  %11228 = vmatpush3.msra.mxu1 %v10726_v53  ;;  %v10759_v47 = vld [vmem:[%s19997_s5 + $0x808] sm:$0xff]  ;;  %v10792_v53 = vld [vmem:[%s19997_s5 + $0x910] sm:$0xff] }
 0x60f   :  { %11233 = vmatpush3.msra.mxu0 %v10773_v3  ;;  %8720 = vmatprep.mubr.f32.mxu0 %v8650_v57  ;;  %v10774_v3 = vld [vmem:[%s19997_s5 + $0x880] sm:$0xff]  ;;  %v10807_v57 = vld [vmem:[%s19997_s5 + $0x988] sm:$0xff] }
 0x610   :  { %8563 = vmatmul.mubr.f32.vlgmr.msra.gmra.mxu1 %v19101_v25  ;;  %11234 = vmatprep.subr.mxu0 %v10788_v38  ;;  %v10804_v25 = vld [vmem:[%s19997_s5 + $0x970] sm:$0xff]  ;;  %v8863_v38 = vcombine.high %v18706_v22, %v18706_v22 }
 0x611   :  { %11267 = vmatprep.subr.mxu1 %v10821_v17  ;;  %11235 = vmatpush3.msra.mxu0 %v10772_v33  ;;  %v10758_v17 = vld [vmem:[%s19997_s5 + $0x800] sm:$0xff]  ;;  %v10791_v33 = vld [vmem:[%s19997_s5 + $0x908] sm:$0xff] }
 0x612   :  { %11268 = vmatpush3.msra.mxu1 %v10805_v24  ;;  %8790 = vmatprep.mubr.f32.mxu1 %v8651_v20  ;;  %v19500_v24 = vrot.slane %v18706_v22, %v20075_v31  ;;  %v10806_v20 = vld [vmem:[%s19997_s5 + $0x980] sm:$0xff]  ;;  %v10837_v22 = vld [vmem:[%s19997_s5 + $0xa78] sm:$0xff] }
 0x613   :  { %11236 = vmatprep.subr.mxu0 %v10787_v39  ;;  %11269 = vmatprep.subr.mxu1 %v10820_v10  ;;  %v10853_v39 = vld [vmem:[%s19997_s5 + $0xaf8] sm:$0xff]  ;;  %v10790_v10 = vld [vmem:[%s19997_s5 + $0x900] sm:$0xff] }
 0x614   :  { %11237 = vmatpush3.msra.mxu0 %v10771_v29  ;;  %11270 = vmatpush3.msra.mxu1 %v10804_v25  ;;  %v19515_v29 = vrot.slane %v8863_v38, %v20075_v31  ;;  %v8878_v25 = vcombine.high %v19500_v24, %v19500_v24  ;;  %v10857_v38 = vld [vmem:[%s19997_s5 + $0xb18] sm:$0xff] }
 0x615   :  { %11238 = vmatprep.subr.mxu0 %v10786_v19  ;;  %11271 = vmatprep.subr.mxu1 %v10819_v48  ;;  %v10852_v19 = vld [vmem:[%s19997_s5 + $0xaf0] sm:$0xff]  ;;  %v10885_v48 = vld [vmem:[%s19997_s5 + $0xbf8] sm:$0xff] }
 0x616   :  { %11239 = vmatpush3.msra.mxu0 %v10770_v4  ;;  %11272 = vmatpush3.msra.mxu1 %v10803_v11  ;;  %v10836_v4 = vld [vmem:[%s19997_s5 + $0xa70] sm:$0xff]  ;;  %v8879_v11 = vcombine.high %v19515_v29, %v19515_v29 }
 0x617   :  { %11240 = vmatprep.subr.mxu0 %v10785_v55  ;;  %11273 = vmatprep.subr.mxu1 %v10818_v34  ;;  %v10851_v55 = vld [vmem:[%s19997_s5 + $0xae8] sm:$0xff]  ;;  %v10884_v34 = vld [vmem:[%s19997_s5 + $0xbf0] sm:$0xff] }
 0x618   :  { %11241 = vmatpush3.msra.mxu0 %v10769_v26  ;;  %11274 = vmatpush3.msra.mxu1 %v10802_v61  ;;  %v10835_v26 = vld [vmem:[%s19997_s5 + $0xa68] sm:$0xff]  ;;  %v10850_v61 = vld [vmem:[%s19997_s5 + $0xae0] sm:$0xff] }
 0x619   :  { %11242 = vmatprep.subr.mxu0 %v10784_v32  ;;  %11275 = vmatprep.subr.mxu1 %v10817_v42  ;;  %v10883_v32 = vld [vmem:[%s19997_s5 + $0xbe8] sm:$0xff]  ;;  %v10834_v42 = vld [vmem:[%s19997_s5 + $0xa60] sm:$0xff] }
 0x61a   :  { %11243 = vmatpush3.msra.mxu0 %v10768_v16  ;;  %11276 = vmatpush3.msra.mxu1 %v10801_v0  ;;  %v10867_v16 = vld [vmem:[%s19997_s5 + $0xb68] sm:$0xff]  ;;  %v10849_v0 = vld [vmem:[%s19997_s5 + $0xad8] sm:$0xff] }
 0x61b   :  { %11244 = vmatprep.subr.mxu0 %v10783_v40  ;;  %11277 = vmatprep.subr.mxu1 %v10816_v12  ;;  %v10882_v40 = vld [vmem:[%s19997_s5 + $0xbe0] sm:$0xff]  ;;  %v10833_v12 = vld [vmem:[%s19997_s5 + $0xa58] sm:$0xff] }
 0x61c   :  { %11245 = vmatpush3.msra.mxu0 %v10767_v52  ;;  %11278 = vmatpush3.msra.mxu1 %v10800_v28  ;;  %v10866_v52 = vld [vmem:[%s19997_s5 + $0xb60] sm:$0xff]  ;;  %v10848_v28 = vld [vmem:[%s19997_s5 + $0xad0] sm:$0xff] }
 0x61d   :  { %11246 = vmatprep.subr.mxu0 %v10782_v23  ;;  %11279 = vmatprep.subr.mxu1 %v10815_v9  ;;  %v10881_v23 = vld [vmem:[%s19997_s5 + $0xbd8] sm:$0xff]  ;;  %v10832_v9 = vld [vmem:[%s19997_s5 + $0xa50] sm:$0xff] }
 0x61e   :  { %11247 = vmatpush3.msra.mxu0 %v10766_v1  ;;  %11280 = vmatpush3.msra.mxu1 %v10799_v36  ;;  %v10865_v1 = vld [vmem:[%s19997_s5 + $0xb58] sm:$0xff]  ;;  %v10847_v36 = vld [vmem:[%s19997_s5 + $0xac8] sm:$0xff] }
 0x61f   :  { %11248 = vmatprep.subr.mxu0 %v10781_v60  ;;  %11281 = vmatprep.subr.mxu1 %v10814_v21  ;;  %v10880_v60 = vld [vmem:[%s19997_s5 + $0xbd0] sm:$0xff]  ;;  %v10831_v21 = vld [vmem:[%s19997_s5 + $0xa48] sm:$0xff] }
 0x620   :  { %11249 = vmatpush3.msra.mxu0 %v10765_v37  ;;  %11282 = vmatpush3.msra.mxu1 %v10798_v13  ;;  %v10864_v37 = vld [vmem:[%s19997_s5 + $0xb50] sm:$0xff]  ;;  %v10846_v13 = vld [vmem:[%s19997_s5 + $0xac0] sm:$0xff] }
 0x621   :  { %11250 = vmatprep.subr.mxu0 %v10780_v2  ;;  %11283 = vmatprep.subr.mxu1 %v10813_v18  ;;  %v10879_v2 = vld [vmem:[%s19997_s5 + $0xbc8] sm:$0xff]  ;;  %v10830_v18 = vld [vmem:[%s19997_s5 + $0xa40] sm:$0xff] }
 0x622   :  { %11251 = vmatpush3.msra.mxu0 %v10764_v56  ;;  %11284 = vmatpush3.msra.mxu1 %v10797_v51  ;;  %v10863_v56 = vld [vmem:[%s19997_s5 + $0xb48] sm:$0xff]  ;;  %v10845_v51 = vld [vmem:[%s19997_s5 + $0xab8] sm:$0xff] }
 0x623   :  { %11252 = vmatprep.subr.mxu0 %v10779_v50  ;;  %11285 = vmatprep.subr.mxu1 %v10812_v43  ;;  %v10878_v50 = vld [vmem:[%s19997_s5 + $0xbc0] sm:$0xff]  ;;  %v10829_v43 = vld [vmem:[%s19997_s5 + $0xa38] sm:$0xff] }
 0x624   :  { %11253 = vmatpush3.msra.mxu0 %v10763_v27  ;;  %11286 = vmatpush3.msra.mxu1 %v10796_v6  ;;  %v10862_v27 = vld [vmem:[%s19997_s5 + $0xb40] sm:$0xff]  ;;  %v10844_v6 = vld [vmem:[%s19997_s5 + $0xab0] sm:$0xff] }
 0x625   :  { %11254 = vmatprep.subr.mxu0 %v10778_v30  ;;  %11287 = vmatprep.subr.mxu1 %v10811_v15  ;;  %v10877_v30 = vld [vmem:[%s19997_s5 + $0xbb8] sm:$0xff]  ;;  %v10828_v15 = vld [vmem:[%s19997_s5 + $0xa30] sm:$0xff] }
 0x626   :  { %11255 = vmatpush3.msra.mxu0 %v10762_v14  ;;  %11288 = vmatpush3.msra.mxu1 %v10795_v8  ;;  %v10861_v14 = vld [vmem:[%s19997_s5 + $0xb38] sm:$0xff]  ;;  %v10843_v8 = vld [vmem:[%s19997_s5 + $0xaa8] sm:$0xff] }
 0x627   :  { %11256 = vmatprep.subr.mxu0 %v10777_v7  ;;  %11289 = vmatprep.subr.mxu1 %v10810_v45  ;;  %v10876_v7 = vld [vmem:[%s19997_s5 + $0xbb0] sm:$0xff]  ;;  %v10827_v45 = vld [vmem:[%s19997_s5 + $0xa28] sm:$0xff] }
 0x628   :  { %11257 = vmatpush3.msra.mxu0 %v10761_v59  ;;  %11290 = vmatpush3.msra.mxu1 %v10794_v63  ;;  %v10860_v59 = vld [vmem:[%s19997_s5 + $0xb30] sm:$0xff]  ;;  %v10842_v63 = vld [vmem:[%s19997_s5 + $0xaa0] sm:$0xff] }
 0x629   :  { %11258 = vmatprep.subr.mxu0 %v10776_v46  ;;  %11291 = vmatprep.subr.mxu1 %v10809_v54  ;;  %v10875_v46 = vld [vmem:[%s19997_s5 + $0xba8] sm:$0xff]  ;;  %v10826_v54 = vld [vmem:[%s19997_s5 + $0xa20] sm:$0xff] }
 0x62a   :  { %11259 = vmatpush3.msra.mxu0 %v10760_v35  ;;  %11292 = vmatpush3.msra.mxu1 %v10793_v49  ;;  %v10859_v35 = vld [vmem:[%s19997_s5 + $0xb28] sm:$0xff]  ;;  %v10841_v49 = vld [vmem:[%s19997_s5 + $0xa98] sm:$0xff] }
 0x62b   :  { %11260 = vmatprep.subr.mxu0 %v10775_v44  ;;  %11293 = vmatprep.subr.mxu1 %v10808_v41  ;;  %v10874_v44 = vld [vmem:[%s19997_s5 + $0xba0] sm:$0xff]  ;;  %v10825_v41 = vld [vmem:[%s19997_s5 + $0xa18] sm:$0xff] }
 0x62c   :  { %11261 = vmatpush3.msra.mxu0 %v10759_v47  ;;  %11294 = vmatpush3.msra.mxu1 %v10792_v53  ;;  %v10858_v47 = vld [vmem:[%s19997_s5 + $0xb20] sm:$0xff]  ;;  %v10840_v53 = vld [vmem:[%s19997_s5 + $0xa90] sm:$0xff] }
 0x62d   :  { %11262 = vmatprep.subr.mxu0 %v10774_v3  ;;  %11295 = vmatprep.subr.mxu1 %v10807_v57  ;;  %v10873_v3 = vld [vmem:[%s19997_s5 + $0xb98] sm:$0xff]  ;;  %v10824_v57 = vld [vmem:[%s19997_s5 + $0xa10] sm:$0xff] }
 0x62e   :  { %11263 = vmatpush3.msra.mxu0 %v10758_v17  ;;  %11296 = vmatpush3.msra.mxu1 %v10791_v33  ;;  %v10839_v17 = vld [vmem:[%s19997_s5 + $0xa88] sm:$0xff]  ;;  %v10872_v33 = vld [vmem:[%s19997_s5 + $0xb90] sm:$0xff] }
 0x62f   :  { %8721 = vmatmul.mubr.f32.vlgmr.msra.gmra.mxu0 %v19293_v5  ;;  %11297 = vmatprep.subr.mxu1 %v10806_v20  ;;  %v10869_v5 = vld [vmem:[%s19997_s5 + $0xb78] sm:$0xff]  ;;  %v10823_v20 = vld [vmem:[%s19997_s5 + $0xa08] sm:$0xff] }
 0x630   :  { %11302 = vmatprep.subr.mxu0 %v10853_v39  ;;  %11298 = vmatpush3.msra.mxu1 %v10790_v10  ;;  %v10856_v39 = vld [vmem:[%s19997_s5 + $0xb10] sm:$0xff]  ;;  %v10838_v10 = vld [vmem:[%s19997_s5 + $0xa80] sm:$0xff] }
 0x631   :  { %11303 = vmatpush3.msra.mxu0 %v10837_v22  ;;  %8948 = vmatprep.mubr.f32.mxu0 %v8878_v25  ;;  %v10871_v22 = vld [vmem:[%s19997_s5 + $0xb88] sm:$0xff]  ;;  %v9091_v25 = vcombine.high %v18759_v58, %v18759_v58 }
 0x632   :  { %8791 = vmatmul.mubr.f32.vlgmr.msra.gmra.mxu1 %v19308_v62  ;;  %11304 = vmatprep.subr.mxu0 %v10852_v19  ;;  %v10868_v62 = vld [vmem:[%s19997_s5 + $0xb70] sm:$0xff]  ;;  %v10822_v19 = vld [vmem:[%s19997_s5 + $0xa00] sm:$0xff] }
 0x633   :  { %11337 = vmatprep.subr.mxu1 %v10885_v48  ;;  %11305 = vmatpush3.msra.mxu0 %v10836_v4  ;;  %v10855_v48 = vld [vmem:[%s19997_s5 + $0xb08] sm:$0xff]  ;;  %v19707_v4 = vrot.slane %v18759_v58, %v20075_v31  ;;  %v10901_v58 = vld [vmem:[%s19997_s5 + $0xc78] sm:$0xff] }
 0x634   :  { %11338 = vmatpush3.msra.mxu1 %v10869_v5  ;;  %9018 = vmatprep.mubr.f32.mxu1 %v8879_v11  ;;  %v10870_v5 = vld [vmem:[%s19997_s5 + $0xb80] sm:$0xff]  ;;  %v10917_v11 = vld [vmem:[%s19997_s5 + $0xcf8] sm:$0xff] }
 0x635   :  { %11306 = vmatprep.subr.mxu0 %v10851_v55  ;;  %11339 = vmatprep.subr.mxu1 %v10884_v34  ;;  %v10854_v55 = vld [vmem:[%s19997_s5 + $0xb00] sm:$0xff]  ;;  %v19722_v34 = vrot.slane %v9091_v25, %v20075_v31  ;;  %v10900_v31 = vld [vmem:[%s19997_s5 + $0xc70] sm:$0xff] }
 0x636   :  { %11307 = vmatpush3.msra.mxu0 %v10835_v26  ;;  %11340 = vmatpush3.msra.mxu1 %v10868_v62  ;;  %v9106_v26 = vcombine.high %v19707_v4, %v19707_v4  ;;  %v10916_v62 = vld [vmem:[%s19997_s5 + $0xcf0] sm:$0xff] }
 0x637   :  { %11308 = vmatprep.subr.mxu0 %v10850_v61  ;;  %11341 = vmatprep.subr.mxu1 %v10883_v32  ;;  %v10949_v61 = vld [vmem:[%s19997_s5 + $0xdf8] sm:$0xff]  ;;  %v9107_v32 = vcombine.high %v19722_v34, %v19722_v34  ;;  %v10936_v25 = vld [vmem:[%s19997_s5 + $0xd90] sm:$0xff] }
 0x638   :  { %11309 = vmatpush3.msra.mxu0 %v10834_v42  ;;  %11342 = vmatpush3.msra.mxu1 %v10867_v16  ;;  %v10915_v42 = vld [vmem:[%s19997_s5 + $0xce8] sm:$0xff]  ;;  %v10948_v16 = vld [vmem:[%s19997_s5 + $0xdf0] sm:$0xff] }
 0x639   :  { %11310 = vmatprep.subr.mxu0 %v10849_v0  ;;  %11343 = vmatprep.subr.mxu1 %v10882_v40  ;;  %v10899_v0 = vld [vmem:[%s19997_s5 + $0xc68] sm:$0xff]  ;;  %v10914_v40 = vld [vmem:[%s19997_s5 + $0xce0] sm:$0xff] }
 0x63a   :  { %11311 = vmatpush3.msra.mxu0 %v10833_v12  ;;  %11344 = vmatpush3.msra.mxu1 %v10866_v52  ;;  %v10947_v12 = vld [vmem:[%s19997_s5 + $0xde8] sm:$0xff]  ;;  %v10898_v52 = vld [vmem:[%s19997_s5 + $0xc60] sm:$0xff] }
 0x63b   :  { %11312 = vmatprep.subr.mxu0 %v10848_v28  ;;  %11345 = vmatprep.subr.mxu1 %v10881_v23  ;;  %v10931_v28 = vld [vmem:[%s19997_s5 + $0xd68] sm:$0xff]  ;;  %v10913_v23 = vld [vmem:[%s19997_s5 + $0xcd8] sm:$0xff] }
 0x63c   :  { %11313 = vmatpush3.msra.mxu0 %v10832_v9  ;;  %11346 = vmatpush3.msra.mxu1 %v10865_v1  ;;  %v10946_v9 = vld [vmem:[%s19997_s5 + $0xde0] sm:$0xff]  ;;  %v10897_v1 = vld [vmem:[%s19997_s5 + $0xc58] sm:$0xff] }
 0x63d   :  { %11314 = vmatprep.subr.mxu0 %v10847_v36  ;;  %11347 = vmatprep.subr.mxu1 %v10880_v60  ;;  %v10930_v36 = vld [vmem:[%s19997_s5 + $0xd60] sm:$0xff]  ;;  %v10912_v60 = vld [vmem:[%s19997_s5 + $0xcd0] sm:$0xff] }
 0x63e   :  { %11315 = vmatpush3.msra.mxu0 %v10831_v21  ;;  %11348 = vmatpush3.msra.mxu1 %v10864_v37  ;;  %v10945_v21 = vld [vmem:[%s19997_s5 + $0xdd8] sm:$0xff]  ;;  %v10896_v37 = vld [vmem:[%s19997_s5 + $0xc50] sm:$0xff] }
 0x63f   :  { %11316 = vmatprep.subr.mxu0 %v10846_v13  ;;  %11349 = vmatprep.subr.mxu1 %v10879_v2  ;;  %v10929_v13 = vld [vmem:[%s19997_s5 + $0xd58] sm:$0xff]  ;;  %v10911_v2 = vld [vmem:[%s19997_s5 + $0xcc8] sm:$0xff] }
 0x640   :  { %11317 = vmatpush3.msra.mxu0 %v10830_v18  ;;  %11350 = vmatpush3.msra.mxu1 %v10863_v56  ;;  %v10944_v18 = vld [vmem:[%s19997_s5 + $0xdd0] sm:$0xff]  ;;  %v10895_v56 = vld [vmem:[%s19997_s5 + $0xc48] sm:$0xff] }
 0x641   :  { %11318 = vmatprep.subr.mxu0 %v10845_v51  ;;  %11351 = vmatprep.subr.mxu1 %v10878_v50  ;;  %v10928_v51 = vld [vmem:[%s19997_s5 + $0xd50] sm:$0xff]  ;;  %v10910_v50 = vld [vmem:[%s19997_s5 + $0xcc0] sm:$0xff] }
 0x642   :  { %11319 = vmatpush3.msra.mxu0 %v10829_v43  ;;  %11352 = vmatpush3.msra.mxu1 %v10862_v27  ;;  %v10943_v43 = vld [vmem:[%s19997_s5 + $0xdc8] sm:$0xff]  ;;  %v10894_v27 = vld [vmem:[%s19997_s5 + $0xc40] sm:$0xff] }
 0x643   :  { %11320 = vmatprep.subr.mxu0 %v10844_v6  ;;  %11353 = vmatprep.subr.mxu1 %v10877_v30  ;;  %v10927_v6 = vld [vmem:[%s19997_s5 + $0xd48] sm:$0xff]  ;;  %v10909_v30 = vld [vmem:[%s19997_s5 + $0xcb8] sm:$0xff] }
 0x644   :  { %11321 = vmatpush3.msra.mxu0 %v10828_v15  ;;  %11354 = vmatpush3.msra.mxu1 %v10861_v14  ;;  %v10942_v15 = vld [vmem:[%s19997_s5 + $0xdc0] sm:$0xff]  ;;  %v10893_v14 = vld [vmem:[%s19997_s5 + $0xc38] sm:$0xff] }
 0x645   :  { %11322 = vmatprep.subr.mxu0 %v10843_v8  ;;  %11355 = vmatprep.subr.mxu1 %v10876_v7  ;;  %v10926_v8 = vld [vmem:[%s19997_s5 + $0xd40] sm:$0xff]  ;;  %v10908_v7 = vld [vmem:[%s19997_s5 + $0xcb0] sm:$0xff] }
 0x646   :  { %11323 = vmatpush3.msra.mxu0 %v10827_v45  ;;  %11356 = vmatpush3.msra.mxu1 %v10860_v59  ;;  %v10941_v45 = vld [vmem:[%s19997_s5 + $0xdb8] sm:$0xff]  ;;  %v10892_v59 = vld [vmem:[%s19997_s5 + $0xc30] sm:$0xff] }
 0x647   :  { %11324 = vmatprep.subr.mxu0 %v10842_v63  ;;  %11357 = vmatprep.subr.mxu1 %v10875_v46  ;;  %v10925_v63 = vld [vmem:[%s19997_s5 + $0xd38] sm:$0xff]  ;;  %v10907_v46 = vld [vmem:[%s19997_s5 + $0xca8] sm:$0xff] }
 0x648   :  { %11325 = vmatpush3.msra.mxu0 %v10826_v54  ;;  %11358 = vmatpush3.msra.mxu1 %v10859_v35  ;;  %v10940_v54 = vld [vmem:[%s19997_s5 + $0xdb0] sm:$0xff]  ;;  %v10891_v35 = vld [vmem:[%s19997_s5 + $0xc28] sm:$0xff] }
 0x649   :  { %11326 = vmatprep.subr.mxu0 %v10841_v49  ;;  %11359 = vmatprep.subr.mxu1 %v10874_v44  ;;  %v10924_v49 = vld [vmem:[%s19997_s5 + $0xd30] sm:$0xff]  ;;  %v10906_v44 = vld [vmem:[%s19997_s5 + $0xca0] sm:$0xff] }
 0x64a   :  { %11327 = vmatpush3.msra.mxu0 %v10825_v41  ;;  %11360 = vmatpush3.msra.mxu1 %v10858_v47  ;;  %v10939_v41 = vld [vmem:[%s19997_s5 + $0xda8] sm:$0xff]  ;;  %v10890_v47 = vld [vmem:[%s19997_s5 + $0xc20] sm:$0xff] }
 0x64b   :  { %11328 = vmatprep.subr.mxu0 %v10840_v53  ;;  %11361 = vmatprep.subr.mxu1 %v10873_v3  ;;  %v10923_v53 = vld [vmem:[%s19997_s5 + $0xd28] sm:$0xff]  ;;  %v10905_v3 = vld [vmem:[%s19997_s5 + $0xc98] sm:$0xff] }
 0x64c   :  { %11329 = vmatpush3.msra.mxu0 %v10824_v57  ;;  %11362 = vmatpush3.msra.mxu1 %v10857_v38  ;;  %v10938_v57 = vld [vmem:[%s19997_s5 + $0xda0] sm:$0xff]  ;;  %v10889_v38 = vld [vmem:[%s19997_s5 + $0xc18] sm:$0xff] }
 0x64d   :  { %11330 = vmatprep.subr.mxu0 %v10839_v17  ;;  %11363 = vmatprep.subr.mxu1 %v10872_v33  ;;  %v10922_v17 = vld [vmem:[%s19997_s5 + $0xd20] sm:$0xff]  ;;  %v10904_v33 = vld [vmem:[%s19997_s5 + $0xc90] sm:$0xff] }
 0x64e   :  { %11331 = vmatpush3.msra.mxu0 %v10823_v20  ;;  %11364 = vmatpush3.msra.mxu1 %v10856_v39  ;;  %v10937_v20 = vld [vmem:[%s19997_s5 + $0xd98] sm:$0xff]  ;;  %v10888_v39 = vld [vmem:[%s19997_s5 + $0xc10] sm:$0xff] }
 0x64f   :  { %11332 = vmatprep.subr.mxu0 %v10838_v10  ;;  %11365 = vmatprep.subr.mxu1 %v10871_v22  ;;  %v10921_v10 = vld [vmem:[%s19997_s5 + $0xd18] sm:$0xff]  ;;  %v10903_v22 = vld [vmem:[%s19997_s5 + $0xc88] sm:$0xff] }
 0x650   :  { %11333 = vmatpush3.msra.mxu0 %v10822_v19  ;;  %11366 = vmatpush3.msra.mxu1 %v10855_v48  ;;  %v10887_v19 = vld [vmem:[%s19997_s5 + $0xc08] sm:$0xff]  ;;  %v10920_v48 = vld [vmem:[%s19997_s5 + $0xd10] sm:$0xff] }
 0x651   :  { %8949 = vmatmul.mubr.f32.vlgmr.msra.gmra.mxu0 %v19500_v24  ;;  %11367 = vmatprep.subr.mxu1 %v10870_v5  ;;  %v10933_v24 = vld [vmem:[%s19997_s5 + $0xd78] sm:$0xff]  ;;  %v10902_v5 = vld [vmem:[%s19997_s5 + $0xc80] sm:$0xff] }
 0x652   :  { %11372 = vmatprep.subr.mxu0 %v10917_v11  ;;  %11368 = vmatpush3.msra.mxu1 %v10854_v55  ;;  %v10935_v11 = vld [vmem:[%s19997_s5 + $0xd88] sm:$0xff]  ;;  %v10886_v55 = vld [vmem:[%s19997_s5 + $0xc00] sm:$0xff] }
 0x653   :  { %11373 = vmatpush3.msra.mxu0 %v10901_v58  ;;  %9176 = vmatprep.mubr.f32.mxu0 %v9106_v26  ;;  %v10919_v58 = vld [vmem:[%s19997_s5 + $0xd08] sm:$0xff]  ;;  %v10934_v26 = vld [vmem:[%s19997_s5 + $0xd80] sm:$0xff] }
 0x654   :  { %9019 = vmatmul.mubr.f32.vlgmr.msra.gmra.mxu1 %v19515_v29  ;;  %11374 = vmatprep.subr.mxu0 %v10916_v62  ;;  %v10932_v29 = vld [vmem:[%s19997_s5 + $0xd70] sm:$0xff]  ;;  %v10918_v62 = vld [vmem:[%s19997_s5 + $0xd00] sm:$0xff] }
 0x655   :  { %11407 = vmatprep.subr.mxu1 %v10949_v61  ;;  %11375 = vmatpush3.msra.mxu0 %v10900_v31  ;;  %v20163_v61 = vmov 0.0   ;;  %v9277_v31 = vld [vmem:[%s19999_s7 + $0x78] sm:$0xff] }
 0x656   :  { %11408 = vmatpush3.msra.mxu1 %v10933_v24  ;;  %9246 = vmatprep.mubr.f32.mxu1 %v9107_v32  ;;  %v9276_v24 = vld [vmem:[%s19999_s7 + $0x70] sm:$0xff]  ;;  %v9273_v32 = vld [vmem:[%s19999_s7 + $0x58] sm:$0xff] }
 0x657   :  { %11376 = vmatprep.subr.mxu0 %v10915_v42  ;;  %11409 = vmatprep.subr.mxu1 %v10948_v16  ;;  %v9272_v42 = vld [vmem:[%s19999_s7 + $0x50] sm:$0xff]  ;;  %v9271_v16 = vld [vmem:[%s19999_s7 + $0x48] sm:$0xff] }
 0x658   :  { %11377 = vmatpush3.msra.mxu0 %v10899_v0  ;;  %11410 = vmatpush3.msra.mxu1 %v10932_v29  ;;  %v9270_v0 = vld [vmem:[%s19999_s7 + $0x40] sm:$0xff]  ;;  %v9269_v29 = vld [vmem:[%s19999_s7 + $0x38] sm:$0xff] }
 0x659   :  { %11378 = vmatprep.subr.mxu0 %v10914_v40  ;;  %11411 = vmatprep.subr.mxu1 %v10947_v12  ;;  %v9268_v40 = vld [vmem:[%s19999_s7 + $0x30] sm:$0xff]  ;;  %v9267_v12 = vld [vmem:[%s19999_s7 + $0x28] sm:$0xff] }
 0x65a   :  { %11379 = vmatpush3.msra.mxu0 %v10898_v52  ;;  %11412 = vmatpush3.msra.mxu1 %v10931_v28  ;;  %v9266_v52 = vld [vmem:[%s19999_s7 + $0x20] sm:$0xff]  ;;  %v9265_v28 = vld [vmem:[%s19999_s7 + $0x18] sm:$0xff] }
 0x65b   :  { %11380 = vmatprep.subr.mxu0 %v10913_v23  ;;  %11413 = vmatprep.subr.mxu1 %v10946_v9  ;;  %v9264_v23 = vld [vmem:[%s19999_s7 + $0x10] sm:$0xff]  ;;  %v9263_v9 = vld [vmem:[%s19999_s7 + $0x8] sm:$0xff] }
 0x65c   :  { %11381 = vmatpush3.msra.mxu0 %v10897_v1  ;;  %11414 = vmatpush3.msra.mxu1 %v10930_v36  ;;  %v9262_v1 = vld [vmem:[%s19999_s7] sm:$0xff] }
 0x65d   :  { %11382 = vmatprep.subr.mxu0 %v10912_v60  ;;  %11415 = vmatprep.subr.mxu1 %v10945_v21 }
 0x65e   :  { %11383 = vmatpush3.msra.mxu0 %v10896_v37  ;;  %11416 = vmatpush3.msra.mxu1 %v10929_v13 }
 0x65f   :  { %11384 = vmatprep.subr.mxu0 %v10911_v2  ;;  %11417 = vmatprep.subr.mxu1 %v10944_v18 }
 0x660   :  { %11385 = vmatpush3.msra.mxu0 %v10895_v56  ;;  %11418 = vmatpush3.msra.mxu1 %v10928_v51 }
 0x661   :  { %11386 = vmatprep.subr.mxu0 %v10910_v50  ;;  %11419 = vmatprep.subr.mxu1 %v10943_v43 }
 0x662   :  { %11387 = vmatpush3.msra.mxu0 %v10894_v27  ;;  %11420 = vmatpush3.msra.mxu1 %v10927_v6 }
 0x663   :  { %11388 = vmatprep.subr.mxu0 %v10909_v30  ;;  %11421 = vmatprep.subr.mxu1 %v10942_v15 }
 0x664   :  { %11389 = vmatpush3.msra.mxu0 %v10893_v14  ;;  %11422 = vmatpush3.msra.mxu1 %v10926_v8 }
 0x665   :  { %11390 = vmatprep.subr.mxu0 %v10908_v7  ;;  %11423 = vmatprep.subr.mxu1 %v10941_v45 }
 0x666   :  { %11391 = vmatpush3.msra.mxu0 %v10892_v59  ;;  %11424 = vmatpush3.msra.mxu1 %v10925_v63 }
 0x667   :  { %11392 = vmatprep.subr.mxu0 %v10907_v46  ;;  %11425 = vmatprep.subr.mxu1 %v10940_v54 }
 0x668   :  { %11393 = vmatpush3.msra.mxu0 %v10891_v35  ;;  %11426 = vmatpush3.msra.mxu1 %v10924_v49  ;;  %v10984_v60 = vpop.f32.mrf.mxu0 }
 0x669   :  { %11394 = vmatprep.subr.mxu0 %v10906_v44  ;;  %11427 = vmatprep.subr.mxu1 %v10939_v41 }
 0x66a   :  { %11395 = vmatpush3.msra.mxu0 %v10890_v47  ;;  %11428 = vmatpush3.msra.mxu1 %v10923_v53  ;;  %v10985_v37 = vpop.f32.mrf.mxu0 }
 0x66b   :  { %11396 = vmatprep.subr.mxu0 %v10905_v3  ;;  %11429 = vmatprep.subr.mxu1 %v10938_v57  ;;  %v11019_v36 = vpop.f32.mrf.mxu1  ;;  %v10986_v63 = vadd.f32 %v10985_v37, %v10984_v60 }
 0x66c   :  { %11397 = vmatpush3.msra.mxu0 %v10889_v38  ;;  %11430 = vmatpush3.msra.mxu1 %v10922_v17 }
 0x66d   :  { %11398 = vmatprep.subr.mxu0 %v10904_v33  ;;  %11431 = vmatprep.subr.mxu1 %v10937_v20  ;;  %v11020_v21 = vpop.f32.mrf.mxu1 }
 0x66e   :  { %11399 = vmatpush3.msra.mxu0 %v10888_v39  ;;  %11432 = vmatpush3.msra.mxu1 %v10921_v10  ;;  %v11021_v45 = vadd.f32 %v11020_v21, %v11019_v36 }
 0x66f   :  { %11400 = vmatprep.subr.mxu0 %v10903_v22  ;;  %11433 = vmatprep.subr.mxu1 %v10936_v25 }
 0x670   :  { %11401 = vmatpush3.msra.mxu0 %v10887_v19  ;;  %11434 = vmatpush3.msra.mxu1 %v10920_v48  ;;  %v7948_v49 = vadd.f32 %v11021_v45, %v10986_v63 }
 0x671   :  { %11402 = vmatprep.subr.mxu0 %v10902_v5  ;;  %11435 = vmatprep.subr.mxu1 %v10935_v11 }
 0x672   :  { %11403 = vmatpush3.msra.mxu0 %v10886_v55  ;;  %11436 = vmatpush3.msra.mxu1 %v10919_v58 }
 0x673   :  { %9177 = vmatmul.mubr.f32.vlgmr.msra.gmra.mxu0 %v19707_v4  ;;  %11437 = vmatprep.subr.mxu1 %v10934_v26  ;;  %v9275_v4 = vld [vmem:[%s19999_s7 + $0x68] sm:$0xff] }
 0x674   :  { %11438 = vmatpush3.msra.mxu1 %v10918_v62  ;;  %11459 = vmatprep.subr.mxu0 %v20163_v61 }
 0x675   :  { %9247 = vmatmul.mubr.f32.vlgmr.msra.gmra.mxu1 %v19722_v34  ;;  %11460 = vmatpush3.msra.mxu0 %v9277_v31  ;;  %v9274_v34 = vld [vmem:[%s19999_s7 + $0x60] sm:$0xff] }
 0x676   :  { %11461 = vmatprep.subr.mxu0 %v20163_v61  ;;  %11491 = vmatprep.mubr.msk.f32.mxu0 %vm11530_vm3, %v20163_v61 }
 0x677   :  { %11462 = vmatpush3.msra.mxu0 %v9276_v24 }
 0x678   :  { %11463 = vmatprep.subr.mxu0 %v20163_v61 }
 0x679   :  { %11464 = vmatpush3.msra.mxu0 %v9275_v4 }
 0x67a   :  { %11465 = vmatprep.subr.mxu0 %v20163_v61 }
 0x67b   :  { %11466 = vmatpush3.msra.mxu0 %v9274_v34 }
 0x67c   :  { %11467 = vmatprep.subr.mxu0 %v20163_v61 }
 0x67d   :  { %11468 = vmatpush3.msra.mxu0 %v9273_v32 }
 0x67e   :  { %11469 = vmatprep.subr.mxu0 %v20163_v61 }
 0x67f   :  { %11470 = vmatpush3.msra.mxu0 %v9272_v42 }
 0x680   :  { %11471 = vmatprep.subr.mxu0 %v20163_v61 }
 0x681   :  { %11472 = vmatpush3.msra.mxu0 %v9271_v16  ;;  %v10950_v16 = vld [vmem:[%s19998_s6] ss:$0 sm:$0xff] }
 0x682   :  { %11473 = vmatprep.subr.mxu0 %v20163_v61 }
 0x683   :  { %11474 = vmatpush3.msra.mxu0 %v9270_v0 }
 0x684   :  { %11475 = vmatprep.subr.mxu0 %v20163_v61 }
 0x685   :  { %11476 = vmatpush3.msra.mxu0 %v9269_v29 }
 0x686   :  { %11477 = vmatprep.subr.mxu0 %v20163_v61 }
 0x687   :  { %11478 = vmatpush3.msra.mxu0 %v9268_v40 }
 0x688   :  { %11479 = vmatprep.subr.mxu0 %v20163_v61 }
 0x689   :  { %11480 = vmatpush3.msra.mxu0 %v9267_v12  ;;  %v11054_v2 = vpop.f32.mrf.mxu0  ;;  %v10951_v12 = vld [vmem:[%s20000_s8] ss:$0 sm:$0xff] }
 0x68a   :  { %11481 = vmatprep.subr.mxu0 %v20163_v61 }
 0x68b   :  { %11482 = vmatpush3.msra.mxu0 %v9266_v52  ;;  %v11055_v56 = vpop.f32.mrf.mxu0 }
 0x68c   :  { %11483 = vmatprep.subr.mxu0 %v20163_v61  ;;  %v11089_v13 = vpop.f32.mrf.mxu1  ;;  %v11056_v46 = vadd.f32 %v11055_v56, %v11054_v2 }
 0x68d   :  { %11484 = vmatpush3.msra.mxu0 %v9265_v28 }
 0x68e   :  { %11485 = vmatprep.subr.mxu0 %v20163_v61  ;;  %v11090_v18 = vpop.f32.mrf.mxu1  ;;  %v8040_v47 = vadd.f32 %v11056_v46, %v7948_v49 }
 0x68f   :  { %11486 = vmatpush3.msra.mxu0 %v9264_v23  ;;  %v11091_v53 = vadd.f32 %v11090_v18, %v11089_v13 }
 0x690   :  { %11487 = vmatprep.subr.mxu0 %v20163_v61 }
 0x691   :  { %11488 = vmatpush3.msra.mxu0 %v9263_v9  ;;  %v8110_v10 = vadd.f32 %v11091_v53, %v8040_v47 }
 0x692   :  { %11489 = vmatprep.subr.mxu0 %v20163_v61 }
 0x693   :  { %11490 = vmatpush3.msra.mxu0 %v9262_v1 }
 0x6ab   :  { %v11124_v50 = vpop.f32.mrf.mxu0 }
 0x6ad   :  { %v11125_v27 = vpop.f32.mrf.mxu0 }
 0x6ae   :  { %v11159_v51 = vpop.f32.mrf.mxu1  ;;  %v11126_v3 = vadd.f32 %v11125_v27, %v11124_v50 }
 0x6b0   :  { %v11160_v43 = vpop.f32.mrf.mxu1 }
 0x6b1   :  { %v11161_v44 = vadd.f32 %v11160_v43, %v11159_v51 }
 0x6b3   :  { %v8337_v17 = vadd.f32 %v11161_v44, %v11126_v3 }
 0x6b5   :  { %v8340_v5 = vadd.f32 %v8337_v17, %v8110_v10 }
 0x6cd   :  { %v11194_v30 = vpop.f32.mrf.mxu0 }
 0x6cf   :  { %v11195_v14 = vpop.f32.mrf.mxu0 }
 0x6d0   :  { %v11229_v6 = vpop.f32.mrf.mxu1  ;;  %v11196_v33 = vadd.f32 %v11195_v14, %v11194_v30 }
 0x6d2   :  { %v11230_v15 = vpop.f32.mrf.mxu1 }
 0x6d3   :  { %v11231_v57 = vadd.f32 %v11230_v15, %v11229_v6 }
 0x6d5   :  { %v8565_v22 = vadd.f32 %v11231_v57, %v11196_v33 }
 0x6d7   :  { %v8568_v62 = vadd.f32 %v8565_v22, %v8340_v5 }
 0x6ef   :  { %v11264_v7 = vpop.f32.mrf.mxu0 }
 0x6f1   :  { %v11265_v54 = vpop.f32.mrf.mxu0 }
 0x6f2   :  { %v11299_v8 = vpop.f32.mrf.mxu1  ;;  %v11266_v25 = vadd.f32 %v11265_v54, %v11264_v7 }
 0x6f4   :  { %v11300_v59 = vpop.f32.mrf.mxu1 }
 0x6f5   :  { %v11301_v20 = vadd.f32 %v11300_v59, %v11299_v8 }
 0x6f7   :  { %v8793_v11 = vadd.f32 %v11301_v20, %v11266_v25 }
 0x6f9   :  { %v8796_v24 = vadd.f32 %v8793_v11, %v8568_v62 }
 0x711   :  { %v11334_v41 = vpop.f32.mrf.mxu0 }
 0x713   :  { %v11335_v39 = vpop.f32.mrf.mxu0 }
 0x714   :  { %v11369_v35 = vpop.f32.mrf.mxu1  ;;  %v11336_v55 = vadd.f32 %v11335_v39, %v11334_v41 }
 0x716   :  { %v11370_v38 = vpop.f32.mrf.mxu1 }
 0x717   :  { %v11371_v19 = vadd.f32 %v11370_v38, %v11369_v35 }
 0x719   :  { %v9021_v61 = vadd.f32 %v11371_v19, %v11336_v55 }
 0x71b   :  { %v9024_v32 = vadd.f32 %v9021_v61, %v8796_v24 }
 0x733   :  { %v11404_v48 = vpop.f32.mrf.mxu0 }
 0x735   :  { %v11405_v58 = vpop.f32.mrf.mxu0  ;;  %v11439_v26 = vpop.f32.mrf.mxu1 }
 0x736   :  { %v11406_v4 = vadd.f32 %v11405_v58, %v11404_v48 }
 0x737   :  { %v11440_v31 = vpop.f32.mrf.mxu1 }
 0x738   :  { %v11441_v34 = vadd.f32 %v11440_v31, %v11439_v26 }
 0x73a   :  { %v9249_v42 = vadd.f32 %v11441_v34, %v11406_v4 }
 0x73c   :  { %v9252_v0 = vadd.f32 %v9249_v42, %v9024_v32 }
 0x73e   :  { %v9260_v29 = vadd.f32 %v10950_v16, %v9252_v0 }
 0x740   :  { %v9261_v40 = vmax.f32 %v9260_v29, 0.0 }
 0x742   :  { %11492 = vmatmul.mubr.f32.vlgmr.msra.gmra.mxu0 %v9261_v40 }
 0x802   :  { %v9351_v52 = vpop.f32.mrf.mxu0 }
 0x803   :  { %v9352_v28 = vadd.f32 %v10951_v12, %v9351_v52 }
 0x804   :  { %v11493_v23 = vpop.f32.mrf.mxu0 }
 0x805   :  { %9355 = vst [vmem:[#allocation4] sm:$0x3] %v9352_v28 }
 0x806   :  { %11517 = shalt.err (!%p11514_p4)
}
 0x807   :  { %9365 = dma.vmem_to_hbm [thread:$0]  %s9363_s23, 32, %s20001_s9, [#allocation5]  }
 0x808   :  { %11526 = dma.done.wait [#allocation5], 32  }
 0x809   :  { %11527 = vsyncadd [#allocation5], 4294967264 }
 0x80a   :  { %9369 = vsyncpa [#allocation5], 1 }

</bundles_post_ra>
